<compile_context>
chip_gen: v6e
topology: v6e:2x2x1
jax: 0.10.0
libtpu: 0.0.40
codegen_flags: <defaults>
</compile_context>

<pallas_src>
import functools
import math

import jax
import jax.numpy as jnp
from jax import lax
from jax.experimental import pallas as pl
from jax.experimental.pallas import tpu as pltpu


def _fused_mha_chain_kernel(x_ref, wqkv_ref, bqkv_ref, wo_ref, bo_ref,
                            out_ref, *, seq_len):
    """Fused: QKV proj -> 1-head SDPA -> out proj -> softmax -> final matmul.

    x_ref:    (L*N, E) bf16   (rows [l*N:(l+1)*N] are seq position l)
    wqkv_ref: (3E, E)  bf16   (torch in_proj layout, [Wq; Wk; Wv])
    bqkv_ref: (1, 3E)  f32
    wo_ref:   (E, E)   bf16   (un-transposed)
    bo_ref:   (1, E)   f32
    out_ref:  (L*N, E) f32
    """
    LN, E = x_ref.shape
    L = seq_len
    N = LN // L
    scale = 1.0 / math.sqrt(E)

    # ---- fused in-projection: ONE bf16 MXU matmul, f32 accumulation ---------
    qkv = lax.dot_general(
        x_ref[...], wqkv_ref[...],
        dimension_numbers=(((1,), (1,)), ((), ())),        # x @ W_qkv.T
        preferred_element_type=jnp.float32,
    ) + bqkv_ref[...]                                       # (L*N, 3E) f32

    q = [qkv[l * N:(l + 1) * N, 0:E] for l in range(L)]
    k = [qkv[l * N:(l + 1) * N, E:2 * E] for l in range(L)]
    v = [qkv[l * N:(l + 1) * N, 2 * E:3 * E] for l in range(L)]

    # ---- single-head SDPA over tiny seq axis L, vectorized over batch N -----
    # Batched scores: one VPU multiply + one XLU lane-reduce for all L*L pairs.
    q_rep = jnp.concatenate([q[l] for l in range(L) for _ in range(L)], axis=0)
    k_rep = jnp.concatenate([k[m] for _ in range(L) for m in range(L)], axis=0)
    s_flat = jnp.sum(q_rep * k_rep, axis=-1, keepdims=True) * scale  # (L*L*N, 1)

    ctx = []
    for l in range(L):
        s = [s_flat[(l * L + m) * N:(l * L + m + 1) * N, :] for m in range(L)]
        s_max = s[0]
        for m in range(1, L):
            s_max = jnp.maximum(s_max, s[m])
        e = [jnp.exp(si - s_max) for si in s]
        denom = e[0]
        for m in range(1, L):
            denom = denom + e[m]
        inv = pl.reciprocal(denom, approx=True)             # EUP, not VALU divide
        # TODO(synk): attention dropout (p=0.1, training mode) omitted -> eval semantics.
        c = (e[0] * inv) * v[0]
        for m in range(1, L):
            c = c + (e[m] * inv) * v[m]
        ctx.append(c)                                        # (N, E) f32

    # ---- fused out-projection: ONE bf16 MXU matmul across all L -------------
    ctx_all = jnp.concatenate(ctx, axis=0).astype(jnp.bfloat16)   # (L*N, E)
    ao = lax.dot_general(
        ctx_all, wo_ref[...],
        dimension_numbers=(((1,), (1,)), ((), ())),          # ctx @ Wo.T
        preferred_element_type=jnp.float32,
    ) + bo_ref[...]                                           # (L*N, E) f32 == attn_output

    # ---- softmax over embed dim, (dropout == identity), then per-l:
    #      out[l] = softmax(ao[l]) @ ao[l]   (contract E of lhs with N of rhs; E == N)
    for l in range(L):
        a = ao[l * N:(l + 1) * N, :]                          # (N, E) f32
        a_max = jnp.max(a, axis=-1, keepdims=True)
        ea = jnp.exp(a - a_max)
        soft = ea * pl.reciprocal(jnp.sum(ea, axis=-1, keepdims=True), approx=True)
        # TODO(synk): F.dropout(p=0.1) omitted (inference semantics) for determinism.
        out_ref[l * N:(l + 1) * N, :] = jnp.dot(
            soft.astype(jnp.bfloat16), a.astype(jnp.bfloat16),
            preferred_element_type=jnp.float32)


@jax.jit
def model_forward(x1, x2, params):
    """Mirrors Model.forward. x1/x2: (S0, S1, E); x2 is permuted but unused (as in torch)."""
    wq, wk, wv, wo, bq, bk, bv, bo = params
    xp = jnp.transpose(x1, (1, 0, 2))        # x1.permute((1, 0, 2)) -> (L, N, E)
    _ = jnp.transpose(x2, (1, 0, 2))         # x2 permuted but never used -> DCE'd under jit
    L, N, E = xp.shape

    # Permute + flatten + bf16 cast fuse into one XLA op under jit; weights are
    # passed un-transposed (torch in_proj layout) so no transposes materialize.
    x_flat = xp.reshape(L * N, E).astype(jnp.bfloat16)
    w_qkv = jnp.concatenate([wq, wk, wv], axis=0).astype(jnp.bfloat16)   # (3E, E)
    b_qkv = jnp.concatenate([bq, bk, bv]).reshape(1, 3 * E)

    kernel = functools.partial(_fused_mha_chain_kernel, seq_len=L)
    out_flat = pl.pallas_call(
        kernel,
        out_shape=jax.ShapeDtypeStruct((L * N, E), jnp.float32),
        in_specs=[pl.BlockSpec(memory_space=pltpu.MemorySpace.VMEM)] * 5,
        out_specs=pl.BlockSpec(memory_space=pltpu.MemorySpace.VMEM),
        compiler_params=pltpu.CompilerParams(vmem_limit_bytes=32 * 1024 * 1024),
    )(x_flat, w_qkv, b_qkv, wo.astype(jnp.bfloat16), bo.reshape(1, E))
    return (out_flat.reshape(L, N, E),)


def reference_forward(x1, x2, params):
    """Pure-JAX f32 reference (eval-mode semantics) for correctness checking."""
    wq, wk, wv, wo, bq, bk, bv, bo = params
    xp = jnp.transpose(x1, (1, 0, 2))        # (L, N, E)
    L, N, E = xp.shape
    q = xp @ wq.T + bq
    k = xp @ wk.T + bk
    v = xp @ wv.T + bv
    scale = 1.0 / math.sqrt(E)
    scores = jnp.einsum('lne,mne->nlm', q, k) * scale
    p = jax.nn.softmax(scores, axis=-1)
    ctx = jnp.einsum('nlm,mne->lne', p, v)
    ao = ctx @ wo.T + bo                     # (L, N, E) == MHA attn_output
    soft = jax.nn.softmax(ao, axis=-1)
    out = jnp.einsum('lnk,lkj->lnj', soft, ao)
    return (out,)


if __name__ == "__main__":
    E = 256      # embed_dim fixed by the module's __init__
    S1 = 2       # seq length after the permute (kept tiny)
    S0 = E       # must equal embed_dim so the trailing matmul is shape-valid

    key = jax.random.PRNGKey(0)
    (kx1, kx2, kwq, kwk, kwv, kwo, kbq, kbk, kbv, kbo) = jax.random.split(key, 10)

    x1 = jax.random.normal(kx1, (S0, S1, E), dtype=jnp.float32)
    x2 = jax.random.normal(kx2, (S0, S1, E), dtype=jnp.float32)

    bound = 1.0 / math.sqrt(E)
    def _w(k):
        return jax.random.uniform(k, (E, E), minval=-bound, maxval=bound, dtype=jnp.float32)
    def _b(k):
        return jax.random.uniform(k, (E,), minval=-bound, maxval=bound, dtype=jnp.float32)

    params = (_w(kwq), _w(kwk), _w(kwv), _w(kwo),
              _b(kbq), _b(kbk), _b(kbv), _b(kbo))

    (out,) = model_forward(x1, x2, params)
    jax.block_until_ready(out)

    (ref,) = reference_forward(x1, x2, params)
    assert out.shape == (S1, S0, E)
    assert jnp.allclose(out, ref, rtol=1e-2, atol=1e-2), "mismatch vs reference"

    print("KERNEL_OK")
</pallas_src>

<mosaic_0001>
module attributes {stable_mosaic.version = 11 : i64} {
  func.func @_fused_mha_chain_kernel(%arg0: memref<512x256xbf16, #tpu.memory_space<vmem>>, %arg1: memref<768x256xbf16, #tpu.memory_space<vmem>>, %arg2: memref<1x768xf32, #tpu.memory_space<vmem>>, %arg3: memref<256x256xbf16, #tpu.memory_space<vmem>>, %arg4: memref<1x256xf32, #tpu.memory_space<vmem>>, %arg5: memref<512x256xf32, #tpu.memory_space<vmem>>) attributes {dimension_semantics = [], scalar_prefetch = 0 : i64, scratch_operands = 0 : i64, tpu.core_type = #tpu.core_type<tc>} {
    %c0 = arith.constant 0 : index
    %c0_0 = arith.constant 0 : index
    %0 = vector.load %arg0[%c0, %c0_0] : memref<512x256xbf16, #tpu.memory_space<vmem>>, vector<512x256xbf16>
    %c0_1 = arith.constant 0 : index
    %c0_2 = arith.constant 0 : index
    %1 = vector.load %arg1[%c0_1, %c0_2] : memref<768x256xbf16, #tpu.memory_space<vmem>>, vector<768x256xbf16>
    %cst = arith.constant dense<0.000000e+00> : vector<512x768xf32>
    %2 = tpu.matmul %0, %1, %cst {dimension_numbers = #tpu.dot_dimension_numbers<[1], [1], [0], [0], [0, 0, 1, 0], [], []>} : vector<512x256xbf16>, vector<768x256xbf16>, vector<512x768xf32> -> vector<512x768xf32>
    %c0_3 = arith.constant 0 : index
    %c0_4 = arith.constant 0 : index
    %3 = vector.load %arg2[%c0_3, %c0_4] : memref<1x768xf32, #tpu.memory_space<vmem>>, vector<1x768xf32>
    %4 = vector.broadcast %3 : vector<1x768xf32> to vector<512x768xf32>
    %5 = arith.addf %2, %4 : vector<512x768xf32>
    %6 = vector.extract_strided_slice %5 {offsets = [0, 0], sizes = [256, 256], strides = [1, 1]} : vector<512x768xf32> to vector<256x256xf32>
    %7 = vector.extract_strided_slice %5 {offsets = [256, 0], sizes = [256, 256], strides = [1, 1]} : vector<512x768xf32> to vector<256x256xf32>
    %8 = vector.extract_strided_slice %5 {offsets = [0, 256], sizes = [256, 256], strides = [1, 1]} : vector<512x768xf32> to vector<256x256xf32>
    %9 = vector.extract_strided_slice %5 {offsets = [256, 256], sizes = [256, 256], strides = [1, 1]} : vector<512x768xf32> to vector<256x256xf32>
    %10 = vector.extract_strided_slice %5 {offsets = [0, 512], sizes = [256, 256], strides = [1, 1]} : vector<512x768xf32> to vector<256x256xf32>
    %11 = vector.extract_strided_slice %5 {offsets = [256, 512], sizes = [256, 256], strides = [1, 1]} : vector<512x768xf32> to vector<256x256xf32>
    %12 = tpu.concatenate %6, %6, %7, %7 in 0 : vector<256x256xf32>, vector<256x256xf32>, vector<256x256xf32>, vector<256x256xf32> -> vector<1024x256xf32>
    %13 = tpu.concatenate %8, %9, %8, %9 in 0 : vector<256x256xf32>, vector<256x256xf32>, vector<256x256xf32>, vector<256x256xf32> -> vector<1024x256xf32>
    %14 = arith.mulf %12, %13 : vector<1024x256xf32>
    %cst_5 = arith.constant dense<0.000000e+00> : vector<1024xf32>
    %15 = vector.multi_reduction <add>, %14, %cst_5 [1] : vector<1024x256xf32> to vector<1024xf32>
    %16 = vector.shape_cast %15 : vector<1024xf32> to vector<1024x1xf32>
    %cst_6 = arith.constant 6.250000e-02 : f32
    %17 = vector.broadcast %cst_6 : f32 to vector<1024x1xf32>
    %18 = arith.mulf %16, %17 : vector<1024x1xf32>
    %19 = vector.extract_strided_slice %18 {offsets = [0, 0], sizes = [256, 1], strides = [1, 1]} : vector<1024x1xf32> to vector<256x1xf32>
    %20 = vector.extract_strided_slice %18 {offsets = [256, 0], sizes = [256, 1], strides = [1, 1]} : vector<1024x1xf32> to vector<256x1xf32>
    %21 = arith.maximumf %19, %20 : vector<256x1xf32>
    %22 = arith.subf %19, %21 : vector<256x1xf32>
    %23 = math.exp %22 : vector<256x1xf32>
    %24 = arith.subf %20, %21 : vector<256x1xf32>
    %25 = math.exp %24 : vector<256x1xf32>
    %26 = arith.addf %23, %25 : vector<256x1xf32>
    %27 = tpu.reciprocal %26 {approx = true} : vector<256x1xf32> -> vector<256x1xf32>
    %28 = arith.mulf %23, %27 : vector<256x1xf32>
    %29 = vector.broadcast %28 : vector<256x1xf32> to vector<256x256xf32>
    %30 = arith.mulf %29, %10 : vector<256x256xf32>
    %31 = arith.mulf %25, %27 : vector<256x1xf32>
    %32 = vector.broadcast %31 : vector<256x1xf32> to vector<256x256xf32>
    %33 = arith.mulf %32, %11 : vector<256x256xf32>
    %34 = arith.addf %30, %33 : vector<256x256xf32>
    %35 = vector.extract_strided_slice %18 {offsets = [512, 0], sizes = [256, 1], strides = [1, 1]} : vector<1024x1xf32> to vector<256x1xf32>
    %36 = vector.extract_strided_slice %18 {offsets = [768, 0], sizes = [256, 1], strides = [1, 1]} : vector<1024x1xf32> to vector<256x1xf32>
    %37 = arith.maximumf %35, %36 : vector<256x1xf32>
    %38 = arith.subf %35, %37 : vector<256x1xf32>
    %39 = math.exp %38 : vector<256x1xf32>
    %40 = arith.subf %36, %37 : vector<256x1xf32>
    %41 = math.exp %40 : vector<256x1xf32>
    %42 = arith.addf %39, %41 : vector<256x1xf32>
    %43 = tpu.reciprocal %42 {approx = true} : vector<256x1xf32> -> vector<256x1xf32>
    %44 = arith.mulf %39, %43 : vector<256x1xf32>
    %45 = vector.broadcast %44 : vector<256x1xf32> to vector<256x256xf32>
    %46 = arith.mulf %45, %10 : vector<256x256xf32>
    %47 = arith.mulf %41, %43 : vector<256x1xf32>
    %48 = vector.broadcast %47 : vector<256x1xf32> to vector<256x256xf32>
    %49 = arith.mulf %48, %11 : vector<256x256xf32>
    %50 = arith.addf %46, %49 : vector<256x256xf32>
    %51 = tpu.concatenate %34, %50 in 0 : vector<256x256xf32>, vector<256x256xf32> -> vector<512x256xf32>
    %52 = arith.truncf %51 : vector<512x256xf32> to vector<512x256xbf16>
    %c0_7 = arith.constant 0 : index
    %c0_8 = arith.constant 0 : index
    %53 = vector.load %arg3[%c0_7, %c0_8] : memref<256x256xbf16, #tpu.memory_space<vmem>>, vector<256x256xbf16>
    %cst_9 = arith.constant dense<0.000000e+00> : vector<512x256xf32>
    %54 = tpu.matmul %52, %53, %cst_9 {dimension_numbers = #tpu.dot_dimension_numbers<[1], [1], [0], [0], [0, 0, 1, 0], [], []>} : vector<512x256xbf16>, vector<256x256xbf16>, vector<512x256xf32> -> vector<512x256xf32>
    %c0_10 = arith.constant 0 : index
    %c0_11 = arith.constant 0 : index
    %55 = vector.load %arg4[%c0_10, %c0_11] : memref<1x256xf32, #tpu.memory_space<vmem>>, vector<1x256xf32>
    %56 = vector.broadcast %55 : vector<1x256xf32> to vector<512x256xf32>
    %57 = arith.addf %54, %56 : vector<512x256xf32>
    %58 = vector.extract_strided_slice %57 {offsets = [0, 0], sizes = [256, 256], strides = [1, 1]} : vector<512x256xf32> to vector<256x256xf32>
    %cst_12 = arith.constant dense<0xFF800000> : vector<256xf32>
    %59 = vector.multi_reduction <maximumf>, %58, %cst_12 [1] : vector<256x256xf32> to vector<256xf32>
    %60 = vector.shape_cast %59 : vector<256xf32> to vector<256x1xf32>
    %61 = vector.broadcast %60 : vector<256x1xf32> to vector<256x256xf32>
    %62 = arith.subf %58, %61 : vector<256x256xf32>
    %63 = math.exp %62 : vector<256x256xf32>
    %cst_13 = arith.constant dense<0.000000e+00> : vector<256xf32>
    %64 = vector.multi_reduction <add>, %63, %cst_13 [1] : vector<256x256xf32> to vector<256xf32>
    %65 = vector.shape_cast %64 : vector<256xf32> to vector<256x1xf32>
    %66 = tpu.reciprocal %65 {approx = true} : vector<256x1xf32> -> vector<256x1xf32>
    %67 = vector.broadcast %66 : vector<256x1xf32> to vector<256x256xf32>
    %68 = arith.mulf %63, %67 : vector<256x256xf32>
    %69 = arith.truncf %68 : vector<256x256xf32> to vector<256x256xbf16>
    %70 = arith.truncf %58 : vector<256x256xf32> to vector<256x256xbf16>
    %cst_14 = arith.constant dense<0.000000e+00> : vector<256x256xf32>
    %71 = tpu.matmul %69, %70, %cst_14 {dimension_numbers = #tpu.dot_dimension_numbers<[1], [0], [0], [1], [0, 0, 1, 1], [], []>} : vector<256x256xbf16>, vector<256x256xbf16>, vector<256x256xf32> -> vector<256x256xf32>
    %c0_15 = arith.constant 0 : index
    %c0_16 = arith.constant 0 : index
    %72 = vector.load %arg5[%c0_15, %c0_16] : memref<512x256xf32, #tpu.memory_space<vmem>>, vector<256x256xf32>
    tpu.vector_store %arg5[%c0_15, %c0_16], %71 {strides = array<i32>} : memref<512x256xf32, #tpu.memory_space<vmem>>, vector<256x256xf32>,
    %73 = vector.extract_strided_slice %57 {offsets = [256, 0], sizes = [256, 256], strides = [1, 1]} : vector<512x256xf32> to vector<256x256xf32>
    %cst_17 = arith.constant dense<0xFF800000> : vector<256xf32>
    %74 = vector.multi_reduction <maximumf>, %73, %cst_17 [1] : vector<256x256xf32> to vector<256xf32>
    %75 = vector.shape_cast %74 : vector<256xf32> to vector<256x1xf32>
    %76 = vector.broadcast %75 : vector<256x1xf32> to vector<256x256xf32>
    %77 = arith.subf %73, %76 : vector<256x256xf32>
    %78 = math.exp %77 : vector<256x256xf32>
    %cst_18 = arith.constant dense<0.000000e+00> : vector<256xf32>
    %79 = vector.multi_reduction <add>, %78, %cst_18 [1] : vector<256x256xf32> to vector<256xf32>
    %80 = vector.shape_cast %79 : vector<256xf32> to vector<256x1xf32>
    %81 = tpu.reciprocal %80 {approx = true} : vector<256x1xf32> -> vector<256x1xf32>
    %82 = vector.broadcast %81 : vector<256x1xf32> to vector<256x256xf32>
    %83 = arith.mulf %78, %82 : vector<256x256xf32>
    %84 = arith.truncf %83 : vector<256x256xf32> to vector<256x256xbf16>
    %85 = arith.truncf %73 : vector<256x256xf32> to vector<256x256xbf16>
    %cst_19 = arith.constant dense<0.000000e+00> : vector<256x256xf32>
    %86 = tpu.matmul %84, %85, %cst_19 {dimension_numbers = #tpu.dot_dimension_numbers<[1], [0], [0], [1], [0, 0, 1, 1], [], []>} : vector<256x256xbf16>, vector<256x256xbf16>, vector<256x256xf32> -> vector<256x256xf32>
    %c256 = arith.constant 256 : index
    %c0_20 = arith.constant 0 : index
    %87 = vector.load %arg5[%c256, %c0_20] : memref<512x256xf32, #tpu.memory_space<vmem>>, vector<256x256xf32>
    tpu.vector_store %arg5[%c256, %c0_20], %86 {strides = array<i32>} : memref<512x256xf32, #tpu.memory_space<vmem>>, vector<256x256xf32>,
    return
  }
}

</mosaic_0001>

<bundles_post_ra>
// kernel: model_forward.1
= control target key start
LH: loop header
LB: loop body
LE: loop exit
PB: predicated region body
PF: predicated region fallthrough
CT: control target
= control target key end

     0   :  { %s13187_s0 = inlined_call_operand.vmem [shape: bf16[512,256], index: 0, kind: input, shape index: {}]   ;;  %s13188_s1 = inlined_call_operand.vmem [shape: bf16[768,256], index: 1, kind: input, shape index: {}]   ;;  %s13189_s2 = inlined_call_operand.vmem [shape: f32[1,768], index: 2, kind: input, shape index: {}]   ;;  %s13190_s3 = inlined_call_operand.vmem [shape: bf16[256,256], index: 3, kind: input, shape index: {}]   ;;  %s13191_s4 = inlined_call_operand.vmem [shape: f32[1,256], index: 4, kind: input, shape index: {}]   ;;  %s13192_s5 = inlined_call_operand.hbm [shape: f32[512,256], index: 5, kind: output, shape index: {}]  }
   0x1   :  { %v6362_v0 = vld [vmem:[%s13188_s1 + $0x74] ss:$8 sps:$4 sm:$0xff]   ;;  %v6366_v2 = vld [vmem:[%s13188_s1 + $0x70] ss:$8 sps:$4 sm:$0xff]   ;;  %v6368_v4 = vld [vmem:[%s13188_s1 + $0x64] ss:$8 sps:$4 sm:$0xff]  }
   0x2   :  { %v6364_v1 = vld [vmem:[%s13188_s1 + $0x174] ss:$8 sps:$4 sm:$0xff]   ;;  %1013 = vmatprep.subr.bf16.mxu0 %v6362_v0  ;;  %v6367_v3 = vld [vmem:[%s13188_s1 + $0x170] ss:$8 sps:$4 sm:$0xff]   ;;  %v6370_v5 = vld [vmem:[%s13188_s1 + $0x164] ss:$8 sps:$4 sm:$0xff]  }
   0x3   :  { %1366 = vmatprep.subr.bf16.mxu1 %v6364_v1  ;;  %1014 = vmatpush1.bf16.xpose.msra.mxu0 %v6366_v2  ;;  %v6372_v6 = vld [vmem:[%s13188_s1 + $0x60] ss:$8 sps:$4 sm:$0xff]   ;;  %v6374_v8 = vld [vmem:[%s13188_s1 + $0x54] ss:$8 sps:$4 sm:$0xff]   ;;  %v6378_v10 = vld [vmem:[%s13188_s1 + $0x50] ss:$8 sps:$4 sm:$0xff]  }
   0x4   :  { %1367 = vmatpush1.bf16.xpose.msra.mxu1 %v6367_v3  ;;  %1015 = vmatprep.subr.bf16.mxu0 %v6368_v4  ;;  %v6373_v7 = vld [vmem:[%s13188_s1 + $0x160] ss:$8 sps:$4 sm:$0xff]   ;;  %v6376_v9 = vld [vmem:[%s13188_s1 + $0x154] ss:$8 sps:$4 sm:$0xff]   ;;  %v6379_v11 = vld [vmem:[%s13188_s1 + $0x150] ss:$8 sps:$4 sm:$0xff]  }
   0x5   :  { %1368 = vmatprep.subr.bf16.mxu1 %v6370_v5  ;;  %v6380_v12 = vld [vmem:[%s13188_s1 + $0x44] ss:$8 sps:$4 sm:$0xff]   ;;  %v6384_v14 = vld [vmem:[%s13188_s1 + $0x40] ss:$8 sps:$4 sm:$0xff]   ;;  %v6386_v16 = vld [vmem:[%s13188_s1 + $0x34] ss:$8 sps:$4 sm:$0xff]  }
   0x6   :  { %v6382_v13 = vld [vmem:[%s13188_s1 + $0x144] ss:$8 sps:$4 sm:$0xff]   ;;  %v6385_v15 = vld [vmem:[%s13188_s1 + $0x140] ss:$8 sps:$4 sm:$0xff]   ;;  %v6388_v17 = vld [vmem:[%s13188_s1 + $0x134] ss:$8 sps:$4 sm:$0xff]  }
   0x7   :  { %v6390_v18 = vld [vmem:[%s13188_s1 + $0x30] ss:$8 sps:$4 sm:$0xff]   ;;  %v6392_v20 = vld [vmem:[%s13188_s1 + $0x24] ss:$8 sps:$4 sm:$0xff]   ;;  %v6396_v22 = vld [vmem:[%s13188_s1 + $0x20] ss:$8 sps:$4 sm:$0xff]  }
   0x8   :  { %v6391_v19 = vld [vmem:[%s13188_s1 + $0x130] ss:$8 sps:$4 sm:$0xff]   ;;  %v6394_v21 = vld [vmem:[%s13188_s1 + $0x124] ss:$8 sps:$4 sm:$0xff]   ;;  %v6397_v23 = vld [vmem:[%s13188_s1 + $0x120] ss:$8 sps:$4 sm:$0xff]  }
   0x9   :  { %v6398_v24 = vld [vmem:[%s13188_s1 + $0x14] ss:$8 sps:$4 sm:$0xff]   ;;  %v6458_v26 = vld [vmem:[%s13187_s0 + $0x4] ss:$8 sps:$4 sm:$0xff]   ;;  %v6402_v27 = vld [vmem:[%s13188_s1 + $0x10] ss:$8 sps:$4 sm:$0xff]  }
   0xa   :  { %v6400_v25 = vld [vmem:[%s13188_s1 + $0x114] ss:$8 sps:$4 sm:$0xff]   ;;  %1045 = vmatprep.mubr.bf16.mxu0 %v6458_v26  ;;  %1398 = vmatprep.mubr.bf16.mxu1 %v6458_v26  ;;  %v6403_v28 = vld [vmem:[%s13188_s1 + $0x110] ss:$8 sps:$4 sm:$0xff]   ;;  %v6404_v29 = vld [vmem:[%s13188_s1 + $0x4] ss:$8 sps:$4 sm:$0xff]  }
   0xb   :  { %1016 = vmatpush1.bf16.xpose.msra.mxu0 %v6372_v6  ;;  %v6406_v30 = vld [vmem:[%s13188_s1 + $0x104] ss:$8 sps:$4 sm:$0xff]   ;;  %v6408_v31 = vld [vmem:[%s13188_s1] ss:$8 sps:$4 sm:$0xff]   ;;  %v6410_v33 = vld [vmem:[%s13188_s1 + $0xf4] ss:$8 sps:$4 sm:$0xff]  }
   0xc   :  { %1369 = vmatpush1.bf16.xpose.msra.mxu1 %v6373_v7  ;;  %1017 = vmatprep.subr.bf16.mxu0 %v6374_v8  ;;  %v6409_v32 = vld [vmem:[%s13188_s1 + $0x100] ss:$8 sps:$4 sm:$0xff]   ;;  %v6412_v34 = vld [vmem:[%s13188_s1 + $0x1f4] ss:$8 sps:$4 sm:$0xff]   ;;  %v6414_v35 = vld [vmem:[%s13188_s1 + $0xf0] ss:$8 sps:$4 sm:$0xff]  }
   0xd   :  { %1370 = vmatprep.subr.bf16.mxu1 %v6376_v9  ;;  %v6415_v36 = vld [vmem:[%s13188_s1 + $0x1f0] ss:$8 sps:$4 sm:$0xff]   ;;  %v6416_v37 = vld [vmem:[%s13188_s1 + $0xe4] ss:$8 sps:$4 sm:$0xff]   ;;  %v6420_v39 = vld [vmem:[%s13188_s1 + $0xe0] ss:$8 sps:$4 sm:$0xff]  }
   0xe   :  { %v6418_v38 = vld [vmem:[%s13188_s1 + $0x1e4] ss:$8 sps:$4 sm:$0xff]   ;;  %v6421_v40 = vld [vmem:[%s13188_s1 + $0x1e0] ss:$8 sps:$4 sm:$0xff]   ;;  %v6422_v41 = vld [vmem:[%s13188_s1 + $0xd4] ss:$8 sps:$4 sm:$0xff]  }
   0xf   :  { %v6424_v42 = vld [vmem:[%s13188_s1 + $0x1d4] ss:$8 sps:$4 sm:$0xff]   ;;  %v6426_v43 = vld [vmem:[%s13188_s1 + $0xd0] ss:$8 sps:$4 sm:$0xff]   ;;  %v6428_v45 = vld [vmem:[%s13188_s1 + $0xc4] ss:$8 sps:$4 sm:$0xff]  }
  0x10   :  { %v6427_v44 = vld [vmem:[%s13188_s1 + $0x1d0] ss:$8 sps:$4 sm:$0xff]   ;;  %v6430_v46 = vld [vmem:[%s13188_s1 + $0x1c4] ss:$8 sps:$4 sm:$0xff]   ;;  %v6432_v47 = vld [vmem:[%s13188_s1 + $0xc0] ss:$8 sps:$4 sm:$0xff]  }
  0x11   :  { %v6433_v48 = vld [vmem:[%s13188_s1 + $0x1c0] ss:$8 sps:$4 sm:$0xff]   ;;  %v6434_v49 = vld [vmem:[%s13188_s1 + $0xb4] ss:$8 sps:$4 sm:$0xff]   ;;  %v6438_v51 = vld [vmem:[%s13188_s1 + $0xb0] ss:$8 sps:$4 sm:$0xff]  }
  0x12   :  { %v6436_v50 = vld [vmem:[%s13188_s1 + $0x1b4] ss:$8 sps:$4 sm:$0xff]   ;;  %v6439_v52 = vld [vmem:[%s13188_s1 + $0x1b0] ss:$8 sps:$4 sm:$0xff]   ;;  %v6440_v53 = vld [vmem:[%s13188_s1 + $0xa4] ss:$8 sps:$4 sm:$0xff]  }
  0x13   :  { %1018 = vmatpush1.bf16.xpose.msra.mxu0 %v6378_v10  ;;  %v6442_v54 = vld [vmem:[%s13188_s1 + $0x1a4] ss:$8 sps:$4 sm:$0xff]  }
  0x14   :  { %1371 = vmatpush1.bf16.xpose.msra.mxu1 %v6379_v11  ;;  %1019 = vmatprep.subr.bf16.mxu0 %v6380_v12 }
  0x15   :  { %1372 = vmatprep.subr.bf16.mxu1 %v6382_v13 }
  0x1b   :  { %1020 = vmatpush1.bf16.xpose.msra.mxu0 %v6384_v14 }
  0x1c   :  { %1373 = vmatpush1.bf16.xpose.msra.mxu1 %v6385_v15  ;;  %1021 = vmatprep.subr.bf16.mxu0 %v6386_v16 }
  0x1d   :  { %1374 = vmatprep.subr.bf16.mxu1 %v6388_v17 }
  0x23   :  { %1022 = vmatpush1.bf16.xpose.msra.mxu0 %v6390_v18 }
  0x24   :  { %1375 = vmatpush1.bf16.xpose.msra.mxu1 %v6391_v19  ;;  %1023 = vmatprep.subr.bf16.mxu0 %v6392_v20 }
  0x25   :  { %1376 = vmatprep.subr.bf16.mxu1 %v6394_v21 }
  0x2b   :  { %1024 = vmatpush1.bf16.xpose.msra.mxu0 %v6396_v22 }
  0x2c   :  { %1377 = vmatpush1.bf16.xpose.msra.mxu1 %v6397_v23  ;;  %1025 = vmatprep.subr.bf16.mxu0 %v6398_v24 }
  0x2d   :  { %1378 = vmatprep.subr.bf16.mxu1 %v6400_v25 }
  0x33   :  { %1026 = vmatpush1.bf16.xpose.msra.mxu0 %v6402_v27 }
  0x34   :  { %1379 = vmatpush1.bf16.xpose.msra.mxu1 %v6403_v28  ;;  %1027 = vmatprep.subr.bf16.mxu0 %v6404_v29 }
  0x35   :  { %1380 = vmatprep.subr.bf16.mxu1 %v6406_v30 }
  0x3b   :  { %1028 = vmatpush1.bf16.xpose.msra.mxu0 %v6408_v31 }
  0x3c   :  { %1381 = vmatpush1.bf16.xpose.msra.mxu1 %v6409_v32  ;;  %1029 = vmatprep.subr.bf16.mxu0 %v6410_v33 }
  0x3d   :  { %1382 = vmatprep.subr.bf16.mxu1 %v6412_v34 }
  0x43   :  { %1030 = vmatpush2.bf16.xpose.msra.mxu0 %v6414_v35 }
  0x44   :  { %1383 = vmatpush2.bf16.xpose.msra.mxu1 %v6415_v36  ;;  %1031 = vmatprep.subr.bf16.mxu0 %v6416_v37 }
  0x45   :  { %1384 = vmatprep.subr.bf16.mxu1 %v6418_v38 }
  0x4b   :  { %1032 = vmatpush2.bf16.xpose.msra.mxu0 %v6420_v39 }
  0x4c   :  { %1385 = vmatpush2.bf16.xpose.msra.mxu1 %v6421_v40  ;;  %1033 = vmatprep.subr.bf16.mxu0 %v6422_v41 }
  0x4d   :  { %1386 = vmatprep.subr.bf16.mxu1 %v6424_v42 }
  0x53   :  { %1034 = vmatpush2.bf16.xpose.msra.mxu0 %v6426_v43 }
  0x54   :  { %1387 = vmatpush2.bf16.xpose.msra.mxu1 %v6427_v44  ;;  %1035 = vmatprep.subr.bf16.mxu0 %v6428_v45 }
  0x55   :  { %1388 = vmatprep.subr.bf16.mxu1 %v6430_v46 }
  0x5b   :  { %1036 = vmatpush2.bf16.xpose.msra.mxu0 %v6432_v47 }
  0x5c   :  { %1389 = vmatpush2.bf16.xpose.msra.mxu1 %v6433_v48  ;;  %1037 = vmatprep.subr.bf16.mxu0 %v6434_v49 }
  0x5d   :  { %1390 = vmatprep.subr.bf16.mxu1 %v6436_v50 }
  0x5e   :  { %10 = vsyncpa [#allocation3], 0  ;;  %v6444_v55 = vld [vmem:[%s13188_s1 + $0xa0] ss:$8 sps:$4 sm:$0xff]   ;;  %v6446_v57 = vld [vmem:[%s13188_s1 + $0x94] ss:$8 sps:$4 sm:$0xff]  }
  0x5f   :  { %v6445_v56 = vld [vmem:[%s13188_s1 + $0x1a0] ss:$8 sps:$4 sm:$0xff]   ;;  %v6448_v58 = vld [vmem:[%s13188_s1 + $0x194] ss:$8 sps:$4 sm:$0xff]   ;;  %v6450_v59 = vld [vmem:[%s13188_s1 + $0x90] ss:$8 sps:$4 sm:$0xff]  }
  0x60   :  { %v6451_v60 = vld [vmem:[%s13188_s1 + $0x190] ss:$8 sps:$4 sm:$0xff]   ;;  %v6452_v61 = vld [vmem:[%s13188_s1 + $0x84] ss:$8 sps:$4 sm:$0xff]   ;;  %v6456_v63 = vld [vmem:[%s13188_s1 + $0x80] ss:$8 sps:$4 sm:$0xff]  }
  0x61   :  { %v6454_v62 = vld [vmem:[%s13188_s1 + $0x184] ss:$8 sps:$4 sm:$0xff]   ;;  %v6457_v0 = vld [vmem:[%s13188_s1 + $0x180] ss:$8 sps:$4 sm:$0xff]   ;;  %v6463_v1 = vld [vmem:[%s13188_s1 + $0x274] ss:$8 sps:$4 sm:$0xff]  }
  0x62   :  { %v7731_v2 = vld [vmem:[%s13187_s0] ss:$8 sps:$4 sm:$0xff]   ;;  %v6461_v3 = vld [vmem:[%s13188_s1 + $0x270] ss:$8 sps:$4 sm:$0xff]   ;;  %v7739_v4 = vld [vmem:[%s13187_s0 + $0x14] ss:$8 sps:$4 sm:$0xff]  }
  0x63   :  { %1038 = vmatpush2.bf16.xpose.msra.mxu0 %v6438_v51  ;;  %v6472_v5 = vld [vmem:[%s13188_s1 + $0x264] ss:$8 sps:$4 sm:$0xff]   ;;  %v7751_v6 = vld [vmem:[%s13187_s0 + $0x10] ss:$8 sps:$4 sm:$0xff]   ;;  %v6470_v8 = vld [vmem:[%s13188_s1 + $0x260] ss:$8 sps:$4 sm:$0xff]  }
  0x64   :  { %1391 = vmatpush2.bf16.xpose.msra.mxu1 %v6439_v52  ;;  %1039 = vmatprep.subr.bf16.mxu0 %v6440_v53  ;;  %v7756_v7 = vld [vmem:[%s13187_s0 + $0x24] ss:$8 sps:$4 sm:$0xff]   ;;  %v6481_v9 = vld [vmem:[%s13188_s1 + $0x254] ss:$8 sps:$4 sm:$0xff]   ;;  %v7771_v10 = vld [vmem:[%s13187_s0 + $0x20] ss:$8 sps:$4 sm:$0xff]  }
  0x65   :  { %1392 = vmatprep.subr.bf16.mxu1 %v6442_v54  ;;  %v7776_v11 = vld [vmem:[%s13187_s0 + $0x34] ss:$8 sps:$4 sm:$0xff]   ;;  %v6479_v12 = vld [vmem:[%s13188_s1 + $0x250] ss:$8 sps:$4 sm:$0xff]   ;;  %v6490_v13 = vld [vmem:[%s13188_s1 + $0x244] ss:$8 sps:$4 sm:$0xff]  }
  0x66   :  { %v7791_v14 = vld [vmem:[%s13187_s0 + $0x30] ss:$8 sps:$4 sm:$0xff]   ;;  %v7796_v15 = vld [vmem:[%s13187_s0 + $0x44] ss:$8 sps:$4 sm:$0xff]   ;;  %v6488_v16 = vld [vmem:[%s13188_s1 + $0x240] ss:$8 sps:$4 sm:$0xff]  }
  0x67   :  { %v6499_v17 = vld [vmem:[%s13188_s1 + $0x234] ss:$8 sps:$4 sm:$0xff]   ;;  %v6478_v18 = vld [vmem:[%s13187_s0 + $0x40] ss:$8 sps:$4 sm:$0xff]   ;;  %v6497_v20 = vld [vmem:[%s13188_s1 + $0x230] ss:$8 sps:$4 sm:$0xff]  }
  0x68   :  { %v6482_v19 = vld [vmem:[%s13187_s0 + $0x54] ss:$8 sps:$4 sm:$0xff]   ;;  %v6508_v21 = vld [vmem:[%s13188_s1 + $0x224] ss:$8 sps:$4 sm:$0xff]   ;;  %v6484_v22 = vld [vmem:[%s13187_s0 + $0x50] ss:$8 sps:$4 sm:$0xff]  }
  0x69   :  { %v6485_v23 = vld [vmem:[%s13187_s0 + $0x64] ss:$8 sps:$4 sm:$0xff]   ;;  %v6506_v24 = vld [vmem:[%s13188_s1 + $0x220] ss:$8 sps:$4 sm:$0xff]   ;;  %v6517_v25 = vld [vmem:[%s13188_s1 + $0x214] ss:$8 sps:$4 sm:$0xff]  }
  0x6a   :  { %v6487_v26 = vld [vmem:[%s13187_s0 + $0x60] ss:$8 sps:$4 sm:$0xff]   ;;  %v6491_v27 = vld [vmem:[%s13187_s0 + $0x74] ss:$8 sps:$4 sm:$0xff]   ;;  %v6515_v28 = vld [vmem:[%s13188_s1 + $0x210] ss:$8 sps:$4 sm:$0xff]  }
  0x6b   :  { %1040 = vmatpush2.bf16.xpose.msra.mxu0 %v6444_v55  ;;  %v6526_v29 = vld [vmem:[%s13188_s1 + $0x204] ss:$8 sps:$4 sm:$0xff]   ;;  %v6493_v30 = vld [vmem:[%s13187_s0 + $0x70] ss:$8 sps:$4 sm:$0xff]   ;;  %v6524_v32 = vld [vmem:[%s13188_s1 + $0x200] ss:$8 sps:$4 sm:$0xff]  }
  0x6c   :  { %1393 = vmatpush2.bf16.xpose.msra.mxu1 %v6445_v56  ;;  %1041 = vmatprep.subr.bf16.mxu0 %v6446_v57  ;;  %v6494_v31 = vld [vmem:[%s13187_s0 + $0x84] ss:$8 sps:$4 sm:$0xff]   ;;  %v6535_v33 = vld [vmem:[%s13188_s1 + $0x2f4] ss:$8 sps:$4 sm:$0xff]   ;;  %v6496_v34 = vld [vmem:[%s13187_s0 + $0x80] ss:$8 sps:$4 sm:$0xff]  }
  0x6d   :  { %1394 = vmatprep.subr.bf16.mxu1 %v6448_v58  ;;  %v6500_v35 = vld [vmem:[%s13187_s0 + $0x94] ss:$8 sps:$4 sm:$0xff]   ;;  %v6533_v36 = vld [vmem:[%s13188_s1 + $0x2f0] ss:$8 sps:$4 sm:$0xff]   ;;  %v6544_v37 = vld [vmem:[%s13188_s1 + $0x2e4] ss:$8 sps:$4 sm:$0xff]  }
  0x6e   :  { %v6502_v38 = vld [vmem:[%s13187_s0 + $0x90] ss:$8 sps:$4 sm:$0xff]   ;;  %v6503_v39 = vld [vmem:[%s13187_s0 + $0xa4] ss:$8 sps:$4 sm:$0xff]   ;;  %v6542_v40 = vld [vmem:[%s13188_s1 + $0x2e0] ss:$8 sps:$4 sm:$0xff]  }
  0x6f   :  { %v6553_v41 = vld [vmem:[%s13188_s1 + $0x2d4] ss:$8 sps:$4 sm:$0xff]   ;;  %v6505_v42 = vld [vmem:[%s13187_s0 + $0xa0] ss:$8 sps:$4 sm:$0xff]   ;;  %v6551_v44 = vld [vmem:[%s13188_s1 + $0x2d0] ss:$8 sps:$4 sm:$0xff]  }
  0x70   :  { %v6509_v43 = vld [vmem:[%s13187_s0 + $0xb4] ss:$8 sps:$4 sm:$0xff]   ;;  %v6562_v45 = vld [vmem:[%s13188_s1 + $0x2c4] ss:$8 sps:$4 sm:$0xff]   ;;  %v6511_v46 = vld [vmem:[%s13187_s0 + $0xb0] ss:$8 sps:$4 sm:$0xff]  }
  0x71   :  { %v6512_v47 = vld [vmem:[%s13187_s0 + $0xc4] ss:$8 sps:$4 sm:$0xff]   ;;  %v6560_v48 = vld [vmem:[%s13188_s1 + $0x2c0] ss:$8 sps:$4 sm:$0xff]   ;;  %v6571_v49 = vld [vmem:[%s13188_s1 + $0x2b4] ss:$8 sps:$4 sm:$0xff]  }
  0x72   :  { %v6514_v50 = vld [vmem:[%s13187_s0 + $0xc0] ss:$8 sps:$4 sm:$0xff]   ;;  %v6518_v51 = vld [vmem:[%s13187_s0 + $0xd4] ss:$8 sps:$4 sm:$0xff]   ;;  %v6569_v52 = vld [vmem:[%s13188_s1 + $0x2b0] ss:$8 sps:$4 sm:$0xff]  }
  0x73   :  { %1042 = vmatpush2.bf16.xpose.msra.mxu0 %v6450_v59  ;;  %v6580_v53 = vld [vmem:[%s13188_s1 + $0x2a4] ss:$8 sps:$4 sm:$0xff]   ;;  %v6520_v54 = vld [vmem:[%s13187_s0 + $0xd0] ss:$8 sps:$4 sm:$0xff]   ;;  %v6578_v56 = vld [vmem:[%s13188_s1 + $0x2a0] ss:$8 sps:$4 sm:$0xff]  }
  0x74   :  { %1395 = vmatpush2.bf16.xpose.msra.mxu1 %v6451_v60  ;;  %1043 = vmatprep.subr.bf16.mxu0 %v6452_v61  ;;  %v6521_v55 = vld [vmem:[%s13187_s0 + $0xe4] ss:$8 sps:$4 sm:$0xff]   ;;  %v6589_v57 = vld [vmem:[%s13188_s1 + $0x294] ss:$8 sps:$4 sm:$0xff]   ;;  %v6523_v58 = vld [vmem:[%s13187_s0 + $0xe0] ss:$8 sps:$4 sm:$0xff]  }
  0x75   :  { %1396 = vmatprep.subr.bf16.mxu1 %v6454_v62  ;;  %v6527_v59 = vld [vmem:[%s13187_s0 + $0xf4] ss:$8 sps:$4 sm:$0xff]   ;;  %v6587_v60 = vld [vmem:[%s13188_s1 + $0x290] ss:$8 sps:$4 sm:$0xff]   ;;  %v6598_v61 = vld [vmem:[%s13188_s1 + $0x284] ss:$8 sps:$4 sm:$0xff]  }
  0x76   :  { %v6529_v62 = vld [vmem:[%s13187_s0 + $0xf0] ss:$8 sps:$4 sm:$0xff]  }
  0x7b   :  { %1044 = vmatpush2.bf16.xpose.msra.mxu0 %v6456_v63  ;;  %v6530_v63 = vld [vmem:[%s13187_s0 + $0x104] ss:$8 sps:$4 sm:$0xff]  }
  0x7c   :  { %1397 = vmatpush2.bf16.xpose.msra.mxu1 %v6457_v0  ;;  %1719 = vmatprep.subr.bf16.mxu0 %v6463_v1  ;;  %v6596_v0 = vld [vmem:[%s13188_s1 + $0x280] ss:$8 sps:$4 sm:$0xff]  }
  0x7d   :  { %v6532_v1 = vld [vmem:[%s13187_s0 + $0x100] ss:$8 sps:$4 sm:$0xff]  }
  0x82   :  { %1046 = vmatmul.mubr.bf16.vlgmr.msra.gmra.mxu0 %v7731_v2 }
  0x83   :  { %1399 = vmatmul.mubr.bf16.vlgmr.msra.gmra.mxu1 %v7731_v2  ;;  %1720 = vmatpush1.bf16.xpose.msra.mxu0 %v6461_v3  ;;  %v6536_v3 = vld [vmem:[%s13187_s0 + $0x114] ss:$8 sps:$4 sm:$0xff]  }
  0x84   :  { %1055 = vmatprep.mubr.bf16.mxu0 %v7739_v4  ;;  %1408 = vmatprep.mubr.bf16.mxu1 %v7739_v4 }
  0x85   :  { %1721 = vmatprep.subr.bf16.mxu0 %v6472_v5  ;;  %v6538_v5 = vld [vmem:[%s13187_s0 + $0x110] ss:$8 sps:$4 sm:$0xff]  }
  0x8a   :  { %1056 = vmatmul.mubr.bf16.gmra.mxu0 %v7751_v6 }
  0x8b   :  { %1409 = vmatmul.mubr.bf16.gmra.mxu1 %v7751_v6  ;;  %1065 = vmatprep.mubr.bf16.mxu0 %v7756_v7 }
  0x8c   :  { %1418 = vmatprep.mubr.bf16.mxu1 %v7756_v7  ;;  %1722 = vmatpush1.bf16.xpose.msra.mxu0 %v6470_v8  ;;  %v6539_v8 = vld [vmem:[%s13187_s0 + $0x124] ss:$8 sps:$4 sm:$0xff]  }
  0x8d   :  { %1723 = vmatprep.subr.bf16.mxu0 %v6481_v9  ;;  %v6541_v9 = vld [vmem:[%s13187_s0 + $0x120] ss:$8 sps:$4 sm:$0xff]  }
  0x92   :  { %1066 = vmatmul.mubr.bf16.gmra.mxu0 %v7771_v10 }
  0x93   :  { %1419 = vmatmul.mubr.bf16.gmra.mxu1 %v7771_v10  ;;  %1075 = vmatprep.mubr.bf16.mxu0 %v7776_v11 }
  0x94   :  { %1428 = vmatprep.mubr.bf16.mxu1 %v7776_v11  ;;  %1724 = vmatpush1.bf16.xpose.msra.mxu0 %v6479_v12  ;;  %v6545_v12 = vld [vmem:[%s13187_s0 + $0x134] ss:$8 sps:$4 sm:$0xff]  }
  0x95   :  { %1725 = vmatprep.subr.bf16.mxu0 %v6490_v13  ;;  %v6547_v13 = vld [vmem:[%s13187_s0 + $0x130] ss:$8 sps:$4 sm:$0xff]  }
  0x9a   :  { %1076 = vmatmul.mubr.bf16.gmra.mxu0 %v7791_v14 }
  0x9b   :  { %1429 = vmatmul.mubr.bf16.gmra.mxu1 %v7791_v14  ;;  %1085 = vmatprep.mubr.bf16.mxu0 %v7796_v15 }
  0x9c   :  { %1438 = vmatprep.mubr.bf16.mxu1 %v7796_v15  ;;  %1726 = vmatpush1.bf16.xpose.msra.mxu0 %v6488_v16  ;;  %v6548_v16 = vld [vmem:[%s13187_s0 + $0x144] ss:$8 sps:$4 sm:$0xff]  }
  0x9d   :  { %1727 = vmatprep.subr.bf16.mxu0 %v6499_v17  ;;  %v6550_v17 = vld [vmem:[%s13187_s0 + $0x140] ss:$8 sps:$4 sm:$0xff]  }
  0xa2   :  { %1086 = vmatmul.mubr.bf16.gmra.mxu0 %v6478_v18 }
  0xa3   :  { %1439 = vmatmul.mubr.bf16.gmra.mxu1 %v6478_v18  ;;  %1095 = vmatprep.mubr.bf16.mxu0 %v6482_v19  ;;  %v6554_v18 = vld [vmem:[%s13187_s0 + $0x154] ss:$8 sps:$4 sm:$0xff]  }
  0xa4   :  { %1448 = vmatprep.mubr.bf16.mxu1 %v6482_v19  ;;  %1728 = vmatpush1.bf16.xpose.msra.mxu0 %v6497_v20  ;;  %v6556_v19 = vld [vmem:[%s13187_s0 + $0x150] ss:$8 sps:$4 sm:$0xff]   ;;  %v6557_v20 = vld [vmem:[%s13187_s0 + $0x164] ss:$8 sps:$4 sm:$0xff]  }
  0xa5   :  { %1729 = vmatprep.subr.bf16.mxu0 %v6508_v21  ;;  %v6559_v21 = vld [vmem:[%s13187_s0 + $0x160] ss:$8 sps:$4 sm:$0xff]  }
  0xaa   :  { %1096 = vmatmul.mubr.bf16.gmra.mxu0 %v6484_v22 }
  0xab   :  { %1449 = vmatmul.mubr.bf16.gmra.mxu1 %v6484_v22  ;;  %1105 = vmatprep.mubr.bf16.mxu0 %v6485_v23  ;;  %v6563_v22 = vld [vmem:[%s13187_s0 + $0x174] ss:$8 sps:$4 sm:$0xff]  }
  0xac   :  { %1458 = vmatprep.mubr.bf16.mxu1 %v6485_v23  ;;  %1730 = vmatpush1.bf16.xpose.msra.mxu0 %v6506_v24  ;;  %v183_v23 = vlaneseq  ;;  %v6565_v24 = vld [vmem:[%s13187_s0 + $0x170] ss:$8 sps:$4 sm:$0xff]  }
  0xad   :  { %1731 = vmatprep.subr.bf16.mxu0 %v6517_v25  ;;  %v6566_v25 = vld [vmem:[%s13187_s0 + $0x184] ss:$8 sps:$4 sm:$0xff]  }
  0xb2   :  { %1106 = vmatmul.mubr.bf16.gmra.mxu0 %v6487_v26 }
  0xb3   :  { %1459 = vmatmul.mubr.bf16.gmra.mxu1 %v6487_v26  ;;  %1115 = vmatprep.mubr.bf16.mxu0 %v6491_v27  ;;  %v7997_v26 = vshrl.u32 %v183_v23, 7 }
  0xb4   :  { %1468 = vmatprep.mubr.bf16.mxu1 %v6491_v27  ;;  %1732 = vmatpush1.bf16.xpose.msra.mxu0 %v6515_v28 }
  0xb5   :  { %1733 = vmatprep.subr.bf16.mxu0 %v6526_v29  ;;  %13697 = vst [vmem:[#allocation5_spill] sm:$0xff] %v7997_v26  ;;  %v13194_v27 = vsub.s32 0, %v7997_v26  ;;  %v193_v28 = vsub.s32 2, %v7997_v26  ;;  %v181_v29 = vld [vmem:[%s13189_s2] sm:$0x3f] }
  0xba   :  { %1116 = vmatmul.mubr.bf16.gmra.mxu0 %v6493_v30 }
  0xbb   :  { %1469 = vmatmul.mubr.bf16.gmra.mxu1 %v6493_v30  ;;  %1125 = vmatprep.mubr.bf16.mxu0 %v6494_v31  ;;  %v13193_v30 = vsub.s32 1, %v7997_v26 }
  0xbc   :  { %1478 = vmatprep.mubr.bf16.mxu1 %v6494_v31  ;;  %1734 = vmatpush1.bf16.xpose.msra.mxu0 %v6524_v32  ;;  %v197_v31 = vsub.s32 3, %v7997_v26  ;;  %v6568_v32 = vld [vmem:[%s13187_s0 + $0x180] ss:$8 sps:$4 sm:$0xff]  }
  0xbd   :  { %1735 = vmatprep.subr.bf16.mxu0 %v6535_v33  ;;  %v8011_v33 = vrot.slane %v181_v29, %v13194_v27 }
  0xc2   :  { %1126 = vmatmul.mubr.bf16.gmra.mxu0 %v6496_v34 }
  0xc3   :  { %1479 = vmatmul.mubr.bf16.gmra.mxu1 %v6496_v34  ;;  %1135 = vmatprep.mubr.bf16.mxu0 %v6500_v35  ;;  %v8013_v34 = vrot.slane %v181_v29, %v193_v28 }
  0xc4   :  { %1488 = vmatprep.mubr.bf16.mxu1 %v6500_v35  ;;  %1736 = vmatpush2.bf16.xpose.msra.mxu0 %v6533_v36  ;;  %v6572_v35 = vld [vmem:[%s13187_s0 + $0x194] ss:$8 sps:$4 sm:$0xff]   ;;  %v8020_v36 = vrot.slane %v181_v29, %v13193_v30 }
  0xc5   :  { %1737 = vmatprep.subr.bf16.mxu0 %v6544_v37  ;;  %v8022_v37 = vrot.slane %v181_v29, %v197_v31 }
  0xca   :  { %1136 = vmatmul.mubr.bf16.gmra.mxu0 %v6502_v38 }
  0xcb   :  { %1489 = vmatmul.mubr.bf16.gmra.mxu1 %v6502_v38  ;;  %1145 = vmatprep.mubr.bf16.mxu0 %v6503_v39 }
  0xcc   :  { %1498 = vmatprep.mubr.bf16.mxu1 %v6503_v39  ;;  %1738 = vmatpush2.bf16.xpose.msra.mxu0 %v6542_v40 }
  0xcd   :  { %1739 = vmatprep.subr.bf16.mxu0 %v6553_v41 }
  0xd2   :  { %1146 = vmatmul.mubr.bf16.gmra.mxu0 %v6505_v42 }
  0xd3   :  { %1499 = vmatmul.mubr.bf16.gmra.mxu1 %v6505_v42  ;;  %1155 = vmatprep.mubr.bf16.mxu0 %v6509_v43 }
  0xd4   :  { %1508 = vmatprep.mubr.bf16.mxu1 %v6509_v43  ;;  %1740 = vmatpush2.bf16.xpose.msra.mxu0 %v6551_v44 }
  0xd5   :  { %1741 = vmatprep.subr.bf16.mxu0 %v6562_v45 }
  0xda   :  { %1156 = vmatmul.mubr.bf16.gmra.mxu0 %v6511_v46 }
  0xdb   :  { %1509 = vmatmul.mubr.bf16.gmra.mxu1 %v6511_v46  ;;  %1165 = vmatprep.mubr.bf16.mxu0 %v6512_v47 }
  0xdc   :  { %1518 = vmatprep.mubr.bf16.mxu1 %v6512_v47  ;;  %1742 = vmatpush2.bf16.xpose.msra.mxu0 %v6560_v48  ;;  %v6574_v48 = vld [vmem:[%s13187_s0 + $0x190] ss:$8 sps:$4 sm:$0xff]  }
  0xdd   :  { %1743 = vmatprep.subr.bf16.mxu0 %v6571_v49 }
  0xe2   :  { %1166 = vmatmul.mubr.bf16.gmra.mxu0 %v6514_v50 }
  0xe3   :  { %1519 = vmatmul.mubr.bf16.gmra.mxu1 %v6514_v50  ;;  %1175 = vmatprep.mubr.bf16.mxu0 %v6518_v51 }
  0xe4   :  { %1528 = vmatprep.mubr.bf16.mxu1 %v6518_v51  ;;  %1744 = vmatpush2.bf16.xpose.msra.mxu0 %v6569_v52 }
  0xe5   :  { %1745 = vmatprep.subr.bf16.mxu0 %v6580_v53  ;;  %v6575_v53 = vld [vmem:[%s13187_s0 + $0x1a4] ss:$8 sps:$4 sm:$0xff]  }
  0xea   :  { %1176 = vmatmul.mubr.bf16.gmra.mxu0 %v6520_v54 }
  0xeb   :  { %1529 = vmatmul.mubr.bf16.gmra.mxu1 %v6520_v54  ;;  %1185 = vmatprep.mubr.bf16.mxu0 %v6521_v55 }
  0xec   :  { %1538 = vmatprep.mubr.bf16.mxu1 %v6521_v55  ;;  %1746 = vmatpush2.bf16.xpose.msra.mxu0 %v6578_v56 }
  0xed   :  { %1747 = vmatprep.subr.bf16.mxu0 %v6589_v57 }
  0xf2   :  { %1186 = vmatmul.mubr.bf16.gmra.mxu0 %v6523_v58 }
  0xf3   :  { %1539 = vmatmul.mubr.bf16.gmra.mxu1 %v6523_v58  ;;  %1195 = vmatprep.mubr.bf16.mxu0 %v6527_v59 }
  0xf4   :  { %1548 = vmatprep.mubr.bf16.mxu1 %v6527_v59  ;;  %1748 = vmatpush2.bf16.xpose.msra.mxu0 %v6587_v60 }
  0xf5   :  { %1749 = vmatprep.subr.bf16.mxu0 %v6598_v61 }
  0xfa   :  { %1196 = vmatmul.mubr.bf16.gmra.mxu0 %v6529_v62 }
  0xfb   :  { %1549 = vmatmul.mubr.bf16.gmra.mxu1 %v6529_v62  ;;  %1205 = vmatprep.mubr.bf16.mxu0 %v6530_v63 }
  0xfc   :  { %1558 = vmatprep.mubr.bf16.mxu1 %v6530_v63  ;;  %1750 = vmatpush2.bf16.xpose.msra.mxu0 %v6596_v0 }
 0x102   :  { %1206 = vmatmul.mubr.bf16.gmra.mxu0 %v6532_v1 }
 0x103   :  { %1559 = vmatmul.mubr.bf16.gmra.mxu1 %v6532_v1  ;;  %1215 = vmatprep.mubr.bf16.mxu0 %v6536_v3 }
 0x104   :  { %1568 = vmatprep.mubr.bf16.mxu1 %v6536_v3 }
 0x10a   :  { %1216 = vmatmul.mubr.bf16.gmra.mxu0 %v6538_v5 }
 0x10b   :  { %1569 = vmatmul.mubr.bf16.gmra.mxu1 %v6538_v5  ;;  %1225 = vmatprep.mubr.bf16.mxu0 %v6539_v8 }
 0x10c   :  { %1578 = vmatprep.mubr.bf16.mxu1 %v6539_v8 }
 0x112   :  { %1226 = vmatmul.mubr.bf16.gmra.mxu0 %v6541_v9 }
 0x113   :  { %1579 = vmatmul.mubr.bf16.gmra.mxu1 %v6541_v9  ;;  %1235 = vmatprep.mubr.bf16.mxu0 %v6545_v12 }
 0x114   :  { %1588 = vmatprep.mubr.bf16.mxu1 %v6545_v12 }
 0x11a   :  { %1236 = vmatmul.mubr.bf16.gmra.mxu0 %v6547_v13 }
 0x11b   :  { %1589 = vmatmul.mubr.bf16.gmra.mxu1 %v6547_v13  ;;  %1245 = vmatprep.mubr.bf16.mxu0 %v6548_v16 }
 0x11c   :  { %1598 = vmatprep.mubr.bf16.mxu1 %v6548_v16  ;;  %v6577_v16 = vld [vmem:[%s13187_s0 + $0x1a0] ss:$8 sps:$4 sm:$0xff]  }
 0x122   :  { %1246 = vmatmul.mubr.bf16.gmra.mxu0 %v6550_v17 }
 0x123   :  { %1599 = vmatmul.mubr.bf16.gmra.mxu1 %v6550_v17  ;;  %1255 = vmatprep.mubr.bf16.mxu0 %v6554_v18 }
 0x124   :  { %1608 = vmatprep.mubr.bf16.mxu1 %v6554_v18 }
 0x12a   :  { %1256 = vmatmul.mubr.bf16.gmra.mxu0 %v6556_v19 }
 0x12b   :  { %1609 = vmatmul.mubr.bf16.gmra.mxu1 %v6556_v19  ;;  %1265 = vmatprep.mubr.bf16.mxu0 %v6557_v20 }
 0x12c   :  { %1618 = vmatprep.mubr.bf16.mxu1 %v6557_v20 }
 0x132   :  { %1266 = vmatmul.mubr.bf16.gmra.mxu0 %v6559_v21 }
 0x133   :  { %1619 = vmatmul.mubr.bf16.gmra.mxu1 %v6559_v21  ;;  %1275 = vmatprep.mubr.bf16.mxu0 %v6563_v22  ;;  %v6581_v21 = vld [vmem:[%s13187_s0 + $0x1b4] ss:$8 sps:$4 sm:$0xff]  }
 0x134   :  { %1628 = vmatprep.mubr.bf16.mxu1 %v6563_v22 }
 0x13a   :  { %1276 = vmatmul.mubr.bf16.gmra.mxu0 %v6565_v24 }
 0x13b   :  { %1629 = vmatmul.mubr.bf16.gmra.mxu1 %v6565_v24  ;;  %1285 = vmatprep.mubr.bf16.mxu0 %v6566_v25 }
 0x13c   :  { %1638 = vmatprep.mubr.bf16.mxu1 %v6566_v25 }
 0x142   :  { %v1047_v38 = vpop.f32.mrf.mxu0  ;;  %1286 = vmatmul.mubr.bf16.gmra.mxu0 %v6568_v32 }
 0x143   :  { %v1400_v39 = vpop.f32.mrf.mxu1  ;;  %1639 = vmatmul.mubr.bf16.gmra.mxu1 %v6568_v32  ;;  %v8025_v40 = vadd.f32 %v1047_v38, %v8011_v33  ;;  %1295 = vmatprep.mubr.bf16.mxu0 %v6572_v35 }
 0x144   :  { %v8028_v41 = vadd.f32 %v1400_v39, %v8013_v34  ;;  %1648 = vmatprep.mubr.bf16.mxu1 %v6572_v35  ;;  %v1049_v42 = vpop.f32.mrf.mxu0 }
 0x145   :  { %v1402_v43 = vpop.f32.mrf.mxu1  ;;  %v8031_v44 = vadd.f32 %v1049_v42, %v8020_v36 }
 0x146   :  { %v8034_v45 = vadd.f32 %v1402_v43, %v8022_v37  ;;  %v1051_v46 = vpop.f32.mrf.mxu0  ;;  %v2072_v51 = vmul.f32 %v8028_v41, %v8025_v40 }
 0x147   :  { %v1404_v47 = vpop.f32.mrf.mxu1  ;;  %v8040_v49 = vadd.f32 %v1051_v46, %v8011_v33 }
 0x148   :  { %v8043_v50 = vadd.f32 %v1404_v47, %v8013_v34  ;;  %v2073_v52 = vmul.f32 %v8034_v45, %v8031_v44  ;;  %v1053_v54 = vpop.f32.mrf.mxu0 }
 0x149   :  { %v1406_v55 = vpop.f32.mrf.mxu1  ;;  %v8053_v56 = vadd.f32 %v1053_v54, %v8020_v36 }
 0x14a   :  { %v8056_v57 = vadd.f32 %v1406_v55, %v8022_v37  ;;  %v2328_v58 = vadd.f32 %v2073_v52, %v2072_v51  ;;  %v2074_v59 = vmul.f32 %v8043_v50, %v8040_v49  ;;  %v1057_v60 = vpop.f32.mrf.mxu0  ;;  %1296 = vmatmul.mubr.bf16.gmra.mxu0 %v6574_v48  ;;  %v6604_v51 = vld [vmem:[%s13190_s3 + $0x74] ss:$8 sps:$4 sm:$0xff]   ;;  %v6583_v55 = vld [vmem:[%s13187_s0 + $0x1b0] ss:$8 sps:$4 sm:$0xff]  }
 0x14b   :  { %v1410_v61 = vpop.f32.mrf.mxu1  ;;  %1649 = vmatmul.mubr.bf16.gmra.mxu1 %v6574_v48  ;;  %v8061_v62 = vadd.f32 %v1057_v60, %v8011_v33  ;;  %1305 = vmatprep.mubr.bf16.mxu0 %v6575_v53  ;;  %v6602_v48 = vld [vmem:[%s13190_s3 + $0x70] ss:$8 sps:$4 sm:$0xff]  }
 0x14c   :  { %v8064_v63 = vadd.f32 %v1410_v61, %v8013_v34  ;;  %2329 = vadd.xlane.f32.xlu0 %v2328_v58  ;;  %v2075_v0 = vmul.f32 %v8056_v57, %v8053_v56  ;;  %v1059_v1 = vpop.f32.mrf.mxu0  ;;  %1658 = vmatprep.mubr.bf16.mxu1 %v6575_v53 }
 0x14d   :  { %v1412_v3 = vpop.f32.mrf.mxu1  ;;  %v8069_v5 = vadd.f32 %v1059_v1, %v8020_v36  ;;  %4196 = vmatprep.subr.bf16.mxu1 %v6604_v51 }
 0x14e   :  { %v8072_v8 = vadd.f32 %v1412_v3, %v8022_v37  ;;  %v2331_v9 = vadd.f32 %v2075_v0, %v2074_v59  ;;  %v1061_v12 = vpop.f32.mrf.mxu0  ;;  %v2076_v17 = vmul.f32 %v8064_v63, %v8061_v62  ;;  %v6586_v0 = vld [vmem:[%s13187_s0 + $0x1c4] ss:$8 sps:$4 sm:$0xff]   ;;  %4197 = vmatpush1.bf16.xpose.msra.mxu1 %v6602_v48  ;;  %v6584_v48 = vld [vmem:[%s13187_s0 + $0x1c0] ss:$8 sps:$4 sm:$0xff]  }
 0x14f   :  { %v1414_v13 = vpop.f32.mrf.mxu1  ;;  %v8082_v19 = vadd.f32 %v1061_v12, %v8011_v33 }
 0x150   :  { %v2077_v18 = vmul.f32 %v8072_v8, %v8069_v5  ;;  %v8085_v20 = vadd.f32 %v1414_v13, %v8013_v34  ;;  %2332 = vadd.xlane.f32.xlu0 %v2331_v9  ;;  %v1063_v22 = vpop.f32.mrf.mxu0 }
 0x151   :  { %v1416_v23 = vpop.f32.mrf.mxu1  ;;  %v8091_v24 = vadd.f32 %v1063_v22, %v8020_v36 }
 0x152   :  { %v8094_v25 = vadd.f32 %v1416_v23, %v8022_v37  ;;  %v2334_v28 = vadd.f32 %v2077_v18, %v2076_v17  ;;  %v2078_v29 = vmul.f32 %v8085_v20, %v8082_v19  ;;  %v1067_v31 = vpop.f32.mrf.mxu0  ;;  %1306 = vmatmul.mubr.bf16.gmra.mxu0 %v6577_v16 }
 0x153   :  { %v1420_v32 = vpop.f32.mrf.mxu1  ;;  %1659 = vmatmul.mubr.bf16.gmra.mxu1 %v6577_v16  ;;  %v8099_v35 = vadd.f32 %v1067_v31, %v8011_v33  ;;  %1315 = vmatprep.mubr.bf16.mxu0 %v6581_v21 }
 0x154   :  { %v8102_v38 = vadd.f32 %v1420_v32, %v8013_v34  ;;  %2335 = vadd.xlane.f32.xlu0 %v2334_v28  ;;  %v2079_v39 = vmul.f32 %v8094_v25, %v8091_v24  ;;  %v1069_v42 = vpop.f32.mrf.mxu0  ;;  %1668 = vmatprep.mubr.bf16.mxu1 %v6581_v21 }
 0x155   :  { %v1422_v43 = vpop.f32.mrf.mxu1  ;;  %v8107_v46 = vadd.f32 %v1069_v42, %v8020_v36 }
 0x156   :  { %v8110_v47 = vadd.f32 %v1422_v43, %v8022_v37  ;;  %v8118_v52 = vadd.f32 %v2079_v39, %v2078_v29  ;;  %v1071_v53 = vpop.f32.mrf.mxu0  ;;  %v2080_v58 = vmul.f32 %v8102_v38, %v8099_v35 }
 0x157   :  { %v1424_v54 = vpop.f32.mrf.mxu1  ;;  %v8128_v60 = vadd.f32 %v1071_v53, %v8011_v33 }
 0x158   :  { %v2081_v59 = vmul.f32 %v8110_v47, %v8107_v46  ;;  %v8131_v61 = vadd.f32 %v1424_v54, %v8013_v34  ;;  %v1073_v1 = vpop.f32.mrf.mxu0 }
 0x159   :  { %v1426_v3 = vpop.f32.mrf.mxu1  ;;  %v8137_v9 = vadd.f32 %v1073_v1, %v8020_v36 }
 0x15a   :  { %v8140_v12 = vadd.f32 %v1426_v3, %v8022_v37  ;;  %v8142_v13 = vadd.f32 %v2081_v59, %v2080_v58  ;;  %v2082_v16 = vmul.f32 %v8131_v61, %v8128_v60  ;;  %v1077_v17 = vpop.f32.mrf.mxu0  ;;  %1316 = vmatmul.mubr.bf16.gmra.mxu0 %v6583_v55  ;;  %v6592_v58 = vld [vmem:[%s13187_s0 + $0x1d4] ss:$8 sps:$4 sm:$0xff]  }
 0x15b   :  { %v1430_v18 = vpop.f32.mrf.mxu1  ;;  %1669 = vmatmul.mubr.bf16.gmra.mxu1 %v6583_v55  ;;  %v8147_v21 = vadd.f32 %v1077_v17, %v8011_v33  ;;  %1325 = vmatprep.mubr.bf16.mxu0 %v6586_v0 }
 0x15c   :  { %v8150_v22 = vadd.f32 %v1430_v18, %v8013_v34  ;;  %1678 = vmatprep.mubr.bf16.mxu1 %v6586_v0  ;;  %v2083_v23 = vmul.f32 %v8140_v12, %v8137_v9  ;;  %v1079_v28 = vpop.f32.mrf.mxu0 }
 0x15d   :  { %v1432_v29 = vpop.f32.mrf.mxu1  ;;  %v8155_v31 = vadd.f32 %v1079_v28, %v8020_v36 }
 0x15e   :  { %v8158_v32 = vadd.f32 %v1432_v29, %v8022_v37  ;;  %v8160_v39 = vadd.f32 %v2083_v23, %v2082_v16  ;;  %v1081_v42 = vpop.f32.mrf.mxu0  ;;  %v2084_v51 = vmul.f32 %v8150_v22, %v8147_v21 }
 0x15f   :  { %v1434_v43 = vpop.f32.mrf.mxu1  ;;  %v8170_v54 = vadd.f32 %v1081_v42, %v8011_v33 }
 0x160   :  { %v2085_v53 = vmul.f32 %v8158_v32, %v8155_v31  ;;  %v8173_v55 = vadd.f32 %v1434_v43, %v8013_v34  ;;  %v1083_v59 = vpop.f32.mrf.mxu0 }
 0x161   :  { %v1436_v0 = vpop.f32.mrf.mxu1  ;;  %v8179_v1 = vadd.f32 %v1083_v59, %v8020_v36 }
 0x162   :  { %v8182_v3 = vadd.f32 %v1436_v0, %v8022_v37  ;;  %v8184_v16 = vadd.f32 %v2085_v53, %v2084_v51  ;;  %v2086_v17 = vmul.f32 %v8173_v55, %v8170_v54  ;;  %v1087_v18 = vpop.f32.mrf.mxu0  ;;  %1326 = vmatmul.mubr.bf16.gmra.mxu0 %v6584_v48  ;;  %v6607_v0 = vld [vmem:[%s13190_s3 + $0x64] ss:$8 sps:$4 sm:$0xff]  }
 0x163   :  { %13698 = vst [vmem:[#allocation6_spill] sm:$0xff] %v8179_v1  ;;  %v1440_v23 = vpop.f32.mrf.mxu1  ;;  %1679 = vmatmul.mubr.bf16.gmra.mxu1 %v6584_v48  ;;  %v8189_v28 = vadd.f32 %v1087_v18, %v8011_v33  ;;  %1335 = vmatprep.mubr.bf16.mxu0 %v6592_v58  ;;  %v6605_v48 = vld [vmem:[%s13190_s3 + $0x60] ss:$8 sps:$4 sm:$0xff]  }
 0x164   :  { %v8192_v29 = vadd.f32 %v1440_v23, %v8013_v34  ;;  %1688 = vmatprep.mubr.bf16.mxu1 %v6592_v58  ;;  %v2087_v42 = vmul.f32 %v8182_v3, %v8179_v1  ;;  %v1089_v43 = vpop.f32.mrf.mxu0  ;;  %4198 = vmatprep.subr.bf16.mxu1 %v6607_v0 }
 0x165   :  { %13699 = vst [vmem:[#allocation7_spill] sm:$0xff] %v8189_v28  ;;  %v1442_v51 = vpop.f32.mrf.mxu1  ;;  %v8197_v53 = vadd.f32 %v1089_v43, %v8020_v36  ;;  %v6590_v43 = vld [vmem:[%s13187_s0 + $0x1d0] ss:$8 sps:$4 sm:$0xff]   ;;  %4199 = vmatpush1.bf16.xpose.msra.mxu1 %v6605_v48 }
 0x166   :  { %13700 = vst [vmem:[#allocation8_spill] sm:$0xff] %v8192_v29  ;;  %v8200_v59 = vadd.f32 %v1442_v51, %v8022_v37  ;;  %v8208_v58 = vadd.f32 %v2087_v42, %v2086_v17  ;;  %v1091_v18 = vpop.f32.mrf.mxu0  ;;  %v2088_v51 = vmul.f32 %v8192_v29, %v8189_v28  ;;  %v6595_v17 = vld [vmem:[%s13187_s0 + $0x1e4] ss:$8 sps:$4 sm:$0xff]  }
 0x167   :  { %13701 = vst [vmem:[#allocation9_spill] sm:$0xff] %v8197_v53  ;;  %v1444_v23 = vpop.f32.mrf.mxu1  ;;  %v8218_v27 = vadd.f32 %v1091_v18, %v8011_v33 }
 0x168   :  { %13702 = vst [vmem:[#allocation10_spill] sm:$0xff] %v8200_v59  ;;  %13703 = vst [vmem:[#allocation11_spill] sm:$0xff] %v8208_v58  ;;  %v2089_v30 = vmul.f32 %v8200_v59, %v8197_v53  ;;  %v8221_v26 = vadd.f32 %v1444_v23, %v8013_v34  ;;  %v1093_v42 = vpop.f32.mrf.mxu0 }
 0x169   :  { %13704 = vst [vmem:[#allocation12_spill] sm:$0xff] %v8218_v27  ;;  %v1446_v1 = vpop.f32.mrf.mxu1  ;;  %v8227_v58 = vadd.f32 %v1093_v42, %v8020_v36 }
 0x16a   :  { %13705 = vst [vmem:[#allocation13_spill] sm:$0xff] %v8221_v26  ;;  %v8230_v28 = vadd.f32 %v1446_v1, %v8022_v37  ;;  %v8232_v53 = vadd.f32 %v2089_v30, %v2088_v51  ;;  %v2090_v18 = vmul.f32 %v8221_v26, %v8218_v27  ;;  %v1097_v23 = vpop.f32.mrf.mxu0  ;;  %1336 = vmatmul.mubr.bf16.gmra.mxu0 %v6590_v43 }
 0x16b   :  { %13706 = vst [vmem:[#allocation14_spill] sm:$0xff] %v8227_v58  ;;  %v1450_v59 = vpop.f32.mrf.mxu1  ;;  %1689 = vmatmul.mubr.bf16.gmra.mxu1 %v6590_v43  ;;  %v8237_v0 = vadd.f32 %v1097_v23, %v8011_v33  ;;  %1345 = vmatprep.mubr.bf16.mxu0 %v6595_v17 }
 0x16c   :  { %13707 = vst [vmem:[#allocation15_spill] sm:$0xff] %v8230_v28  ;;  %13708 = vst [vmem:[#allocation16_spill] sm:$0xff] %v8232_v53  ;;  %v8240_v48 = vadd.f32 %v1450_v59, %v8013_v34  ;;  %1698 = vmatprep.mubr.bf16.mxu1 %v6595_v17  ;;  %v2091_v1 = vmul.f32 %v8230_v28, %v8227_v58  ;;  %v1099_v30 = vpop.f32.mrf.mxu0  ;;  %v6593_v59 = vld [vmem:[%s13187_s0 + $0x1e0] ss:$8 sps:$4 sm:$0xff]  }
 0x16d   :  { %13709 = vst [vmem:[#allocation17_spill] sm:$0xff] %v8237_v0  ;;  %v1452_v51 = vpop.f32.mrf.mxu1  ;;  %v8245_v42 = vadd.f32 %v1099_v30, %v8020_v36 }
 0x16e   :  { %13710 = vst [vmem:[#allocation18_spill] sm:$0xff] %v8240_v48  ;;  %v8248_v27 = vadd.f32 %v1452_v51, %v8022_v37  ;;  %v8250_v43 = vadd.f32 %v2091_v1, %v2090_v18  ;;  %v1101_v23 = vpop.f32.mrf.mxu0  ;;  %v2092_v17 = vmul.f32 %v8240_v48, %v8237_v0  ;;  %v6601_v18 = vld [vmem:[%s13187_s0 + $0x1f4] ss:$8 sps:$4 sm:$0xff]  }
 0x16f   :  { %13711 = vst [vmem:[#allocation19_spill] sm:$0xff] %v8245_v42  ;;  %v1454_v26 = vpop.f32.mrf.mxu1  ;;  %v8260_v30 = vadd.f32 %v1101_v23, %v8011_v33 }
 0x170   :  { %13712 = vst [vmem:[#allocation20_spill] sm:$0xff] %v8248_v27  ;;  %13713 = vst [vmem:[#allocation21_spill] sm:$0xff] %v8250_v43  ;;  %v2093_v58 = vmul.f32 %v8248_v27, %v8245_v42  ;;  %v8263_v51 = vadd.f32 %v1454_v26, %v8013_v34  ;;  %v1103_v1 = vpop.f32.mrf.mxu0 }
 0x171   :  { %13714 = vst [vmem:[#allocation22_spill] sm:$0xff] %v8260_v30  ;;  %v1456_v43 = vpop.f32.mrf.mxu1  ;;  %v8269_v28 = vadd.f32 %v1103_v1, %v8020_v36 }
 0x172   :  { %13715 = vst [vmem:[#allocation23_spill] sm:$0xff] %v8263_v51  ;;  %v8272_v0 = vadd.f32 %v1456_v43, %v8022_v37  ;;  %v8274_v48 = vadd.f32 %v2093_v58, %v2092_v17  ;;  %v2094_v23 = vmul.f32 %v8263_v51, %v8260_v30  ;;  %v1107_v42 = vpop.f32.mrf.mxu0  ;;  %1346 = vmatmul.mubr.bf16.gmra.mxu0 %v6593_v59 }
 0x173   :  { %13716 = vst [vmem:[#allocation24_spill] sm:$0xff] %v8269_v28  ;;  %v1460_v26 = vpop.f32.mrf.mxu1  ;;  %1699 = vmatmul.mubr.bf16.gmra.mxu1 %v6593_v59  ;;  %v8279_v27 = vadd.f32 %v1107_v42, %v8011_v33  ;;  %1355 = vmatprep.mubr.bf16.mxu0 %v6601_v18  ;;  %v6608_v42 = vld [vmem:[%s13190_s3 + $0x50] ss:$8 sps:$4 sm:$0xff]   ;;  %v6610_v59 = vld [vmem:[%s13190_s3 + $0x54] ss:$8 sps:$4 sm:$0xff]  }
 0x174   :  { %13717 = vst [vmem:[#allocation25_spill] sm:$0xff] %v8272_v0  ;;  %13718 = vst [vmem:[#allocation26_spill] sm:$0xff] %v8274_v48  ;;  %v8282_v53 = vadd.f32 %v1460_v26, %v8013_v34  ;;  %1708 = vmatprep.mubr.bf16.mxu1 %v6601_v18  ;;  %v2095_v43 = vmul.f32 %v8272_v0, %v8269_v28  ;;  %v1109_v58 = vpop.f32.mrf.mxu0  ;;  %4200 = vmatprep.subr.bf16.mxu1 %v6610_v59 }
 0x175   :  { %13719 = vst [vmem:[#allocation27_spill] sm:$0xff] %v8279_v27  ;;  %v1462_v17 = vpop.f32.mrf.mxu1  ;;  %v8287_v1 = vadd.f32 %v1109_v58, %v8020_v36  ;;  %v6599_v58 = vld [vmem:[%s13187_s0 + $0x1f0] ss:$8 sps:$4 sm:$0xff]   ;;  %4201 = vmatpush1.bf16.xpose.msra.mxu1 %v6608_v42 }
 0x176   :  { %13720 = vst [vmem:[#allocation28_spill] sm:$0xff] %v8282_v53  ;;  %v8290_v30 = vadd.f32 %v1462_v17, %v8022_v37  ;;  %v8298_v18 = vadd.f32 %v2095_v43, %v2094_v23  ;;  %v1111_v26 = vpop.f32.mrf.mxu0  ;;  %v2096_v17 = vmul.f32 %v8282_v53, %v8279_v27 }
 0x177   :  { %13721 = vst [vmem:[#allocation29_spill] sm:$0xff] %v8287_v1  ;;  %v1464_v28 = vpop.f32.mrf.mxu1  ;;  %v8308_v51 = vadd.f32 %v1111_v26, %v8011_v33  ;;  %v7418_v26 = vld [vmem:[%s13187_s0 + $0x4] ss:$8 sps:$4 sm:$0xff]  }
 0x178   :  { %13722 = vst [vmem:[#allocation30_spill] sm:$0xff] %v8298_v18  ;;  %v2097_v0 = vmul.f32 %v8290_v30, %v8287_v1  ;;  %v8311_v48 = vadd.f32 %v1464_v28, %v8013_v34  ;;  %v1113_v23 = vpop.f32.mrf.mxu0 }
 0x179   :  { %13723 = vst [vmem:[#allocation31_spill] sm:$0xff] %v8308_v51  ;;  %v1466_v43 = vpop.f32.mrf.mxu1  ;;  %v8314_v18 = vadd.f32 %v1113_v23, %v8020_v36 }
 0x17a   :  { %13724 = vst [vmem:[#allocation32_spill] sm:$0xff] %v8311_v48  ;;  %v8317_v29 = vadd.f32 %v1466_v43, %v8022_v37  ;;  %v8319_v27 = vadd.f32 %v2097_v0, %v2096_v17  ;;  %v1117_v53 = vpop.f32.mrf.mxu0  ;;  %1356 = vmatmul.mubr.bf16.gmra.mxu0 %v6599_v58  ;;  %v2098_v28 = vmul.f32 %v8311_v48, %v8308_v51 }
 0x17b   :  { %13725 = vst [vmem:[#allocation33_spill] sm:$0xff] %v8314_v18  ;;  %v1470_v1 = vpop.f32.mrf.mxu1  ;;  %1709 = vmatmul.mubr.bf16.gmra.mxu1 %v6599_v58  ;;  %v8324_v59 = vadd.f32 %v1117_v53, %v8011_v33  ;;  %1751 = vmatprep.mubr.bf16.mxu0 %v7418_v26 }
 0x17c   :  { %13726 = vst [vmem:[#allocation34_spill] sm:$0xff] %v8317_v29  ;;  %13727 = vst [vmem:[#allocation35_spill] sm:$0xff] %v8319_v27  ;;  %v8327_v42 = vadd.f32 %v1470_v1, %v8013_v34  ;;  %v2099_v0 = vmul.f32 %v8317_v29, %v8314_v18  ;;  %v1119_v17 = vpop.f32.mrf.mxu0 }
 0x17d   :  { %13728 = vst [vmem:[#allocation36_spill] sm:$0xff] %v8324_v59  ;;  %v1472_v23 = vpop.f32.mrf.mxu1  ;;  %v8335_v58 = vadd.f32 %v1119_v17, %v8020_v36 }
 0x17e   :  { %13729 = vst [vmem:[#allocation37_spill] sm:$0xff] %v8327_v42  ;;  %v8338_v43 = vadd.f32 %v1472_v23, %v8022_v37  ;;  %v8340_v53 = vadd.f32 %v2099_v0, %v2098_v28  ;;  %v1121_v1 = vpop.f32.mrf.mxu0  ;;  %v2100_v48 = vmul.f32 %v8327_v42, %v8324_v59 }
 0x17f   :  { %13730 = vst [vmem:[#allocation38_spill] sm:$0xff] %v8335_v58  ;;  %v1474_v51 = vpop.f32.mrf.mxu1  ;;  %v8347_v18 = vadd.f32 %v1121_v1, %v8011_v33 }
 0x180   :  { %13731 = vst [vmem:[#allocation39_spill] sm:$0xff] %v8338_v43  ;;  %v2101_v26 = vmul.f32 %v8338_v43, %v8335_v58  ;;  %v8350_v29 = vadd.f32 %v1474_v51, %v8013_v34  ;;  %v1123_v17 = vpop.f32.mrf.mxu0 }
 0x181   :  { %13732 = vst [vmem:[#allocation40_spill] sm:$0xff] %v8347_v18  ;;  %v1476_v27 = vpop.f32.mrf.mxu1  ;;  %v8353_v23 = vadd.f32 %v1123_v17, %v8020_v36 }
 0x182   :  { %13733 = vst [vmem:[#allocation41_spill] sm:$0xff] %v8350_v29  ;;  %v8356_v28 = vadd.f32 %v1476_v27, %v8022_v37  ;;  %v8358_v0 = vadd.f32 %v2101_v26, %v2100_v48  ;;  %v1127_v59 = vpop.f32.mrf.mxu0  ;;  %1752 = vmatmul.mubr.bf16.vlgmr.msra.gmra.mxu0 %v7731_v2  ;;  %v2102_v1 = vmul.f32 %v8350_v29, %v8347_v18 }
 0x183   :  { %13734 = vst [vmem:[#allocation42_spill] sm:$0xff] %v8353_v23  ;;  %v1480_v42 = vpop.f32.mrf.mxu1  ;;  %v8364_v51 = vadd.f32 %v1127_v59, %v8011_v33  ;;  %1761 = vmatprep.mubr.bf16.mxu0 %v7739_v4  ;;  %v6611_v59 = vld [vmem:[%s13190_s3 + $0x40] ss:$8 sps:$4 sm:$0xff]  }
 0x184   :  { %13735 = vst [vmem:[#allocation43_spill] sm:$0xff] %v8356_v28  ;;  %13736 = vst [vmem:[#allocation44_spill] sm:$0xff] %v8358_v0  ;;  %v8367_v58 = vadd.f32 %v1480_v42, %v8013_v34  ;;  %v2103_v27 = vmul.f32 %v8356_v28, %v8353_v23  ;;  %v1129_v48 = vpop.f32.mrf.mxu0  ;;  %v6613_v42 = vld [vmem:[%s13190_s3 + $0x44] ss:$8 sps:$4 sm:$0xff]  }
 0x185   :  { %13737 = vst [vmem:[#allocation45_spill] sm:$0xff] %v8364_v51  ;;  %v1482_v26 = vpop.f32.mrf.mxu1  ;;  %v8373_v17 = vadd.f32 %v1129_v48, %v8020_v36  ;;  %4202 = vmatprep.subr.bf16.mxu1 %v6613_v42 }
 0x186   :  { %13738 = vst [vmem:[#allocation46_spill] sm:$0xff] %v8367_v58  ;;  %v8376_v2 = vadd.f32 %v1482_v26, %v8022_v37  ;;  %v8384_v4 = vadd.f32 %v2103_v27, %v2102_v1  ;;  %v1131_v18 = vpop.f32.mrf.mxu0  ;;  %v2104_v28 = vmul.f32 %v8367_v58, %v8364_v51  ;;  %4203 = vmatpush1.bf16.xpose.msra.mxu1 %v6611_v59 }
 0x187   :  { %13739 = vst [vmem:[#allocation47_spill] sm:$0xff] %v8373_v17  ;;  %v1484_v23 = vpop.f32.mrf.mxu1  ;;  %v8391_v26 = vadd.f32 %v1131_v18, %v8011_v33 }
 0x188   :  { %13740 = vst [vmem:[#allocation48_spill] sm:$0xff] %v8376_v2  ;;  %v2105_v48 = vmul.f32 %v8376_v2, %v8373_v17  ;;  %v8394_v29 = vadd.f32 %v1484_v23, %v8013_v34  ;;  %v1133_v0 = vpop.f32.mrf.mxu0 }
 0x189   :  { %13741 = vst [vmem:[#allocation49_spill] sm:$0xff] %v8391_v26  ;;  %v1486_v43 = vpop.f32.mrf.mxu1  ;;  %v8397_v1 = vadd.f32 %v1133_v0, %v8020_v36 }
 0x18a   :  { %13742 = vst [vmem:[#allocation50_spill] sm:$0xff] %v8394_v29  ;;  %v8400_v27 = vadd.f32 %v1486_v43, %v8022_v37  ;;  %v8402_v51 = vadd.f32 %v2105_v48, %v2104_v28  ;;  %v1137_v58 = vpop.f32.mrf.mxu0  ;;  %1762 = vmatmul.mubr.bf16.gmra.mxu0 %v7751_v6  ;;  %v2106_v18 = vmul.f32 %v8394_v29, %v8391_v26 }
 0x18b   :  { %13743 = vst [vmem:[#allocation51_spill] sm:$0xff] %v8397_v1  ;;  %v1490_v17 = vpop.f32.mrf.mxu1  ;;  %v8408_v23 = vadd.f32 %v1137_v58, %v8011_v33  ;;  %1771 = vmatprep.mubr.bf16.mxu0 %v7756_v7 }
 0x18c   :  { %13744 = vst [vmem:[#allocation52_spill] sm:$0xff] %v8400_v27  ;;  %13745 = vst [vmem:[#allocation53_spill] sm:$0xff] %v8402_v51  ;;  %v8411_v59 = vadd.f32 %v1490_v17, %v8013_v34  ;;  %v2107_v43 = vmul.f32 %v8400_v27, %v8397_v1  ;;  %v1139_v28 = vpop.f32.mrf.mxu0 }
 0x18d   :  { %13746 = vst [vmem:[#allocation54_spill] sm:$0xff] %v8408_v23  ;;  %v1492_v0 = vpop.f32.mrf.mxu1  ;;  %v8417_v42 = vadd.f32 %v1139_v28, %v8020_v36 }
 0x18e   :  { %13747 = vst [vmem:[#allocation55_spill] sm:$0xff] %v8411_v59  ;;  %v8420_v6 = vadd.f32 %v1492_v0, %v8022_v37  ;;  %v8422_v48 = vadd.f32 %v2107_v43, %v2106_v18  ;;  %v1141_v58 = vpop.f32.mrf.mxu0  ;;  %v2108_v17 = vmul.f32 %v8411_v59, %v8408_v23 }
 0x18f   :  { %13748 = vst [vmem:[#allocation56_spill] sm:$0xff] %v8417_v42  ;;  %v1494_v26 = vpop.f32.mrf.mxu1  ;;  %v8429_v1 = vadd.f32 %v1141_v58, %v8011_v33 }
 0x190   :  { %13749 = vst [vmem:[#allocation57_spill] sm:$0xff] %v8420_v6  ;;  %13750 = vst [vmem:[#allocation58_spill] sm:$0xff] %v8422_v48  ;;  %v2109_v7 = vmul.f32 %v8420_v6, %v8417_v42  ;;  %v8432_v27 = vadd.f32 %v1494_v26, %v8013_v34  ;;  %v1143_v28 = vpop.f32.mrf.mxu0 }
 0x191   :  { %13751 = vst [vmem:[#allocation59_spill] sm:$0xff] %v8429_v1  ;;  %v1496_v29 = vpop.f32.mrf.mxu1  ;;  %v8435_v0 = vadd.f32 %v1143_v28, %v8020_v36 }
 0x192   :  { %13752 = vst [vmem:[#allocation60_spill] sm:$0xff] %v8432_v27  ;;  %v8438_v18 = vadd.f32 %v1496_v29, %v8022_v37  ;;  %v8440_v43 = vadd.f32 %v2109_v7, %v2108_v17  ;;  %v1147_v23 = vpop.f32.mrf.mxu0  ;;  %1772 = vmatmul.mubr.bf16.gmra.mxu0 %v7771_v10  ;;  %v2110_v58 = vmul.f32 %v8432_v27, %v8429_v1 }
 0x193   :  { %13753 = vst [vmem:[#allocation61_spill] sm:$0xff] %v8435_v0  ;;  %v1500_v59 = vpop.f32.mrf.mxu1  ;;  %v8446_v26 = vadd.f32 %v1147_v23, %v8011_v33  ;;  %1781 = vmatprep.mubr.bf16.mxu0 %v7776_v11  ;;  %v6614_v23 = vld [vmem:[%s13190_s3 + $0x30] ss:$8 sps:$4 sm:$0xff]  }
 0x194   :  { %13754 = vst [vmem:[#allocation62_spill] sm:$0xff] %v8438_v18  ;;  %13755 = vst [vmem:[#allocation63_spill] sm:$0xff] %v8440_v43  ;;  %v8449_v42 = vadd.f32 %v1500_v59, %v8013_v34  ;;  %v2111_v29 = vmul.f32 %v8438_v18, %v8435_v0  ;;  %v1149_v17 = vpop.f32.mrf.mxu0  ;;  %v6616_v59 = vld [vmem:[%s13190_s3 + $0x34] ss:$8 sps:$4 sm:$0xff]  }
 0x195   :  { %13756 = vst [vmem:[#allocation64_spill] sm:$0xff] %v8446_v26  ;;  %v1502_v7 = vpop.f32.mrf.mxu1  ;;  %v8455_v28 = vadd.f32 %v1149_v17, %v8020_v36  ;;  %4204 = vmatprep.subr.bf16.mxu1 %v6616_v59 }
 0x196   :  { %13757 = vst [vmem:[#allocation65_spill] sm:$0xff] %v8449_v42  ;;  %v8458_v10 = vadd.f32 %v1502_v7, %v8022_v37  ;;  %v8466_v11 = vadd.f32 %v2111_v29, %v2110_v58  ;;  %v1151_v1 = vpop.f32.mrf.mxu0  ;;  %v2112_v18 = vmul.f32 %v8449_v42, %v8446_v26  ;;  %4205 = vmatpush1.bf16.xpose.msra.mxu1 %v6614_v23 }
 0x197   :  { %13758 = vst [vmem:[#allocation66_spill] sm:$0xff] %v8455_v28  ;;  %v1504_v0 = vpop.f32.mrf.mxu1  ;;  %v8473_v7 = vadd.f32 %v1151_v1, %v8011_v33 }
 0x198   :  { %13759 = vst [vmem:[#allocation67_spill] sm:$0xff] %v8458_v10  ;;  %13760 = vst [vmem:[#allocation68_spill] sm:$0xff] %v8466_v11  ;;  %v2113_v17 = vmul.f32 %v8458_v10, %v8455_v28  ;;  %v8476_v27 = vadd.f32 %v1504_v0, %v8013_v34  ;;  %v1153_v43 = vpop.f32.mrf.mxu0 }
 0x199   :  { %13761 = vst [vmem:[#allocation69_spill] sm:$0xff] %v8473_v7  ;;  %v1506_v6 = vpop.f32.mrf.mxu1  ;;  %v8479_v58 = vadd.f32 %v1153_v43, %v8020_v36 }
 0x19a   :  { %13762 = vst [vmem:[#allocation70_spill] sm:$0xff] %v8476_v27  ;;  %v8482_v29 = vadd.f32 %v1506_v6, %v8022_v37  ;;  %v8484_v26 = vadd.f32 %v2113_v17, %v2112_v18  ;;  %v1157_v42 = vpop.f32.mrf.mxu0  ;;  %1782 = vmatmul.mubr.bf16.gmra.mxu0 %v7791_v14  ;;  %v2114_v1 = vmul.f32 %v8476_v27, %v8473_v7 }
 0x19b   :  { %13763 = vst [vmem:[#allocation71_spill] sm:$0xff] %v8479_v58  ;;  %v1510_v28 = vpop.f32.mrf.mxu1  ;;  %v8490_v0 = vadd.f32 %v1157_v42, %v8011_v33  ;;  %1791 = vmatprep.mubr.bf16.mxu0 %v7796_v15 }
 0x19c   :  { %13764 = vst [vmem:[#allocation72_spill] sm:$0xff] %v8482_v29  ;;  %13765 = vst [vmem:[#allocation73_spill] sm:$0xff] %v8484_v26  ;;  %v8493_v23 = vadd.f32 %v1510_v28, %v8013_v34  ;;  %v2115_v6 = vmul.f32 %v8482_v29, %v8479_v58  ;;  %v1159_v18 = vpop.f32.mrf.mxu0 }
 0x19d   :  { %13766 = vst [vmem:[#allocation74_spill] sm:$0xff] %v8490_v0  ;;  %v1512_v43 = vpop.f32.mrf.mxu1  ;;  %v8499_v59 = vadd.f32 %v1159_v18, %v8020_v36 }
 0x19e   :  { %13767 = vst [vmem:[#allocation75_spill] sm:$0xff] %v8493_v23  ;;  %v8502_v14 = vadd.f32 %v1512_v43, %v8022_v37  ;;  %v8504_v17 = vadd.f32 %v2115_v6, %v2114_v1  ;;  %v1161_v42 = vpop.f32.mrf.mxu0  ;;  %v2116_v28 = vmul.f32 %v8493_v23, %v8490_v0 }
 0x19f   :  { %13768 = vst [vmem:[#allocation76_spill] sm:$0xff] %v8499_v59  ;;  %v1514_v7 = vpop.f32.mrf.mxu1  ;;  %v8511_v58 = vadd.f32 %v1161_v42, %v8011_v33  ;;  %v7419_v42 = vld [vmem:[%s13187_s0 + $0x40] ss:$8 sps:$4 sm:$0xff]  }
 0x1a0   :  { %13769 = vst [vmem:[#allocation77_spill] sm:$0xff] %v8502_v14  ;;  %13770 = vst [vmem:[#allocation78_spill] sm:$0xff] %v8504_v17  ;;  %v2117_v15 = vmul.f32 %v8502_v14, %v8499_v59  ;;  %v8514_v29 = vadd.f32 %v1514_v7, %v8013_v34  ;;  %v1163_v18 = vpop.f32.mrf.mxu0 }
 0x1a1   :  { %13771 = vst [vmem:[#allocation79_spill] sm:$0xff] %v8511_v58  ;;  %v1516_v27 = vpop.f32.mrf.mxu1  ;;  %v8517_v43 = vadd.f32 %v1163_v18, %v8020_v36 }
 0x1a2   :  { %13772 = vst [vmem:[#allocation80_spill] sm:$0xff] %v8514_v29  ;;  %v8520_v1 = vadd.f32 %v1516_v27, %v8022_v37  ;;  %v8522_v6 = vadd.f32 %v2117_v15, %v2116_v28  ;;  %v1167_v0 = vpop.f32.mrf.mxu0  ;;  %1792 = vmatmul.mubr.bf16.gmra.mxu0 %v7419_v42  ;;  %v2118_v7 = vmul.f32 %v8514_v29, %v8511_v58  ;;  %v7420_v27 = vld [vmem:[%s13187_s0 + $0x54] ss:$8 sps:$4 sm:$0xff]  }
 0x1a3   :  { %13773 = vst [vmem:[#allocation81_spill] sm:$0xff] %v8517_v43  ;;  %v1520_v23 = vpop.f32.mrf.mxu1  ;;  %v8530_v59 = vadd.f32 %v1167_v0, %v8011_v33  ;;  %1801 = vmatprep.mubr.bf16.mxu0 %v7420_v27  ;;  %v6617_v0 = vld [vmem:[%s13190_s3 + $0x20] ss:$8 sps:$4 sm:$0xff]  }
 0x1a4   :  { %13774 = vst [vmem:[#allocation82_spill] sm:$0xff] %v8520_v1  ;;  %13775 = vst [vmem:[#allocation83_spill] sm:$0xff] %v8522_v6  ;;  %v8533_v18 = vadd.f32 %v1520_v23, %v8013_v34  ;;  %v2119_v28 = vmul.f32 %v8520_v1, %v8517_v43  ;;  %v1169_v15 = vpop.f32.mrf.mxu0  ;;  %v6619_v23 = vld [vmem:[%s13190_s3 + $0x24] ss:$8 sps:$4 sm:$0xff]  }
 0x1a5   :  { %13776 = vst [vmem:[#allocation84_spill] sm:$0xff] %v8530_v59  ;;  %v1522_v6 = vpop.f32.mrf.mxu1  ;;  %v8541_v42 = vadd.f32 %v1169_v15, %v8020_v36  ;;  %4206 = vmatprep.subr.bf16.mxu1 %v6619_v23 }
 0x1a6   :  { %13777 = vst [vmem:[#allocation85_spill] sm:$0xff] %v8533_v18  ;;  %v8544_v58 = vadd.f32 %v1522_v6, %v8022_v37  ;;  %v8552_v27 = vadd.f32 %v2119_v28, %v2118_v7  ;;  %v1171_v29 = vpop.f32.mrf.mxu0  ;;  %v2120_v1 = vmul.f32 %v8533_v18, %v8530_v59  ;;  %4207 = vmatpush1.bf16.xpose.msra.mxu1 %v6617_v0 }
 0x1a7   :  { %13778 = vst [vmem:[#allocation86_spill] sm:$0xff] %v8541_v42  ;;  %v1524_v43 = vpop.f32.mrf.mxu1  ;;  %v8559_v6 = vadd.f32 %v1171_v29, %v8011_v33  ;;  %v7421_v29 = vld [vmem:[%s13187_s0 + $0x50] ss:$8 sps:$4 sm:$0xff]  }
 0x1a8   :  { %13779 = vst [vmem:[#allocation87_spill] sm:$0xff] %v8544_v58  ;;  %13780 = vst [vmem:[#allocation88_spill] sm:$0xff] %v8552_v27  ;;  %v2121_v15 = vmul.f32 %v8544_v58, %v8541_v42  ;;  %v8562_v14 = vadd.f32 %v1524_v43, %v8013_v34  ;;  %v1173_v17 = vpop.f32.mrf.mxu0 }
 0x1a9   :  { %13781 = vst [vmem:[#allocation89_spill] sm:$0xff] %v8559_v6  ;;  %v1526_v26 = vpop.f32.mrf.mxu1  ;;  %v8565_v7 = vadd.f32 %v1173_v17, %v8020_v36 }
 0x1aa   :  { %13782 = vst [vmem:[#allocation90_spill] sm:$0xff] %v8562_v14  ;;  %v8568_v28 = vadd.f32 %v1526_v26, %v8022_v37  ;;  %v8570_v59 = vadd.f32 %v2121_v15, %v2120_v1  ;;  %v1177_v18 = vpop.f32.mrf.mxu0  ;;  %1802 = vmatmul.mubr.bf16.gmra.mxu0 %v7421_v29  ;;  %v2122_v43 = vmul.f32 %v8562_v14, %v8559_v6  ;;  %v7422_v26 = vld [vmem:[%s13187_s0 + $0x64] ss:$8 sps:$4 sm:$0xff]  }
 0x1ab   :  { %13783 = vst [vmem:[#allocation91_spill] sm:$0xff] %v8565_v7  ;;  %v1530_v42 = vpop.f32.mrf.mxu1  ;;  %v8578_v0 = vadd.f32 %v1177_v18, %v8011_v33  ;;  %1811 = vmatprep.mubr.bf16.mxu0 %v7422_v26 }
 0x1ac   :  { %13784 = vst [vmem:[#allocation92_spill] sm:$0xff] %v8568_v28  ;;  %13785 = vst [vmem:[#allocation93_spill] sm:$0xff] %v8570_v59  ;;  %v8581_v17 = vadd.f32 %v1530_v42, %v8013_v34  ;;  %v2123_v1 = vmul.f32 %v8568_v28, %v8565_v7  ;;  %v1179_v23 = vpop.f32.mrf.mxu0 }
 0x1ad   :  { %13786 = vst [vmem:[#allocation94_spill] sm:$0xff] %v8578_v0  ;;  %v1532_v15 = vpop.f32.mrf.mxu1  ;;  %v8589_v29 = vadd.f32 %v1179_v23, %v8020_v36 }
 0x1ae   :  { %13787 = vst [vmem:[#allocation95_spill] sm:$0xff] %v8581_v17  ;;  %v8592_v6 = vadd.f32 %v1532_v15, %v8022_v37  ;;  %v8594_v18 = vadd.f32 %v2123_v1, %v2122_v43  ;;  %v1181_v42 = vpop.f32.mrf.mxu0  ;;  %v2124_v59 = vmul.f32 %v8581_v17, %v8578_v0 }
 0x1af   :  { %13788 = vst [vmem:[#allocation96_spill] sm:$0xff] %v8589_v29  ;;  %v1534_v14 = vpop.f32.mrf.mxu1  ;;  %v8601_v7 = vadd.f32 %v1181_v42, %v8011_v33  ;;  %v7423_v42 = vld [vmem:[%s13187_s0 + $0x60] ss:$8 sps:$4 sm:$0xff]  }
 0x1b0   :  { %13789 = vst [vmem:[#allocation97_spill] sm:$0xff] %v8592_v6  ;;  %13790 = vst [vmem:[#allocation98_spill] sm:$0xff] %v8594_v18  ;;  %v2125_v26 = vmul.f32 %v8592_v6, %v8589_v29  ;;  %v8604_v28 = vadd.f32 %v1534_v14, %v8013_v34  ;;  %v1183_v23 = vpop.f32.mrf.mxu0 }
 0x1b1   :  { %13791 = vst [vmem:[#allocation99_spill] sm:$0xff] %v8601_v7  ;;  %v1536_v58 = vpop.f32.mrf.mxu1  ;;  %v8607_v15 = vadd.f32 %v1183_v23, %v8020_v36 }
 0x1b2   :  { %13792 = vst [vmem:[#allocation100_spill] sm:$0xff] %v8604_v28  ;;  %v8610_v43 = vadd.f32 %v1536_v58, %v8022_v37  ;;  %v8612_v1 = vadd.f32 %v2125_v26, %v2124_v59  ;;  %v1187_v0 = vpop.f32.mrf.mxu0  ;;  %1812 = vmatmul.mubr.bf16.gmra.mxu0 %v7423_v42  ;;  %v2126_v14 = vmul.f32 %v8604_v28, %v8601_v7  ;;  %v7424_v58 = vld [vmem:[%s13187_s0 + $0x74] ss:$8 sps:$4 sm:$0xff]  }
 0x1b3   :  { %13793 = vst [vmem:[#allocation101_spill] sm:$0xff] %v8607_v15  ;;  %v1540_v17 = vpop.f32.mrf.mxu1  ;;  %v8620_v29 = vadd.f32 %v1187_v0, %v8011_v33  ;;  %1821 = vmatprep.mubr.bf16.mxu0 %v7424_v58  ;;  %v6620_v0 = vld [vmem:[%s13190_s3 + $0x10] ss:$8 sps:$4 sm:$0xff]  }
 0x1b4   :  { %13794 = vst [vmem:[#allocation102_spill] sm:$0xff] %v8610_v43  ;;  %13795 = vst [vmem:[#allocation103_spill] sm:$0xff] %v8612_v1  ;;  %v8623_v23 = vadd.f32 %v1540_v17, %v8013_v34  ;;  %v2127_v59 = vmul.f32 %v8610_v43, %v8607_v15  ;;  %v1189_v26 = vpop.f32.mrf.mxu0  ;;  %v6622_v17 = vld [vmem:[%s13190_s3 + $0x14] ss:$8 sps:$4 sm:$0xff]  }
 0x1b5   :  { %13796 = vst [vmem:[#allocation104_spill] sm:$0xff] %v8620_v29  ;;  %v1542_v1 = vpop.f32.mrf.mxu1  ;;  %v8631_v42 = vadd.f32 %v1189_v26, %v8020_v36  ;;  %4208 = vmatprep.subr.bf16.mxu1 %v6622_v17 }
 0x1b6   :  { %13797 = vst [vmem:[#allocation105_spill] sm:$0xff] %v8623_v23  ;;  %v8634_v7 = vadd.f32 %v1542_v1, %v8022_v37  ;;  %v8642_v58 = vadd.f32 %v2127_v59, %v2126_v14  ;;  %v1191_v28 = vpop.f32.mrf.mxu0  ;;  %v2128_v43 = vmul.f32 %v8623_v23, %v8620_v29  ;;  %4209 = vmatpush1.bf16.xpose.msra.mxu1 %v6620_v0 }
 0x1b7   :  { %13798 = vst [vmem:[#allocation106_spill] sm:$0xff] %v8631_v42  ;;  %v1544_v15 = vpop.f32.mrf.mxu1  ;;  %v8649_v1 = vadd.f32 %v1191_v28, %v8011_v33  ;;  %v7425_v28 = vld [vmem:[%s13187_s0 + $0x70] ss:$8 sps:$4 sm:$0xff]  }
 0x1b8   :  { %13799 = vst [vmem:[#allocation107_spill] sm:$0xff] %v8634_v7  ;;  %13800 = vst [vmem:[#allocation108_spill] sm:$0xff] %v8642_v58  ;;  %v2129_v26 = vmul.f32 %v8634_v7, %v8631_v42  ;;  %v8652_v6 = vadd.f32 %v1544_v15, %v8013_v34  ;;  %v1193_v18 = vpop.f32.mrf.mxu0 }
 0x1b9   :  { %13801 = vst [vmem:[#allocation109_spill] sm:$0xff] %v8649_v1  ;;  %v1546_v27 = vpop.f32.mrf.mxu1  ;;  %v8655_v14 = vadd.f32 %v1193_v18, %v8020_v36 }
 0x1ba   :  { %13802 = vst [vmem:[#allocation110_spill] sm:$0xff] %v8652_v6  ;;  %v8658_v59 = vadd.f32 %v1546_v27, %v8022_v37  ;;  %v8660_v29 = vadd.f32 %v2129_v26, %v2128_v43  ;;  %v1197_v23 = vpop.f32.mrf.mxu0  ;;  %1822 = vmatmul.mubr.bf16.gmra.mxu0 %v7425_v28  ;;  %v2130_v15 = vmul.f32 %v8652_v6, %v8649_v1  ;;  %v7426_v27 = vld [vmem:[%s13187_s0 + $0x84] ss:$8 sps:$4 sm:$0xff]  }
 0x1bb   :  { %13803 = vst [vmem:[#allocation111_spill] sm:$0xff] %v8655_v14  ;;  %v1550_v42 = vpop.f32.mrf.mxu1  ;;  %v8668_v0 = vadd.f32 %v1197_v23, %v8011_v33  ;;  %1831 = vmatprep.mubr.bf16.mxu0 %v7426_v27 }
 0x1bc   :  { %13804 = vst [vmem:[#allocation112_spill] sm:$0xff] %v8658_v59  ;;  %13805 = vst [vmem:[#allocation113_spill] sm:$0xff] %v8660_v29  ;;  %v8671_v18 = vadd.f32 %v1550_v42, %v8013_v34  ;;  %v2131_v43 = vmul.f32 %v8658_v59, %v8655_v14  ;;  %v1199_v17 = vpop.f32.mrf.mxu0 }
 0x1bd   :  { %13806 = vst [vmem:[#allocation114_spill] sm:$0xff] %v8668_v0  ;;  %v1552_v26 = vpop.f32.mrf.mxu1  ;;  %v8679_v28 = vadd.f32 %v1199_v17, %v8020_v36 }
 0x1be   :  { %13807 = vst [vmem:[#allocation115_spill] sm:$0xff] %v8671_v18  ;;  %v8682_v1 = vadd.f32 %v1552_v26, %v8022_v37  ;;  %v8684_v23 = vadd.f32 %v2131_v43, %v2130_v15  ;;  %v1201_v42 = vpop.f32.mrf.mxu0  ;;  %v2132_v29 = vmul.f32 %v8671_v18, %v8668_v0 }
 0x1bf   :  { %13808 = vst [vmem:[#allocation116_spill] sm:$0xff] %v8679_v28  ;;  %v1554_v6 = vpop.f32.mrf.mxu1  ;;  %v8691_v14 = vadd.f32 %v1201_v42, %v8011_v33  ;;  %v7427_v42 = vld [vmem:[%s13187_s0 + $0x80] ss:$8 sps:$4 sm:$0xff]  }
 0x1c0   :  { %13809 = vst [vmem:[#allocation117_spill] sm:$0xff] %v8682_v1  ;;  %13810 = vst [vmem:[#allocation118_spill] sm:$0xff] %v8684_v23  ;;  %v2133_v27 = vmul.f32 %v8682_v1, %v8679_v28  ;;  %v8694_v59 = vadd.f32 %v1554_v6, %v8013_v34  ;;  %v1203_v17 = vpop.f32.mrf.mxu0 }
 0x1c1   :  { %13811 = vst [vmem:[#allocation119_spill] sm:$0xff] %v8691_v14  ;;  %v1556_v7 = vpop.f32.mrf.mxu1  ;;  %v8697_v26 = vadd.f32 %v1203_v17, %v8020_v36  ;;  %v7428_v17 = vld [vmem:[%s13187_s0 + $0x94] ss:$8 sps:$4 sm:$0xff]  }
 0x1c2   :  { %13812 = vst [vmem:[#allocation120_spill] sm:$0xff] %v8694_v59  ;;  %v8700_v15 = vadd.f32 %v1556_v7, %v8022_v37  ;;  %v8702_v43 = vadd.f32 %v2133_v27, %v2132_v29  ;;  %v1207_v0 = vpop.f32.mrf.mxu0  ;;  %1832 = vmatmul.mubr.bf16.gmra.mxu0 %v7427_v42  ;;  %v2134_v29 = vmul.f32 %v8694_v59, %v8691_v14  ;;  %v6623_v42 = vld [vmem:[%s13190_s3] ss:$8 sps:$4 sm:$0xff]  }
 0x1c3   :  { %13813 = vst [vmem:[#allocation121_spill] sm:$0xff] %v8697_v26  ;;  %v1560_v18 = vpop.f32.mrf.mxu1  ;;  %v1208_v6 = vadd.f32 %v1207_v0, %v8011_v33  ;;  %1841 = vmatprep.mubr.bf16.mxu0 %v7428_v17  ;;  %v6625_v0 = vld [vmem:[%s13190_s3 + $0x4] ss:$8 sps:$4 sm:$0xff]  }
 0x1c4   :  { %13814 = vst [vmem:[#allocation122_spill] sm:$0xff] %v8700_v15  ;;  %13815 = vst [vmem:[#allocation123_spill] sm:$0xff] %v8702_v43  ;;  %v1561_v28 = vadd.f32 %v1560_v18, %v8013_v34  ;;  %v2135_v7 = vmul.f32 %v8700_v15, %v8697_v26  ;;  %v1209_v27 = vpop.f32.mrf.mxu0  ;;  %4210 = vmatprep.subr.bf16.mxu1 %v6625_v0 }
 0x1c5   :  { %v1562_v43 = vpop.f32.mrf.mxu1  ;;  %v1210_v1 = vadd.f32 %v1209_v27, %v8020_v36  ;;  %4211 = vmatpush1.bf16.xpose.msra.mxu1 %v6623_v42  ;;  %v2200_v11 = vmul.f32 %v8028_v41, %v1208_v6 }
 0x1c6   :  { %v2264_v18 = vmul.f32 %v1561_v28, %v1208_v6  ;;  %v1563_v17 = vadd.f32 %v1562_v43, %v8022_v37  ;;  %v1211_v23 = vpop.f32.mrf.mxu0  ;;  %v8724_v15 = vadd.f32 %v2135_v7, %v2134_v29  ;;  %v2136_v27 = vmul.f32 %v1561_v28, %v8025_v40 }
 0x1c7   :  { %v1564_v26 = vpop.f32.mrf.mxu1  ;;  %v2201_v14 = vmul.f32 %v8034_v45, %v1210_v1  ;;  %v1212_v58 = vadd.f32 %v1211_v23, %v8011_v33  ;;  %v7429_v23 = vld [vmem:[%s13187_s0 + $0x90] ss:$8 sps:$4 sm:$0xff]  }
 0x1c8   :  { %v2265_v59 = vmul.f32 %v1563_v17, %v1210_v1  ;;  %v1565_v10 = vadd.f32 %v1564_v26, %v8013_v34  ;;  %v1213_v48 = vpop.f32.mrf.mxu0  ;;  %v2137_v43 = vmul.f32 %v1563_v17, %v8031_v44 }
 0x1c9   :  { %v1566_v51 = vpop.f32.mrf.mxu1  ;;  %v1214_v7 = vadd.f32 %v1213_v48, %v8020_v36  ;;  %v8737_v41 = vadd.f32 %v2201_v14, %v2200_v11  ;;  %v2202_v28 = vmul.f32 %v8043_v50, %v1212_v58 }
 0x1ca   :  { %v2266_v2 = vmul.f32 %v1565_v10, %v1212_v58  ;;  %v1567_v29 = vadd.f32 %v1566_v51, %v8022_v37  ;;  %v1217_v45 = vpop.f32.mrf.mxu0  ;;  %1842 = vmatmul.mubr.bf16.gmra.mxu0 %v7429_v23  ;;  %v2424_v26 = vadd.f32 %v2137_v43, %v2136_v27  ;;  %v8739_v6 = vadd.f32 %v2265_v59, %v2264_v18  ;;  %v7430_v51 = vld [vmem:[%s13187_s0 + $0xa4] ss:$8 sps:$4 sm:$0xff]  }
 0x1cb   :  { %v1570_v1 = vpop.f32.mrf.mxu1  ;;  %v1218_v40 = vadd.f32 %v1217_v45, %v8011_v33  ;;  %1851 = vmatprep.mubr.bf16.mxu0 %v7430_v51  ;;  %v2203_v48 = vmul.f32 %v8056_v57, %v1214_v7  ;;  %v2138_v42 = vmul.f32 %v1565_v10, %v8040_v49 }
 0x1cc   :  { %v1571_v44 = vadd.f32 %v1570_v1, %v8013_v34  ;;  %2425 = vadd.xlane.f32.xlu1 %v2424_v26  ;;  %v1219_v11 = vpop.f32.mrf.mxu0  ;;  %v2139_v59 = vmul.f32 %v1567_v29, %v8053_v56  ;;  %v2267_v0 = vmul.f32 %v1567_v29, %v1214_v7 }
 0x1cd   :  { %v1572_v14 = vpop.f32.mrf.mxu1  ;;  %v1220_v17 = vadd.f32 %v1219_v11, %v8020_v36  ;;  %v8752_v23 = vadd.f32 %v2203_v48, %v2202_v28  ;;  %v2204_v56 = vmul.f32 %v8064_v63, %v1218_v40  ;;  %v7431_v11 = vld [vmem:[%s13187_s0 + $0xa0] ss:$8 sps:$4 sm:$0xff]  }
 0x1ce   :  { %v2268_v18 = vmul.f32 %v1571_v44, %v1218_v40  ;;  %v1573_v27 = vadd.f32 %v1572_v14, %v8022_v37  ;;  %v1221_v43 = vpop.f32.mrf.mxu0  ;;  %v2427_v1 = vadd.f32 %v2139_v59, %v2138_v42  ;;  %v8754_v57 = vadd.f32 %v2267_v0, %v2266_v2  ;;  %v7432_v59 = vld [vmem:[%s13187_s0 + $0xb4] ss:$8 sps:$4 sm:$0xff]   ;;  %v6626_v0 = vld [vmem:[%s13190_s3 + $0xf0] ss:$8 sps:$4 sm:$0xff]  }
 0x1cf   :  { %v1574_v45 = vpop.f32.mrf.mxu1  ;;  %v2205_v49 = vmul.f32 %v8072_v8, %v1220_v17  ;;  %v1222_v50 = vadd.f32 %v1221_v43, %v8011_v33  ;;  %v2140_v58 = vmul.f32 %v1571_v44, %v8061_v62 }
 0x1d0   :  { %v1575_v10 = vadd.f32 %v1574_v45, %v8013_v34  ;;  %v2141_v7 = vmul.f32 %v1573_v27, %v8069_v5  ;;  %v2269_v29 = vmul.f32 %v1573_v27, %v1220_v17  ;;  %2428 = vadd.xlane.f32.xlu1 %v2427_v1  ;;  %v1223_v26 = vpop.f32.mrf.mxu0 }
 0x1d1   :  { %v1576_v51 = vpop.f32.mrf.mxu1  ;;  %v1224_v2 = vadd.f32 %v1223_v26, %v8020_v36  ;;  %v8767_v62 = vadd.f32 %v2205_v49, %v2204_v56  ;;  %v2206_v40 = vmul.f32 %v8085_v20, %v1222_v50 }
 0x1d2   :  { %v2270_v48 = vmul.f32 %v1575_v10, %v1222_v50  ;;  %v1577_v28 = vadd.f32 %v1576_v51, %v8022_v37  ;;  %v1227_v8 = vpop.f32.mrf.mxu0  ;;  %1852 = vmatmul.mubr.bf16.gmra.mxu0 %v7431_v11  ;;  %v2430_v63 = vadd.f32 %v2141_v7, %v2140_v58  ;;  %v8769_v5 = vadd.f32 %v2269_v29, %v2268_v18  ;;  %v6628_v18 = vld [vmem:[%s13190_s3 + $0xf4] ss:$8 sps:$4 sm:$0xff]  }
 0x1d3   :  { %v1580_v42 = vpop.f32.mrf.mxu1  ;;  %v1228_v44 = vadd.f32 %v1227_v8, %v8011_v33  ;;  %1861 = vmatprep.mubr.bf16.mxu0 %v7432_v59  ;;  %v2207_v17 = vmul.f32 %v8094_v25, %v1224_v2  ;;  %v2142_v20 = vmul.f32 %v1575_v10, %v8082_v19  ;;  %4212 = vmatprep.subr.bf16.mxu1 %v6628_v18 }
 0x1d4   :  { %v1581_v14 = vadd.f32 %v1580_v42, %v8013_v34  ;;  %2338 = vadd.xlane.f32.xlu1 %v8118_v52  ;;  %2431 = vadd.xlane.f32.xlu0 %v2430_v63  ;;  %v1229_v27 = vpop.f32.mrf.mxu0  ;;  %v2143_v45 = vmul.f32 %v1577_v28, %v8091_v24  ;;  %v2271_v1 = vmul.f32 %v1577_v28, %v1224_v2 }
 0x1d5   :  { %v1582_v43 = vpop.f32.mrf.mxu1  ;;  %v1230_v50 = vadd.f32 %v1229_v27, %v8020_v36  ;;  %v2208_v56 = vmul.f32 %v8102_v38, %v1228_v44  ;;  %4213 = vmatpush2.bf16.xpose.msra.mxu1 %v6626_v0  ;;  %v8790_v19 = vadd.f32 %v2207_v17, %v2206_v40 }
 0x1d6   :  { %v2272_v49 = vmul.f32 %v1581_v14, %v1228_v44  ;;  %v1583_v58 = vadd.f32 %v1582_v43, %v8022_v37  ;;  %v1231_v7 = vpop.f32.mrf.mxu0  ;;  %v2433_v29 = vadd.f32 %v2143_v45, %v2142_v20  ;;  %v8795_v26 = vadd.f32 %v2271_v1, %v2270_v48 }
 0x1d7   :  { %v1584_v25 = vpop.f32.mrf.mxu1  ;;  %v2209_v52 = vmul.f32 %v8110_v47, %v1230_v50  ;;  %v1232_v10 = vadd.f32 %v1231_v7, %v8011_v33  ;;  %v2144_v51 = vmul.f32 %v1581_v14, %v8099_v35  ;;  %v7433_v35 = vld [vmem:[%s13187_s0 + $0xb0] ss:$8 sps:$4 sm:$0xff]  }
 0x1d8   :  { %v1585_v24 = vadd.f32 %v1584_v25, %v8013_v34  ;;  %v2145_v38 = vmul.f32 %v1583_v58, %v8107_v46  ;;  %v2273_v2 = vmul.f32 %v1583_v58, %v1230_v50  ;;  %2434 = vadd.xlane.f32.xlu1 %v2433_v29  ;;  %2341 = vadd.xlane.f32.xlu0 %v8142_v13  ;;  %v1233_v28 = vpop.f32.mrf.mxu0 }
 0x1d9   :  { %v1586_v8 = vpop.f32.mrf.mxu1  ;;  %v1234_v11 = vadd.f32 %v1233_v28, %v8020_v36  ;;  %v2210_v47 = vmul.f32 %v8131_v61, %v1232_v10  ;;  %v8806_v44 = vadd.f32 %v2209_v52, %v2208_v56  ;;  %v7434_v61 = vld [vmem:[%s13187_s0 + $0xc4] ss:$8 sps:$4 sm:$0xff]  }
 0x1da   :  { %v2274_v42 = vmul.f32 %v1585_v24, %v1232_v10  ;;  %v1587_v63 = vadd.f32 %v1586_v8, %v8022_v37  ;;  %v1237_v40 = vpop.f32.mrf.mxu0  ;;  %1862 = vmatmul.mubr.bf16.gmra.mxu0 %v7433_v35  ;;  %v2436_v46 = vadd.f32 %v2145_v38, %v2144_v51  ;;  %v8814_v0 = vadd.f32 %v2273_v2, %v2272_v49  ;;  %v7435_v8 = vld [vmem:[%s13187_s0 + $0xc0] ss:$8 sps:$4 sm:$0xff]   ;;  %v13816_v35 = vld [vmem:[#allocation11_spill] sm:$0xff] }
 0x1db   :  { %v1590_v48 = vpop.f32.mrf.mxu1  ;;  %v1238_v13 = vadd.f32 %v1237_v40, %v8011_v33  ;;  %1871 = vmatprep.mubr.bf16.mxu0 %v7434_v61  ;;  %v2211_v59 = vmul.f32 %v8140_v12, %v1234_v11  ;;  %v2146_v18 = vmul.f32 %v1585_v24, %v8128_v60 }
 0x1dc   :  { %v1591_v14 = vadd.f32 %v1590_v48, %v8013_v34  ;;  %2344 = vadd.xlane.f32.xlu1 %v8160_v39  ;;  %2437 = vadd.xlane.f32.xlu0 %v2436_v46  ;;  %v1239_v17 = vpop.f32.mrf.mxu0  ;;  %v2147_v27 = vmul.f32 %v1587_v63, %v8137_v9  ;;  %v2275_v43 = vmul.f32 %v1587_v63, %v1234_v11  ;;  %v7436_v63 = vld [vmem:[%s13187_s0 + $0xd4] ss:$8 sps:$4 sm:$0xff]  }
 0x1dd   :  { %v1592_v20 = vpop.f32.mrf.mxu1  ;;  %v1240_v1 = vadd.f32 %v1239_v17, %v8020_v36  ;;  %v2212_v50 = vmul.f32 %v8150_v22, %v1238_v13  ;;  %v8822_v7 = vadd.f32 %v2211_v59, %v2210_v47 }
 0x1de   :  { %v2276_v45 = vmul.f32 %v1591_v14, %v1238_v13  ;;  %v1593_v56 = vadd.f32 %v1592_v20, %v8022_v37  ;;  %v1241_v12 = vpop.f32.mrf.mxu0  ;;  %v2439_v58 = vadd.f32 %v2147_v27, %v2146_v18  ;;  %v8827_v9 = vadd.f32 %v2275_v43, %v2274_v42 }
 0x1df   :  { %v1594_v49 = vpop.f32.mrf.mxu1  ;;  %v2213_v60 = vmul.f32 %v8158_v32, %v1240_v1  ;;  %v1242_v39 = vadd.f32 %v1241_v12, %v8011_v33  ;;  %v2148_v29 = vmul.f32 %v1591_v14, %v8147_v21  ;;  %v13817_v14 = vld [vmem:[#allocation6_spill] sm:$0xff] }
 0x1e0   :  { %v1595_v25 = vadd.f32 %v1594_v49, %v8013_v34  ;;  %v2149_v52 = vmul.f32 %v1593_v56, %v8155_v31  ;;  %v2277_v22 = vmul.f32 %v1593_v56, %v1240_v1  ;;  %2440 = vadd.xlane.f32.xlu1 %v2439_v58  ;;  %2347 = vadd.xlane.f32.xlu0 %v8184_v16  ;;  %v1243_v10 = vpop.f32.mrf.mxu0  ;;  %v13820_v58 = vld [vmem:[#allocation7_spill] sm:$0xff] }
 0x1e1   :  { %v1596_v24 = vpop.f32.mrf.mxu1  ;;  %v1244_v38 = vadd.f32 %v1243_v10, %v8020_v36  ;;  %v8837_v31 = vadd.f32 %v2213_v60, %v2212_v50  ;;  %v2214_v16 = vmul.f32 %v8173_v55, %v1242_v39  ;;  %v13819_v50 = vld [vmem:[#allocation10_spill] sm:$0xff] }
 0x1e2   :  { %v2278_v51 = vmul.f32 %v1595_v25, %v1242_v39  ;;  %v1597_v32 = vadd.f32 %v1596_v24, %v8022_v37  ;;  %v1247_v2 = vpop.f32.mrf.mxu0  ;;  %1872 = vmatmul.mubr.bf16.gmra.mxu0 %v7435_v8  ;;  %v2442_v21 = vadd.f32 %v2149_v52, %v2148_v29  ;;  %v8839_v42 = vadd.f32 %v2277_v22, %v2276_v45  ;;  %v13821_v39 = vld [vmem:[#allocation9_spill] sm:$0xff]  ;;  %v13822_v52 = vld [vmem:[#allocation16_spill] sm:$0xff] }
 0x1e3   :  { %v1600_v28 = vpop.f32.mrf.mxu1  ;;  %v1248_v11 = vadd.f32 %v1247_v2, %v8011_v33  ;;  %1881 = vmatprep.mubr.bf16.mxu0 %v7436_v63  ;;  %v2215_v40 = vmul.f32 %v8182_v3, %v1244_v38  ;;  %v2150_v48 = vmul.f32 %v1595_v25, %v8170_v54  ;;  %v13818_v54 = vld [vmem:[#allocation8_spill] sm:$0xff] }
 0x1e4   :  { %v1601_v47 = vadd.f32 %v1600_v28, %v8013_v34  ;;  %2350 = vadd.xlane.f32.xlu1 %v13816_v35  ;;  %2443 = vadd.xlane.f32.xlu0 %v2442_v21  ;;  %v1249_v46 = vpop.f32.mrf.mxu0  ;;  %v2151_v55 = vmul.f32 %v1597_v32, %v13817_v14  ;;  %v2279_v61 = vmul.f32 %v1597_v32, %v1244_v38  ;;  %v7437_v28 = vld [vmem:[%s13187_s0 + $0xd0] ss:$8 sps:$4 sm:$0xff]  }
 0x1e5   :  { %v1602_v13 = vpop.f32.mrf.mxu1  ;;  %v1250_v18 = vadd.f32 %v1249_v46, %v8020_v36  ;;  %v8853_v45 = vadd.f32 %v2215_v40, %v2214_v16  ;;  %v2216_v1 = vmul.f32 %v13818_v54, %v1248_v11  ;;  %v13824_v35 = vld [vmem:[#allocation15_spill] sm:$0xff] }
 0x1e6   :  { %v2280_v59 = vmul.f32 %v1601_v47, %v1248_v11  ;;  %v1603_v17 = vadd.f32 %v1602_v13, %v8022_v37  ;;  %v1251_v20 = vpop.f32.mrf.mxu0  ;;  %v2445_v43 = vadd.f32 %v2151_v55, %v2150_v48  ;;  %v8855_v3 = vadd.f32 %v2279_v61, %v2278_v51  ;;  %v13823_v11 = vld [vmem:[#allocation13_spill] sm:$0xff]  ;;  %v13825_v13 = vld [vmem:[#allocation12_spill] sm:$0xff] }
 0x1e7   :  { %v1604_v27 = vpop.f32.mrf.mxu1  ;;  %v2217_v56 = vmul.f32 %v13819_v50, %v1250_v18  ;;  %v1252_v12 = vadd.f32 %v1251_v20, %v8011_v33  ;;  %v2152_v60 = vmul.f32 %v1601_v47, %v13820_v58  ;;  %v7438_v48 = vld [vmem:[%s13187_s0 + $0xe4] ss:$8 sps:$4 sm:$0xff]  }
 0x1e8   :  { %v1605_v49 = vadd.f32 %v1604_v27, %v8013_v34  ;;  %v2153_v25 = vmul.f32 %v1603_v17, %v13821_v39  ;;  %v2281_v29 = vmul.f32 %v1603_v17, %v1250_v18  ;;  %2446 = vadd.xlane.f32.xlu1 %v2445_v43  ;;  %2353 = vadd.xlane.f32.xlu0 %v13822_v52  ;;  %v1253_v22 = vpop.f32.mrf.mxu0  ;;  %v13826_v55 = vld [vmem:[#allocation21_spill] sm:$0xff]  ;;  %v13827_v18 = vld [vmem:[#allocation14_spill] sm:$0xff]  ;;  %v13829_v39 = vld [vmem:[#allocation20_spill] sm:$0xff] }
 0x1e9   :  { %v1606_v10 = vpop.f32.mrf.mxu1  ;;  %v1254_v51 = vadd.f32 %v1253_v22, %v8020_v36  ;;  %v8869_v21 = vadd.f32 %v2217_v56, %v2216_v1  ;;  %v2218_v47 = vmul.f32 %v13823_v11, %v1252_v12  ;;  %v13830_v22 = vld [vmem:[#allocation17_spill] sm:$0xff] }
 0x1ea   :  { %v2282_v24 = vmul.f32 %v1605_v49, %v1252_v12  ;;  %v1607_v38 = vadd.f32 %v1606_v10, %v8022_v37  ;;  %v1257_v32 = vpop.f32.mrf.mxu0  ;;  %1882 = vmatmul.mubr.bf16.gmra.mxu0 %v7437_v28  ;;  %v2448_v8 = vadd.f32 %v2153_v25, %v2152_v60  ;;  %v8871_v16 = vadd.f32 %v2281_v29, %v2280_v59 }
 0x1eb   :  { %v1610_v2 = vpop.f32.mrf.mxu1  ;;  %v1258_v63 = vadd.f32 %v1257_v32, %v8011_v33  ;;  %1891 = vmatprep.mubr.bf16.mxu0 %v7438_v48  ;;  %v2219_v46 = vmul.f32 %v13824_v35, %v1254_v51  ;;  %v2154_v14 = vmul.f32 %v1605_v49, %v13825_v13  ;;  %v13828_v49 = vld [vmem:[#allocation18_spill] sm:$0xff] }
 0x1ec   :  { %v1611_v40 = vadd.f32 %v1610_v2, %v8013_v34  ;;  %2356 = vadd.xlane.f32.xlu1 %v13826_v55  ;;  %2449 = vadd.xlane.f32.xlu0 %v2448_v8  ;;  %v1259_v61 = vpop.f32.mrf.mxu0  ;;  %v2155_v17 = vmul.f32 %v1607_v38, %v13827_v18  ;;  %v2283_v20 = vmul.f32 %v1607_v38, %v1254_v51  ;;  %v13831_v51 = vld [vmem:[#allocation19_spill] sm:$0xff]  ;;  %v13832_v2 = vld [vmem:[#allocation26_spill] sm:$0xff] }
 0x1ed   :  { %v1612_v59 = vpop.f32.mrf.mxu1  ;;  %v1260_v43 = vadd.f32 %v1259_v61, %v8020_v36  ;;  %v8885_v12 = vadd.f32 %v2219_v46, %v2218_v47  ;;  %v2220_v60 = vmul.f32 %v13828_v49, %v1258_v63  ;;  %v7439_v35 = vld [vmem:[%s13187_s0 + $0xe0] ss:$8 sps:$4 sm:$0xff]   ;;  %v7440_v18 = vld [vmem:[%s13187_s0 + $0xf4] ss:$8 sps:$4 sm:$0xff]  }
 0x1ee   :  { %v2284_v27 = vmul.f32 %v1611_v40, %v1258_v63  ;;  %v1613_v54 = vadd.f32 %v1612_v59, %v8022_v37  ;;  %v1261_v1 = vpop.f32.mrf.mxu0  ;;  %v2451_v56 = vadd.f32 %v2155_v17, %v2154_v14  ;;  %v8887_v58 = vadd.f32 %v2283_v20, %v2282_v24  ;;  %v13833_v14 = vld [vmem:[#allocation23_spill] sm:$0xff]  ;;  %v13834_v17 = vld [vmem:[#allocation25_spill] sm:$0xff] }
 0x1ef   :  { %v1614_v50 = vpop.f32.mrf.mxu1  ;;  %v2221_v25 = vmul.f32 %v13829_v39, %v1260_v43  ;;  %v1262_v29 = vadd.f32 %v1261_v1, %v8011_v33  ;;  %v2156_v10 = vmul.f32 %v1611_v40, %v13830_v22  ;;  %v13836_v1 = vld [vmem:[#allocation30_spill] sm:$0xff] }
 0x1f0   :  { %v1615_v52 = vadd.f32 %v1614_v50, %v8013_v34  ;;  %v2157_v38 = vmul.f32 %v1613_v54, %v13831_v51  ;;  %v2285_v32 = vmul.f32 %v1613_v54, %v1260_v43  ;;  %2452 = vadd.xlane.f32.xlu1 %v2451_v56  ;;  %2359 = vadd.xlane.f32.xlu0 %v13832_v2  ;;  %v1263_v28 = vpop.f32.mrf.mxu0  ;;  %v13835_v43 = vld [vmem:[#allocation22_spill] sm:$0xff]  ;;  %v13837_v56 = vld [vmem:[#allocation24_spill] sm:$0xff] }
 0x1f1   :  { %v1616_v8 = vpop.f32.mrf.mxu1  ;;  %v1264_v11 = vadd.f32 %v1263_v28, %v8020_v36  ;;  %v8901_v46 = vadd.f32 %v2221_v25, %v2220_v60  ;;  %v2222_v55 = vmul.f32 %v13833_v14, %v1262_v29  ;;  %v13841_v14 = vld [vmem:[#allocation35_spill] sm:$0xff] }
 0x1f2   :  { %v2286_v24 = vmul.f32 %v1615_v52, %v1262_v29  ;;  %v1617_v47 = vadd.f32 %v1616_v8, %v8022_v37  ;;  %v1267_v63 = vpop.f32.mrf.mxu0  ;;  %1892 = vmatmul.mubr.bf16.gmra.mxu0 %v7439_v35  ;;  %v2454_v40 = vadd.f32 %v2157_v38, %v2156_v10  ;;  %v8903_v13 = vadd.f32 %v2285_v32, %v2284_v27 }
 0x1f3   :  { %v1620_v48 = vpop.f32.mrf.mxu1  ;;  %v1268_v61 = vadd.f32 %v1267_v63, %v8011_v33  ;;  %1901 = vmatprep.mubr.bf16.mxu0 %v7440_v18  ;;  %v2223_v20 = vmul.f32 %v13834_v17, %v1264_v11  ;;  %v2158_v54 = vmul.f32 %v1615_v52, %v13835_v43  ;;  %v13838_v52 = vld [vmem:[#allocation28_spill] sm:$0xff] }
 0x1f4   :  { %v1621_v59 = vadd.f32 %v1620_v48, %v8013_v34  ;;  %2362 = vadd.xlane.f32.xlu1 %v13836_v1  ;;  %2455 = vadd.xlane.f32.xlu0 %v2454_v40  ;;  %v1269_v27 = vpop.f32.mrf.mxu0  ;;  %v2159_v49 = vmul.f32 %v1617_v47, %v13837_v56  ;;  %v2287_v60 = vmul.f32 %v1617_v47, %v1264_v11  ;;  %v13839_v47 = vld [vmem:[#allocation27_spill] sm:$0xff]  ;;  %v13840_v48 = vld [vmem:[#allocation29_spill] sm:$0xff] }
 0x1f5   :  { %v1622_v50 = vpop.f32.mrf.mxu1  ;;  %v1270_v25 = vadd.f32 %v1269_v27, %v8020_v36  ;;  %v8917_v38 = vadd.f32 %v2223_v20, %v2222_v55  ;;  %v2224_v2 = vmul.f32 %v13838_v52, %v1268_v61  ;;  %v7441_v27 = vld [vmem:[%s13187_s0 + $0xf0] ss:$8 sps:$4 sm:$0xff]  }
 0x1f6   :  { %v2288_v39 = vmul.f32 %v1621_v59, %v1268_v61  ;;  %v1623_v29 = vadd.f32 %v1622_v50, %v8022_v37  ;;  %v1271_v22 = vpop.f32.mrf.mxu0  ;;  %v2457_v51 = vadd.f32 %v2159_v49, %v2158_v54  ;;  %v8919_v32 = vadd.f32 %v2287_v60, %v2286_v24  ;;  %v13842_v24 = vld [vmem:[#allocation32_spill] sm:$0xff] }
 0x1f7   :  { %v1624_v10 = vpop.f32.mrf.mxu1  ;;  %v2225_v28 = vmul.f32 %v8290_v30, %v1270_v25  ;;  %v1272_v8 = vadd.f32 %v1271_v22, %v8011_v33  ;;  %v2160_v63 = vmul.f32 %v1621_v59, %v13839_v47  ;;  %v6629_v30 = vld [vmem:[%s13190_s3 + $0xe0] ss:$8 sps:$4 sm:$0xff]   ;;  %v6631_v59 = vld [vmem:[%s13190_s3 + $0xe4] ss:$8 sps:$4 sm:$0xff]  }
 0x1f8   :  { %v1625_v11 = vadd.f32 %v1624_v10, %v8013_v34  ;;  %v2161_v35 = vmul.f32 %v1623_v29, %v13840_v48  ;;  %v2289_v40 = vmul.f32 %v1623_v29, %v1270_v25  ;;  %2458 = vadd.xlane.f32.xlu1 %v2457_v51  ;;  %2365 = vadd.xlane.f32.xlu0 %v13841_v14  ;;  %v1273_v55 = vpop.f32.mrf.mxu0  ;;  %v7442_v29 = vld [vmem:[%s13187_s0 + $0x104] ss:$8 sps:$4 sm:$0xff]   ;;  %v13844_v51 = vld [vmem:[#allocation31_spill] sm:$0xff] }
 0x1f9   :  { %v1626_v18 = vpop.f32.mrf.mxu1  ;;  %v2226_v17 = vmul.f32 %v13842_v24, %v1272_v8  ;;  %v1274_v61 = vadd.f32 %v1273_v55, %v8020_v36  ;;  %v8940_v56 = vadd.f32 %v2225_v28, %v2224_v2  ;;  %4214 = vmatprep.subr.bf16.mxu1 %v6631_v59  ;;  %v13843_v22 = vld [vmem:[#allocation34_spill] sm:$0xff]  ;;  %v13845_v28 = vld [vmem:[#allocation33_spill] sm:$0xff]  ;;  %v13847_v59 = vld [vmem:[#allocation39_spill] sm:$0xff] }
 0x1fa   :  { %v2290_v20 = vmul.f32 %v1625_v11, %v1272_v8  ;;  %v1627_v43 = vadd.f32 %v1626_v18, %v8022_v37  ;;  %v1277_v54 = vpop.f32.mrf.mxu0  ;;  %1902 = vmatmul.mubr.bf16.gmra.mxu0 %v7441_v27  ;;  %v2460_v50 = vadd.f32 %v2161_v35, %v2160_v63  ;;  %v8942_v49 = vadd.f32 %v2289_v40, %v2288_v39 }
 0x1fb   :  { %v1630_v1 = vpop.f32.mrf.mxu1  ;;  %v1278_v60 = vadd.f32 %v1277_v54, %v8011_v33  ;;  %1911 = vmatprep.mubr.bf16.mxu0 %v7442_v29  ;;  %v2227_v10 = vmul.f32 %v13843_v22, %v1274_v61  ;;  %v2162_v52 = vmul.f32 %v1625_v11, %v13844_v51  ;;  %4215 = vmatpush2.bf16.xpose.msra.mxu1 %v6629_v30  ;;  %v13849_v30 = vld [vmem:[#allocation38_spill] sm:$0xff]  ;;  %v13850_v22 = vld [vmem:[#allocation44_spill] sm:$0xff] }
 0x1fc   :  { %v1631_v25 = vadd.f32 %v1630_v1, %v8013_v34  ;;  %2368 = vadd.xlane.f32.xlu1 %v8340_v53  ;;  %2461 = vadd.xlane.f32.xlu0 %v2460_v50  ;;  %v1279_v2 = vpop.f32.mrf.mxu0  ;;  %v2163_v8 = vmul.f32 %v1627_v43, %v13845_v28  ;;  %v2291_v47 = vmul.f32 %v1627_v43, %v1274_v61  ;;  %v13846_v53 = vld [vmem:[#allocation37_spill] sm:$0xff]  ;;  %v13848_v43 = vld [vmem:[#allocation36_spill] sm:$0xff] }
 0x1fd   :  { %v1632_v39 = vpop.f32.mrf.mxu1  ;;  %v1280_v48 = vadd.f32 %v1279_v2, %v8020_v36  ;;  %v8955_v18 = vadd.f32 %v2227_v10, %v2226_v17  ;;  %v2228_v24 = vmul.f32 %v13846_v53, %v1278_v60 }
 0x1fe   :  { %v2292_v63 = vmul.f32 %v1631_v25, %v1278_v60  ;;  %v1633_v35 = vadd.f32 %v1632_v39, %v8022_v37  ;;  %v1281_v40 = vpop.f32.mrf.mxu0  ;;  %v2463_v55 = vadd.f32 %v2163_v8, %v2162_v52  ;;  %v8957_v11 = vadd.f32 %v2291_v47, %v2290_v20  ;;  %v7443_v39 = vld [vmem:[%s13187_s0 + $0x100] ss:$8 sps:$4 sm:$0xff]  }
 0x1ff   :  { %v1634_v14 = vpop.f32.mrf.mxu1  ;;  %v2229_v54 = vmul.f32 %v13847_v59, %v1280_v48  ;;  %v1282_v1 = vadd.f32 %v1281_v40, %v8011_v33  ;;  %v2164_v27 = vmul.f32 %v1631_v25, %v13848_v43  ;;  %v13851_v47 = vld [vmem:[#allocation41_spill] sm:$0xff]  ;;  %v13853_v59 = vld [vmem:[#allocation40_spill] sm:$0xff] }
 0x200   :  { %v1635_v61 = vadd.f32 %v1634_v14, %v8013_v34  ;;  %v2165_v50 = vmul.f32 %v1633_v35, %v13849_v30  ;;  %v2293_v29 = vmul.f32 %v1633_v35, %v1280_v48  ;;  %2464 = vadd.xlane.f32.xlu1 %v2463_v55  ;;  %2371 = vadd.xlane.f32.xlu0 %v13850_v22  ;;  %v1283_v17 = vpop.f32.mrf.mxu0  ;;  %v7444_v14 = vld [vmem:[%s13187_s0 + $0x114] ss:$8 sps:$4 sm:$0xff]  }
 0x201   :  { %v1636_v10 = vpop.f32.mrf.mxu1  ;;  %v1284_v51 = vadd.f32 %v1283_v17, %v8020_v36  ;;  %v8971_v28 = vadd.f32 %v2229_v54, %v2228_v24  ;;  %v2230_v48 = vmul.f32 %v13851_v47, %v1282_v1  ;;  %v13852_v55 = vld [vmem:[#allocation43_spill] sm:$0xff]  ;;  %v13854_v54 = vld [vmem:[#allocation42_spill] sm:$0xff] }
 0x202   :  { %v2294_v20 = vmul.f32 %v1635_v61, %v1282_v1  ;;  %v1637_v60 = vadd.f32 %v1636_v10, %v8022_v37  ;;  %v1287_v52 = vpop.f32.mrf.mxu0  ;;  %1912 = vmatmul.mubr.bf16.gmra.mxu0 %v7443_v39  ;;  %v2466_v25 = vadd.f32 %v2165_v50, %v2164_v27  ;;  %v8973_v8 = vadd.f32 %v2293_v29, %v2292_v63  ;;  %v13857_v39 = vld [vmem:[#allocation48_spill] sm:$0xff] }
 0x203   :  { %v1640_v2 = vpop.f32.mrf.mxu1  ;;  %v1288_v35 = vadd.f32 %v1287_v52, %v8011_v33  ;;  %1921 = vmatprep.mubr.bf16.mxu0 %v7444_v14  ;;  %v2231_v53 = vmul.f32 %v13852_v55, %v1284_v51  ;;  %v2166_v43 = vmul.f32 %v1635_v61, %v13853_v59  ;;  %v13856_v61 = vld [vmem:[#allocation46_spill] sm:$0xff]  ;;  %v13859_v55 = vld [vmem:[#allocation47_spill] sm:$0xff] }
 0x204   :  { %v1641_v40 = vadd.f32 %v1640_v2, %v8013_v34  ;;  %2374 = vadd.xlane.f32.xlu1 %v8384_v4  ;;  %2467 = vadd.xlane.f32.xlu0 %v2466_v25  ;;  %v1289_v63 = vpop.f32.mrf.mxu0  ;;  %v2167_v1 = vmul.f32 %v1637_v60, %v13854_v54  ;;  %v2295_v27 = vmul.f32 %v1637_v60, %v1284_v51  ;;  %v13858_v60 = vld [vmem:[#allocation45_spill] sm:$0xff] }
 0x205   :  { %v1642_v24 = vpop.f32.mrf.mxu1  ;;  %v1290_v50 = vadd.f32 %v1289_v63, %v8020_v36  ;;  %v8987_v52 = vadd.f32 %v2231_v53, %v2230_v48  ;;  %v2232_v4 = vmul.f32 %v13856_v61, %v1288_v35 }
 0x206   :  { %v2296_v30 = vmul.f32 %v1641_v40, %v1288_v35  ;;  %v1643_v29 = vadd.f32 %v1642_v24, %v8022_v37  ;;  %v1291_v22 = vpop.f32.mrf.mxu0  ;;  %v2469_v10 = vadd.f32 %v2167_v1, %v2166_v43  ;;  %v8989_v2 = vadd.f32 %v2295_v27, %v2294_v20  ;;  %v13860_v24 = vld [vmem:[#allocation53_spill] sm:$0xff]  ;;  %v13861_v20 = vld [vmem:[#allocation50_spill] sm:$0xff]  ;;  %v6632_v1 = vld [vmem:[%s13190_s3 + $0xd0] ss:$8 sps:$4 sm:$0xff]  }
 0x207   :  { %v1644_v17 = vpop.f32.mrf.mxu1  ;;  %v2233_v25 = vmul.f32 %v13857_v39, %v1290_v50  ;;  %v1292_v47 = vadd.f32 %v1291_v22, %v8011_v33  ;;  %v2168_v14 = vmul.f32 %v1641_v40, %v13858_v60  ;;  %v6634_v40 = vld [vmem:[%s13190_s3 + $0xd4] ss:$8 sps:$4 sm:$0xff]   ;;  %v7445_v22 = vld [vmem:[%s13187_s0 + $0x110] ss:$8 sps:$4 sm:$0xff]   ;;  %v7446_v60 = vld [vmem:[%s13187_s0 + $0x124] ss:$8 sps:$4 sm:$0xff]  }
 0x208   :  { %13855 = vst [vmem:[#allocation11_spill] sm:$0xff] %v8989_v2  ;;  %v1645_v51 = vadd.f32 %v1644_v17, %v8013_v34  ;;  %v2169_v59 = vmul.f32 %v1643_v29, %v13859_v55  ;;  %v2297_v63 = vmul.f32 %v1643_v29, %v1290_v50  ;;  %2470 = vadd.xlane.f32.xlu1 %v2469_v10  ;;  %v1293_v48 = vpop.f32.mrf.mxu0  ;;  %v13864_v55 = vld [vmem:[#allocation52_spill] sm:$0xff]  ;;  %v13874_v2 = vld [vmem:[#allocation63_spill] sm:$0xff] }
 0x209   :  { %2377 = vadd.xlane.f32.xlu0 %v13860_v24  ;;  %v1646_v53 = vpop.f32.mrf.mxu1  ;;  %v2234_v43 = vmul.f32 %v13861_v20, %v1292_v47  ;;  %v1294_v35 = vadd.f32 %v1293_v48, %v8020_v36  ;;  %v9010_v10 = vadd.f32 %v2233_v25, %v2232_v4  ;;  %4216 = vmatprep.subr.bf16.mxu1 %v6634_v40  ;;  %v13865_v48 = vld [vmem:[#allocation49_spill] sm:$0xff]  ;;  %v13867_v25 = vld [vmem:[#allocation51_spill] sm:$0xff] }
 0x20a   :  { %v2298_v54 = vmul.f32 %v1645_v51, %v1292_v47  ;;  %v1647_v27 = vadd.f32 %v1646_v53, %v8022_v37  ;;  %v1297_v50 = vpop.f32.mrf.mxu0  ;;  %1922 = vmatmul.mubr.bf16.gmra.mxu0 %v7445_v22  ;;  %v2472_v17 = vadd.f32 %v2169_v59, %v2168_v14  ;;  %v9012_v61 = vadd.f32 %v2297_v63, %v2296_v30  ;;  %v13866_v14 = vld [vmem:[#allocation58_spill] sm:$0xff] }
 0x20b   :  { %v1650_v29 = vpop.f32.mrf.mxu1  ;;  %13862 = vst [vmem:[#allocation6_spill] sm:$0xff] %v9010_v10  ;;  %v1298_v39 = vadd.f32 %v1297_v50, %v8011_v33  ;;  %1931 = vmatprep.mubr.bf16.mxu0 %v7446_v60  ;;  %v2235_v24 = vmul.f32 %v13864_v55, %v1294_v35  ;;  %v2170_v53 = vmul.f32 %v1645_v51, %v13865_v48 }
 0x20c   :  { %13863 = vst [vmem:[#allocation8_spill] sm:$0xff] %v9012_v61  ;;  %v1651_v47 = vadd.f32 %v1650_v29, %v8013_v34  ;;  %v2299_v20 = vmul.f32 %v1647_v27, %v1294_v35  ;;  %2380 = vadd.xlane.f32.xlu1 %v13866_v14  ;;  %v1299_v30 = vpop.f32.mrf.mxu0  ;;  %v2171_v59 = vmul.f32 %v1647_v27, %v13867_v25  ;;  %v13870_v35 = vld [vmem:[#allocation55_spill] sm:$0xff]  ;;  %v13872_v25 = vld [vmem:[#allocation54_spill] sm:$0xff] }
 0x20d   :  { %2473 = vadd.xlane.f32.xlu0 %v2472_v17  ;;  %v1652_v4 = vpop.f32.mrf.mxu1  ;;  %v1300_v50 = vadd.f32 %v1299_v30, %v8020_v36  ;;  %4217 = vmatpush2.bf16.xpose.msra.mxu1 %v6632_v1  ;;  %v9025_v55 = vadd.f32 %v2235_v24, %v2234_v43  ;;  %v2236_v48 = vmul.f32 %v13870_v35, %v1298_v39  ;;  %v13871_v17 = vld [vmem:[#allocation57_spill] sm:$0xff]  ;;  %v13873_v1 = vld [vmem:[#allocation56_spill] sm:$0xff] }
 0x20e   :  { %v2300_v63 = vmul.f32 %v1651_v47, %v1298_v39  ;;  %v1653_v29 = vadd.f32 %v1652_v4, %v8022_v37  ;;  %v1301_v22 = vpop.f32.mrf.mxu0  ;;  %v2475_v60 = vadd.f32 %v2171_v59, %v2170_v53  ;;  %v9027_v51 = vadd.f32 %v2299_v20, %v2298_v54 }
 0x20f   :  { %v1654_v40 = vpop.f32.mrf.mxu1  ;;  %13868 = vst [vmem:[#allocation10_spill] sm:$0xff] %v9025_v55  ;;  %v2237_v14 = vmul.f32 %v13871_v17, %v1300_v50  ;;  %v1302_v61 = vadd.f32 %v1301_v22, %v8011_v33  ;;  %v2172_v30 = vmul.f32 %v1651_v47, %v13872_v25  ;;  %v7447_v22 = vld [vmem:[%s13187_s0 + $0x120] ss:$8 sps:$4 sm:$0xff]  }
 0x210   :  { %13869 = vst [vmem:[#allocation7_spill] sm:$0xff] %v9027_v51  ;;  %v1655_v27 = vadd.f32 %v1654_v40, %v8013_v34  ;;  %v2173_v10 = vmul.f32 %v1653_v29, %v13873_v1  ;;  %v2301_v4 = vmul.f32 %v1653_v29, %v1300_v50  ;;  %2476 = vadd.xlane.f32.xlu1 %v2475_v60  ;;  %v1303_v43 = vpop.f32.mrf.mxu0  ;;  %v13878_v60 = vld [vmem:[#allocation62_spill] sm:$0xff]  ;;  %v7448_v1 = vld [vmem:[%s13187_s0 + $0x134] ss:$8 sps:$4 sm:$0xff]   ;;  %v13888_v55 = vld [vmem:[#allocation73_spill] sm:$0xff] }
 0x211   :  { %2383 = vadd.xlane.f32.xlu0 %v13874_v2  ;;  %v1656_v24 = vpop.f32.mrf.mxu1  ;;  %v1304_v53 = vadd.f32 %v1303_v43, %v8020_v36  ;;  %v9041_v40 = vadd.f32 %v2237_v14, %v2236_v48  ;;  %v13877_v2 = vld [vmem:[#allocation60_spill] sm:$0xff]  ;;  %v13879_v43 = vld [vmem:[#allocation59_spill] sm:$0xff] }
 0x212   :  { %v2302_v54 = vmul.f32 %v1655_v27, %v1302_v61  ;;  %v1657_v39 = vadd.f32 %v1656_v24, %v8022_v37  ;;  %v1307_v20 = vpop.f32.mrf.mxu0  ;;  %1932 = vmatmul.mubr.bf16.gmra.mxu0 %v7447_v22  ;;  %v2478_v47 = vadd.f32 %v2173_v10, %v2172_v30  ;;  %v9043_v50 = vadd.f32 %v2301_v4, %v2300_v63  ;;  %v13880_v48 = vld [vmem:[#allocation68_spill] sm:$0xff] }
 0x213   :  { %v1660_v59 = vpop.f32.mrf.mxu1  ;;  %13875 = vst [vmem:[#allocation9_spill] sm:$0xff] %v9041_v40  ;;  %v2238_v29 = vmul.f32 %v13877_v2, %v1302_v61  ;;  %v2239_v35 = vmul.f32 %v13878_v60, %v1304_v53  ;;  %v1308_v17 = vadd.f32 %v1307_v20, %v8011_v33  ;;  %1941 = vmatprep.mubr.bf16.mxu0 %v7448_v1  ;;  %v13881_v61 = vld [vmem:[#allocation61_spill] sm:$0xff] }
 0x214   :  { %13876 = vst [vmem:[#allocation16_spill] sm:$0xff] %v9043_v50  ;;  %v1661_v25 = vadd.f32 %v1660_v59, %v8013_v34  ;;  %v2174_v24 = vmul.f32 %v1655_v27, %v13879_v43  ;;  %v2303_v10 = vmul.f32 %v1657_v39, %v1304_v53  ;;  %2386 = vadd.xlane.f32.xlu1 %v13880_v48  ;;  %v1309_v63 = vpop.f32.mrf.mxu0  ;;  %v13884_v27 = vld [vmem:[#allocation65_spill] sm:$0xff]  ;;  %v13885_v43 = vld [vmem:[#allocation67_spill] sm:$0xff] }
 0x215   :  { %2479 = vadd.xlane.f32.xlu0 %v2478_v47  ;;  %v1662_v14 = vpop.f32.mrf.mxu1  ;;  %v2175_v30 = vmul.f32 %v1657_v39, %v13881_v61  ;;  %v1310_v20 = vadd.f32 %v1309_v63, %v8020_v36  ;;  %v9057_v50 = vadd.f32 %v2239_v35, %v2238_v29  ;;  %v2240_v53 = vmul.f32 %v13884_v27, %v1308_v17  ;;  %v13886_v61 = vld [vmem:[#allocation64_spill] sm:$0xff]  ;;  %v13887_v63 = vld [vmem:[#allocation66_spill] sm:$0xff] }
 0x216   :  { %v2304_v4 = vmul.f32 %v1661_v25, %v1308_v17  ;;  %v1663_v59 = vadd.f32 %v1662_v14, %v8022_v37  ;;  %v1311_v22 = vpop.f32.mrf.mxu0  ;;  %v9059_v1 = vadd.f32 %v2303_v10, %v2302_v54  ;;  %v2176_v40 = vmul.f32 %v1661_v25, %v13886_v61  ;;  %v13889_v54 = vld [vmem:[#allocation70_spill] sm:$0xff] }
 0x217   :  { %v1664_v2 = vpop.f32.mrf.mxu1  ;;  %v2481_v60 = vadd.f32 %v2175_v30, %v2174_v24  ;;  %13882 = vst [vmem:[#allocation13_spill] sm:$0xff] %v9057_v50  ;;  %v2241_v47 = vmul.f32 %v13885_v43, %v1310_v20  ;;  %v1312_v48 = vadd.f32 %v1311_v22, %v8011_v33  ;;  %v6635_v30 = vld [vmem:[%s13190_s3 + $0xc0] ss:$8 sps:$4 sm:$0xff]   ;;  %v6637_v25 = vld [vmem:[%s13190_s3 + $0xc4] ss:$8 sps:$4 sm:$0xff]   ;;  %v13892_v43 = vld [vmem:[#allocation72_spill] sm:$0xff] }
 0x218   :  { %13883 = vst [vmem:[#allocation15_spill] sm:$0xff] %v9059_v1  ;;  %v1665_v39 = vadd.f32 %v1664_v2, %v8013_v34  ;;  %v2177_v51 = vmul.f32 %v1663_v59, %v13887_v63  ;;  %v2305_v14 = vmul.f32 %v1663_v59, %v1310_v20  ;;  %v1313_v29 = vpop.f32.mrf.mxu0  ;;  %4218 = vmatprep.subr.bf16.mxu1 %v6637_v25  ;;  %v13902_v50 = vld [vmem:[#allocation83_spill] sm:$0xff] }
 0x219   :  { %2482 = vadd.xlane.f32.xlu1 %v2481_v60  ;;  %2389 = vadd.xlane.f32.xlu0 %v13888_v55  ;;  %v1666_v35 = vpop.f32.mrf.mxu1  ;;  %v2242_v24 = vmul.f32 %v13889_v54, %v1312_v48  ;;  %v1314_v17 = vadd.f32 %v1313_v29, %v8020_v36  ;;  %v7449_v55 = vld [vmem:[%s13187_s0 + $0x130] ss:$8 sps:$4 sm:$0xff]   ;;  %v9080_v60 = vadd.f32 %v2241_v47, %v2240_v53  ;;  %v7450_v29 = vld [vmem:[%s13187_s0 + $0x144] ss:$8 sps:$4 sm:$0xff]  }
 0x21a   :  { %v2306_v10 = vmul.f32 %v1665_v39, %v1312_v48  ;;  %v1667_v20 = vadd.f32 %v1666_v35, %v8022_v37  ;;  %v1317_v59 = vpop.f32.mrf.mxu0  ;;  %1942 = vmatmul.mubr.bf16.gmra.mxu0 %v7449_v55  ;;  %v2484_v2 = vadd.f32 %v2177_v51, %v2176_v40  ;;  %v9082_v27 = vadd.f32 %v2305_v14, %v2304_v4  ;;  %v13893_v35 = vld [vmem:[#allocation69_spill] sm:$0xff]  ;;  %v13894_v51 = vld [vmem:[#allocation78_spill] sm:$0xff]  ;;  %v13895_v53 = vld [vmem:[#allocation71_spill] sm:$0xff] }
 0x21b   :  { %v1670_v22 = vpop.f32.mrf.mxu1  ;;  %13890 = vst [vmem:[#allocation12_spill] sm:$0xff] %v9080_v60  ;;  %v2243_v48 = vmul.f32 %v13892_v43, %v1314_v17  ;;  %v1318_v61 = vadd.f32 %v1317_v59, %v8011_v33  ;;  %1951 = vmatprep.mubr.bf16.mxu0 %v7450_v29  ;;  %v2178_v54 = vmul.f32 %v1665_v39, %v13893_v35 }
 0x21c   :  { %13891 = vst [vmem:[#allocation21_spill] sm:$0xff] %v9082_v27  ;;  %v1671_v63 = vadd.f32 %v1670_v22, %v8013_v34  ;;  %v2307_v55 = vmul.f32 %v1667_v20, %v1314_v17  ;;  %v1319_v40 = vpop.f32.mrf.mxu0  ;;  %v2179_v47 = vmul.f32 %v1667_v20, %v13895_v53  ;;  %4219 = vmatpush2.bf16.xpose.msra.mxu1 %v6635_v30  ;;  %v13898_v17 = vld [vmem:[#allocation75_spill] sm:$0xff]  ;;  %v13900_v53 = vld [vmem:[#allocation74_spill] sm:$0xff]  ;;  %v13901_v30 = vld [vmem:[#allocation76_spill] sm:$0xff] }
 0x21d   :  { %2392 = vadd.xlane.f32.xlu1 %v13894_v51  ;;  %2485 = vadd.xlane.f32.xlu0 %v2484_v2  ;;  %v1672_v4 = vpop.f32.mrf.mxu1  ;;  %v1320_v59 = vadd.f32 %v1319_v40, %v8020_v36  ;;  %v9095_v25 = vadd.f32 %v2243_v48, %v2242_v24  ;;  %v2244_v35 = vmul.f32 %v13898_v17, %v1318_v61  ;;  %v13899_v2 = vld [vmem:[#allocation77_spill] sm:$0xff] }
 0x21e   :  { %v2308_v14 = vmul.f32 %v1671_v63, %v1318_v61  ;;  %v1673_v22 = vadd.f32 %v1672_v4, %v8022_v37  ;;  %v1321_v43 = vpop.f32.mrf.mxu0  ;;  %v2487_v29 = vadd.f32 %v2179_v47, %v2178_v54  ;;  %v9097_v39 = vadd.f32 %v2307_v55, %v2306_v10 }
 0x21f   :  { %v1674_v27 = vpop.f32.mrf.mxu1  ;;  %13896 = vst [vmem:[#allocation14_spill] sm:$0xff] %v9095_v25  ;;  %v2245_v51 = vmul.f32 %v13899_v2, %v1320_v59  ;;  %v1322_v60 = vadd.f32 %v1321_v43, %v8011_v33  ;;  %v2180_v40 = vmul.f32 %v1671_v63, %v13900_v53  ;;  %v13916_v25 = vld [vmem:[#allocation93_spill] sm:$0xff] }
 0x220   :  { %13897 = vst [vmem:[#allocation18_spill] sm:$0xff] %v9097_v39  ;;  %v1675_v20 = vadd.f32 %v1674_v27, %v8013_v34  ;;  %v2181_v1 = vmul.f32 %v1673_v22, %v13901_v30  ;;  %v2309_v4 = vmul.f32 %v1673_v22, %v1320_v59  ;;  %v1323_v24 = vpop.f32.mrf.mxu0  ;;  %v7451_v27 = vld [vmem:[%s13187_s0 + $0x140] ss:$8 sps:$4 sm:$0xff]   ;;  %v7452_v30 = vld [vmem:[%s13187_s0 + $0x154] ss:$8 sps:$4 sm:$0xff]  }
 0x221   :  { %2488 = vadd.xlane.f32.xlu1 %v2487_v29  ;;  %2395 = vadd.xlane.f32.xlu0 %v13902_v50  ;;  %v1676_v48 = vpop.f32.mrf.mxu1  ;;  %v1324_v54 = vadd.f32 %v1323_v24, %v8020_v36  ;;  %v9111_v43 = vadd.f32 %v2245_v51, %v2244_v35  ;;  %v13905_v50 = vld [vmem:[#allocation80_spill] sm:$0xff]  ;;  %v13906_v29 = vld [vmem:[#allocation82_spill] sm:$0xff]  ;;  %v13907_v24 = vld [vmem:[#allocation79_spill] sm:$0xff] }
 0x222   :  { %v2310_v10 = vmul.f32 %v1675_v20, %v1322_v60  ;;  %v1677_v61 = vadd.f32 %v1676_v48, %v8022_v37  ;;  %v1327_v55 = vpop.f32.mrf.mxu0  ;;  %1952 = vmatmul.mubr.bf16.gmra.mxu0 %v7451_v27  ;;  %v2490_v63 = vadd.f32 %v2181_v1, %v2180_v40  ;;  %v9113_v59 = vadd.f32 %v2309_v4, %v2308_v14  ;;  %v13908_v35 = vld [vmem:[#allocation88_spill] sm:$0xff] }
 0x223   :  { %v1680_v47 = vpop.f32.mrf.mxu1  ;;  %13903 = vst [vmem:[#allocation20_spill] sm:$0xff] %v9111_v43  ;;  %v2246_v22 = vmul.f32 %v13905_v50, %v1322_v60  ;;  %v2247_v17 = vmul.f32 %v13906_v29, %v1324_v54  ;;  %v1328_v2 = vadd.f32 %v1327_v55, %v8011_v33  ;;  %1961 = vmatprep.mubr.bf16.mxu0 %v7452_v30  ;;  %v13909_v60 = vld [vmem:[#allocation81_spill] sm:$0xff] }
 0x224   :  { %13904 = vst [vmem:[#allocation17_spill] sm:$0xff] %v9113_v59  ;;  %v1681_v53 = vadd.f32 %v1680_v47, %v8013_v34  ;;  %v2182_v48 = vmul.f32 %v1675_v20, %v13907_v24  ;;  %v2311_v1 = vmul.f32 %v1677_v61, %v1324_v54  ;;  %v1329_v14 = vpop.f32.mrf.mxu0  ;;  %v2183_v40 = vmul.f32 %v1677_v61, %v13909_v60  ;;  %v13912_v20 = vld [vmem:[#allocation85_spill] sm:$0xff]  ;;  %v13913_v24 = vld [vmem:[#allocation87_spill] sm:$0xff]  ;;  %v13914_v60 = vld [vmem:[#allocation84_spill] sm:$0xff] }
 0x225   :  { %2398 = vadd.xlane.f32.xlu1 %v13908_v35  ;;  %2491 = vadd.xlane.f32.xlu0 %v2490_v63  ;;  %v1682_v51 = vpop.f32.mrf.mxu1  ;;  %v1330_v55 = vadd.f32 %v1329_v14, %v8020_v36  ;;  %v9127_v59 = vadd.f32 %v2247_v17, %v2246_v22  ;;  %v2248_v54 = vmul.f32 %v13912_v20, %v1328_v2  ;;  %v13915_v14 = vld [vmem:[#allocation86_spill] sm:$0xff] }
 0x226   :  { %v2312_v4 = vmul.f32 %v1681_v53, %v1328_v2  ;;  %v1683_v47 = vadd.f32 %v1682_v51, %v8022_v37  ;;  %v1331_v27 = vpop.f32.mrf.mxu0  ;;  %v2493_v29 = vadd.f32 %v2183_v40, %v2182_v48  ;;  %v9129_v30 = vadd.f32 %v2311_v1, %v2310_v10  ;;  %v13917_v10 = vld [vmem:[#allocation90_spill] sm:$0xff]  ;;  %v6638_v40 = vld [vmem:[%s13190_s3 + $0xb0] ss:$8 sps:$4 sm:$0xff]  }
 0x227   :  { %v1684_v50 = vpop.f32.mrf.mxu1  ;;  %13910 = vst [vmem:[#allocation19_spill] sm:$0xff] %v9127_v59  ;;  %v2249_v63 = vmul.f32 %v13913_v24, %v1330_v55  ;;  %v1332_v35 = vadd.f32 %v1331_v27, %v8011_v33  ;;  %v2184_v43 = vmul.f32 %v1681_v53, %v13914_v60  ;;  %v6640_v53 = vld [vmem:[%s13190_s3 + $0xb4] ss:$8 sps:$4 sm:$0xff]  }
 0x228   :  { %13911 = vst [vmem:[#allocation26_spill] sm:$0xff] %v9129_v30  ;;  %v1685_v61 = vadd.f32 %v1684_v50, %v8013_v34  ;;  %v2185_v39 = vmul.f32 %v1683_v47, %v13915_v14  ;;  %v2313_v51 = vmul.f32 %v1683_v47, %v1330_v55  ;;  %v1333_v22 = vpop.f32.mrf.mxu0  ;;  %v13920_v24 = vld [vmem:[#allocation92_spill] sm:$0xff]  ;;  %4220 = vmatprep.subr.bf16.mxu1 %v6640_v53  ;;  %v13930_v59 = vld [vmem:[#allocation103_spill] sm:$0xff] }
 0x229   :  { %2494 = vadd.xlane.f32.xlu1 %v2493_v29  ;;  %2401 = vadd.xlane.f32.xlu0 %v13916_v25  ;;  %v1686_v17 = vpop.f32.mrf.mxu1  ;;  %v2250_v48 = vmul.f32 %v13917_v10, %v1332_v35  ;;  %v1334_v2 = vadd.f32 %v1333_v22, %v8020_v36  ;;  %v7453_v25 = vld [vmem:[%s13187_s0 + $0x150] ss:$8 sps:$4 sm:$0xff]   ;;  %v9150_v29 = vadd.f32 %v2249_v63, %v2248_v54  ;;  %v7454_v22 = vld [vmem:[%s13187_s0 + $0x164] ss:$8 sps:$4 sm:$0xff]  }
 0x22a   :  { %v2314_v1 = vmul.f32 %v1685_v61, %v1332_v35  ;;  %v1687_v55 = vadd.f32 %v1686_v17, %v8022_v37  ;;  %v1337_v47 = vpop.f32.mrf.mxu0  ;;  %1962 = vmatmul.mubr.bf16.gmra.mxu0 %v7453_v25  ;;  %v2496_v50 = vadd.f32 %v2185_v39, %v2184_v43  ;;  %v9152_v20 = vadd.f32 %v2313_v51, %v2312_v4  ;;  %v13921_v17 = vld [vmem:[#allocation89_spill] sm:$0xff]  ;;  %v13922_v39 = vld [vmem:[#allocation98_spill] sm:$0xff]  ;;  %v13923_v54 = vld [vmem:[#allocation91_spill] sm:$0xff] }
 0x22b   :  { %v1690_v27 = vpop.f32.mrf.mxu1  ;;  %13918 = vst [vmem:[#allocation23_spill] sm:$0xff] %v9150_v29  ;;  %v2251_v35 = vmul.f32 %v13920_v24, %v1334_v2  ;;  %v1338_v60 = vadd.f32 %v1337_v47, %v8011_v33  ;;  %1971 = vmatprep.mubr.bf16.mxu0 %v7454_v22  ;;  %v2186_v10 = vmul.f32 %v1685_v61, %v13921_v17 }
 0x22c   :  { %13919 = vst [vmem:[#allocation25_spill] sm:$0xff] %v9152_v20  ;;  %v1691_v14 = vadd.f32 %v1690_v27, %v8013_v34  ;;  %v2315_v25 = vmul.f32 %v1687_v55, %v1334_v2  ;;  %v1339_v43 = vpop.f32.mrf.mxu0  ;;  %v2187_v63 = vmul.f32 %v1687_v55, %v13923_v54  ;;  %4221 = vmatpush2.bf16.xpose.msra.mxu1 %v6638_v40  ;;  %v13926_v2 = vld [vmem:[#allocation95_spill] sm:$0xff]  ;;  %v13928_v54 = vld [vmem:[#allocation94_spill] sm:$0xff]  ;;  %v13929_v40 = vld [vmem:[#allocation96_spill] sm:$0xff] }
 0x22d   :  { %2404 = vadd.xlane.f32.xlu1 %v13922_v39  ;;  %2497 = vadd.xlane.f32.xlu0 %v2496_v50  ;;  %v1692_v4 = vpop.f32.mrf.mxu1  ;;  %v1340_v47 = vadd.f32 %v1339_v43, %v8020_v36  ;;  %v9165_v53 = vadd.f32 %v2251_v35, %v2250_v48  ;;  %v2252_v17 = vmul.f32 %v13926_v2, %v1338_v60  ;;  %v13927_v50 = vld [vmem:[#allocation97_spill] sm:$0xff] }
 0x22e   :  { %v2316_v51 = vmul.f32 %v1691_v14, %v1338_v60  ;;  %v1693_v27 = vadd.f32 %v1692_v4, %v8022_v37  ;;  %v1341_v24 = vpop.f32.mrf.mxu0  ;;  %v2499_v22 = vadd.f32 %v2187_v63, %v2186_v10  ;;  %v9167_v61 = vadd.f32 %v2315_v25, %v2314_v1 }
 0x22f   :  { %v1694_v20 = vpop.f32.mrf.mxu1  ;;  %13924 = vst [vmem:[#allocation22_spill] sm:$0xff] %v9165_v53  ;;  %v2253_v39 = vmul.f32 %v13927_v50, %v1340_v47  ;;  %v1342_v29 = vadd.f32 %v1341_v24, %v8011_v33  ;;  %v2188_v43 = vmul.f32 %v1691_v14, %v13928_v54  ;;  %v13944_v53 = vld [vmem:[#allocation113_spill] sm:$0xff] }
 0x230   :  { %13925 = vst [vmem:[#allocation30_spill] sm:$0xff] %v9167_v61  ;;  %v1695_v55 = vadd.f32 %v1694_v20, %v8013_v34  ;;  %v2189_v30 = vmul.f32 %v1693_v27, %v13929_v40  ;;  %v2317_v4 = vmul.f32 %v1693_v27, %v1340_v47  ;;  %v1343_v48 = vpop.f32.mrf.mxu0  ;;  %v7455_v20 = vld [vmem:[%s13187_s0 + $0x160] ss:$8 sps:$4 sm:$0xff]   ;;  %v7456_v40 = vld [vmem:[%s13187_s0 + $0x174] ss:$8 sps:$4 sm:$0xff]  }
 0x231   :  { %2500 = vadd.xlane.f32.xlu1 %v2499_v22  ;;  %2407 = vadd.xlane.f32.xlu0 %v13930_v59  ;;  %v1696_v35 = vpop.f32.mrf.mxu1  ;;  %v1344_v10 = vadd.f32 %v1343_v48, %v8020_v36  ;;  %v9181_v24 = vadd.f32 %v2253_v39, %v2252_v17  ;;  %v13933_v59 = vld [vmem:[#allocation100_spill] sm:$0xff]  ;;  %v13934_v22 = vld [vmem:[#allocation102_spill] sm:$0xff]  ;;  %v13935_v48 = vld [vmem:[#allocation99_spill] sm:$0xff] }
 0x232   :  { %v2318_v1 = vmul.f32 %v1695_v55, %v1342_v29  ;;  %v1697_v60 = vadd.f32 %v1696_v35, %v8022_v37  ;;  %v1347_v25 = vpop.f32.mrf.mxu0  ;;  %1972 = vmatmul.mubr.bf16.gmra.mxu0 %v7455_v20  ;;  %v2502_v14 = vadd.f32 %v2189_v30, %v2188_v43  ;;  %v9183_v47 = vadd.f32 %v2317_v4, %v2316_v51  ;;  %v13936_v17 = vld [vmem:[#allocation108_spill] sm:$0xff] }
 0x233   :  { %v1700_v63 = vpop.f32.mrf.mxu1  ;;  %13931 = vst [vmem:[#allocation24_spill] sm:$0xff] %v9181_v24  ;;  %v2254_v27 = vmul.f32 %v13933_v59, %v1342_v29  ;;  %v2255_v2 = vmul.f32 %v13934_v22, %v1344_v10  ;;  %v1348_v50 = vadd.f32 %v1347_v25, %v8011_v33  ;;  %1981 = vmatprep.mubr.bf16.mxu0 %v7456_v40  ;;  %v13937_v29 = vld [vmem:[#allocation101_spill] sm:$0xff] }
 0x234   :  { %13932 = vst [vmem:[#allocation28_spill] sm:$0xff] %v9183_v47  ;;  %v1701_v54 = vadd.f32 %v1700_v63, %v8013_v34  ;;  %v2190_v35 = vmul.f32 %v1695_v55, %v13935_v48  ;;  %v2319_v30 = vmul.f32 %v1697_v60, %v1344_v10  ;;  %v1349_v51 = vpop.f32.mrf.mxu0  ;;  %v2191_v43 = vmul.f32 %v1697_v60, %v13937_v29  ;;  %v13940_v55 = vld [vmem:[#allocation105_spill] sm:$0xff]  ;;  %v13941_v48 = vld [vmem:[#allocation107_spill] sm:$0xff]  ;;  %v13942_v29 = vld [vmem:[#allocation104_spill] sm:$0xff] }
 0x235   :  { %2410 = vadd.xlane.f32.xlu1 %v13936_v17  ;;  %2503 = vadd.xlane.f32.xlu0 %v2502_v14  ;;  %v1702_v39 = vpop.f32.mrf.mxu1  ;;  %v1350_v25 = vadd.f32 %v1349_v51, %v8020_v36  ;;  %v9197_v47 = vadd.f32 %v2255_v2, %v2254_v27  ;;  %v2256_v10 = vmul.f32 %v13940_v55, %v1348_v50  ;;  %v13943_v51 = vld [vmem:[#allocation106_spill] sm:$0xff] }
 0x236   :  { %v2320_v4 = vmul.f32 %v1701_v54, %v1348_v50  ;;  %v1703_v63 = vadd.f32 %v1702_v39, %v8022_v37  ;;  %v1351_v20 = vpop.f32.mrf.mxu0  ;;  %v2505_v22 = vadd.f32 %v2191_v43, %v2190_v35  ;;  %v9199_v40 = vadd.f32 %v2319_v30, %v2318_v1  ;;  %v13945_v1 = vld [vmem:[#allocation110_spill] sm:$0xff] }
 0x237   :  { %v1704_v59 = vpop.f32.mrf.mxu1  ;;  %13938 = vst [vmem:[#allocation27_spill] sm:$0xff] %v9197_v47  ;;  %v2257_v14 = vmul.f32 %v13941_v48, %v1350_v25  ;;  %v1352_v17 = vadd.f32 %v1351_v20, %v8011_v33  ;;  %v2192_v24 = vmul.f32 %v1701_v54, %v13942_v29  ;;  %v6641_v43 = vld [vmem:[%s13190_s3 + $0xa0] ss:$8 sps:$4 sm:$0xff]   ;;  %v6643_v54 = vld [vmem:[%s13190_s3 + $0xa4] ss:$8 sps:$4 sm:$0xff]   ;;  %v13948_v48 = vld [vmem:[#allocation112_spill] sm:$0xff] }
 0x238   :  { %13939 = vst [vmem:[#allocation29_spill] sm:$0xff] %v9199_v40  ;;  %v1705_v60 = vadd.f32 %v1704_v59, %v8013_v34  ;;  %v2193_v61 = vmul.f32 %v1703_v63, %v13943_v51  ;;  %v2321_v39 = vmul.f32 %v1703_v63, %v1350_v25  ;;  %v1353_v27 = vpop.f32.mrf.mxu0  ;;  %4222 = vmatprep.subr.bf16.mxu1 %v6643_v54  ;;  %v13958_v47 = vld [vmem:[#allocation123_spill] sm:$0xff] }
 0x239   :  { %2506 = vadd.xlane.f32.xlu1 %v2505_v22  ;;  %2413 = vadd.xlane.f32.xlu0 %v13944_v53  ;;  %v1706_v2 = vpop.f32.mrf.mxu1  ;;  %v2258_v35 = vmul.f32 %v13945_v1, %v1352_v17  ;;  %v1354_v50 = vadd.f32 %v1353_v27, %v8020_v36  ;;  %v7457_v53 = vld [vmem:[%s13187_s0 + $0x170] ss:$8 sps:$4 sm:$0xff]   ;;  %v9220_v22 = vadd.f32 %v2257_v14, %v2256_v10  ;;  %v7458_v27 = vld [vmem:[%s13187_s0 + $0x184] ss:$8 sps:$4 sm:$0xff]  }
 0x23a   :  { %v2322_v30 = vmul.f32 %v1705_v60, %v1352_v17  ;;  %v1707_v25 = vadd.f32 %v1706_v2, %v8022_v37  ;;  %v1357_v63 = vpop.f32.mrf.mxu0  ;;  %1982 = vmatmul.mubr.bf16.gmra.mxu0 %v7457_v53  ;;  %v2508_v59 = vadd.f32 %v2193_v61, %v2192_v24  ;;  %v9222_v55 = vadd.f32 %v2321_v39, %v2320_v4  ;;  %v13949_v2 = vld [vmem:[#allocation109_spill] sm:$0xff]  ;;  %v13950_v61 = vld [vmem:[#allocation118_spill] sm:$0xff]  ;;  %v13951_v10 = vld [vmem:[#allocation111_spill] sm:$0xff] }
 0x23b   :  { %v1710_v20 = vpop.f32.mrf.mxu1  ;;  %13946 = vst [vmem:[#allocation35_spill] sm:$0xff] %v9220_v22  ;;  %v2259_v17 = vmul.f32 %v13948_v48, %v1354_v50  ;;  %v1358_v29 = vadd.f32 %v1357_v63, %v8011_v33  ;;  %1991 = vmatprep.mubr.bf16.mxu0 %v7458_v27  ;;  %v2194_v1 = vmul.f32 %v1705_v60, %v13949_v2 }
 0x23c   :  { %13947 = vst [vmem:[#allocation32_spill] sm:$0xff] %v9222_v55  ;;  %v1711_v51 = vadd.f32 %v1710_v20, %v8013_v34  ;;  %v2323_v53 = vmul.f32 %v1707_v25, %v1354_v50  ;;  %v1359_v24 = vpop.f32.mrf.mxu0  ;;  %v2195_v14 = vmul.f32 %v1707_v25, %v13951_v10  ;;  %4223 = vmatpush2.bf16.xpose.msra.mxu1 %v6641_v43  ;;  %v13954_v50 = vld [vmem:[#allocation115_spill] sm:$0xff]  ;;  %v13956_v10 = vld [vmem:[#allocation114_spill] sm:$0xff]  ;;  %v13957_v43 = vld [vmem:[#allocation116_spill] sm:$0xff] }
 0x23d   :  { %2416 = vadd.xlane.f32.xlu1 %v13950_v61  ;;  %2509 = vadd.xlane.f32.xlu0 %v2508_v59  ;;  %v1712_v4 = vpop.f32.mrf.mxu1  ;;  %v1360_v63 = vadd.f32 %v1359_v24, %v8020_v36  ;;  %v9235_v54 = vadd.f32 %v2259_v17, %v2258_v35  ;;  %v2260_v2 = vmul.f32 %v13954_v50, %v1358_v29  ;;  %v13955_v59 = vld [vmem:[#allocation117_spill] sm:$0xff] }
 0x23e   :  { %v2324_v39 = vmul.f32 %v1711_v51, %v1358_v29  ;;  %v1713_v20 = vadd.f32 %v1712_v4, %v8022_v37  ;;  %v1361_v48 = vpop.f32.mrf.mxu0  ;;  %v2511_v27 = vadd.f32 %v2195_v14, %v2194_v1  ;;  %v9237_v60 = vadd.f32 %v2323_v53, %v2322_v30 }
 0x23f   :  { %v1714_v55 = vpop.f32.mrf.mxu1  ;;  %13952 = vst [vmem:[#allocation34_spill] sm:$0xff] %v9235_v54  ;;  %v2261_v61 = vmul.f32 %v13955_v59, %v1360_v63  ;;  %v1362_v22 = vadd.f32 %v1361_v48, %v8011_v33  ;;  %v2196_v24 = vmul.f32 %v1711_v51, %v13956_v10  ;;  %v7459_v33 = vld [vmem:[%s13187_s0 + $0x180] ss:$8 sps:$4 sm:$0xff]   ;;  %v13963_v48 = vld [vmem:[#allocation119_spill] sm:$0xff] }
 0x240   :  { %13953 = vst [vmem:[#allocation31_spill] sm:$0xff] %v9237_v60  ;;  %v1715_v25 = vadd.f32 %v1714_v55, %v8013_v34  ;;  %v2197_v40 = vmul.f32 %v1713_v20, %v13957_v43  ;;  %v2325_v4 = vmul.f32 %v1713_v20, %v1360_v63  ;;  %v1363_v35 = vpop.f32.mrf.mxu0  ;;  %v13962_v63 = vld [vmem:[#allocation122_spill] sm:$0xff]  ;;  %v7461_v43 = vld [vmem:[%s13187_s0 + $0x190] ss:$8 sps:$4 sm:$0xff]  }
 0x241   :  { %2512 = vadd.xlane.f32.xlu1 %v2511_v27  ;;  %2419 = vadd.xlane.f32.xlu0 %v13958_v47  ;;  %v1716_v17 = vpop.f32.mrf.mxu1  ;;  %v1364_v1 = vadd.f32 %v1363_v35, %v8020_v36  ;;  %v9253_v55 = vadd.f32 %v2261_v61, %v2260_v2  ;;  %v13961_v47 = vld [vmem:[#allocation120_spill] sm:$0xff] }
 0x242   :  { %v2326_v30 = vmul.f32 %v1715_v25, %v1362_v22  ;;  %v1717_v29 = vadd.f32 %v1716_v17, %v8022_v37  ;;  %v9248_v53 = vpop.f32.mrf.mxu0  ;;  %1992 = vmatmul.mubr.bf16.gmra.mxu0 %v7459_v33  ;;  %v2514_v34 = vadd.f32 %v2197_v40, %v2196_v24  ;;  %v9255_v51 = vadd.f32 %v2325_v4, %v2324_v39  ;;  %v7460_v36 = vld [vmem:[%s13187_s0 + $0x194] ss:$8 sps:$4 sm:$0xff]   ;;  %v6644_v2 = vld [vmem:[%s13190_s3 + $0x90] ss:$8 sps:$4 sm:$0xff]   ;;  %v7462_v4 = vld [vmem:[%s13187_s0 + $0x1a4] ss:$8 sps:$4 sm:$0xff]   ;;  %v2330_v17 = vpop.xlane.xlu0 %2329 }
 0x243   :  { %13959 = vst [vmem:[#allocation33_spill] sm:$0xff] %v9253_v55  ;;  %v2262_v14 = vmul.f32 %v13961_v47, %v1362_v22  ;;  %v2263_v20 = vmul.f32 %v13962_v63, %v1364_v1  ;;  %2001 = vmatprep.mubr.bf16.mxu0 %v7460_v36  ;;  %v6646_v37 = vld [vmem:[%s13190_s3 + $0x94] ss:$8 sps:$4 sm:$0xff]   ;;  %v2198_v27 = vmul.f32 %v1715_v25, %v13963_v48  ;;  %v13964_v22 = vld [vmem:[#allocation121_spill] sm:$0xff] }
 0x244   :  { %13960 = vst [vmem:[#allocation37_spill] sm:$0xff] %v9255_v51  ;;  %v2327_v40 = vmul.f32 %v1717_v29, %v1364_v1  ;;  %v9267_v39 = vpop.f32.mrf.mxu0  ;;  %v2199_v50 = vmul.f32 %v1717_v29, %v13964_v22  ;;  %4224 = vmatprep.subr.bf16.mxu1 %v6646_v37  ;;  %v7463_v29 = vld [vmem:[%s13187_s0 + $0x1a0] ss:$8 sps:$4 sm:$0xff]  }
 0x245   :  { %2422 = vadd.xlane.f32.xlu1 %v8724_v15  ;;  %2515 = vadd.xlane.f32.xlu0 %v2514_v34  ;;  %v9273_v59 = vadd.f32 %v2263_v20, %v2262_v14  ;;  %v7464_v34 = vld [vmem:[%s13187_s0 + $0x1b4] ss:$8 sps:$4 sm:$0xff]  }
 0x246   :  { %v9275_v61 = vpop.f32.mrf.mxu0  ;;  %v2517_v10 = vadd.f32 %v2199_v50, %v2198_v27  ;;  %4225 = vmatpush2.bf16.xpose.msra.mxu1 %v6644_v2  ;;  %v9277_v25 = vadd.f32 %v2327_v40, %v2326_v30  ;;  %v6647_v30 = vld [vmem:[%s13190_s3 + $0x80] ss:$8 sps:$4 sm:$0xff]   ;;  %v2333_v33 = vpop.xlane.xlu0 %2332 }
 0x247   :  { %13965 = vst [vmem:[#allocation39_spill] sm:$0xff] %v9273_v59 }
 0x248   :  { %13966 = vst [vmem:[#allocation36_spill] sm:$0xff] %v9277_v25  ;;  %v9280_v15 = vpop.f32.mrf.mxu0 }
 0x249   :  { %2518 = vadd.xlane.f32.xlu1 %v2517_v10  ;;  %2521 = vadd.xlane.f32.xlu0 %v8737_v41  ;;  %v6649_v41 = vld [vmem:[%s13190_s3 + $0x84] ss:$8 sps:$4 sm:$0xff]  }
 0x24a   :  { %v9282_v24 = vpop.f32.mrf.mxu0  ;;  %2002 = vmatmul.mubr.bf16.gmra.mxu0 %v7461_v43  ;;  %4226 = vmatprep.subr.bf16.mxu1 %v6649_v41  ;;  %v2336_v63 = vpop.xlane.xlu0 %2335 }
 0x24b   :  { %2011 = vmatprep.mubr.bf16.mxu0 %v7462_v4 }
 0x24c   :  { %v9292_v35 = vpop.f32.mrf.mxu0 }
 0x24d   :  { %2524 = vadd.xlane.f32.xlu1 %v8752_v23  ;;  %2617 = vadd.xlane.f32.xlu0 %v8739_v6 }
 0x24e   :  { %v9300_v1 = vpop.f32.mrf.mxu0  ;;  %4227 = vmatpush2.bf16.xpose.msra.mxu1 %v6647_v30 }
 0x250   :  { %v9304_v6 = vpop.f32.mrf.mxu0 }
 0x251   :  { %2620 = vadd.xlane.f32.xlu1 %v8754_v57  ;;  %2527 = vadd.xlane.f32.xlu0 %v8767_v62 }
 0x252   :  { %v9306_v23 = vpop.f32.mrf.mxu0  ;;  %2012 = vmatmul.mubr.bf16.gmra.mxu0 %v7463_v29  ;;  %v2713_v29 = vmul.f32 0.0625, %v2333_v33 }
 0x253   :  { %2021 = vmatprep.mubr.bf16.mxu0 %v7464_v34 }
 0x254   :  { %v9316_v57 = vpop.f32.mrf.mxu0 }
 0x255   :  { %2530 = vadd.xlane.f32.xlu1 %v8790_v19  ;;  %2623 = vadd.xlane.f32.xlu0 %v8769_v5  ;;  %v2426_v62 = vpop.xlane.xlu1 %2425  ;;  %v7465_v19 = vld [vmem:[%s13187_s0 + $0x1b0] ss:$8 sps:$4 sm:$0xff]   ;;  %v7466_v5 = vld [vmem:[%s13187_s0 + $0x1c4] ss:$8 sps:$4 sm:$0xff]  }
 0x256   :  { %v9318_v47 = vpop.f32.mrf.mxu0  ;;  %v2744_v50 = vmul.f32 0.0625, %v2426_v62 }
 0x258   :  { %v9322_v14 = vpop.f32.mrf.mxu0 }
 0x259   :  { %2626 = vadd.xlane.f32.xlu1 %v8795_v26  ;;  %2533 = vadd.xlane.f32.xlu0 %v8806_v44  ;;  %v2429_v20 = vpop.xlane.xlu1 %2428 }
 0x25a   :  { %v9324_v36 = vpop.f32.mrf.mxu0  ;;  %2022 = vmatmul.mubr.bf16.gmra.mxu0 %v7465_v19  ;;  %v2745_v41 = vmul.f32 0.0625, %v2429_v20  ;;  %v7469_v20 = vld [vmem:[%s13187_s0 + $0x1d0] ss:$8 sps:$4 sm:$0xff]  }
 0x25b   :  { %2031 = vmatprep.mubr.bf16.mxu0 %v7466_v5 }
 0x25c   :  { %v9334_v26 = vpop.f32.mrf.mxu0  ;;  %v2841_v62 = vmax.f32 %v2713_v29, %v2745_v41 }
 0x25d   :  { %2536 = vadd.xlane.f32.xlu1 %v8822_v7  ;;  %2629 = vadd.xlane.f32.xlu0 %v8814_v0  ;;  %v2339_v44 = vpop.xlane.xlu1 %2338  ;;  %v2432_v37 = vpop.xlane.xlu0 %2431  ;;  %v7467_v0 = vld [vmem:[%s13187_s0 + $0x1c0] ss:$8 sps:$4 sm:$0xff]   ;;  %v7468_v7 = vld [vmem:[%s13187_s0 + $0x1d4] ss:$8 sps:$4 sm:$0xff]  }
 0x25e   :  { %v9336_v48 = vpop.f32.mrf.mxu0  ;;  %v2746_v19 = vmul.f32 0.0625, %v2432_v37  ;;  %v2873_v25 = vsub.f32 %v2713_v29, %v2841_v62 }
 0x260   :  { %v9340_v27 = vpop.f32.mrf.mxu0 }
 0x261   :  { %2632 = vadd.xlane.f32.xlu1 %v8827_v9  ;;  %2539 = vadd.xlane.f32.xlu0 %v8837_v31  ;;  %v2435_v40 = vpop.xlane.xlu1 %2434  ;;  %v9342_v22 = vpop.xlane.xlu0 %2341  ;;  %v2712_v9 = vmul.f32 0.0625, %v2330_v17 }
 0x262   :  { %v9344_v2 = vpop.f32.mrf.mxu0  ;;  %2032 = vmatmul.mubr.bf16.gmra.mxu0 %v7467_v0  ;;  %v2747_v59 = vmul.f32 0.0625, %v2435_v40  ;;  %v7471_v40 = vld [vmem:[%s13187_s0 + $0x1e0] ss:$8 sps:$4 sm:$0xff]  }
 0x263   :  { %2041 = vmatprep.mubr.bf16.mxu0 %v7468_v7  ;;  %v2840_v4 = vmax.f32 %v2712_v9, %v2744_v50 }
 0x264   :  { %v9354_v31 = vpop.f32.mrf.mxu0 }
 0x265   :  { %2542 = vadd.xlane.f32.xlu1 %v8853_v45  ;;  %2635 = vadd.xlane.f32.xlu0 %v8839_v42  ;;  %v9356_v10 = vpop.xlane.xlu1 %2344  ;;  %v2438_v43 = vpop.xlane.xlu0 %2437  ;;  %v2872_v42 = vsub.f32 %v2712_v9, %v2840_v4  ;;  %v2968_v33 = vsub.f32 %v2744_v50, %v2840_v4  ;;  %v2969_v4 = vsub.f32 %v2745_v41, %v2841_v62 }
 0x266   :  { %v9358_v30 = vpop.f32.mrf.mxu0  ;;  %v2748_v62 = vmul.f32 0.0625, %v2438_v43 }
 0x267   :  { %v2904_v9 = vmul.f32 1.442695, %v2872_v42  ;;  %v3000_v50 = vmul.f32 1.442695, %v2968_v33  ;;  %v2906_v42 = vmul.f32 1.442695, %v2873_v25 }
 0x268   :  { %v9362_v34 = vpop.f32.mrf.mxu0 }
 0x269   :  { %2638 = vadd.xlane.f32.xlu1 %v8855_v3  ;;  %2545 = vadd.xlane.f32.xlu0 %v8869_v21  ;;  %v2441_v17 = vpop.xlane.xlu1 %2440  ;;  %v9364_v45 = vpop.xlane.xlu0 %2347  ;;  %v7470_v3 = vld [vmem:[%s13187_s0 + $0x1e4] ss:$8 sps:$4 sm:$0xff]   ;;  %v2714_v21 = vmul.f32 0.0625, %v2336_v63  ;;  %6650 = vpow2.f32 %v2904_v9 }
 0x26a   :  { %v9366_v5 = vpop.f32.mrf.mxu0  ;;  %2042 = vmatmul.mubr.bf16.gmra.mxu0 %v7469_v20  ;;  %6652 = vpow2.f32 %v3000_v50 }
 0x26b   :  { %2051 = vmatprep.mubr.bf16.mxu0 %v7470_v3  ;;  %v2842_v51 = vmax.f32 %v2714_v21, %v2746_v19  ;;  %6654 = vpow2.f32 %v2906_v42 }
 0x26c   :  { %v9376_v0 = vpop.f32.mrf.mxu0 }
 0x26d   :  { %2548 = vadd.xlane.f32.xlu1 %v8885_v12  ;;  %2641 = vadd.xlane.f32.xlu0 %v8871_v16  ;;  %v9378_v37 = vpop.xlane.xlu1 %2350  ;;  %v2444_v7 = vpop.xlane.xlu0 %2443  ;;  %v2715_v16 = vmul.f32 0.0625, %v2339_v44  ;;  %v2874_v29 = vsub.f32 %v2714_v21, %v2842_v51  ;;  %v7472_v44 = vld [vmem:[%s13187_s0 + $0x1f4] ss:$8 sps:$4 sm:$0xff]  }
 0x26e   :  { %v9380_v20 = vpop.f32.mrf.mxu0 }
 0x26f   :  { %v2843_v41 = vmax.f32 %v2715_v16, %v2747_v59  ;;  %v2908_v9 = vmul.f32 1.442695, %v2874_v29  ;;  %v2717_v29 = vmul.f32 0.0625, %v9356_v10 }
 0x270   :  { %v9384_v12 = vpop.f32.mrf.mxu0 }
 0x271   :  { %2644 = vadd.xlane.f32.xlu1 %v8887_v58  ;;  %2551 = vadd.xlane.f32.xlu0 %v8901_v46  ;;  %v9386_v63 = vpop.xlane.xlu1 %2446  ;;  %v9388_v3 = vpop.xlane.xlu0 %2353  ;;  %v3002_v58 = vmul.f32 1.442695, %v2969_v4  ;;  %v2970_v46 = vsub.f32 %v2746_v19, %v2842_v51  ;;  %v2875_v50 = vsub.f32 %v2715_v16, %v2843_v41  ;;  %v2716_v4 = vmul.f32 0.0625, %v9342_v22 }
 0x272   :  { %v9390_v55 = vpop.f32.mrf.mxu0  ;;  %2052 = vmatmul.mubr.bf16.gmra.mxu0 %v7471_v40  ;;  %v2971_v40 = vsub.f32 %v2747_v59, %v2843_v41  ;;  %v7473_v59 = vld [vmem:[%s13187_s0 + $0x1f0] ss:$8 sps:$4 sm:$0xff]  }
 0x273   :  { %2061 = vmatprep.mubr.bf16.mxu0 %v7472_v44  ;;  %6656 = vpow2.f32 %v3002_v58  ;;  %v3004_v19 = vmul.f32 1.442695, %v2970_v46  ;;  %v2844_v43 = vmax.f32 %v2716_v4, %v2748_v62 }
 0x274   :  { %v9400_v25 = vpop.f32.mrf.mxu0  ;;  %6658 = vpow2.f32 %v2908_v9  ;;  %v3006_v58 = vmul.f32 1.442695, %v2971_v40  ;;  %v9432_v9 = vmul.f32 0.0625, %v2444_v7  ;;  %v2718_v7 = vmul.f32 0.0625, %v9364_v45 }
 0x275   :  { %2554 = vadd.xlane.f32.xlu1 %v8917_v38  ;;  %2647 = vadd.xlane.f32.xlu0 %v8903_v13  ;;  %v9402_v33 = vpop.xlane.xlu1 %2356  ;;  %v9404_v21 = vpop.xlane.xlu0 %2449  ;;  %v9409_v38 = vmul.f32 0.0625, %v2441_v17  ;;  %6660 = vpow2.f32 %v3004_v19  ;;  %v2910_v17 = vmul.f32 1.442695, %v2875_v50  ;;  %v2876_v41 = vsub.f32 %v2716_v4, %v2844_v43 }
 0x276   :  { %v9406_v51 = vpop.f32.mrf.mxu0  ;;  %v2972_v54 = vsub.f32 %v2748_v62, %v2844_v43  ;;  %v9440_v19 = vpop.eup %6650  ;;  %v9453_v62 = vmul.f32 0.0625, %v9386_v63 }
 0x277   :  { %v2845_v46 = vmax.f32 %v2717_v29, %v9409_v38  ;;  %6662 = vpow2.f32 %v2910_v17  ;;  %v9450_v4 = vpop.eup %6652 }
 0x278   :  { %v9413_v13 = vpop.f32.mrf.mxu0  ;;  %6664 = vpow2.f32 %v3006_v58  ;;  %v3008_v45 = vmul.f32 1.442695, %v2972_v54 }
 0x279   :  { %2650 = vadd.xlane.f32.xlu1 %v8919_v32  ;;  %2557 = vadd.xlane.f32.xlu0 %v8940_v56  ;;  %v9415_v44 = vpop.xlane.xlu1 %2452  ;;  %v9417_v42 = vpop.xlane.xlu0 %2359  ;;  %v13967_v32 = vld [vmem:[#allocation5_spill] sm:$0xff]  ;;  %v2877_v40 = vsub.f32 %v2717_v29, %v2845_v46  ;;  %v2973_v58 = vsub.f32 %v9409_v38, %v2845_v46  ;;  %v2719_v29 = vmul.f32 0.0625, %v9378_v37 }
 0x27a   :  { %v9420_v16 = vpop.f32.mrf.mxu0  ;;  %2062 = vmatmul.mubr.bf16.gmra.mxu0 %v7473_v59  ;;  %v201_v22 = vsub.s32 4, %v13967_v32  ;;  %v205_v56 = vsub.s32 5, %v13967_v32 }
 0x27b   :  { %v2914_v46 = vmul.f32 1.442695, %v2877_v40 }
 0x27c   :  { %v9430_v10 = vpop.f32.mrf.mxu0 }
 0x27d   :  { %2560 = vadd.xlane.f32.xlu1 %v8955_v18  ;;  %2653 = vadd.xlane.f32.xlu0 %v8942_v49  ;;  %v9434_v60 = vpop.xlane.xlu1 %2362  ;;  %v9436_v59 = vpop.xlane.xlu0 %2455  ;;  %v7474_v18 = vld [vmem:[%s13189_s2] sm:$0x3f] }
 0x27e   :  { %v9438_v32 = vpop.f32.mrf.mxu0  ;;  %v9445_v50 = vrot.slane %v7474_v18, %v201_v22  ;;  %v9447_v49 = vrot.slane %v7474_v18, %v205_v56  ;;  %v2912_v22 = vmul.f32 1.442695, %v2876_v41  ;;  %v2846_v56 = vmax.f32 %v2718_v7, %v9432_v9 }
 0x27f   :  { %13968 = vst [vmem:[#allocation38_spill] sm:$0xff] %v9438_v32  ;;  %v9468_v32 = vpop.eup %6654  ;;  %v3064_v41 = vadd.f32 %v9450_v4, %v9440_v19 }
 0x280   :  { %v9457_v43 = vpop.f32.mrf.mxu0  ;;  %v9480_v54 = vpop.eup %6656  ;;  %v9484_v37 = vadd.f32 %v9275_v61, %v9445_v50  ;;  %v9488_v38 = vadd.f32 %v9280_v15, %v9447_v49  ;;  %6666 = vpow2.f32 %v2912_v22  ;;  %v2878_v61 = vsub.f32 %v2718_v7, %v2846_v56 }
 0x281   :  { %2656 = vadd.xlane.f32.xlu1 %v8957_v11  ;;  %2563 = vadd.xlane.f32.xlu0 %v8971_v28  ;;  %v9460_v18 = vpop.xlane.xlu1 %2458  ;;  %v9462_v17 = vpop.xlane.xlu0 %2365  ;;  %v9472_v11 = vadd.f32 %v9248_v53, %v9445_v50  ;;  %v9476_v28 = vadd.f32 %v9267_v39, %v9447_v49  ;;  %v2847_v53 = vmax.f32 %v2719_v29, %v9453_v62  ;;  %6668 = vpow2.f32 %v3008_v45 }
 0x282   :  { %v9466_v63 = vpop.f32.mrf.mxu0  ;;  %13971 = vst [vmem:[#allocation43_spill] sm:$0xff] %v9484_v37  ;;  %13972 = vst [vmem:[#allocation40_spill] sm:$0xff] %v9488_v38  ;;  %v9500_v37 = vmul.f32 0.0625, %v9404_v21  ;;  %v2974_v38 = vsub.f32 %v9432_v9, %v2846_v56  ;;  %v9517_v21 = vadd.f32 %v9300_v1, %v9445_v50  ;;  %v3065_v7 = vadd.f32 %v9480_v54, %v9468_v32  ;;  %v13979_v1 = vld [vmem:[#allocation11_spill] sm:$0xff] }
 0x283   :  { %13969 = vst [vmem:[#allocation44_spill] sm:$0xff] %v9472_v11  ;;  %13970 = vst [vmem:[#allocation41_spill] sm:$0xff] %v9476_v28  ;;  %v9497_v28 = vadd.f32 %v9282_v24, %v9445_v50  ;;  %v9513_v24 = vpop.eup %6658  ;;  %v2720_v22 = vmul.f32 0.0625, %v9388_v3  ;;  %6670 = vrcp.f32 %v3064_v41  ;;  %v9526_v45 = vadd.f32 %v9304_v6, %v9447_v49 }
 0x284   :  { %v9493_v39 = vpop.f32.mrf.mxu0  ;;  %13976 = vst [vmem:[#allocation45_spill] sm:$0xff] %v9517_v21  ;;  %v9530_v9 = vadd.f32 %v9306_v23, %v9445_v50  ;;  %6672 = vpow2.f32 %v2914_v46  ;;  %v2879_v56 = vsub.f32 %v2719_v29, %v2847_v53  ;;  %v2916_v3 = vmul.f32 1.442695, %v2878_v61 }
 0x285   :  { %2566 = vadd.xlane.f32.xlu1 %v8987_v52  ;;  %2659 = vadd.xlane.f32.xlu0 %v8973_v8  ;;  %13973 = vst [vmem:[#allocation42_spill] sm:$0xff] %v9493_v39  ;;  %13974 = vst [vmem:[#allocation46_spill] sm:$0xff] %v9497_v28  ;;  %v9502_v15 = vpop.xlane.xlu1 %2368  ;;  %v9504_v40 = vpop.xlane.xlu0 %2461  ;;  %v9508_v52 = vadd.f32 %v9292_v35, %v9447_v49  ;;  %v3010_v8 = vmul.f32 1.442695, %v2973_v58  ;;  %v13980_v58 = vld [vmem:[#allocation6_spill] sm:$0xff]  ;;  %v2975_v41 = vsub.f32 %v9453_v62, %v2847_v53 }
 0x286   :  { %v9511_v39 = vpop.f32.mrf.mxu0  ;;  %v9522_v35 = vpop.eup %6660  ;;  %13977 = vst [vmem:[#allocation47_spill] sm:$0xff] %v9526_v45  ;;  %13978 = vst [vmem:[#allocation53_spill] sm:$0xff] %v9530_v9  ;;  %v9539_v6 = vmul.f32 0.0625, %v9415_v44  ;;  %v9547_v29 = vadd.f32 %v9316_v57, %v9447_v49  ;;  %v9551_v46 = vadd.f32 %v9318_v47, %v9445_v50  ;;  %v3012_v61 = vmul.f32 1.442695, %v2974_v38 }
 0x287   :  { %13975 = vst [vmem:[#allocation48_spill] sm:$0xff] %v9508_v52  ;;  %v2848_v52 = vmax.f32 %v2720_v22, %v9500_v37  ;;  %6674 = vpow2.f32 %v3010_v8  ;;  %v9557_v44 = vadd.f32 %v9322_v14, %v9447_v49  ;;  %v3066_v53 = vadd.f32 %v9522_v35, %v9513_v24  ;;  %v9562_v57 = vpop.eup %6662 }
 0x288   :  { %v9534_v21 = vpop.f32.mrf.mxu0  ;;  %13981 = vst [vmem:[#allocation50_spill] sm:$0xff] %v9547_v29  ;;  %13982 = vst [vmem:[#allocation52_spill] sm:$0xff] %v9551_v46  ;;  %6676 = vrcp.f32 %v3065_v7  ;;  %v9566_v47 = vadd.f32 %v9324_v36, %v9445_v50  ;;  %v9570_v38 = vadd.f32 %v9334_v26, %v9447_v49  ;;  %v2918_v8 = vmul.f32 1.442695, %v2879_v56  ;;  %v9579_v7 = vpop.eup %6664 }
 0x289   :  { %2662 = vadd.xlane.f32.xlu1 %v13979_v1  ;;  %2569 = vadd.xlane.f32.xlu0 %v13980_v58  ;;  %v9541_v45 = vpop.xlane.xlu1 %2464  ;;  %v9543_v23 = vpop.xlane.xlu0 %2371  ;;  %13983 = vst [vmem:[#allocation49_spill] sm:$0xff] %v9557_v44  ;;  %v2721_v1 = vmul.f32 0.0625, %v9402_v33  ;;  %v9573_v14 = vmul.f32 0.0625, %v9436_v59  ;;  %v13986_v58 = vld [vmem:[#allocation10_spill] sm:$0xff]  ;;  %v13987_v44 = vld [vmem:[#allocation8_spill] sm:$0xff]  ;;  %6678 = vpow2.f32 %v2916_v3  ;;  %v2880_v36 = vsub.f32 %v2720_v22, %v2848_v52 }
 0x28a   :  { %v9553_v62 = vpop.f32.mrf.mxu0  ;;  %13984 = vst [vmem:[#allocation58_spill] sm:$0xff] %v9566_v47  ;;  %13985 = vst [vmem:[#allocation51_spill] sm:$0xff] %v9570_v38  ;;  %v3014_v46 = vmul.f32 1.442695, %v2975_v41  ;;  %v9588_v59 = vadd.f32 %v9336_v48, %v9445_v50  ;;  %6680 = vpow2.f32 %v3012_v61  ;;  %v2976_v56 = vsub.f32 %v9500_v37, %v2848_v52  ;;  %v13993_v52 = vld [vmem:[#allocation9_spill] sm:$0xff] }
 0x28b   :  { %v2849_v47 = vmax.f32 %v2721_v1, %v9539_v6  ;;  %v9596_v22 = vadd.f32 %v9340_v27, %v9447_v49  ;;  %v9600_v3 = vadd.f32 %v9344_v2, %v9445_v50  ;;  %v9603_v41 = vmul.f32 0.0625, %v9460_v18  ;;  %v13992_v27 = vld [vmem:[#allocation7_spill] sm:$0xff] }
 0x28c   :  { %v9577_v33 = vpop.f32.mrf.mxu0  ;;  %13988 = vst [vmem:[#allocation55_spill] sm:$0xff] %v9588_v59  ;;  %6682 = vrcp.f32 %v3066_v53  ;;  %v3067_v48 = vadd.f32 %v9579_v7, %v9562_v57  ;;  %v2920_v18 = vmul.f32 1.442695, %v2880_v36  ;;  %v2723_v53 = vmul.f32 0.0625, %v9434_v60 }
 0x28d   :  { %2572 = vadd.xlane.f32.xlu1 %v13986_v58  ;;  %2665 = vadd.xlane.f32.xlu0 %v13987_v44  ;;  %v9582_v29 = vpop.xlane.xlu1 %2374  ;;  %v9584_v26 = vpop.xlane.xlu0 %2467  ;;  %v2722_v44 = vmul.f32 0.0625, %v9417_v42  ;;  %13989 = vst [vmem:[#allocation57_spill] sm:$0xff] %v9596_v22  ;;  %13990 = vst [vmem:[#allocation54_spill] sm:$0xff] %v9600_v3  ;;  %v9609_v42 = vadd.f32 %v9354_v31, %v9447_v49  ;;  %6684 = vpow2.f32 %v2918_v8 }
 0x28e   :  { %v9592_v58 = vpop.f32.mrf.mxu0  ;;  %6686 = vpow2.f32 %v3014_v46  ;;  %v2881_v61 = vsub.f32 %v2721_v1, %v2849_v47  ;;  %v9621_v31 = vpop.eup %6666  ;;  %v9625_v8 = vadd.f32 %v9358_v30, %v9445_v50  ;;  %v2977_v46 = vsub.f32 %v9539_v6, %v2849_v47 }
 0x28f   :  { %13991 = vst [vmem:[#allocation56_spill] sm:$0xff] %v9609_v42  ;;  %v2850_v37 = vmax.f32 %v2722_v44, %v9573_v14  ;;  %v9634_v60 = vpop.eup %6668  ;;  %v9638_v36 = vadd.f32 %v9366_v5, %v9445_v50  ;;  %v9642_v42 = vadd.f32 %v9376_v0, %v9447_v49  ;;  %v9646_v30 = vadd.f32 %v9380_v20, %v9445_v50  ;;  %v14002_v0 = vld [vmem:[#allocation16_spill] sm:$0xff] }
 0x290   :  { %v9614_v2 = vpop.f32.mrf.mxu0  ;;  %13994 = vst [vmem:[#allocation63_spill] sm:$0xff] %v9625_v8  ;;  %v9651_v6 = vadd.f32 %v9384_v12, %v9447_v49  ;;  %v9655_v47 = vadd.f32 %v9390_v55, %v9445_v50  ;;  %6688 = vrcp.f32 %v3067_v48  ;;  %v2922_v12 = vmul.f32 1.442695, %v2881_v61  ;;  %v14014_v8 = vld [vmem:[#allocation14_spill] sm:$0xff] }
 0x291   :  { %2668 = vadd.xlane.f32.xlu1 %v13992_v27  ;;  %2575 = vadd.xlane.f32.xlu0 %v13993_v52  ;;  %v9617_v3 = vpop.xlane.xlu1 %2470  ;;  %v9629_v27 = vadd.f32 %v9362_v34, %v9447_v49  ;;  %v3016_v52 = vmul.f32 1.442695, %v2976_v56  ;;  %13996 = vst [vmem:[#allocation62_spill] sm:$0xff] %v9638_v36  ;;  %13997 = vst [vmem:[#allocation59_spill] sm:$0xff] %v9642_v42  ;;  %v2851_v34 = vmax.f32 %v2723_v53, %v9603_v41  ;;  %v6671_v56 = vpop.eup %6670  ;;  %v14001_v36 = vld [vmem:[#allocation13_spill] sm:$0xff] }
 0x292   :  { %v9619_v22 = vpop.xlane.xlu0 %2377  ;;  %v9632_v1 = vpop.f32.mrf.mxu0  ;;  %13998 = vst [vmem:[#allocation68_spill] sm:$0xff] %v9646_v30  ;;  %13999 = vst [vmem:[#allocation61_spill] sm:$0xff] %v9651_v6  ;;  %v2882_v5 = vsub.f32 %v2722_v44, %v2850_v37  ;;  %v9665_v30 = vadd.f32 %v9400_v25, %v9447_v49  ;;  %6690 = vpow2.f32 %v2920_v18  ;;  %v2978_v6 = vsub.f32 %v9573_v14, %v2850_v37 }
 0x293   :  { %13995 = vst [vmem:[#allocation60_spill] sm:$0xff] %v9629_v27  ;;  %14000 = vst [vmem:[#allocation65_spill] sm:$0xff] %v9655_v47  ;;  %v9661_v20 = vpop.eup %6672  ;;  %6692 = vpow2.f32 %v3016_v52  ;;  %v9678_v48 = vadd.f32 %v9413_v13, %v9447_v49  ;;  %v3068_v14 = vadd.f32 %v9634_v60, %v9621_v31  ;;  %v9688_v37 = vadd.f32 %v9420_v16, %v9445_v50  ;;  %v14010_v47 = vld [vmem:[#allocation15_spill] sm:$0xff]  ;;  %v14011_v16 = vld [vmem:[#allocation12_spill] sm:$0xff] }
 0x294   :  { %v9659_v42 = vpop.f32.mrf.mxu0  ;;  %14003 = vst [vmem:[#allocation67_spill] sm:$0xff] %v9665_v30  ;;  %v9682_v18 = vpop.eup %6674  ;;  %v2883_v61 = vsub.f32 %v2723_v53, %v2851_v34  ;;  %v9695_v13 = vadd.f32 %v9430_v10, %v9447_v49  ;;  %v14008_v30 = vld [vmem:[#allocation38_spill] sm:$0xff]  ;;  %6694 = vpow2.f32 %v2922_v12 }
 0x295   :  { %2578 = vadd.xlane.f32.xlu1 %v14001_v36  ;;  %2671 = vadd.xlane.f32.xlu0 %v14002_v0  ;;  %v9668_v55 = vpop.xlane.xlu1 %2380  ;;  %v9674_v36 = vadd.f32 %v9406_v51, %v9445_v50  ;;  %14005 = vst [vmem:[#allocation66_spill] sm:$0xff] %v9678_v48  ;;  %v3018_v0 = vmul.f32 1.442695, %v2977_v46  ;;  %14006 = vst [vmem:[#allocation73_spill] sm:$0xff] %v9688_v37  ;;  %v9691_v51 = vmul.f32 0.0625, %v9504_v40  ;;  %v6677_v52 = vpop.eup %6676  ;;  %v2724_v37 = vmul.f32 0.0625, %v9462_v17 }
 0x296   :  { %v9670_v44 = vpop.xlane.xlu0 %2473  ;;  %v9680_v25 = vpop.f32.mrf.mxu0  ;;  %14007 = vst [vmem:[#allocation70_spill] sm:$0xff] %v9695_v13  ;;  %v2924_v46 = vmul.f32 1.442695, %v2882_v5  ;;  %v9699_v48 = vadd.f32 %v14008_v30, %v9445_v50  ;;  %v3020_v40 = vmul.f32 1.442695, %v2978_v6  ;;  %v3128_v5 = vmul.f32 %v6671_v56, %v9440_v19 }
 0x297   :  { %14004 = vst [vmem:[#allocation64_spill] sm:$0xff] %v9674_v36  ;;  %v2979_v36 = vsub.f32 %v9603_v41, %v2851_v34  ;;  %v9712_v30 = vpop.eup %6678  ;;  %v3069_v41 = vadd.f32 %v9682_v18, %v9661_v20  ;;  %6696 = vpow2.f32 %v3018_v0  ;;  %v9717_v34 = vmul.f32 0.0625, %v9541_v45 }
 0x298   :  { %14009 = vst [vmem:[#allocation72_spill] sm:$0xff] %v9699_v48  ;;  %v9704_v53 = vpop.f32.mrf.mxu0  ;;  %v9722_v6 = vmul.f32 %v6671_v56, %v9450_v4  ;;  %v9724_v17 = vpop.eup %6680  ;;  %v2926_v12 = vmul.f32 1.442695, %v2883_v61  ;;  %v3129_v19 = vmul.f32 %v6677_v52, %v9468_v32  ;;  %6698 = vrcp.f32 %v3068_v14  ;;  %v14015_v4 = vld [vmem:[#allocation21_spill] sm:$0xff] }
 0x299   :  { %2674 = vadd.xlane.f32.xlu1 %v14010_v47  ;;  %2581 = vadd.xlane.f32.xlu0 %v14011_v16  ;;  %v9707_v27 = vpop.xlane.xlu1 %2476  ;;  %v2852_v16 = vmax.f32 %v2724_v37, %v9691_v51  ;;  %v6683_v13 = vpop.eup %6682  ;;  %6700 = vpow2.f32 %v2924_v46  ;;  %v9730_v0 = vadd.f32 %v9457_v43, %v9447_v49  ;;  %v3022_v45 = vmul.f32 1.442695, %v2979_v36 }
 0x29a   :  { %v9709_v10 = vpop.xlane.xlu0 %2383  ;;  %v9719_v47 = vpop.f32.mrf.mxu0  ;;  %14012 = vst [vmem:[#allocation69_spill] sm:$0xff] %v9722_v6  ;;  %v2725_v48 = vmul.f32 0.0625, %v9502_v15  ;;  %6702 = vpow2.f32 %v3020_v40  ;;  %v9741_v32 = vadd.f32 %v9466_v63, %v9445_v50  ;;  %v9748_v36 = vmul.f32 %v3128_v5, %v9472_v11  ;;  %v14018_v15 = vld [vmem:[#allocation41_spill] sm:$0xff] }
 0x29b   :  { %14013 = vst [vmem:[#allocation78_spill] sm:$0xff] %v9730_v0  ;;  %v9737_v61 = vpop.eup %6684  ;;  %v9761_v63 = vmul.f32 0.0625, %v9584_v26  ;;  %v9766_v6 = vmul.f32 %v6677_v52, %v9480_v54  ;;  %6704 = vpow2.f32 %v2926_v12  ;;  %v2884_v11 = vsub.f32 %v2724_v37, %v2852_v16  ;;  %v14026_v54 = vld [vmem:[#allocation20_spill] sm:$0xff] }
 0x29c   :  { %v9735_v56 = vpop.f32.mrf.mxu0  ;;  %14016 = vst [vmem:[#allocation71_spill] sm:$0xff] %v9741_v32  ;;  %14017 = vst [vmem:[#allocation75_spill] sm:$0xff] %v9748_v36  ;;  %v9753_v46 = vpop.eup %6686  ;;  %v2853_v40 = vmax.f32 %v2725_v48, %v9717_v34  ;;  %v3130_v36 = vmul.f32 %v6683_v13, %v9513_v24  ;;  %6706 = vpow2.f32 %v3022_v45  ;;  %v9776_v26 = vmul.f32 0.0625, %v9543_v23  ;;  %v14028_v23 = vld [vmem:[#allocation40_spill] sm:$0xff] }
 0x29d   :  { %2584 = vadd.xlane.f32.xlu1 %v14014_v8  ;;  %2677 = vadd.xlane.f32.xlu0 %v14015_v4  ;;  %v9743_v14 = vpop.xlane.xlu1 %2386  ;;  %v9751_v8 = vmul.f32 %v3128_v5, %v14018_v15  ;;  %v14020_v4 = vld [vmem:[#allocation42_spill] sm:$0xff]  ;;  %14022 = vst [vmem:[#allocation76_spill] sm:$0xff] %v9766_v6  ;;  %v14023_v5 = vld [vmem:[#allocation43_spill] sm:$0xff]  ;;  %v6689_v37 = vpop.eup %6688  ;;  %v3071_v12 = vadd.f32 %v9753_v46, %v9737_v61  ;;  %6708 = vrcp.f32 %v3069_v41 }
 0x29e   :  { %v9745_v43 = vpop.xlane.xlu0 %2479  ;;  %v9757_v0 = vadd.f32 %v14020_v4, %v9447_v49  ;;  %v9763_v32 = vpop.f32.mrf.mxu0  ;;  %v9769_v15 = vmul.f32 %v3129_v19, %v14023_v5  ;;  %v3070_v4 = vadd.f32 %v9724_v17, %v9712_v30  ;;  %v9786_v24 = vadd.f32 %v9511_v39, %v9445_v50 }
 0x29f   :  { %14019 = vst [vmem:[#allocation77_spill] sm:$0xff] %v9751_v8  ;;  %v14025_v8 = vld [vmem:[#allocation18_spill] sm:$0xff]  ;;  %v9802_v5 = vadd.f32 %v9534_v21, %v9447_v49  ;;  %v2854_v39 = vmax.f32 %v9776_v26, %v9761_v63 }
 0x2a0   :  { %14021 = vst [vmem:[#allocation74_spill] sm:$0xff] %v9757_v0  ;;  %14024 = vst [vmem:[#allocation83_spill] sm:$0xff] %v9769_v15  ;;  %v2980_v0 = vsub.f32 %v9691_v51, %v2852_v16  ;;  %v9780_v52 = vpop.f32.mrf.mxu0  ;;  %v9793_v16 = vmul.f32 %v3129_v19, %v14028_v23  ;;  %v2885_v15 = vsub.f32 %v2725_v48, %v2853_v40  ;;  %v2928_v19 = vmul.f32 1.442695, %v2884_v11 }
 0x2a1   :  { %2680 = vadd.xlane.f32.xlu1 %v14025_v8  ;;  %2587 = vadd.xlane.f32.xlu0 %v14026_v54  ;;  %14027 = vst [vmem:[#allocation80_spill] sm:$0xff] %v9786_v24  ;;  %v9796_v8 = vmul.f32 %v6683_v13, %v9522_v35  ;;  %v9798_v54 = vpop.eup %6690  ;;  %14029 = vst [vmem:[#allocation82_spill] sm:$0xff] %v9802_v5  ;;  %v2981_v23 = vsub.f32 %v9717_v34, %v2853_v40  ;;  %v9812_v35 = vmul.f32 0.0625, %v9617_v3  ;;  %v14033_v5 = vld [vmem:[#allocation19_spill] sm:$0xff] }
 0x2a2   :  { %v9788_v45 = vpop.xlane.xlu1 %2482  ;;  %v9790_v51 = vpop.xlane.xlu0 %2389  ;;  %v9815_v13 = vmul.f32 %v3130_v36, %v9497_v28  ;;  %v3024_v21 = vmul.f32 1.442695, %v2980_v0  ;;  %v9819_v48 = vadd.f32 %v9553_v62, %v9445_v50  ;;  %v3131_v11 = vmul.f32 %v6689_v37, %v9562_v57 }
 0x2a3   :  { %v9806_v24 = vpop.f32.mrf.mxu0  ;;  %v9808_v6 = vpop.eup %6692  ;;  %6710 = vrcp.f32 %v3070_v4  ;;  %v9828_v3 = vadd.f32 %v9577_v33, %v9447_v49  ;;  %v2727_v34 = vmul.f32 0.0625, %v9582_v29  ;;  %v9832_v0 = vmul.f32 0.0625, %v9670_v44 }
 0x2a4   :  { %14030 = vst [vmem:[#allocation79_spill] sm:$0xff] %v9806_v24  ;;  %14031 = vst [vmem:[#allocation88_spill] sm:$0xff] %v9815_v13  ;;  %v14034_v24 = vld [vmem:[#allocation17_spill] sm:$0xff]  ;;  %v9841_v28 = vpop.eup %6694  ;;  %v3072_v57 = vadd.f32 %v9808_v6, %v9798_v54  ;;  %v2930_v4 = vmul.f32 1.442695, %v2885_v15  ;;  %v2886_v33 = vsub.f32 %v9776_v26, %v2854_v39  ;;  %v9849_v29 = vmul.f32 %v6689_v37, %v9579_v7  ;;  %v14041_v26 = vld [vmem:[#allocation26_spill] sm:$0xff] }
 0x2a5   :  { %14032 = vst [vmem:[#allocation81_spill] sm:$0xff] %v9819_v48  ;;  %2590 = vadd.xlane.f32.xlu1 %v14033_v5  ;;  %2683 = vadd.xlane.f32.xlu0 %v14034_v24  ;;  %v9823_v41 = vpop.f32.mrf.mxu0  ;;  %14036 = vst [vmem:[#allocation87_spill] sm:$0xff] %v9828_v3  ;;  %v14037_v5 = vld [vmem:[#allocation48_spill] sm:$0xff]  ;;  %v9851_v44 = vpop.eup %6696  ;;  %6712 = vpow2.f32 %v2928_v19  ;;  %v3026_v3 = vmul.f32 1.442695, %v2981_v23  ;;  %v2982_v13 = vsub.f32 %v9761_v63, %v2854_v39  ;;  %v14042_v7 = vld [vmem:[#allocation23_spill] sm:$0xff] }
 0x2a6   :  { %14035 = vst [vmem:[#allocation85_spill] sm:$0xff] %v9823_v41  ;;  %v9834_v62 = vpop.xlane.xlu1 %2392  ;;  %v9836_v40 = vpop.xlane.xlu0 %2485  ;;  %v9839_v24 = vmul.f32 %v3130_v36, %v14037_v5  ;;  %v2855_v36 = vmax.f32 %v2727_v34, %v9812_v35  ;;  %v2728_v5 = vmul.f32 0.0625, %v9619_v22  ;;  %6714 = vpow2.f32 %v3024_v21  ;;  %v14044_v19 = vld [vmem:[#allocation45_spill] sm:$0xff]  ;;  %v14046_v39 = vld [vmem:[#allocation47_spill] sm:$0xff] }
 0x2a7   :  { %v9846_v48 = vpop.f32.mrf.mxu0  ;;  %v6699_v41 = vpop.eup %6698  ;;  %v9858_v15 = vadd.f32 %v9592_v58, %v9445_v50  ;;  %v9865_v23 = vmul.f32 %v3131_v11, %v14044_v19  ;;  %v9871_v21 = vmul.f32 0.0625, %v9707_v27  ;;  %6716 = vrcp.f32 %v3071_v12 }
 0x2a8   :  { %14038 = vst [vmem:[#allocation84_spill] sm:$0xff] %v9839_v24  ;;  %14039 = vst [vmem:[#allocation86_spill] sm:$0xff] %v9846_v48  ;;  %v9867_v48 = vpop.eup %6700  ;;  %v2856_v22 = vmax.f32 %v2728_v5, %v9832_v0  ;;  %v3073_v19 = vadd.f32 %v9851_v44, %v9841_v28  ;;  %6718 = vpow2.f32 %v2930_v4  ;;  %v2887_v24 = vsub.f32 %v2727_v34, %v2855_v36 }
 0x2a9   :  { %14040 = vst [vmem:[#allocation93_spill] sm:$0xff] %v9858_v15  ;;  %2686 = vadd.xlane.f32.xlu1 %v14041_v26  ;;  %2593 = vadd.xlane.f32.xlu0 %v14042_v7  ;;  %v9862_v37 = vpop.f32.mrf.mxu0  ;;  %14045 = vst [vmem:[#allocation92_spill] sm:$0xff] %v9865_v23  ;;  %v9878_v26 = vmul.f32 %v3131_v11, %v14046_v39  ;;  %v9880_v7 = vpop.eup %6702  ;;  %v2932_v15 = vmul.f32 1.442695, %v2886_v33  ;;  %6720 = vpow2.f32 %v3026_v3  ;;  %v2729_v23 = vmul.f32 0.0625, %v9668_v55  ;;  %v14051_v33 = vld [vmem:[#allocation22_spill] sm:$0xff] }
 0x2aa   :  { %14043 = vst [vmem:[#allocation90_spill] sm:$0xff] %v9862_v37  ;;  %v9873_v63 = vpop.xlane.xlu1 %2488  ;;  %v9875_v58 = vpop.xlane.xlu0 %2395  ;;  %v9886_v37 = vadd.f32 %v9614_v2, %v9447_v49  ;;  %v3132_v11 = vmul.f32 %v6699_v41, %v9621_v31  ;;  %v3028_v39 = vmul.f32 1.442695, %v2982_v13  ;;  %v9897_v4 = vadd.f32 %v9632_v1, %v9445_v50  ;;  %v14052_v2 = vld [vmem:[#allocation25_spill] sm:$0xff] }
 0x2ab   :  { %14047 = vst [vmem:[#allocation89_spill] sm:$0xff] %v9878_v26  ;;  %v9888_v27 = vpop.f32.mrf.mxu0  ;;  %v9892_v12 = vpop.eup %6704  ;;  %v2983_v26 = vsub.f32 %v9812_v35, %v2855_v36  ;;  %v9904_v3 = vmul.f32 %v6699_v41, %v9634_v60  ;;  %v9910_v31 = vadd.f32 %v9880_v7, %v9867_v48  ;;  %v2888_v35 = vsub.f32 %v2728_v5, %v2856_v22 }
 0x2ac   :  { %14048 = vst [vmem:[#allocation98_spill] sm:$0xff] %v9886_v37  ;;  %14049 = vst [vmem:[#allocation91_spill] sm:$0xff] %v9888_v27  ;;  %v9906_v55 = vpop.eup %6706  ;;  %v2857_v13 = vmax.f32 %v2729_v23, %v9871_v21  ;;  %6722 = vrcp.f32 %v3072_v57  ;;  %v9919_v36 = vadd.f32 %v9659_v42, %v9447_v49  ;;  %v2984_v60 = vsub.f32 %v9832_v0, %v2856_v22  ;;  %v14058_v22 = vld [vmem:[#allocation30_spill] sm:$0xff] }
 0x2ad   :  { %14050 = vst [vmem:[#allocation95_spill] sm:$0xff] %v9897_v4  ;;  %2596 = vadd.xlane.f32.xlu1 %v14051_v33  ;;  %2689 = vadd.xlane.f32.xlu0 %v14052_v2  ;;  %v9901_v37 = vpop.f32.mrf.mxu0  ;;  %6724 = vpow2.f32 %v2932_v15  ;;  %v9923_v41 = vmul.f32 0.0625, %v9745_v43  ;;  %v6709_v5 = vpop.eup %6708  ;;  %v2934_v2 = vmul.f32 1.442695, %v2887_v24  ;;  %v9929_v4 = vadd.f32 %v9680_v25, %v9445_v50  ;;  %v14057_v15 = vld [vmem:[#allocation50_spill] sm:$0xff]  ;;  %v14059_v24 = vld [vmem:[#allocation24_spill] sm:$0xff] }
 0x2ae   :  { %14053 = vst [vmem:[#allocation97_spill] sm:$0xff] %v9901_v37  ;;  %v9913_v1 = vpop.xlane.xlu1 %2398  ;;  %v9915_v34 = vpop.xlane.xlu0 %2491  ;;  %14054 = vst [vmem:[#allocation94_spill] sm:$0xff] %v9919_v36  ;;  %v9932_v57 = vmul.f32 %v3132_v11, %v9530_v9  ;;  %v9935_v37 = vmul.f32 %v3132_v11, %v14057_v15  ;;  %v9939_v42 = vadd.f32 %v9906_v55, %v9892_v12  ;;  %6726 = vpow2.f32 %v3028_v39 }
 0x2af   :  { %v9925_v33 = vpop.f32.mrf.mxu0  ;;  %14056 = vst [vmem:[#allocation103_spill] sm:$0xff] %v9929_v4  ;;  %v3030_v43 = vmul.f32 1.442695, %v2983_v26  ;;  %v2730_v0 = vmul.f32 0.0625, %v9709_v10  ;;  %v2936_v9 = vmul.f32 1.442695, %v2888_v35  ;;  %v9948_v11 = vadd.f32 %v9704_v53, %v9447_v49 }
 0x2b0   :  { %14055 = vst [vmem:[#allocation96_spill] sm:$0xff] %v9925_v33  ;;  %v6711_v4 = vpop.eup %6710  ;;  %v2889_v15 = vsub.f32 %v2729_v23, %v2857_v13  ;;  %v9951_v36 = vmul.f32 0.0625, %v9788_v45  ;;  %v3032_v10 = vmul.f32 1.442695, %v2984_v60  ;;  %6728 = vrcp.f32 %v3073_v19  ;;  %v14071_v33 = vld [vmem:[#allocation49_spill] sm:$0xff] }
 0x2b1   :  { %2692 = vadd.xlane.f32.xlu1 %v14058_v22  ;;  %2599 = vadd.xlane.f32.xlu0 %v14059_v24  ;;  %v9944_v25 = vpop.f32.mrf.mxu0  ;;  %14061 = vst [vmem:[#allocation102_spill] sm:$0xff] %v9948_v11  ;;  %v2985_v22 = vsub.f32 %v9871_v21, %v2857_v13  ;;  %v2858_v24 = vmax.f32 %v2730_v0, %v9923_v41  ;;  %6730 = vpow2.f32 %v2934_v2  ;;  %v2731_v53 = vmul.f32 0.0625, %v9743_v14  ;;  %v14064_v21 = vld [vmem:[#allocation27_spill] sm:$0xff]  ;;  %v14065_v13 = vld [vmem:[#allocation28_spill] sm:$0xff] }
 0x2b2   :  { %14060 = vst [vmem:[#allocation100_spill] sm:$0xff] %v9944_v25  ;;  %v9953_v39 = vpop.xlane.xlu1 %2494  ;;  %v9955_v26 = vpop.xlane.xlu0 %2401  ;;  %v9963_v23 = vmul.f32 0.0625, %v9836_v40  ;;  %v3133_v45 = vmul.f32 %v6709_v5, %v9661_v20  ;;  %6732 = vpow2.f32 %v3030_v43  ;;  %v9970_v60 = vadd.f32 %v9719_v47, %v9445_v50 }
 0x2b3   :  { %v9959_v25 = vpop.f32.mrf.mxu0  ;;  %v9966_v35 = vpop.eup %6712  ;;  %v9977_v14 = vmul.f32 %v6709_v5, %v9682_v18  ;;  %v3134_v40 = vmul.f32 %v6711_v4, %v9712_v30  ;;  %6734 = vpow2.f32 %v2936_v9  ;;  %v2938_v20 = vmul.f32 1.442695, %v2889_v15 }
 0x2b4   :  { %14062 = vst [vmem:[#allocation99_spill] sm:$0xff] %v9959_v25  ;;  %14063 = vst [vmem:[#allocation108_spill] sm:$0xff] %v9970_v60  ;;  %v9980_v2 = vpop.eup %6714  ;;  %v2859_v43 = vmax.f32 %v2731_v53, %v9951_v36  ;;  %v2732_v47 = vmul.f32 0.0625, %v9790_v51  ;;  %6736 = vpow2.f32 %v3032_v10  ;;  %v2890_v18 = vsub.f32 %v2730_v0, %v2858_v24  ;;  %v14070_v60 = vld [vmem:[#allocation52_spill] sm:$0xff] }
 0x2b5   :  { %2602 = vadd.xlane.f32.xlu1 %v14064_v21  ;;  %2695 = vadd.xlane.f32.xlu0 %v14065_v13  ;;  %v9974_v19 = vpop.f32.mrf.mxu0  ;;  %14067 = vst [vmem:[#allocation105_spill] sm:$0xff] %v9980_v2  ;;  %v9988_v13 = vpop.eup %6716  ;;  %v9991_v5 = vmul.f32 0.0625, %v9873_v63  ;;  %v2986_v15 = vsub.f32 %v9923_v41, %v2858_v24  ;;  %v10000_v11 = vmul.f32 %v3133_v45, %v14070_v60  ;;  %v10016_v41 = vmul.f32 0.0625, %v9834_v62  ;;  %v14075_v24 = vld [vmem:[#allocation35_spill] sm:$0xff]  ;;  %v14078_v62 = vld [vmem:[#allocation58_spill] sm:$0xff] }
 0x2b6   :  { %14066 = vst [vmem:[#allocation101_spill] sm:$0xff] %v9974_v19  ;;  %v9984_v25 = vpop.xlane.xlu1 %2404  ;;  %v9986_v21 = vpop.xlane.xlu0 %2497  ;;  %v3034_v19 = vmul.f32 1.442695, %v2985_v22  ;;  %v2860_v51 = vmax.f32 %v2732_v47, %v9963_v23  ;;  %v10003_v27 = vmul.f32 %v3133_v45, %v14071_v33  ;;  %v10009_v63 = vadd.f32 %v9980_v2, %v9966_v35  ;;  %v14074_v22 = vld [vmem:[#allocation29_spill] sm:$0xff] }
 0x2b7   :  { %v9993_v30 = vpop.f32.mrf.mxu0  ;;  %v9995_v9 = vpop.eup %6718  ;;  %v10013_v0 = vadd.f32 %v9735_v56, %v9447_v49  ;;  %v10023_v45 = vmul.f32 %v6711_v4, %v9724_v17  ;;  %6738 = vpow2.f32 %v2938_v20  ;;  %v10027_v33 = vadd.f32 %v9763_v32, %v9445_v50 }
 0x2b8   :  { %14068 = vst [vmem:[#allocation107_spill] sm:$0xff] %v9993_v30  ;;  %14069 = vst [vmem:[#allocation104_spill] sm:$0xff] %v9995_v9  ;;  %v10005_v10 = vpop.eup %6720  ;;  %v2891_v30 = vsub.f32 %v2731_v53, %v2859_v43  ;;  %v10034_v2 = vmul.f32 %v3134_v40, %v14078_v62  ;;  %6740 = vpow2.f32 %v3034_v19  ;;  %v2987_v17 = vsub.f32 %v9951_v36, %v2859_v43  ;;  %v14082_v43 = vld [vmem:[#allocation34_spill] sm:$0xff] }
 0x2b9   :  { %14072 = vst [vmem:[#allocation106_spill] sm:$0xff] %v10005_v10  ;;  %14073 = vst [vmem:[#allocation113_spill] sm:$0xff] %v10013_v0  ;;  %2698 = vadd.xlane.f32.xlu1 %v14074_v22  ;;  %2605 = vadd.xlane.f32.xlu0 %v14075_v24  ;;  %v10020_v60 = vpop.f32.mrf.mxu0  ;;  %v10036_v22 = vpop.eup %6722  ;;  %v2940_v24 = vmul.f32 1.442695, %v2890_v18  ;;  %v2861_v4 = vmax.f32 %v10016_v41, %v9991_v5  ;;  %v3036_v53 = vmul.f32 1.442695, %v2986_v15  ;;  %6742 = vrcp.f32 %v9910_v31 }
 0x2ba   :  { %14076 = vst [vmem:[#allocation110_spill] sm:$0xff] %v10020_v60  ;;  %14077 = vst [vmem:[#allocation112_spill] sm:$0xff] %v10027_v33  ;;  %v10029_v56 = vpop.xlane.xlu1 %2500  ;;  %v10031_v0 = vpop.xlane.xlu0 %2407  ;;  %v2892_v60 = vsub.f32 %v2732_v47, %v2860_v51  ;;  %v10046_v33 = vmul.f32 0.0625, %v9915_v34  ;;  %v10051_v19 = vadd.f32 %v10005_v10, %v9995_v9  ;;  %v2988_v36 = vsub.f32 %v9963_v23, %v2860_v51  ;;  %v14083_v18 = vld [vmem:[#allocation32_spill] sm:$0xff]  ;;  %v14096_v9 = vld [vmem:[#allocation54_spill] sm:$0xff] }
 0x2bb   :  { %14079 = vst [vmem:[#allocation109_spill] sm:$0xff] %v10034_v2  ;;  %v10041_v20 = vpop.f32.mrf.mxu0  ;;  %v10043_v32 = vpop.eup %6724  ;;  %v10059_v15 = vmul.f32 %v3134_v40, %v9570_v38  ;;  %v10065_v31 = vadd.f32 %v9780_v52, %v9447_v49  ;;  %v2942_v34 = vmul.f32 1.442695, %v2891_v30  ;;  %v3135_v51 = vmul.f32 %v9988_v13, %v9737_v61 }
 0x2bc   :  { %14080 = vst [vmem:[#allocation118_spill] sm:$0xff] %v10041_v20  ;;  %14081 = vst [vmem:[#allocation111_spill] sm:$0xff] %v10043_v32  ;;  %v10061_v47 = vpop.eup %6726  ;;  %v2734_v20 = vmul.f32 0.0625, %v9875_v58  ;;  %6744 = vpow2.f32 %v2940_v24  ;;  %v2893_v40 = vsub.f32 %v10016_v41, %v2861_v4  ;;  %v3136_v52 = vmul.f32 %v10036_v22, %v9798_v54  ;;  %v14090_v41 = vld [vmem:[#allocation33_spill] sm:$0xff] }
 0x2bd   :  { %2608 = vadd.xlane.f32.xlu1 %v14082_v43  ;;  %2701 = vadd.xlane.f32.xlu0 %v14083_v18  ;;  %v10056_v62 = vpop.f32.mrf.mxu0  ;;  %14085 = vst [vmem:[#allocation117_spill] sm:$0xff] %v10061_v47  ;;  %14086 = vst [vmem:[#allocation114_spill] sm:$0xff] %v10065_v31  ;;  %v3038_v43 = vmul.f32 1.442695, %v2987_v17  ;;  %v6729_v38 = vpop.eup %6728  ;;  %6746 = vpow2.f32 %v3036_v53  ;;  %v2944_v30 = vmul.f32 1.442695, %v2892_v60  ;;  %v2989_v24 = vsub.f32 %v9991_v5, %v2861_v4 }
 0x2be   :  { %14084 = vst [vmem:[#allocation115_spill] sm:$0xff] %v10056_v62  ;;  %v10068_v10 = vpop.xlane.xlu1 %2410  ;;  %v10070_v23 = vpop.xlane.xlu0 %2503  ;;  %v2862_v58 = vmax.f32 %v2734_v20, %v10046_v33  ;;  %v10081_v62 = vmul.f32 0.0625, %v9953_v39  ;;  %v3040_v61 = vmul.f32 1.442695, %v2988_v36  ;;  %v14089_v17 = vld [vmem:[#allocation31_spill] sm:$0xff]  ;;  %v10092_v54 = vmul.f32 %v9988_v13, %v9753_v46  ;;  %v14093_v36 = vld [vmem:[#allocation57_spill] sm:$0xff] }
 0x2bf   :  { %v10075_v18 = vpop.f32.mrf.mxu0  ;;  %v10083_v31 = vpop.eup %6730  ;;  %6748 = vrcp.f32 %v9939_v42  ;;  %v2735_v39 = vmul.f32 0.0625, %v9913_v1  ;;  %v10103_v4 = vmul.f32 %v3135_v51, %v9588_v59  ;;  %v10112_v46 = vadd.f32 %v10061_v47, %v10043_v32  ;;  %v14098_v47 = vld [vmem:[#allocation39_spill] sm:$0xff] }
 0x2c0   :  { %14087 = vst [vmem:[#allocation116_spill] sm:$0xff] %v10075_v18  ;;  %14088 = vst [vmem:[#allocation123_spill] sm:$0xff] %v10083_v31  ;;  %v10095_v60 = vpop.eup %6732  ;;  %6750 = vpow2.f32 %v2942_v34  ;;  %v2946_v42 = vmul.f32 1.442695, %v2893_v40  ;;  %v3137_v1 = vmul.f32 %v6729_v38, %v9841_v28  ;;  %v2990_v2 = vsub.f32 %v10046_v33, %v2862_v58  ;;  %v14100_v33 = vld [vmem:[#allocation56_spill] sm:$0xff] }
 0x2c1   :  { %2704 = vadd.xlane.f32.xlu1 %v14089_v17  ;;  %2611 = vadd.xlane.f32.xlu0 %v14090_v41  ;;  %v10088_v18 = vpop.f32.mrf.mxu0  ;;  %14092 = vst [vmem:[#allocation122_spill] sm:$0xff] %v10095_v60  ;;  %v10106_v17 = vmul.f32 %v3135_v51, %v14093_v36  ;;  %v10108_v41 = vpop.eup %6734  ;;  %6752 = vpow2.f32 %v3038_v43  ;;  %v2863_v59 = vmax.f32 %v2735_v39, %v10081_v62  ;;  %v3042_v36 = vmul.f32 1.442695, %v2989_v24  ;;  %v14099_v43 = vld [vmem:[#allocation37_spill] sm:$0xff]  ;;  %v14103_v24 = vld [vmem:[#allocation63_spill] sm:$0xff] }
 0x2c2   :  { %14091 = vst [vmem:[#allocation120_spill] sm:$0xff] %v10088_v18  ;;  %v10098_v53 = vpop.xlane.xlu1 %2506  ;;  %v10100_v5 = vpop.xlane.xlu0 %2413  ;;  %14094 = vst [vmem:[#allocation119_spill] sm:$0xff] %v10108_v41  ;;  %6754 = vpow2.f32 %v2944_v30  ;;  %v2894_v18 = vsub.f32 %v2734_v20, %v2862_v58  ;;  %v10119_v51 = vmul.f32 %v3136_v52, %v14096_v9  ;;  %v10126_v28 = vmul.f32 %v10036_v22, %v9808_v6 }
 0x2c3   :  { %v1913_v13 = vpop.f32.mrf.mxu0  ;;  %v10115_v34 = vpop.eup %6736  ;;  %6756 = vpow2.f32 %v3040_v61  ;;  %v3079_v20 = vadd.f32 %v10095_v60, %v10083_v31  ;;  %v10131_v30 = vmul.f32 0.0625, %v9986_v21  ;;  %v10138_v58 = vmul.f32 %v3136_v52, %v14100_v33 }
 0x2c4   :  { %14095 = vst [vmem:[#allocation121_spill] sm:$0xff] %v10115_v34  ;;  %14097 = vst [vmem:[#allocation11_spill] sm:$0xff] %v10119_v51  ;;  %6758 = vrcp.f32 %v10009_v63  ;;  %v10145_v6 = vadd.f32 %v10115_v34, %v10108_v41  ;;  %v10148_v21 = vmul.f32 %v3137_v1, %v14103_v24  ;;  %v2948_v52 = vmul.f32 1.442695, %v2894_v18  ;;  %v14107_v41 = vld [vmem:[#allocation36_spill] sm:$0xff] }
 0x2c5   :  { %2614 = vadd.xlane.f32.xlu1 %v14098_v47  ;;  %2707 = vadd.xlane.f32.xlu0 %v14099_v43  ;;  %v1915_v40 = vpop.f32.mrf.mxu0  ;;  %14101 = vst [vmem:[#allocation6_spill] sm:$0xff] %v10138_v58  ;;  %v10141_v47 = vpop.eup %6738  ;;  %6760 = vpow2.f32 %v2946_v42  ;;  %v10151_v43 = vmul.f32 %v6729_v38, %v9851_v44  ;;  %v2895_v33 = vsub.f32 %v2735_v39, %v2863_v59  ;;  %v2736_v63 = vmul.f32 0.0625, %v9955_v26 }
 0x2c6   :  { %v10133_v9 = vpop.xlane.xlu1 %2416  ;;  %v10135_v61 = vpop.xlane.xlu0 %2509  ;;  %14102 = vst [vmem:[#allocation10_spill] sm:$0xff] %v10141_v47  ;;  %14104 = vst [vmem:[#allocation8_spill] sm:$0xff] %v10148_v21  ;;  %v10157_v60 = vmul.f32 0.0625, %v10029_v56  ;;  %6762 = vpow2.f32 %v3042_v36  ;;  %v3044_v34 = vmul.f32 1.442695, %v2990_v2  ;;  %v2991_v42 = vsub.f32 %v10081_v62, %v2863_v59  ;;  %v14111_v36 = vld [vmem:[#allocation60_spill] sm:$0xff] }
 0x2c7   :  { %v1917_v22 = vpop.f32.mrf.mxu0  ;;  %v10153_v32 = vpop.eup %6740  ;;  %v2737_v44 = vmul.f32 0.0625, %v9984_v25  ;;  %v2864_v18 = vmax.f32 %v2736_v63, %v10131_v30  ;;  %v10167_v26 = vadd.f32 %v1915_v40, %v9447_v49  ;;  %v10181_v62 = vadd.f32 %v1913_v13, %v9445_v50 }
 0x2c8   :  { %14105 = vst [vmem:[#allocation7_spill] sm:$0xff] %v10153_v32  ;;  %v6743_v31 = vpop.eup %6742  ;;  %v10161_v24 = vadd.f32 %v1917_v22, %v9445_v50  ;;  %v10178_v59 = vadd.f32 %v10153_v32, %v10141_v47  ;;  %6764 = vrcp.f32 %v10051_v19  ;;  %v2950_v22 = vmul.f32 1.442695, %v2895_v33  ;;  %v14114_v47 = vld [vmem:[#allocation76_spill] sm:$0xff] }
 0x2c9   :  { %2710 = vadd.xlane.f32.xlu1 %v14107_v41  ;;  %v1919_v38 = vpop.f32.mrf.mxu0  ;;  %14108 = vst [vmem:[#allocation13_spill] sm:$0xff] %v10167_v26  ;;  %14110 = vst [vmem:[#allocation38_spill] sm:$0xff] %v10181_v62  ;;  %v10184_v41 = vmul.f32 %v3137_v1, %v14111_v36  ;;  %v10187_v40 = vpop.eup %6744  ;;  %6766 = vpow2.f32 %v2948_v52  ;;  %v10191_v51 = vmul.f32 %v6743_v31, %v9867_v48  ;;  %v3046_v13 = vmul.f32 1.442695, %v2991_v42 }
 0x2ca   :  { %14106 = vst [vmem:[#allocation9_spill] sm:$0xff] %v10161_v24  ;;  %v10170_v56 = vadd.f32 %v1919_v38, %v9447_v49  ;;  %v10172_v39 = vpop.xlane.xlu1 %2512  ;;  %v10174_v2 = vpop.xlane.xlu0 %2419  ;;  %14112 = vst [vmem:[#allocation15_spill] sm:$0xff] %v10187_v40  ;;  %v2865_v38 = vmax.f32 %v2737_v44, %v10157_v60  ;;  %6768 = vpow2.f32 %v3044_v34  ;;  %v3258_v58 = vmul.f32 %v14114_v47, %v10161_v24  ;;  %v14115_v40 = vld [vmem:[#allocation69_spill] sm:$0xff] }
 0x2cb   :  { %v1923_v25 = vpop.f32.mrf.mxu0  ;;  %v10193_v32 = vpop.eup %6746  ;;  %v2896_v52 = vsub.f32 %v2736_v63, %v2864_v18  ;;  %v2992_v33 = vsub.f32 %v10131_v30, %v2864_v18  ;;  %v3257_v48 = vmul.f32 %v14115_v40, %v10167_v26  ;;  %6770 = vrcp.f32 %v10112_v46 }
 0x2cc   :  { %14109 = vst [vmem:[#allocation16_spill] sm:$0xff] %v10170_v56  ;;  %14113 = vst [vmem:[#allocation12_spill] sm:$0xff] %v10193_v32  ;;  %v3259_v1 = vmul.f32 %v14114_v47, %v10170_v56  ;;  %v10199_v36 = vpop.eup %6748  ;;  %v10212_v42 = vmul.f32 0.0625, %v10070_v23  ;;  %v3256_v47 = vmul.f32 %v14115_v40, %v10181_v62  ;;  %v10217_v30 = vmul.f32 %v6743_v31, %v9880_v7  ;;  %v14120_v40 = vld [vmem:[#allocation83_spill] sm:$0xff] }
 0x2cd   :  { %v1925_v19 = vpop.f32.mrf.mxu0  ;;  %v10209_v34 = vpop.eup %6750  ;;  %6772 = vrcp.f32 %v3079_v20  ;;  %v2897_v24 = vsub.f32 %v2737_v44, %v2865_v38  ;;  %v10222_v56 = vmul.f32 0.0625, %v10031_v0  ;;  %v2993_v23 = vsub.f32 %v10157_v60, %v2865_v38 }
 0x2ce   :  { %v10204_v21 = vpop.xlane.xlu1 %2422  ;;  %v10206_v32 = vpop.xlane.xlu0 %2515  ;;  %14116 = vst [vmem:[#allocation14_spill] sm:$0xff] %v10209_v34  ;;  %14117 = vst [vmem:[#allocation21_spill] sm:$0xff] %v10217_v30  ;;  %6774 = vpow2.f32 %v2950_v22  ;;  %v3323_v46 = vadd.f32 %v3259_v1, %v9793_v16  ;;  %v3322_v62 = vadd.f32 %v3258_v58, %v14120_v40  ;;  %v10231_v7 = vmul.f32 %v10199_v36, %v9892_v12  ;;  %v14122_v16 = vld [vmem:[#allocation77_spill] sm:$0xff]  ;;  %v14123_v12 = vld [vmem:[#allocation75_spill] sm:$0xff] }
 0x2cf   :  { %v1927_v63 = vpop.f32.mrf.mxu0  ;;  %v10219_v18 = vpop.eup %6752  ;;  %6776 = vpow2.f32 %v3046_v13  ;;  %v2952_v20 = vmul.f32 1.442695, %v2896_v52  ;;  %v3048_v44 = vmul.f32 1.442695, %v2992_v33  ;;  %v10236_v0 = vmul.f32 0.0625, %v10098_v53 }
 0x2d0   :  { %14118 = vst [vmem:[#allocation42_spill] sm:$0xff] %v10219_v18  ;;  %v10225_v26 = vpop.eup %6754  ;;  %v3321_v22 = vadd.f32 %v3257_v48, %v14122_v16  ;;  %v2866_v58 = vmax.f32 %v10222_v56, %v10212_v42  ;;  %v3320_v38 = vadd.f32 %v3256_v47, %v14123_v12  ;;  %v10249_v40 = vadd.f32 %v1927_v63, %v9445_v50 }
 0x2d1   :  { %14119 = vst [vmem:[#allocation18_spill] sm:$0xff] %v10225_v26  ;;  %v1929_v34 = vpop.f32.mrf.mxu0  ;;  %v10233_v31 = vpop.eup %6756  ;;  %v2954_v48 = vmul.f32 1.442695, %v2897_v24  ;;  %v2739_v16 = vmul.f32 0.0625, %v10068_v10  ;;  %v3050_v18 = vmul.f32 1.442695, %v2993_v23  ;;  %v10261_v47 = vadd.f32 %v1923_v25, %v9445_v50 }
 0x2d2   :  { %14121 = vst [vmem:[#allocation20_spill] sm:$0xff] %v10233_v31  ;;  %v10239_v1 = vpop.xlane.xlu1 %2518  ;;  %v10241_v13 = vpop.xlane.xlu0 %2521  ;;  %14124 = vst [vmem:[#allocation19_spill] sm:$0xff] %v10249_v40  ;;  %v10252_v52 = vadd.f32 %v1929_v34, %v9447_v49  ;;  %v10258_v31 = vadd.f32 %v1925_v19, %v9447_v49  ;;  %v3929_v26 = vpack.c.bf16 %v3323_v46, %v3321_v22  ;;  %6778 = vrcp.f32 %v10145_v6 }
 0x2d3   :  { %v10243_v60 = vpop.eup %6758  ;;  %v1933_v53 = vpop.f32.mrf.mxu0  ;;  %v3928_v30 = vpack.c.bf16 %v3322_v62, %v3320_v38  ;;  %14128 = vst [vmem:[#allocation22_spill] sm:$0xff] %v10261_v47  ;;  %6780 = vpow2.f32 %v2952_v20  ;;  %v10267_v12 = vmax.f32 %v2739_v16, %v10236_v0  ;;  %v14130_v62 = vld [vmem:[#allocation62_spill] sm:$0xff]  ;;  %v2898_v6 = vsub.f32 %v10222_v56, %v2866_v58 }
 0x2d4   :  { %14125 = vst [vmem:[#allocation17_spill] sm:$0xff] %v10252_v52  ;;  %v10254_v33 = vpop.eup %6760  ;;  %14127 = vst [vmem:[#allocation23_spill] sm:$0xff] %v10258_v31  ;;  %v3263_v10 = vmul.f32 %v9849_v29, %v10252_v52  ;;  %4228 = vmatprep.mubr.bf16.mxu1 %v3929_v26  ;;  %v10277_v25 = vmul.f32 %v10191_v51, %v14130_v62  ;;  %6782 = vpow2.f32 %v3048_v44  ;;  %v10281_v46 = vmul.f32 0.0625, %v10135_v61  ;;  %v14131_v62 = vld [vmem:[#allocation59_spill] sm:$0xff]  ;;  %v14135_v52 = vld [vmem:[#allocation89_spill] sm:$0xff] }
 0x2d5   :  { %14126 = vst [vmem:[#allocation26_spill] sm:$0xff] %v10254_v33  ;;  %v1935_v63 = vpop.f32.mrf.mxu0  ;;  %v10264_v34 = vpop.eup %6762  ;;  %v3262_v23 = vmul.f32 %v9849_v29, %v10249_v40  ;;  %4229 = vmatmul.mubr.bf16.vlgmr.msra.gmra.mxu1 %v3928_v30  ;;  %6784 = vpow2.f32 %v2954_v48  ;;  %v2994_v22 = vsub.f32 %v10212_v42, %v2866_v58  ;;  %v3261_v38 = vmul.f32 %v9796_v8, %v10258_v31  ;;  %v14133_v40 = vld [vmem:[#allocation68_spill] sm:$0xff] }
 0x2d6   :  { %14129 = vst [vmem:[#allocation25_spill] sm:$0xff] %v10264_v34  ;;  %v10271_v24 = vpop.xlane.xlu1 %2524  ;;  %v10273_v19 = vpop.xlane.xlu0 %2617  ;;  %v10292_v44 = vmul.f32 %v10191_v51, %v14131_v62  ;;  %6786 = vpow2.f32 %v3050_v18  ;;  %v2740_v61 = vmul.f32 0.0625, %v10100_v5  ;;  %v3260_v29 = vmul.f32 %v9796_v8, %v10261_v47  ;;  %v14137_v47 = vld [vmem:[#allocation92_spill] sm:$0xff] }
 0x2d7   :  { %v1937_v20 = vpop.f32.mrf.mxu0  ;;  %v10285_v26 = vpop.eup %6764  ;;  %v10301_v48 = vmul.f32 %v10231_v7, %v14133_v40  ;;  %v2899_v58 = vsub.f32 %v2739_v16, %v10267_v12  ;;  %v3327_v51 = vadd.f32 %v3263_v10, %v14135_v52  ;;  %v10313_v5 = vmul.f32 %v10199_v36, %v9906_v55  ;;  %v14140_v34 = vld [vmem:[#allocation84_spill] sm:$0xff] }
 0x2d8   :  { %v10294_v56 = vpop.eup %6766  ;;  %6788 = vrcp.f32 %v10178_v59  ;;  %v2956_v18 = vmul.f32 1.442695, %v2898_v6  ;;  %v2868_v40 = vmax.f32 %v2740_v61, %v10281_v46  ;;  %v10321_v16 = vadd.f32 %v1937_v20, %v9445_v50 }
 0x2d9   :  { %14132 = vst [vmem:[#allocation30_spill] sm:$0xff] %v10294_v56  ;;  %v1939_v30 = vpop.f32.mrf.mxu0  ;;  %v10303_v42 = vpop.eup %6768  ;;  %v3052_v56 = vmul.f32 1.442695, %v2994_v22  ;;  %v3325_v33 = vadd.f32 %v3261_v38, %v14140_v34  ;;  %v10327_v55 = vadd.f32 %v1935_v63, %v9447_v49  ;;  %v10337_v6 = vmul.f32 0.0625, %v10172_v39 }
 0x2da   :  { %14134 = vst [vmem:[#allocation24_spill] sm:$0xff] %v10303_v42  ;;  %v10307_v62 = vpop.xlane.xlu1 %2620  ;;  %v10309_v31 = vpop.xlane.xlu0 %2527  ;;  %v3326_v42 = vadd.f32 %v3262_v23, %v14137_v47  ;;  %14138 = vst [vmem:[#allocation28_spill] sm:$0xff] %v10321_v16  ;;  %v10330_v59 = vadd.f32 %v1939_v30, %v9447_v49  ;;  %v2995_v47 = vsub.f32 %v10236_v0, %v10267_v12  ;;  %v14144_v23 = vld [vmem:[#allocation88_spill] sm:$0xff]  ;;  %v2958_v63 = vmul.f32 1.442695, %v2899_v58 }
 0x2db   :  { %v10316_v8 = vpop.eup %6770  ;;  %v1943_v52 = vpop.f32.mrf.mxu0  ;;  %14141 = vst [vmem:[#allocation35_spill] sm:$0xff] %v10327_v55  ;;  %v3324_v20 = vadd.f32 %v3260_v29, %v14144_v23  ;;  %v10341_v22 = vadd.f32 %v1933_v53, %v9445_v50  ;;  %v2741_v30 = vmul.f32 0.0625, %v10133_v9  ;;  %6790 = vpow2.f32 %v2956_v18  ;;  %v14146_v23 = vld [vmem:[#allocation61_spill] sm:$0xff] }
 0x2dc   :  { %14136 = vst [vmem:[#allocation27_spill] sm:$0xff] %v10316_v8  ;;  %v10323_v10 = vpop.eup %6772  ;;  %14142 = vst [vmem:[#allocation34_spill] sm:$0xff] %v10330_v59  ;;  %v3931_v8 = vpack.c.bf16 %v3327_v51, %v3325_v33  ;;  %v2900_v39 = vsub.f32 %v2740_v61, %v2868_v40  ;;  %v3266_v12 = vmul.f32 %v9977_v14, %v10321_v16  ;;  %6792 = vpow2.f32 %v3052_v56 }
 0x2dd   :  { %14139 = vst [vmem:[#allocation29_spill] sm:$0xff] %v10323_v10  ;;  %v10332_v36 = vpop.eup %6774  ;;  %14145 = vst [vmem:[#allocation31_spill] sm:$0xff] %v10341_v22  ;;  %v1945_v34 = vpop.f32.mrf.mxu0  ;;  %v3930_v0 = vpack.c.bf16 %v3326_v42, %v3324_v20  ;;  %v2996_v58 = vsub.f32 %v10281_v46, %v2868_v40  ;;  %v3265_v9 = vmul.f32 %v9904_v3, %v10327_v55  ;;  %v3054_v51 = vmul.f32 1.442695, %v2995_v47 }
 0x2de   :  { %14143 = vst [vmem:[#allocation32_spill] sm:$0xff] %v10332_v36  ;;  %v10343_v38 = vpop.eup %6776  ;;  %v3267_v36 = vmul.f32 %v9977_v14, %v10330_v59  ;;  %v10348_v10 = vpop.xlane.xlu0 %2623  ;;  %4238 = vmatprep.mubr.bf16.mxu1 %v3931_v8  ;;  %v10359_v33 = vmul.f32 %v10231_v7, %v14146_v23  ;;  %v2869_v61 = vmax.f32 %v2741_v30, %v10337_v6  ;;  %v10365_v42 = vmul.f32 0.0625, %v10273_v19 }
 0x2df   :  { %v10352_v53 = vpop.xlane.xlu1 %2530  ;;  %v1947_v29 = vpop.f32.mrf.mxu0  ;;  %v3264_v14 = vmul.f32 %v9904_v3, %v10341_v22  ;;  %4239 = vmatmul.mubr.bf16.gmra.mxu1 %v3930_v0  ;;  %6794 = vpow2.f32 %v2958_v63  ;;  %v10370_v46 = vmul.f32 0.0625, %v10174_v2  ;;  %v10373_v7 = vmul.f32 0.0625, %v10206_v32 }
 0x2e0   :  { %v10367_v40 = vpop.eup %6778  ;;  %v3331_v8 = vadd.f32 %v3267_v36, %v10003_v27  ;;  %v2960_v47 = vmul.f32 1.442695, %v2900_v39  ;;  %v2776_v3 = vmul.f32 0.0625, %v10241_v13  ;;  %v3330_v19 = vadd.f32 %v3266_v12, %v10000_v11 }
 0x2e1   :  { %v1949_v56 = vpop.f32.mrf.mxu0  ;;  %v10376_v18 = vpop.eup %6780  ;;  %v10381_v20 = vadd.f32 %v1947_v29, %v9445_v50  ;;  %v3056_v2 = vmul.f32 1.442695, %v2996_v58  ;;  %v3329_v23 = vadd.f32 %v3265_v9, %v9935_v37  ;;  %v10387_v32 = vadd.f32 %v1945_v34, %v9447_v49 }
 0x2e2   :  { %v10383_v63 = vpop.eup %6782  ;;  %v10390_v27 = vadd.f32 %v1949_v56, %v9447_v49  ;;  %v10392_v36 = vpop.xlane.xlu0 %2533  ;;  %v2901_v11 = vsub.f32 %v2741_v30, %v2869_v61  ;;  %v3328_v39 = vadd.f32 %v3264_v14, %v9932_v57  ;;  %v3384_v12 = vmax.f32 %v2776_v3, %v10365_v42 }
 0x2e3   :  { %14147 = vst [vmem:[#allocation33_spill] sm:$0xff] %v10381_v20  ;;  %v1953_v0 = vpop.f32.mrf.mxu0  ;;  %14148 = vst [vmem:[#allocation39_spill] sm:$0xff] %v10387_v32  ;;  %v10394_v13 = vpop.eup %6784  ;;  %v10399_v29 = vadd.f32 %v1943_v52, %v9445_v50  ;;  %v2997_v9 = vsub.f32 %v10337_v6, %v2869_v61  ;;  %v2870_v56 = vmax.f32 %v10370_v46, %v10373_v7  ;;  %6796 = vpow2.f32 %v3054_v51 }
 0x2e4   :  { %14149 = vst [vmem:[#allocation37_spill] sm:$0xff] %v10390_v27  ;;  %v10401_v58 = vpop.xlane.xlu1 %2626  ;;  %v10403_v34 = vpop.eup %6786  ;;  %v3271_v30 = vmul.f32 %v10092_v54, %v10390_v27  ;;  %v3933_v22 = vpack.c.bf16 %v3331_v8, %v3329_v23  ;;  %v10413_v52 = vmul.f32 0.0625, %v10239_v1  ;;  %v3932_v14 = vpack.c.bf16 %v3330_v19, %v3328_v39 }
 0x2e5   :  { %14150 = vst [vmem:[#allocation36_spill] sm:$0xff] %v10399_v29  ;;  %v1955_v37 = vpop.f32.mrf.mxu0  ;;  %v10410_v57 = vpop.eup %6788  ;;  %v3270_v16 = vmul.f32 %v10092_v54, %v10381_v20  ;;  %6798 = vpow2.f32 %v2960_v47  ;;  %v2743_v6 = vmul.f32 0.0625, %v10204_v21  ;;  %v3269_v61 = vmul.f32 %v10023_v45, %v10387_v32 }
 0x2e6   :  { %4248 = vmatprep.mubr.bf16.mxu1 %v3933_v22  ;;  %v10422_v23 = vmul.f32 %v10243_v60, %v9966_v35  ;;  %6800 = vpow2.f32 %v3056_v2  ;;  %v2962_v51 = vmul.f32 1.442695, %v2901_v11  ;;  %v3416_v1 = vsub.f32 %v2776_v3, %v3384_v12  ;;  %v10429_v22 = vpop.xlane.xlu0 %2629 }
 0x2e7   :  { %v1957_v55 = vpop.f32.mrf.mxu0  ;;  %v3268_v8 = vmul.f32 %v10023_v45, %v10399_v29  ;;  %4249 = vmatmul.mubr.bf16.gmra.mxu1 %v3932_v14  ;;  %v3058_v19 = vmul.f32 1.442695, %v2997_v9  ;;  %v2902_v47 = vsub.f32 %v10370_v46, %v2870_v56  ;;  %v3512_v21 = vsub.f32 %v10365_v42, %v3384_v12 }
 0x2e8   :  { %v3335_v39 = vadd.f32 %v3271_v30, %v10106_v17  ;;  %v2998_v35 = vsub.f32 %v10373_v7, %v2870_v56  ;;  %v10433_v2 = vmax.f32 %v2743_v6, %v10413_v52  ;;  %v10436_v3 = vmul.f32 0.0625, %v10307_v62  ;;  %v10439_v11 = vpop.xlane.xlu1 %2536  ;;  %v10441_v46 = vpop.eup %6790  ;;  %v14156_v56 = vld [vmem:[#allocation109_spill] sm:$0xff] }
 0x2e9   :  { %v1959_v54 = vpop.f32.mrf.mxu0  ;;  %v3334_v45 = vadd.f32 %v3270_v16, %v10103_v4  ;;  %14151 = vst [vmem:[#allocation76_spill] sm:$0xff] %v10441_v46  ;;  %v3333_v42 = vadd.f32 %v3269_v61, %v10059_v15  ;;  %v10445_v17 = vadd.f32 %v1955_v37, %v9447_v49  ;;  %v10448_v7 = vadd.f32 %v1957_v55, %v9445_v50  ;;  %v10453_v62 = vpop.eup %6792 }
 0x2ea   :  { %v10451_v12 = vadd.f32 %v1959_v54, %v9447_v49  ;;  %14155 = vst [vmem:[#allocation75_spill] sm:$0xff] %v10453_v62  ;;  %v10456_v4 = vmul.f32 0.0625, %v10271_v24  ;;  %v3448_v16 = vmul.f32 1.442695, %v3416_v1  ;;  %v3332_v30 = vadd.f32 %v3268_v8, %v14156_v56 }
 0x2eb   :  { %v1963_v9 = vpop.f32.mrf.mxu0  ;;  %14152 = vst [vmem:[#allocation69_spill] sm:$0xff] %v10445_v17  ;;  %14153 = vst [vmem:[#allocation83_spill] sm:$0xff] %v10448_v7  ;;  %v10460_v14 = vadd.f32 %v1953_v0, %v9445_v50  ;;  %6802 = vpow2.f32 %v2962_v51  ;;  %v3544_v37 = vmul.f32 1.442695, %v3512_v21  ;;  %v3935_v61 = vpack.c.bf16 %v3335_v39, %v3333_v42  ;;  %v10476_v39 = vpop.xlane.xlu0 %2539  ;;  %v14159_v42 = vld [vmem:[#allocation105_spill] sm:$0xff] }
 0x2ec   :  { %14154 = vst [vmem:[#allocation77_spill] sm:$0xff] %v10451_v12  ;;  %v3275_v55 = vmul.f32 %v10151_v43, %v10451_v12  ;;  %v10464_v54 = vpop.eup %6794  ;;  %v2903_v29 = vsub.f32 %v2743_v6, %v10433_v2  ;;  %v3385_v24 = vmax.f32 %v10456_v4, %v10436_v3  ;;  %v3934_v1 = vpack.c.bf16 %v3334_v45, %v3332_v30 }
 0x2ed   :  { %14157 = vst [vmem:[#allocation89_spill] sm:$0xff] %v10460_v14  ;;  %v1965_v15 = vpop.f32.mrf.mxu0  ;;  %14158 = vst [vmem:[#allocation92_spill] sm:$0xff] %v10464_v54  ;;  %v3274_v8 = vmul.f32 %v10151_v43, %v10448_v7  ;;  %6804 = vpow2.f32 %v3058_v19  ;;  %v10472_v51 = vmul.f32 0.0625, %v10348_v10  ;;  %v3273_v21 = vmul.f32 %v10126_v28, %v10445_v17  ;;  %4258 = vmatprep.mubr.bf16.mxu1 %v3935_v61  ;;  %v2633_v19 = vpop.xlane.xlu1 %2632 }
 0x2ee   :  { %v10480_v6 = vmul.f32 %v10243_v60, %v14159_v42  ;;  %v2964_v56 = vmul.f32 1.442695, %v2902_v47  ;;  %v3060_v45 = vmul.f32 1.442695, %v2998_v35  ;;  %6806 = vpow2.f32 %v3448_v16  ;;  %v14160_v35 = vld [vmem:[#allocation8_spill] sm:$0xff] }
 0x2ef   :  { %v1967_v0 = vpop.f32.mrf.mxu0  ;;  %v3272_v43 = vmul.f32 %v10126_v28, %v10460_v14  ;;  %4259 = vmatmul.mubr.bf16.gmra.mxu1 %v3934_v1  ;;  %v2999_v30 = vsub.f32 %v10413_v52, %v10433_v2  ;;  %6808 = vpow2.f32 %v3544_v37  ;;  %v2778_v7 = vmul.f32 0.0625, %v10309_v31  ;;  %v14162_v2 = vld [vmem:[#allocation6_spill] sm:$0xff] }
 0x2f0   :  { %v3339_v61 = vadd.f32 %v3275_v55, %v10184_v41  ;;  %v2966_v17 = vmul.f32 1.442695, %v2903_v29  ;;  %v3417_v60 = vsub.f32 %v10456_v4, %v3385_v24  ;;  %v10490_v47 = vmul.f32 0.0625, %v10401_v58  ;;  %v10495_v1 = vpop.eup %6796  ;;  %v14164_v4 = vld [vmem:[#allocation11_spill] sm:$0xff] }
 0x2f1   :  { %v1969_v10 = vpop.f32.mrf.mxu0  ;;  %v3338_v16 = vadd.f32 %v3274_v8, %v14160_v35  ;;  %14161 = vst [vmem:[#allocation84_spill] sm:$0xff] %v10495_v1  ;;  %v3513_v42 = vsub.f32 %v10436_v3, %v3385_v24  ;;  %v2779_v52 = vmul.f32 0.0625, %v10352_v53  ;;  %v3386_v31 = vmax.f32 %v2778_v7, %v10472_v51 }
 0x2f2   :  { %v3337_v41 = vadd.f32 %v3273_v21, %v14162_v2  ;;  %v10501_v29 = vpop.eup %6798  ;;  %v3336_v37 = vadd.f32 %v3272_v43, %v14164_v4  ;;  %v10505_v58 = vadd.f32 %v1965_v15, %v9447_v49  ;;  %v10508_v55 = vadd.f32 %v1967_v0, %v9445_v50  ;;  %v2636_v21 = vpop.xlane.xlu0 %2635  ;;  %v14170_v43 = vld [vmem:[#allocation65_spill] sm:$0xff] }
 0x2f3   :  { %v10493_v28 = vpop.f32.mrf.mxu0  ;;  %14163 = vst [vmem:[#allocation88_spill] sm:$0xff] %v10501_v29  ;;  %v10511_v8 = vadd.f32 %v1969_v10, %v9447_v49  ;;  %v10515_v53 = vpop.eup %6800  ;;  %6810 = vpow2.f32 %v2964_v56  ;;  %v10518_v24 = vadd.f32 %v1963_v9, %v9445_v50  ;;  %v10522_v15 = vmul.f32 %v10422_v23, %v14170_v43 }
 0x2f4   :  { %14165 = vst [vmem:[#allocation109_spill] sm:$0xff] %v10505_v58  ;;  %14166 = vst [vmem:[#allocation105_spill] sm:$0xff] %v10508_v55  ;;  %v3937_v35 = vpack.c.bf16 %v3339_v61, %v3337_v41  ;;  %v3062_v2 = vmul.f32 1.442695, %v2999_v30  ;;  %v3387_v0 = vmax.f32 %v2779_v52, %v10490_v47  ;;  %v3936_v4 = vpack.c.bf16 %v3338_v16, %v3336_v37  ;;  %v10525_v10 = vpop.xlane.xlu1 %2542  ;;  %v14171_v16 = vld [vmem:[#allocation21_spill] sm:$0xff] }
 0x2f5   :  { %14167 = vst [vmem:[#allocation8_spill] sm:$0xff] %v10511_v8  ;;  %v10513_v3 = vpop.f32.mrf.mxu0  ;;  %14168 = vst [vmem:[#allocation6_spill] sm:$0xff] %v10515_v53  ;;  %v3279_v14 = vmul.f32 %v10313_v5, %v10511_v8  ;;  %6812 = vpow2.f32 %v3060_v45  ;;  %v3418_v56 = vsub.f32 %v2778_v7, %v3386_v31  ;;  %v10530_v9 = vmul.f32 0.0625, %v10429_v22 }
 0x2f6   :  { %14169 = vst [vmem:[#allocation11_spill] sm:$0xff] %v10518_v24  ;;  %v3278_v61 = vmul.f32 %v10313_v5, %v10508_v55  ;;  %4268 = vmatprep.mubr.bf16.mxu1 %v3937_v35  ;;  %6814 = vpow2.f32 %v2966_v17  ;;  %v3450_v30 = vmul.f32 1.442695, %v3417_v60  ;;  %v3546_v41 = vmul.f32 1.442695, %v3513_v42 }
 0x2f7   :  { %v1977_v12 = vpop.f32.mrf.mxu0  ;;  %v3277_v37 = vmul.f32 %v14171_v16, %v10505_v58  ;;  %4269 = vmatmul.mubr.bf16.gmra.mxu1 %v3936_v4  ;;  %v3514_v8 = vsub.f32 %v10472_v51, %v3386_v31  ;;  %v2780_v45 = vmul.f32 0.0625, %v10392_v36  ;;  %v10538_v7 = vmul.f32 0.0625, %v2633_v19  ;;  %v10551_v31 = vpop.xlane.xlu0 %2545 }
 0x2f8   :  { %v3276_v22 = vmul.f32 %v14171_v16, %v10518_v24  ;;  %v10542_v20 = vpop.eup %6802  ;;  %6816 = vpow2.f32 %v3062_v2  ;;  %v3419_v5 = vsub.f32 %v2779_v52, %v3387_v0  ;;  %v3515_v17 = vsub.f32 %v10490_v47, %v3387_v0  ;;  %v2639_v2 = vpop.xlane.xlu1 %2638  ;;  %v14174_v47 = vld [vmem:[#allocation104_spill] sm:$0xff] }
 0x2f9   :  { %v1979_v43 = vpop.f32.mrf.mxu0  ;;  %14172 = vst [vmem:[#allocation21_spill] sm:$0xff] %v10542_v20  ;;  %v3343_v60 = vadd.f32 %v3279_v14, %v10359_v33  ;;  %v3452_v35 = vmul.f32 1.442695, %v3418_v56  ;;  %v2781_v51 = vmul.f32 0.0625, %v10439_v11  ;;  %v3388_v36 = vmax.f32 %v2780_v45, %v10530_v9  ;;  %v14175_v14 = vld [vmem:[#allocation106_spill] sm:$0xff] }
 0x2fa   :  { %v3342_v19 = vadd.f32 %v3278_v61, %v10301_v48  ;;  %v10553_v4 = vpop.eup %6804  ;;  %6818 = vpow2.f32 %v3450_v30  ;;  %v3341_v52 = vadd.f32 %v3277_v37, %v10292_v44  ;;  %v3141_v33 = vmul.f32 %v10285_v26, %v14174_v47  ;;  %v14213_v20 = vld [vmem:[#allocation70_spill] sm:$0xff] }
 0x2fb   :  { %v10546_v42 = vpop.f32.mrf.mxu0  ;;  %14173 = vst [vmem:[#allocation124_spill] sm:$0xff] %v10553_v4  ;;  %v3237_v0 = vmul.f32 %v10285_v26, %v14175_v14  ;;  %v10562_v11 = vpop.eup %6806  ;;  %6820 = vpow2.f32 %v3546_v41  ;;  %v3548_v48 = vmul.f32 1.442695, %v3514_v8  ;;  %v3389_v61 = vmax.f32 %v2781_v51, %v10538_v7  ;;  %v14212_v4 = vld [vmem:[#allocation72_spill] sm:$0xff] }
 0x2fc   :  { %14176 = vst [vmem:[#allocation104_spill] sm:$0xff] %v10562_v11  ;;  %v3340_v16 = vadd.f32 %v3276_v22, %v10277_v25  ;;  %v10566_v30 = vpop.eup %6808  ;;  %v3454_v44 = vmul.f32 1.442695, %v3419_v5  ;;  %v3550_v37 = vmul.f32 1.442695, %v3515_v17  ;;  %v10568_v55 = vmul.f32 0.0625, %v2636_v21  ;;  %v2642_v17 = vpop.xlane.xlu0 %2641 }
 0x2fd   :  { %v10560_v56 = vpop.f32.mrf.mxu0  ;;  %14177 = vst [vmem:[#allocation106_spill] sm:$0xff] %v10566_v30  ;;  %v3939_v47 = vpack.c.bf16 %v3343_v60, %v3341_v52  ;;  %6822 = vpow2.f32 %v3452_v35  ;;  %v3420_v26 = vsub.f32 %v2780_v45, %v3388_v36  ;;  %v10573_v58 = vadd.f32 %v1979_v43, %v9447_v49 }
 0x2fe   :  { %v3938_v14 = vpack.c.bf16 %v3342_v19, %v3340_v16  ;;  %v3516_v8 = vsub.f32 %v10530_v9, %v3388_v36  ;;  %v2782_v41 = vmul.f32 0.0625, %v10476_v39  ;;  %v10577_v25 = vmul.f32 0.0625, %v2639_v2  ;;  %v2549_v36 = vpop.xlane.xlu1 %2548  ;;  %v14183_v19 = vld [vmem:[#allocation64_spill] sm:$0xff] }
 0x2ff   :  { %v10570_v24 = vpop.f32.mrf.mxu0  ;;  %14178 = vst [vmem:[#allocation125_spill] sm:$0xff] %v10573_v58  ;;  %v10580_v22 = vadd.f32 %v1977_v12, %v9445_v50  ;;  %4278 = vmatprep.mubr.bf16.mxu1 %v3939_v47  ;;  %v3608_v5 = vadd.f32 %v10566_v30, %v10562_v11  ;;  %6824 = vpow2.f32 %v3548_v48  ;;  %v3421_v45 = vsub.f32 %v2781_v51, %v3389_v61  ;;  %v14205_v11 = vld [vmem:[#allocation42_spill] sm:$0xff] }
 0x300   :  { %v10586_v43 = vadd.f32 %v10513_v3, %v9447_v49  ;;  %4279 = vmatmul.mubr.bf16.gmra.mxu1 %v3938_v14  ;;  %v10588_v9 = vpop.eup %6810  ;;  %v3517_v39 = vsub.f32 %v10538_v7, %v3389_v61  ;;  %v2783_v12 = vmul.f32 0.0625, %v10525_v10  ;;  %v3390_v60 = vmax.f32 %v2782_v41, %v10568_v55  ;;  %v10623_v27 = vpop.xlane.xlu0 %2551 }
 0x301   :  { %14179 = vst [vmem:[#allocation126_spill] sm:$0xff] %v10580_v22  ;;  %v1989_v21 = vpop.f32.mrf.mxu0  ;;  %14181 = vst [vmem:[#allocation128_spill] sm:$0xff] %v10588_v9  ;;  %v10595_v35 = vadd.f32 %v10493_v28, %v9445_v50  ;;  %6826 = vpow2.f32 %v3454_v44  ;;  %v3456_v3 = vmul.f32 1.442695, %v3420_v26  ;;  %v3186_v52 = vmul.f32 %v3141_v33, %v14183_v19  ;;  %v14186_v26 = vld [vmem:[#allocation66_spill] sm:$0xff] }
 0x302   :  { %14180 = vst [vmem:[#allocation127_spill] sm:$0xff] %v10586_v43  ;;  %v3283_v2 = vmul.f32 %v3237_v0, %v10573_v58  ;;  %v10601_v48 = vpop.eup %6812  ;;  %6828 = vpow2.f32 %v3550_v37  ;;  %v3552_v7 = vmul.f32 1.442695, %v3516_v8  ;;  %v3391_v10 = vmax.f32 %v2783_v12, %v10577_v25 }
 0x303   :  { %14182 = vst [vmem:[#allocation129_spill] sm:$0xff] %v10595_v35  ;;  %v10597_v51 = vpop.f32.mrf.mxu0  ;;  %14184 = vst [vmem:[#allocation130_spill] sm:$0xff] %v10601_v48  ;;  %v3282_v61 = vmul.f32 %v3237_v0, %v10580_v22  ;;  %v10607_v28 = vpop.eup %6814  ;;  %6830 = vrcp.f32 %v3608_v5  ;;  %v3458_v47 = vmul.f32 1.442695, %v3421_v45  ;;  %v3281_v44 = vmul.f32 %v10480_v6, %v10586_v43  ;;  %v14188_v45 = vld [vmem:[#allocation67_spill] sm:$0xff] }
 0x304   :  { %14185 = vst [vmem:[#allocation131_spill] sm:$0xff] %v10607_v28  ;;  %v3187_v14 = vmul.f32 %v3141_v33, %v14186_v26  ;;  %v3554_v19 = vmul.f32 1.442695, %v3517_v39  ;;  %v3422_v58 = vsub.f32 %v2782_v41, %v3390_v60  ;;  %v3280_v37 = vmul.f32 %v10480_v6, %v10595_v35  ;;  %v14190_v26 = vld [vmem:[#allocation15_spill] sm:$0xff] }
 0x305   :  { %v10605_v16 = vpop.f32.mrf.mxu0  ;;  %v10614_v8 = vmul.f32 0.0625, %v2642_v17  ;;  %v10618_v0 = vpop.eup %6816  ;;  %6832 = vpow2.f32 %v3456_v3  ;;  %v3518_v5 = vsub.f32 %v10568_v55, %v3390_v60  ;;  %v3185_v22 = vmul.f32 %v10422_v23, %v14188_v45  ;;  %v14191_v3 = vld [vmem:[#allocation12_spill] sm:$0xff] }
 0x306   :  { %14187 = vst [vmem:[#allocation132_spill] sm:$0xff] %v10618_v0  ;;  %v3347_v43 = vadd.f32 %v3283_v2, %v3187_v14  ;;  %6834 = vpow2.f32 %v3552_v7  ;;  %v3423_v33 = vsub.f32 %v2783_v12, %v3391_v10  ;;  %v2784_v41 = vmul.f32 0.0625, %v10551_v31  ;;  %v2645_v17 = vpop.xlane.xlu1 %2644 }
 0x307   :  { %v10616_v32 = vpop.f32.mrf.mxu0  ;;  %v3346_v6 = vadd.f32 %v3282_v61, %v3186_v52  ;;  %v10628_v35 = vpop.eup %6818  ;;  %v10632_v59 = vadd.f32 %v14191_v3, %v14190_v26  ;;  %6836 = vpow2.f32 %v3458_v47  ;;  %v3519_v23 = vsub.f32 %v10577_v25, %v3391_v10 }
 0x308   :  { %14189 = vst [vmem:[#allocation133_spill] sm:$0xff] %v10628_v35  ;;  %v3345_v55 = vadd.f32 %v3281_v44, %v3185_v22  ;;  %v10635_v60 = vpop.eup %6820  ;;  %6838 = vpow2.f32 %v3554_v19  ;;  %v3460_v12 = vmul.f32 1.442695, %v3422_v58  ;;  %v3344_v31 = vadd.f32 %v3280_v37, %v10522_v15  ;;  %v14197_v44 = vld [vmem:[#allocation123_spill] sm:$0xff] }
 0x309   :  { %v10626_v39 = vpop.f32.mrf.mxu0  ;;  %14192 = vst [vmem:[#allocation15_spill] sm:$0xff] %v10635_v60  ;;  %v3392_v52 = vmax.f32 %v2784_v41, %v10614_v8  ;;  %v3556_v7 = vmul.f32 1.442695, %v3518_v5  ;;  %v10641_v61 = vmul.f32 0.0625, %v2549_v36  ;;  %v10644_v14 = vadd.f32 %v1989_v21, %v9447_v49  ;;  %v2648_v21 = vpop.xlane.xlu0 %2647  ;;  %v14199_v5 = vld [vmem:[#allocation122_spill] sm:$0xff] }
 0x30a   :  { %v3941_v47 = vpack.c.bf16 %v3347_v43, %v3345_v55  ;;  %v10646_v45 = vpop.eup %6822  ;;  %v3462_v25 = vmul.f32 1.442695, %v3423_v33  ;;  %v3940_v22 = vpack.c.bf16 %v3346_v6, %v3344_v31  ;;  %v10648_v10 = vmul.f32 0.0625, %v2645_v17  ;;  %v14198_v43 = vld [vmem:[#allocation29_spill] sm:$0xff]  ;;  %v14203_v55 = vld [vmem:[#allocation27_spill] sm:$0xff]  ;;  %v10672_v31 = vpop.xlane.xlu1 %2554 }
 0x30b   :  { %v10639_v2 = vpop.f32.mrf.mxu0  ;;  %14193 = vst [vmem:[#allocation12_spill] sm:$0xff] %v10644_v14  ;;  %14194 = vst [vmem:[#allocation134_spill] sm:$0xff] %v10646_v45  ;;  %v10652_v58 = vadd.f32 %v10570_v24, %v9445_v50  ;;  %v3558_v19 = vmul.f32 1.442695, %v3519_v23  ;;  %v10658_v36 = vadd.f32 %v10560_v56, %v9447_v49  ;;  %v3143_v37 = vmul.f32 %v14198_v43, %v14197_v44  ;;  %v14202_v23 = vld [vmem:[#allocation111_spill] sm:$0xff]  ;;  %v14204_v44 = vld [vmem:[#allocation14_spill] sm:$0xff] }
 0x30c   :  { %v3239_v33 = vmul.f32 %v14198_v43, %v14199_v5  ;;  %4288 = vmatprep.mubr.bf16.mxu1 %v3941_v47  ;;  %v10664_v6 = vpop.eup %6824  ;;  %6840 = vpow2.f32 %v3460_v12  ;;  %v3424_v24 = vsub.f32 %v2784_v41, %v3392_v52  ;;  %v10668_v17 = vadd.f32 %v10546_v42, %v9445_v50  ;;  %v14206_v47 = vld [vmem:[#allocation117_spill] sm:$0xff] }
 0x30d   :  { %14195 = vst [vmem:[#allocation135_spill] sm:$0xff] %v10652_v58  ;;  %v10654_v15 = vpop.f32.mrf.mxu0  ;;  %14196 = vst [vmem:[#allocation136_spill] sm:$0xff] %v10658_v36  ;;  %v3142_v56 = vmul.f32 %v14203_v55, %v14202_v23  ;;  %4289 = vmatmul.mubr.bf16.gmra.mxu1 %v3940_v22  ;;  %v10678_v43 = vadd.f32 %v14205_v11, %v14204_v44  ;;  %6842 = vpow2.f32 %v3556_v7  ;;  %v10709_v29 = vpop.xlane.xlu0 %2557 }
 0x30e   :  { %14200 = vst [vmem:[#allocation123_spill] sm:$0xff] %v10664_v6  ;;  %14201 = vst [vmem:[#allocation29_spill] sm:$0xff] %v10668_v17  ;;  %v3238_v41 = vmul.f32 %v14203_v55, %v14206_v47  ;;  %v3287_v12 = vmul.f32 %v3239_v33, %v10644_v14  ;;  %v10683_v42 = vpop.eup %6826  ;;  %v10687_v5 = vadd.f32 %v10635_v60, %v10628_v35  ;;  %6844 = vpow2.f32 %v3462_v25  ;;  %v14209_v14 = vld [vmem:[#allocation78_spill] sm:$0xff]  ;;  %v14211_v35 = vld [vmem:[#allocation73_spill] sm:$0xff] }
 0x30f   :  { %v10674_v30 = vpop.f32.mrf.mxu0  ;;  %14207 = vst [vmem:[#allocation122_spill] sm:$0xff] %v10683_v42  ;;  %v10691_v22 = vmax.f32 %v10641_v61, %v10648_v10  ;;  %v3286_v23 = vmul.f32 %v3239_v33, %v10652_v58  ;;  %v10696_v7 = vpop.eup %6828  ;;  %6846 = vpow2.f32 %v3558_v19  ;;  %v3520_v55 = vsub.f32 %v10614_v8, %v3392_v52  ;;  %v14215_v52 = vld [vmem:[#allocation10_spill] sm:$0xff] }
 0x310   :  { %14208 = vst [vmem:[#allocation111_spill] sm:$0xff] %v10696_v7  ;;  %v3285_v47 = vmul.f32 %v3238_v41, %v10658_v36  ;;  %v3191_v28 = vmul.f32 %v3143_v37, %v14209_v14  ;;  %v10701_v60 = vpop.eup %6830  ;;  %v3464_v25 = vmul.f32 1.442695, %v3424_v24  ;;  %v3188_v48 = vmul.f32 %v3142_v56, %v14211_v35 }
 0x311   :  { %v10694_v0 = vpop.f32.mrf.mxu0  ;;  %14210 = vst [vmem:[#allocation27_spill] sm:$0xff] %v10701_v60  ;;  %v3284_v9 = vmul.f32 %v3238_v41, %v10668_v17  ;;  %v3190_v33 = vmul.f32 %v3143_v37, %v14212_v4  ;;  %v3189_v53 = vmul.f32 %v3142_v56, %v14213_v20  ;;  %v10713_v8 = vadd.f32 %v10605_v16, %v9447_v49  ;;  %v2651_v41 = vpop.xlane.xlu1 %2650  ;;  %v14218_v17 = vld [vmem:[#allocation7_spill] sm:$0xff] }
 0x312   :  { %v3351_v19 = vadd.f32 %v3287_v12, %v3191_v28  ;;  %v3145_v24 = vmul.f32 %v10410_v57, %v14215_v52  ;;  %v10717_v36 = vpop.eup %6832  ;;  %v10721_v37 = vadd.f32 %v10616_v32, %v9445_v50  ;;  %v3241_v28 = vmul.f32 %v10410_v57, %v14218_v17  ;;  %v14221_v20 = vld [vmem:[#allocation119_spill] sm:$0xff] }
 0x313   :  { %v10706_v58 = vpop.f32.mrf.mxu0  ;;  %14214 = vst [vmem:[#allocation14_spill] sm:$0xff] %v10713_v8  ;;  %14216 = vst [vmem:[#allocation42_spill] sm:$0xff] %v10717_v36  ;;  %v3350_v35 = vadd.f32 %v3286_v23, %v3190_v33  ;;  %v10727_v56 = vadd.f32 %v10626_v39, %v9447_v49  ;;  %v10731_v12 = vpop.eup %6834  ;;  %v3560_v52 = vmul.f32 1.442695, %v3520_v55  ;;  %v3349_v4 = vadd.f32 %v3285_v47, %v3189_v53  ;;  %v14222_v33 = vld [vmem:[#allocation121_spill] sm:$0xff]  ;;  %v14226_v55 = vld [vmem:[#allocation82_spill] sm:$0xff] }
 0x314   :  { %14217 = vst [vmem:[#allocation117_spill] sm:$0xff] %v10721_v37  ;;  %14220 = vst [vmem:[#allocation7_spill] sm:$0xff] %v10731_v12  ;;  %v3144_v23 = vmul.f32 %v10367_v40, %v14221_v20  ;;  %v3240_v32 = vmul.f32 %v10367_v40, %v14222_v33  ;;  %v10737_v14 = vpop.eup %6836  ;;  %v3348_v60 = vadd.f32 %v3284_v9, %v3188_v48  ;;  %v10739_v57 = vmul.f32 0.0625, %v2648_v21 }
 0x315   :  { %14219 = vst [vmem:[#allocation10_spill] sm:$0xff] %v10727_v56  ;;  %v10729_v16 = vpop.f32.mrf.mxu0  ;;  %14223 = vst [vmem:[#allocation119_spill] sm:$0xff] %v10737_v14  ;;  %v10743_v39 = vadd.f32 %v10597_v51, %v9445_v50  ;;  %v3291_v17 = vmul.f32 %v3241_v28, %v10727_v56  ;;  %v10748_v53 = vpop.eup %6838  ;;  %v3425_v20 = vsub.f32 %v10641_v61, %v10691_v22  ;;  %v2786_v51 = vmul.f32 0.0625, %v10623_v27  ;;  %v14227_v61 = vld [vmem:[#allocation74_spill] sm:$0xff] }
 0x316   :  { %14225 = vst [vmem:[#allocation137_spill] sm:$0xff] %v10748_v53  ;;  %v3289_v40 = vmul.f32 %v3240_v32, %v10713_v8  ;;  %v3195_v47 = vmul.f32 %v3145_v24, %v14226_v55  ;;  %v3943_v9 = vpack.c.bf16 %v3351_v19, %v3349_v4  ;;  %v3610_v48 = vadd.f32 %v10664_v6, %v10646_v45  ;;  %v2654_v8 = vpop.xlane.xlu0 %2653  ;;  %v14263_v45 = vld [vmem:[#allocation93_spill] sm:$0xff] }
 0x317   :  { %14224 = vst [vmem:[#allocation121_spill] sm:$0xff] %v10743_v39  ;;  %v10746_v1 = vpop.f32.mrf.mxu0  ;;  %v3942_v21 = vpack.c.bf16 %v3350_v35, %v3348_v60  ;;  %v3290_v33 = vmul.f32 %v3241_v28, %v10721_v37  ;;  %6848 = vpow2.f32 %v3464_v25  ;;  %v3521_v54 = vsub.f32 %v10648_v10, %v10691_v22  ;;  %v2561_v35 = vpop.xlane.xlu1 %2560  ;;  %v14228_v60 = vld [vmem:[#allocation80_spill] sm:$0xff] }
 0x318   :  { %v3193_v62 = vmul.f32 %v3144_v23, %v14227_v61  ;;  %v3355_v46 = vadd.f32 %v3291_v17, %v3195_v47  ;;  %4298 = vmatprep.mubr.bf16.mxu1 %v3943_v9  ;;  %6850 = vpow2.f32 %v3560_v52  ;;  %v10764_v4 = vmax.f32 %v2786_v51, %v10739_v57  ;;  %v14231_v47 = vld [vmem:[#allocation71_spill] sm:$0xff]  ;;  %v14234_v37 = vld [vmem:[#allocation20_spill] sm:$0xff]  ;;  %v14247_v61 = vld [vmem:[#allocation25_spill] sm:$0xff] }
 0x319   :  { %v10758_v56 = vpop.f32.mrf.mxu0  ;;  %v3288_v27 = vmul.f32 %v3240_v32, %v10743_v39  ;;  %v3194_v19 = vmul.f32 %v3145_v24, %v14228_v60  ;;  %4299 = vmatmul.mubr.bf16.gmra.mxu1 %v3942_v21  ;;  %v10768_v28 = vpop.eup %6840  ;;  %v3611_v10 = vadd.f32 %v10696_v7, %v10683_v42  ;;  %v3466_v22 = vmul.f32 1.442695, %v3425_v20  ;;  %v14233_v39 = vld [vmem:[#allocation18_spill] sm:$0xff] }
 0x31a   :  { %14229 = vst [vmem:[#allocation138_spill] sm:$0xff] %v10768_v28  ;;  %v3353_v25 = vadd.f32 %v3289_v40, %v3193_v62  ;;  %6852 = vrcp.f32 %v10632_v59  ;;  %v10773_v17 = vpop.eup %6842  ;;  %v10775_v52 = vmul.f32 0.0625, %v2651_v41  ;;  %v3192_v9 = vmul.f32 %v3144_v23, %v14231_v47 }
 0x31b   :  { %14230 = vst [vmem:[#allocation139_spill] sm:$0xff] %v10773_v17  ;;  %v3354_v32 = vadd.f32 %v3290_v33, %v3194_v19  ;;  %6854 = vrcp.f32 %v10678_v43  ;;  %v10779_v24 = vpop.f32.mrf.mxu0  ;;  %v10781_v21 = vpop.eup %6844  ;;  %v3084_v60 = vadd.f32 %v14234_v37, %v14233_v39  ;;  %v3562_v62 = vmul.f32 1.442695, %v3521_v54  ;;  %v14236_v43 = vld [vmem:[#allocation79_spill] sm:$0xff]  ;;  %v14238_v19 = vld [vmem:[#allocation85_spill] sm:$0xff] }
 0x31c   :  { %14232 = vst [vmem:[#allocation140_spill] sm:$0xff] %v10781_v21  ;;  %6856 = vrcp.f32 %v10687_v5  ;;  %v3945_v59 = vpack.c.bf16 %v3355_v46, %v3353_v25  ;;  %v10786_v20 = vpop.eup %6846  ;;  %v2787_v41 = vmul.f32 0.0625, %v10672_v31  ;;  %v3426_v23 = vsub.f32 %v2786_v51, %v10764_v4  ;;  %v10800_v54 = vpop.xlane.xlu0 %2563  ;;  %v14240_v25 = vld [vmem:[#allocation86_spill] sm:$0xff] }
 0x31d   :  { %14235 = vst [vmem:[#allocation18_spill] sm:$0xff] %v10786_v20  ;;  %6858 = vrcp.f32 %v3610_v48  ;;  %v3352_v40 = vadd.f32 %v3288_v27, %v3192_v9  ;;  %v10792_v33 = vadd.f32 %v14236_v43, %v9445_v50  ;;  %v10796_v47 = vadd.f32 %v14238_v19, %v9447_v49  ;;  %v2657_v51 = vpop.xlane.xlu1 %2656  ;;  %v10805_v27 = vpop.f32.mrf.mxu0 }
 0x31e   :  { %6860 = vrcp.f32 %v3611_v10  ;;  %v3612_v46 = vadd.f32 %v10731_v12, %v10717_v36  ;;  %4308 = vmatprep.mubr.bf16.mxu1 %v3945_v59  ;;  %v3613_v31 = vadd.f32 %v10748_v53, %v10737_v14  ;;  %v3395_v5 = vmax.f32 %v2787_v41, %v10775_v52  ;;  %v14242_v10 = vld [vmem:[#allocation90_spill] sm:$0xff] }
 0x31f   :  { %14237 = vst [vmem:[#allocation20_spill] sm:$0xff] %v10792_v33  ;;  %14239 = vst [vmem:[#allocation79_spill] sm:$0xff] %v10796_v47  ;;  %6862 = vpow2.f32 %v3466_v22  ;;  %v3944_v48 = vpack.c.bf16 %v3354_v32, %v3352_v40  ;;  %v10809_v9 = vadd.f32 %v14240_v25, %v9445_v50  ;;  %v10813_v43 = vadd.f32 %v14242_v10, %v9447_v49  ;;  %v14244_v22 = vld [vmem:[#allocation91_spill] sm:$0xff]  ;;  %v14246_v25 = vld [vmem:[#allocation26_spill] sm:$0xff] }
 0x320   :  { %v3614_v59 = vadd.f32 %v10773_v17, %v10768_v28  ;;  %6864 = vpow2.f32 %v3562_v62  ;;  %v10819_v19 = vadd.f32 %v14244_v22, %v9445_v50  ;;  %v3468_v32 = vmul.f32 1.442695, %v3426_v23  ;;  %v14248_v10 = vld [vmem:[#allocation97_spill] sm:$0xff]  ;;  %v14250_v62 = vld [vmem:[#allocation96_spill] sm:$0xff]  ;;  %v14253_v28 = vld [vmem:[#allocation30_spill] sm:$0xff] }
 0x321   :  { %14241 = vst [vmem:[#allocation85_spill] sm:$0xff] %v10809_v9  ;;  %14243 = vst [vmem:[#allocation86_spill] sm:$0xff] %v10813_v43  ;;  %v3522_v40 = vsub.f32 %v10739_v57, %v10764_v4  ;;  %6866 = vrcp.f32 %v3084_v60  ;;  %4309 = vmatmul.mubr.bf16.gmra.mxu1 %v3944_v48  ;;  %v3085_v55 = vadd.f32 %v14247_v61, %v14246_v25  ;;  %v10829_v17 = vmul.f32 0.0625, %v2654_v8  ;;  %v10836_v4 = vpop.f32.mrf.mxu0  ;;  %v2660_v8 = vpop.xlane.xlu0 %2659 }
 0x322   :  { %14245 = vst [vmem:[#allocation90_spill] sm:$0xff] %v10819_v19  ;;  %v10827_v53 = vadd.f32 %v14248_v10, %v9447_v49  ;;  %6868 = vrcp.f32 %v3612_v46  ;;  %v10833_v22 = vadd.f32 %v14250_v62, %v9445_v50  ;;  %v3427_v23 = vsub.f32 %v2787_v41, %v3395_v5  ;;  %v14254_v62 = vld [vmem:[#allocation24_spill] sm:$0xff] }
 0x323   :  { %6870 = vrcp.f32 %v3613_v31  ;;  %v3523_v57 = vsub.f32 %v10775_v52, %v3395_v5  ;;  %v3615_v60 = vadd.f32 %v10786_v20, %v10781_v21  ;;  %v2788_v48 = vmul.f32 0.0625, %v10709_v29  ;;  %v10849_v31 = vpop.xlane.xlu1 %2566  ;;  %v10870_v14 = vpop.f32.mrf.mxu0 }
 0x324   :  { %14249 = vst [vmem:[#allocation91_spill] sm:$0xff] %v10827_v53  ;;  %14251 = vst [vmem:[#allocation26_spill] sm:$0xff] %v10833_v22  ;;  %6872 = vrcp.f32 %v3614_v59  ;;  %v10841_v10 = vmul.f32 0.0625, %v2657_v51  ;;  %v10843_v46 = vpop.eup %6848  ;;  %v10847_v12 = vadd.f32 %v14254_v62, %v14253_v28  ;;  %v3564_v41 = vmul.f32 1.442695, %v3522_v40 }
 0x325   :  { %14252 = vst [vmem:[#allocation25_spill] sm:$0xff] %v10843_v46  ;;  %6874 = vpow2.f32 %v3468_v32  ;;  %v2789_v52 = vmul.f32 0.0625, %v2561_v35  ;;  %v10851_v5 = vpop.eup %6850  ;;  %v3396_v59 = vmax.f32 %v2788_v48, %v10829_v17  ;;  %v10856_v29 = vadd.f32 %v10639_v2, %v9445_v50 }
 0x326   :  { %14255 = vst [vmem:[#allocation97_spill] sm:$0xff] %v10851_v5  ;;  %v10860_v51 = vadd.f32 %v10654_v15, %v9447_v49  ;;  %6876 = vrcp.f32 %v3085_v55  ;;  %v3470_v21 = vmul.f32 1.442695, %v3427_v23  ;;  %v3566_v32 = vmul.f32 1.442695, %v3523_v57 }
 0x327   :  { %14256 = vst [vmem:[#allocation96_spill] sm:$0xff] %v10856_v29  ;;  %v6853_v20 = vpop.eup %6852  ;;  %v10864_v35 = vadd.f32 %v10674_v30, %v9445_v50  ;;  %v10868_v40 = vadd.f32 %v10694_v0, %v9447_v49  ;;  %6878 = vrcp.f32 %v3615_v60  ;;  %v3397_v36 = vmax.f32 %v2789_v52, %v10841_v10 }
 0x328   :  { %14257 = vst [vmem:[#allocation30_spill] sm:$0xff] %v10860_v51  ;;  %v6855_v2 = vpop.eup %6854  ;;  %v3146_v15 = vmul.f32 %v6853_v20, %v14190_v26  ;;  %v3242_v55 = vmul.f32 %v6853_v20, %v14191_v3  ;;  %v3616_v30 = vadd.f32 %v10851_v5, %v10843_v46  ;;  %6880 = vpow2.f32 %v3564_v41  ;;  %v10886_v3 = vpop.xlane.xlu0 %2569 }
 0x329   :  { %14258 = vst [vmem:[#allocation24_spill] sm:$0xff] %v10864_v35  ;;  %14259 = vst [vmem:[#allocation141_spill] sm:$0xff] %v10868_v40  ;;  %v10875_v23 = vpop.eup %6856  ;;  %v3147_v57 = vmul.f32 %v6855_v2, %v14204_v44  ;;  %v3243_v0 = vmul.f32 %v6855_v2, %v14205_v11  ;;  %v3428_v6 = vsub.f32 %v2788_v48, %v3396_v59  ;;  %v14264_v44 = vld [vmem:[#allocation98_spill] sm:$0xff]  ;;  %v2663_v2 = vpop.xlane.xlu1 %2662  ;;  %6882 = vpow2.f32 %v3470_v21 }
 0x32a   :  { %14260 = vst [vmem:[#allocation142_spill] sm:$0xff] %v10875_v23  ;;  %v10881_v7 = vpop.eup %6858  ;;  %v3524_v60 = vsub.f32 %v10829_v17, %v3396_v59  ;;  %v3292_v42 = vmul.f32 %v3242_v55, %v10856_v29  ;;  %v3293_v26 = vmul.f32 %v3242_v55, %v10860_v51  ;;  %v10894_v48 = vpop.f32.mrf.mxu0  ;;  %v14266_v59 = vld [vmem:[#allocation32_spill] sm:$0xff]  ;;  %v3429_v29 = vsub.f32 %v2789_v52, %v3397_v36  ;;  %v14267_v51 = vld [vmem:[#allocation87_spill] sm:$0xff] }
 0x32b   :  { %14261 = vst [vmem:[#allocation143_spill] sm:$0xff] %v10881_v7  ;;  %v10888_v20 = vpop.eup %6860  ;;  %v3198_v5 = vmul.f32 %v3147_v57, %v14263_v45  ;;  %v3294_v41 = vmul.f32 %v3243_v0, %v10864_v35  ;;  %v3199_v46 = vmul.f32 %v3147_v57, %v14264_v44  ;;  %v3295_v11 = vmul.f32 %v3243_v0, %v10868_v40  ;;  %v14269_v35 = vld [vmem:[#allocation81_spill] sm:$0xff] }
 0x32c   :  { %14262 = vst [vmem:[#allocation144_spill] sm:$0xff] %v10888_v20  ;;  %v10896_v17 = vpop.eup %6862  ;;  %v10900_v55 = vadd.f32 %v10343_v38, %v14266_v59  ;;  %v3197_v20 = vmul.f32 %v3146_v15, %v14267_v51  ;;  %6884 = vpow2.f32 %v3566_v32  ;;  %v3196_v57 = vmul.f32 %v3146_v15, %v14269_v35  ;;  %v10915_v32 = vpop.f32.mrf.mxu0 }
 0x32d   :  { %14265 = vst [vmem:[#allocation145_spill] sm:$0xff] %v10896_v17  ;;  %v10903_v45 = vpop.eup %6864  ;;  %v3358_v44 = vadd.f32 %v3294_v41, %v3198_v5  ;;  %v3359_v0 = vadd.f32 %v3295_v11, %v3199_v46  ;;  %v10908_v7 = vadd.f32 %v10383_v63, %v10376_v18  ;;  %6886 = vrcp.f32 %v3616_v30  ;;  %v2666_v30 = vpop.xlane.xlu0 %2665 }
 0x32e   :  { %14268 = vst [vmem:[#allocation32_spill] sm:$0xff] %v10903_v45  ;;  %v6867_v40 = vpop.eup %6866  ;;  %v3472_v23 = vmul.f32 1.442695, %v3428_v6  ;;  %v3357_v19 = vadd.f32 %v3293_v26, %v3197_v20  ;;  %v3568_v21 = vmul.f32 1.442695, %v3524_v60  ;;  %v3525_v52 = vsub.f32 %v10841_v10, %v3397_v36  ;;  %v2573_v20 = vpop.xlane.xlu1 %2572 }
 0x32f   :  { %v10910_v22 = vpop.eup %6868  ;;  %v3356_v51 = vadd.f32 %v3292_v42, %v3196_v57  ;;  %v10913_v53 = vmul.f32 0.0625, %v2660_v8  ;;  %v3617_v46 = vadd.f32 %v10903_v45, %v10896_v17  ;;  %v3474_v15 = vmul.f32 1.442695, %v3429_v29  ;;  %v14279_v57 = vld [vmem:[#allocation94_spill] sm:$0xff] }
 0x330   :  { %14270 = vst [vmem:[#allocation146_spill] sm:$0xff] %v10910_v22  ;;  %v10917_v5 = vpop.eup %6870  ;;  %v10923_v6 = vadd.f32 %v10729_v16, %v9447_v49  ;;  %v3947_v26 = vpack.c.bf16 %v3359_v0, %v3357_v19  ;;  %v2790_v36 = vmul.f32 0.0625, %v10800_v54  ;;  %v10930_v10 = vadd.f32 %v10706_v58, %v9445_v50  ;;  %v14303_v22 = vld [vmem:[#allocation132_spill] sm:$0xff] }
 0x331   :  { %14271 = vst [vmem:[#allocation147_spill] sm:$0xff] %v10917_v5  ;;  %v10925_v60 = vpop.eup %6872  ;;  %v3946_v42 = vpack.c.bf16 %v3358_v44, %v3356_v51  ;;  %v3148_v8 = vmul.f32 %v6867_v40, %v14233_v39  ;;  %6888 = vpow2.f32 %v3472_v23  ;;  %v3244_v16 = vmul.f32 %v6867_v40, %v14234_v37  ;;  %v10949_v23 = vpop.f32.mrf.mxu0  ;;  %v14302_v5 = vld [vmem:[#allocation131_spill] sm:$0xff] }
 0x332   :  { %14272 = vst [vmem:[#allocation148_spill] sm:$0xff] %v10923_v6  ;;  %14273 = vst [vmem:[#allocation149_spill] sm:$0xff] %v10925_v60  ;;  %v10933_v41 = vpop.eup %6874  ;;  %v10938_v19 = vadd.f32 %v10746_v1, %v9445_v50  ;;  %v10942_v54 = vadd.f32 %v10758_v56, %v9447_v49  ;;  %4318 = vmatprep.mubr.bf16.mxu1 %v3947_v26  ;;  %6890 = vpow2.f32 %v3568_v21  ;;  %v3570_v58 = vmul.f32 1.442695, %v3525_v52  ;;  %v14281_v21 = vld [vmem:[#allocation103_spill] sm:$0xff]  ;;  %v14282_v26 = vld [vmem:[#allocation102_spill] sm:$0xff] }
 0x333   :  { %14274 = vst [vmem:[#allocation150_spill] sm:$0xff] %v10930_v10  ;;  %14275 = vst [vmem:[#allocation151_spill] sm:$0xff] %v10933_v41  ;;  %v6877_v29 = vpop.eup %6876  ;;  %v10945_v39 = vmax.f32 %v2790_v36, %v10913_v53  ;;  %v10947_v51 = vmul.f32 0.0625, %v2663_v2  ;;  %4319 = vmatmul.mubr.bf16.gmra.mxu1 %v3946_v42  ;;  %6892 = vpow2.f32 %v3474_v15  ;;  %v3297_v1 = vmul.f32 %v3244_v16, %v10923_v6  ;;  %v2576_v42 = vpop.xlane.xlu0 %2575 }
 0x334   :  { %14276 = vst [vmem:[#allocation152_spill] sm:$0xff] %v10938_v19  ;;  %14277 = vst [vmem:[#allocation153_spill] sm:$0xff] %v10942_v54  ;;  %v3149_v37 = vmul.f32 %v6877_v29, %v14246_v25  ;;  %v3245_v56 = vmul.f32 %v6877_v29, %v14247_v61  ;;  %v10954_v40 = vpop.eup %6878  ;;  %v2791_v44 = vmul.f32 0.0625, %v10849_v31  ;;  %v3296_v11 = vmul.f32 %v3244_v16, %v10930_v10  ;;  %v14283_v29 = vld [vmem:[#allocation95_spill] sm:$0xff]  ;;  %v2669_v6 = vpop.xlane.xlu1 %2668 }
 0x335   :  { %14278 = vst [vmem:[#allocation154_spill] sm:$0xff] %v10954_v40  ;;  %v3201_v0 = vmul.f32 %v3148_v8, %v14279_v57  ;;  %6894 = vrcp.f32 %v10847_v12  ;;  %v10960_v2 = vpop.eup %6880  ;;  %v3430_v31 = vsub.f32 %v2790_v36, %v10945_v39  ;;  %v3200_v10 = vmul.f32 %v3148_v8, %v14283_v29  ;;  %v10969_v12 = vpop.f32.mrf.mxu0 }
 0x336   :  { %14280 = vst [vmem:[#allocation155_spill] sm:$0xff] %v10960_v2  ;;  %v3202_v52 = vmul.f32 %v3149_v37, %v14281_v21  ;;  %v3298_v15 = vmul.f32 %v3245_v56, %v10938_v19  ;;  %v3203_v25 = vmul.f32 %v3149_v37, %v14282_v26  ;;  %v3299_v61 = vmul.f32 %v3245_v56, %v10942_v54  ;;  %v10973_v45 = vpop.eup %6882  ;;  %v14286_v56 = vld [vmem:[#allocation75_spill] sm:$0xff] }
 0x337   :  { %6896 = vpow2.f32 %v3570_v58  ;;  %v3399_v16 = vmax.f32 %v2791_v44, %v10947_v51  ;;  %v3361_v57 = vadd.f32 %v3297_v1, %v3201_v0  ;;  %v10971_v35 = vmul.f32 0.0625, %v2666_v30  ;;  %14284 = vst [vmem:[#allocation156_spill] sm:$0xff] %v10973_v45  ;;  %v14285_v58 = vld [vmem:[#allocation76_spill] sm:$0xff]  ;;  %v2672_v17 = vpop.xlane.xlu0 %2671 }
 0x338   :  { %v3362_v21 = vadd.f32 %v3298_v15, %v3202_v52  ;;  %v3363_v19 = vadd.f32 %v3299_v61, %v3203_v25  ;;  %v3089_v37 = vadd.f32 %v10403_v34, %v10394_v13  ;;  %v3090_v36 = vadd.f32 %v14286_v56, %v14285_v58 }
 0x339   :  { %v3360_v54 = vadd.f32 %v3296_v11, %v3200_v10  ;;  %6898 = vrcp.f32 %v10900_v55  ;;  %v10980_v8 = vpop.eup %6884  ;;  %v3618_v1 = vadd.f32 %v10960_v2, %v10933_v41  ;;  %v2792_v30 = vmul.f32 0.0625, %v10886_v3  ;;  %v10989_v10 = vpop.f32.mrf.mxu0  ;;  %v14289_v3 = vld [vmem:[#allocation100_spill] sm:$0xff] }
 0x33a   :  { %14287 = vst [vmem:[#allocation76_spill] sm:$0xff] %v10980_v8  ;;  %v2825_v0 = vmul.f32 0.0625, %v2669_v6  ;;  %v3949_v52 = vpack.c.bf16 %v3363_v19, %v3361_v57  ;;  %v10985_v15 = vpop.eup %6886  ;;  %6900 = vrcp.f32 %v3617_v46  ;;  %v3476_v25 = vmul.f32 1.442695, %v3430_v31  ;;  %v14291_v46 = vld [vmem:[#allocation92_spill] sm:$0xff]  ;;  %v14296_v31 = vld [vmem:[#allocation21_spill] sm:$0xff] }
 0x33b   :  { %14288 = vst [vmem:[#allocation75_spill] sm:$0xff] %v10985_v15  ;;  %v3526_v61 = vsub.f32 %v10913_v53, %v10945_v39  ;;  %v3948_v29 = vpack.c.bf16 %v3362_v21, %v3360_v54  ;;  %v3431_v55 = vsub.f32 %v2791_v44, %v3399_v16  ;;  %v2793_v11 = vmul.f32 0.0625, %v2573_v20  ;;  %v14292_v19 = vld [vmem:[#allocation84_spill] sm:$0xff]  ;;  %v14294_v39 = vld [vmem:[#allocation6_spill] sm:$0xff] }
 0x33c   :  { %v3400_v26 = vmax.f32 %v2792_v30, %v10971_v35  ;;  %4328 = vmatprep.mubr.bf16.mxu1 %v3949_v52  ;;  %6902 = vrcp.f32 %v10908_v7  ;;  %v10995_v6 = vadd.f32 %v14289_v3, %v9447_v49  ;;  %v3091_v57 = vadd.f32 %v14292_v19, %v14291_v46  ;;  %v14293_v54 = vld [vmem:[#allocation88_spill] sm:$0xff] }
 0x33d   :  { %v3527_v53 = vsub.f32 %v10947_v51, %v3399_v16  ;;  %4329 = vmatmul.mubr.bf16.gmra.mxu1 %v3948_v29  ;;  %6904 = vrcp.f32 %v3089_v37  ;;  %v11002_v20 = vadd.f32 %v14294_v39, %v14293_v54  ;;  %v3619_v44 = vadd.f32 %v10980_v8, %v10973_v45  ;;  %v14297_v52 = vld [vmem:[#allocation124_spill] sm:$0xff]  ;;  %v11014_v16 = vpop.f32.mrf.mxu0 }
 0x33e   :  { %14290 = vst [vmem:[#allocation100_spill] sm:$0xff] %v10995_v6  ;;  %6906 = vrcp.f32 %v3618_v1  ;;  %v3401_v7 = vmax.f32 %v2793_v11, %v2825_v0  ;;  %v11006_v21 = vpop.eup %6888  ;;  %v11010_v3 = vadd.f32 %v14297_v52, %v14296_v31  ;;  %v3572_v2 = vmul.f32 1.442695, %v3526_v61  ;;  %v14299_v37 = vld [vmem:[#allocation128_spill] sm:$0xff]  ;;  %v14300_v1 = vld [vmem:[#allocation130_spill] sm:$0xff] }
 0x33f   :  { %14295 = vst [vmem:[#allocation92_spill] sm:$0xff] %v11006_v21  ;;  %6908 = vpow2.f32 %v3476_v25  ;;  %v11012_v51 = vmul.f32 0.0625, %v2672_v17  ;;  %v11016_v29 = vpop.eup %6890  ;;  %v11020_v41 = vadd.f32 %v14300_v1, %v14299_v37  ;;  %v3478_v8 = vmul.f32 1.442695, %v3431_v55  ;;  %v2579_v17 = vpop.xlane.xlu1 %2578 }
 0x340   :  { %14298 = vst [vmem:[#allocation84_spill] sm:$0xff] %v11016_v29  ;;  %v3432_v45 = vsub.f32 %v2792_v30, %v3400_v26  ;;  %6910 = vrcp.f32 %v3090_v36  ;;  %v11022_v15 = vpop.eup %6892  ;;  %v3574_v60 = vmul.f32 1.442695, %v3527_v53  ;;  %v3528_v40 = vsub.f32 %v10971_v35, %v3400_v26  ;;  %v11041_v26 = vpop.f32.mrf.mxu0 }
 0x341   :  { %14301 = vst [vmem:[#allocation88_spill] sm:$0xff] %v11022_v15  ;;  %v11025_v25 = vmul.f32 0.0625, %v2576_v42  ;;  %6912 = vrcp.f32 %v3091_v57  ;;  %v11029_v52 = vadd.f32 %v14303_v22, %v14302_v5  ;;  %v3433_v1 = vsub.f32 %v2793_v11, %v3401_v7 }
 0x342   :  { %v6895_v61 = vpop.eup %6894  ;;  %6914 = vrcp.f32 %v3619_v44  ;;  %v3529_v37 = vsub.f32 %v2825_v0, %v3401_v7  ;;  %v3620_v36 = vadd.f32 %v11016_v29, %v11006_v21  ;;  %v11035_v30 = vadd.f32 %v10779_v24, %v9445_v50  ;;  %v2049_v7 = vpop.f32.mrf.mxu0  ;;  %v14312_v21 = vld [vmem:[#allocation108_spill] sm:$0xff] }
 0x343   :  { %6916 = vpow2.f32 %v3572_v2  ;;  %v11039_v35 = vmax.f32 %v11025_v25, %v11012_v51  ;;  %v3480_v55 = vmul.f32 1.442695, %v3432_v45  ;;  %v11047_v0 = vadd.f32 %v10805_v27, %v9447_v49 }
 0x344   :  { %14304 = vst [vmem:[#allocation6_spill] sm:$0xff] %v11035_v30  ;;  %v11043_v42 = vpop.eup %6896  ;;  %6918 = vpow2.f32 %v3478_v8  ;;  %v11049_v11 = vmul.f32 0.0625, %v2579_v17  ;;  %v3576_v2 = vmul.f32 1.442695, %v3528_v40  ;;  %v11053_v24 = vadd.f32 %v10836_v4, %v9445_v50 }
 0x345   :  { %14305 = vst [vmem:[#allocation21_spill] sm:$0xff] %v11043_v42  ;;  %14306 = vst [vmem:[#allocation131_spill] sm:$0xff] %v11047_v0  ;;  %6920 = vpow2.f32 %v3574_v60  ;;  %v11057_v57 = vadd.f32 %v10870_v14, %v9447_v49  ;;  %v11059_v44 = vmul.f32 1.442695, %v3433_v1  ;;  %v11061_v45 = vmul.f32 1.442695, %v3529_v37  ;;  %v2675_v37 = vpop.xlane.xlu1 %2674 }
 0x346   :  { %14307 = vst [vmem:[#allocation132_spill] sm:$0xff] %v11053_v24  ;;  %v6899_v53 = vpop.eup %6898  ;;  %v3150_v27 = vmul.f32 %v6895_v61, %v14253_v28  ;;  %v3246_v8 = vmul.f32 %v6895_v61, %v14254_v62  ;;  %6922 = vrcp.f32 %v3620_v36  ;;  %v11073_v1 = vadd.f32 %v11043_v42, %v11022_v15  ;;  %v14310_v61 = vld [vmem:[#allocation112_spill] sm:$0xff]  ;;  %v14311_v60 = vld [vmem:[#allocation114_spill] sm:$0xff]  ;;  %v14313_v42 = vld [vmem:[#allocation113_spill] sm:$0xff] }
 0x347   :  { %14308 = vst [vmem:[#allocation157_spill] sm:$0xff] %v11057_v57  ;;  %v3151_v4 = vmul.f32 %v6899_v53, %v14266_v59  ;;  %v3247_v40 = vmul.f32 %v6899_v53, %v10343_v38  ;;  %v11069_v14 = vpop.eup %6900  ;;  %6924 = vpow2.f32 %v3480_v55  ;;  %v11083_v55 = vpop.xlane.xlu0 %2581 }
 0x348   :  { %14309 = vst [vmem:[#allocation158_spill] sm:$0xff] %v11069_v14  ;;  %v3300_v28 = vmul.f32 %v3246_v8, %v11035_v30  ;;  %v3301_v62 = vmul.f32 %v3246_v8, %v11047_v0  ;;  %v3204_v14 = vmul.f32 %v3150_v27, %v14312_v21  ;;  %v3205_v15 = vmul.f32 %v3150_v27, %v14313_v42  ;;  %v11100_v21 = vpop.f32.mrf.mxu0 }
 0x349   :  { %v6903_v17 = vpop.eup %6902  ;;  %v3206_v36 = vmul.f32 %v3151_v4, %v14310_v61  ;;  %v3302_v59 = vmul.f32 %v3247_v40, %v11053_v24  ;;  %v3207_v38 = vmul.f32 %v3151_v4, %v14311_v60  ;;  %v3303_v53 = vmul.f32 %v3247_v40, %v11057_v57  ;;  %v2585_v57 = vpop.xlane.xlu1 %2584 }
 0x34a   :  { %v6905_v29 = vpop.eup %6904  ;;  %v11087_v8 = vadd.f32 %v10915_v32, %v9447_v49  ;;  %v11091_v30 = vadd.f32 %v10969_v12, %v9447_v49  ;;  %v11097_v40 = vadd.f32 %v10949_v23, %v9445_v50  ;;  %v3365_v32 = vadd.f32 %v3301_v62, %v3205_v15 }
 0x34b   :  { %v11093_v24 = vpop.eup %6906  ;;  %v3366_v4 = vadd.f32 %v3302_v59, %v3206_v36  ;;  %v3367_v61 = vadd.f32 %v3303_v53, %v3207_v38  ;;  %v3153_v27 = vmul.f32 %v6905_v29, %v10394_v13  ;;  %v11104_v42 = vmul.f32 0.0625, %v2675_v37 }
 0x34c   :  { %14314 = vst [vmem:[#allocation159_spill] sm:$0xff] %v11087_v8  ;;  %14315 = vst [vmem:[#allocation160_spill] sm:$0xff] %v11091_v30  ;;  %v11102_v0 = vpop.eup %6908  ;;  %v11108_v12 = vadd.f32 %v10894_v48, %v9445_v50  ;;  %v3249_v36 = vmul.f32 %v6905_v29, %v10403_v34  ;;  %6926 = vpow2.f32 %v3576_v2  ;;  %v3364_v38 = vadd.f32 %v3300_v28, %v3204_v14  ;;  %v11126_v14 = vpop.f32.mrf.mxu0 }
 0x34d   :  { %14316 = vst [vmem:[#allocation161_spill] sm:$0xff] %v11097_v40  ;;  %v6911_v59 = vpop.eup %6910  ;;  %v3152_v23 = vmul.f32 %v6903_v17, %v10376_v18  ;;  %v3248_v13 = vmul.f32 %v6903_v17, %v10383_v63  ;;  %v3951_v15 = vpack.c.bf16 %v3367_v61, %v3365_v32  ;;  %v11116_v62 = vadd.f32 %v11014_v16, %v9447_v49  ;;  %v2678_v16 = vpop.xlane.xlu0 %2677 }
 0x34e   :  { %14317 = vst [vmem:[#allocation162_spill] sm:$0xff] %v11108_v12  ;;  %v6913_v53 = vpop.eup %6912  ;;  %v3307_v60 = vmul.f32 %v3249_v36, %v11091_v30  ;;  %v11119_v48 = vadd.f32 %v2049_v7, %v9447_v49  ;;  %v3950_v29 = vpack.c.bf16 %v3366_v4, %v3364_v38  ;;  %v3306_v18 = vmul.f32 %v3249_v36, %v11097_v40 }
 0x34f   :  { %14318 = vst [vmem:[#allocation163_spill] sm:$0xff] %v11116_v62  ;;  %v11121_v34 = vpop.eup %6914  ;;  %v3305_v2 = vmul.f32 %v3248_v13, %v11087_v8  ;;  %v3211_v63 = vmul.f32 %v3153_v27, %v10813_v43  ;;  %v3304_v37 = vmul.f32 %v3248_v13, %v11108_v12  ;;  %4338 = vmatprep.mubr.bf16.mxu1 %v3951_v15  ;;  %6928 = vpow2.f32 %v11059_v44  ;;  %v11150_v15 = vpop.f32.mrf.mxu0  ;;  %v14403_v43 = vld [vmem:[#allocation52_spill] sm:$0xff] }
 0x350   :  { %14319 = vst [vmem:[#allocation164_spill] sm:$0xff] %v11119_v48  ;;  %v11128_v28 = vpop.eup %6916  ;;  %v3154_v7 = vmul.f32 %v6911_v59, %v14285_v58  ;;  %v3250_v17 = vmul.f32 %v6911_v59, %v14286_v56  ;;  %v3155_v61 = vmul.f32 %v6913_v53, %v14291_v46  ;;  %v3209_v32 = vmul.f32 %v3152_v23, %v10796_v47 }
 0x351   :  { %v11134_v4 = vpop.eup %6918  ;;  %v3210_v36 = vmul.f32 %v3153_v27, %v10809_v9  ;;  %v3371_v38 = vadd.f32 %v3307_v60, %v3211_v63  ;;  %4339 = vmatmul.mubr.bf16.gmra.mxu1 %v3950_v29  ;;  %v3251_v40 = vmul.f32 %v6913_v53, %v14292_v19  ;;  %v3208_v58 = vmul.f32 %v3152_v23, %v10792_v33  ;;  %v2681_v53 = vpop.xlane.xlu1 %2680 }
 0x352   :  { %v11139_v8 = vpop.eup %6920  ;;  %v3309_v56 = vmul.f32 %v3250_v17, %v11116_v62  ;;  %v11146_v46 = vadd.f32 %v11041_v26, %v9445_v50  ;;  %v3369_v59 = vadd.f32 %v3305_v2, %v3209_v32  ;;  %v3215_v27 = vmul.f32 %v3155_v61, %v10995_v6  ;;  %v14321_v26 = vld [vmem:[#allocation91_spill] sm:$0xff] }
 0x353   :  { %v3370_v13 = vadd.f32 %v3306_v18, %v3210_v36  ;;  %v3311_v60 = vmul.f32 %v3251_v40, %v11119_v48  ;;  %v11152_v19 = vpop.eup %6922  ;;  %6930 = vpow2.f32 %v11061_v45  ;;  %v3403_v44 = vmax.f32 %v11049_v11, %v11104_v42  ;;  %v2588_v48 = vpop.xlane.xlu0 %2587 }
 0x354   :  { %14320 = vst [vmem:[#allocation165_spill] sm:$0xff] %v11146_v46  ;;  %v11157_v23 = vmul.f32 0.0625, %v2678_v16  ;;  %v3213_v29 = vmul.f32 %v3154_v7, %v14321_v26  ;;  %v11160_v2 = vpop.eup %6924  ;;  %v3368_v18 = vadd.f32 %v3304_v37, %v3208_v58  ;;  %v11164_v63 = vadd.f32 %v10989_v10, %v9445_v50  ;;  %v11174_v10 = vpop.f32.mrf.mxu0 }
 0x355   :  { %v3375_v32 = vadd.f32 %v3311_v60, %v3215_v27  ;;  %v3953_v36 = vpack.c.bf16 %v3371_v38, %v3369_v59  ;;  %v3622_v45 = vadd.f32 %v11128_v28, %v11102_v0  ;;  %v2796_v62 = vmul.f32 0.0625, %v11083_v55 }
 0x356   :  { %14322 = vst [vmem:[#allocation166_spill] sm:$0xff] %v11164_v63  ;;  %v3373_v16 = vadd.f32 %v3309_v56, %v3213_v29  ;;  %6932 = vrcp.f32 %v11002_v20  ;;  %v3952_v6 = vpack.c.bf16 %v3370_v13, %v3368_v18  ;;  %v11170_v26 = vmul.f32 0.0625, %v2681_v53  ;;  %v14323_v13 = vld [vmem:[#allocation26_spill] sm:$0xff]  ;;  %v11197_v18 = vpop.f32.mrf.mxu0 }
 0x357   :  { %v3310_v37 = vmul.f32 %v3251_v40, %v11146_v46  ;;  %4348 = vmatprep.mubr.bf16.mxu1 %v3953_v36  ;;  %6934 = vrcp.f32 %v11010_v3  ;;  %v3530_v38 = vsub.f32 %v11012_v51, %v11039_v35  ;;  %v3404_v55 = vmax.f32 %v2796_v62, %v11157_v23  ;;  %v14324_v3 = vld [vmem:[#allocation99_spill] sm:$0xff] }
 0x358   :  { %6936 = vrcp.f32 %v11073_v1  ;;  %v3955_v58 = vpack.c.bf16 %v3375_v32, %v3373_v16  ;;  %v3435_v20 = vsub.f32 %v11049_v11, %v3403_v44  ;;  %v2797_v56 = vmul.f32 0.0625, %v2585_v57  ;;  %v2591_v11 = vpop.xlane.xlu1 %2590  ;;  %v14328_v32 = vld [vmem:[#allocation101_spill] sm:$0xff] }
 0x359   :  { %v3308_v59 = vmul.f32 %v3250_v17, %v11164_v63  ;;  %v3214_v40 = vmul.f32 %v3155_v61, %v14323_v13  ;;  %4349 = vmatmul.mubr.bf16.gmra.mxu1 %v3952_v6  ;;  %v11183_v27 = vpop.eup %6926  ;;  %v11187_v60 = vadd.f32 %v14324_v3, %v9445_v50  ;;  %6938 = vrcp.f32 %v3622_v45  ;;  %v14327_v17 = vld [vmem:[#allocation90_spill] sm:$0xff]  ;;  %v2684_v45 = vpop.xlane.xlu0 %2683  ;;  %v14336_v3 = vld [vmem:[#allocation115_spill] sm:$0xff] }
 0x35a   :  { %v14326_v51 = vsub.f32 %v11025_v25, %v11039_v35  ;;  %v3531_v53 = vsub.f32 %v11104_v42, %v3403_v44  ;;  %4358 = vmatprep.mubr.bf16.mxu1 %v3955_v58  ;;  %v3623_v57 = vadd.f32 %v11139_v8, %v11134_v4  ;;  %v3405_v6 = vmax.f32 %v2797_v56, %v11170_v26  ;;  %v14332_v58 = vld [vmem:[#allocation110_spill] sm:$0xff] }
 0x35b   :  { %14325 = vst [vmem:[#allocation99_spill] sm:$0xff] %v11187_v60  ;;  %v3212_v61 = vmul.f32 %v3154_v7, %v14327_v17  ;;  %v3374_v29 = vadd.f32 %v3310_v37, %v3214_v40  ;;  %v11201_v36 = vadd.f32 %v14328_v32, %v9447_v49  ;;  %v3580_v25 = vmul.f32 1.442695, %v3530_v38  ;;  %v14330_v7 = vld [vmem:[#allocation107_spill] sm:$0xff] }
 0x35c   :  { %v3484_v1 = vmul.f32 1.442695, %v14326_v51  ;;  %v3436_v35 = vsub.f32 %v2796_v62, %v3404_v55  ;;  %6940 = vrcp.f32 %v11020_v41  ;;  %v3486_v42 = vmul.f32 1.442695, %v3435_v20  ;;  %v11214_v62 = vpop.eup %6928 }
 0x35d   :  { %14329 = vst [vmem:[#allocation101_spill] sm:$0xff] %v11201_v36  ;;  %v3532_v44 = vsub.f32 %v11157_v23, %v3404_v55  ;;  %v3372_v16 = vadd.f32 %v3308_v59, %v3212_v61  ;;  %6942 = vrcp.f32 %v11029_v52  ;;  %v11208_v37 = vadd.f32 %v14330_v7, %v9445_v50  ;;  %v2065_v55 = vpop.f32.mrf.mxu0  ;;  %v14334_v52 = vld [vmem:[#allocation118_spill] sm:$0xff] }
 0x35e   :  { %v11212_v40 = vadd.f32 %v14332_v58, %v9447_v49  ;;  %6944 = vpow2.f32 %v3484_v1  ;;  %v3582_v38 = vmul.f32 1.442695, %v3531_v53  ;;  %v3437_v41 = vsub.f32 %v2797_v56, %v3405_v6  ;;  %v2687_v1 = vpop.xlane.xlu1 %2686 }
 0x35f   :  { %14331 = vst [vmem:[#allocation107_spill] sm:$0xff] %v11208_v37  ;;  %6946 = vrcp.f32 %v3623_v57  ;;  %v11216_v20 = vmul.f32 0.0625, %v2684_v45  ;;  %v3954_v23 = vpack.c.bf16 %v3374_v29, %v3372_v16  ;;  %v11220_v59 = vadd.f32 %v14334_v52, %v9445_v50  ;;  %v14338_v29 = vld [vmem:[#allocation116_spill] sm:$0xff] }
 0x360   :  { %14333 = vst [vmem:[#allocation110_spill] sm:$0xff] %v11212_v40  ;;  %v11224_v51 = vadd.f32 %v14336_v3, %v9447_v49  ;;  %6948 = vpow2.f32 %v3580_v25  ;;  %v3488_v61 = vmul.f32 1.442695, %v3436_v35  ;;  %v11226_v53 = vpop.eup %6930  ;;  %v3584_v57 = vmul.f32 1.442695, %v3532_v44  ;;  %v14340_v16 = vld [vmem:[#allocation120_spill] sm:$0xff]  ;;  %v2067_v44 = vpop.f32.mrf.mxu0 }
 0x361   :  { %14335 = vst [vmem:[#allocation118_spill] sm:$0xff] %v11220_v59  ;;  %6950 = vpow2.f32 %v3486_v42  ;;  %v3533_v56 = vsub.f32 %v11170_v26, %v3405_v6  ;;  %v11229_v32 = vmul.f32 0.0625, %v2588_v48  ;;  %4359 = vmatmul.mubr.bf16.gmra.mxu1 %v3954_v23  ;;  %v11233_v45 = vadd.f32 %v14338_v29, %v9445_v50 }
 0x362   :  { %14337 = vst [vmem:[#allocation115_spill] sm:$0xff] %v11224_v51  ;;  %v11237_v7 = vadd.f32 %v14340_v16, %v9447_v49  ;;  %6952 = vpow2.f32 %v3582_v38  ;;  %v11239_v25 = vmul.f32 0.0625, %v2591_v11  ;;  %v11243_v42 = vadd.f32 %v11183_v27, %v11160_v2 }
 0x363   :  { %14339 = vst [vmem:[#allocation116_spill] sm:$0xff] %v11233_v45  ;;  %v6933_v35 = vpop.eup %6932  ;;  %v3490_v26 = vmul.f32 1.442695, %v3437_v41  ;;  %v11247_v48 = vmax.f32 %v11229_v32, %v11216_v20  ;;  %v11249_v6 = vmul.f32 0.0625, %v2687_v1  ;;  %6954 = vpow2.f32 %v3488_v61 }
 0x364   :  { %14341 = vst [vmem:[#allocation120_spill] sm:$0xff] %v11237_v7  ;;  %v6935_v58 = vpop.eup %6934  ;;  %v11253_v38 = vadd.f32 %v11126_v14, %v9447_v49  ;;  %v11257_v11 = vadd.f32 %v11150_v15, %v9445_v50  ;;  %v11261_v41 = vadd.f32 %v11174_v10, %v9447_v49  ;;  %v11267_v52 = vadd.f32 %v11226_v53, %v11214_v62  ;;  %v14346_v10 = vld [vmem:[#allocation124_spill] sm:$0xff] }
 0x365   :  { %v11263_v23 = vpop.eup %6936  ;;  %6956 = vpow2.f32 %v3584_v57  ;;  %v3586_v3 = vmul.f32 1.442695, %v3533_v56  ;;  %v11271_v14 = vadd.f32 %v11100_v21, %v9445_v50  ;;  %v3156_v61 = vmul.f32 %v6933_v35, %v14293_v54  ;;  %v2069_v54 = vpop.f32.mrf.mxu0 }
 0x366   :  { %14342 = vst [vmem:[#allocation167_spill] sm:$0xff] %v11253_v38  ;;  %14343 = vst [vmem:[#allocation168_spill] sm:$0xff] %v11257_v11  ;;  %v3252_v15 = vmul.f32 %v6933_v35, %v14294_v39  ;;  %v3157_v1 = vmul.f32 %v6935_v58, %v14296_v31  ;;  %v3253_v29 = vmul.f32 %v6935_v58, %v14346_v10  ;;  %v11277_v16 = vpop.eup %6938  ;;  %6958 = vpow2.f32 %v3490_v26 }
 0x367   :  { %14344 = vst [vmem:[#allocation169_spill] sm:$0xff] %v11261_v41  ;;  %14345 = vst [vmem:[#allocation170_spill] sm:$0xff] %v11271_v14  ;;  %v3438_v63 = vsub.f32 %v11229_v32, %v11247_v48  ;;  %v3534_v57 = vsub.f32 %v11216_v20, %v11247_v48  ;;  %v11285_v21 = vmax.f32 %v11239_v25, %v11249_v6  ;;  %6960 = vpow2.f32 %v3586_v3 }
 0x368   :  { %v3313_v39 = vmul.f32 %v3252_v15, %v11253_v38  ;;  %v3314_v31 = vmul.f32 %v3253_v29, %v11257_v11  ;;  %v3219_v56 = vmul.f32 %v3157_v1, %v11212_v40  ;;  %v3315_v35 = vmul.f32 %v3253_v29, %v11261_v41  ;;  %v14349_v11 = vld [vmem:[#allocation128_spill] sm:$0xff] }
 0x369   :  { %v6941_v26 = vpop.eup %6940  ;;  %v3312_v58 = vmul.f32 %v3252_v15, %v11271_v14  ;;  %v3218_v32 = vmul.f32 %v3157_v1, %v11208_v37  ;;  %v11294_v20 = vadd.f32 %v2065_v55, %v9447_v49  ;;  %v11297_v48 = vadd.f32 %v2067_v44, %v9445_v50  ;;  %v2594_v15 = vpop.xlane.xlu0 %2593  ;;  %v14351_v55 = vld [vmem:[#allocation130_spill] sm:$0xff] }
 0x36a   :  { %v6943_v10 = vpop.eup %6942  ;;  %v3217_v38 = vmul.f32 %v3156_v61, %v11201_v36  ;;  %v3379_v17 = vadd.f32 %v3315_v35, %v3219_v56  ;;  %v3158_v46 = vmul.f32 %v6941_v26, %v14349_v11  ;;  %v11302_v40 = vadd.f32 %v2069_v54, %v9447_v49  ;;  %v11311_v56 = vpop.xlane.xlu1 %2596  ;;  %v14352_v49 = vld [vmem:[#allocation133_spill] sm:$0xff]  ;;  %v14353_v54 = vld [vmem:[#allocation142_spill] sm:$0xff] }
 0x36b   :  { %14347 = vst [vmem:[#allocation124_spill] sm:$0xff] %v11294_v20  ;;  %14348 = vst [vmem:[#allocation171_spill] sm:$0xff] %v11297_v48  ;;  %v11304_v29 = vpop.eup %6944  ;;  %v3216_v1 = vmul.f32 %v3156_v61, %v11187_v60  ;;  %v3378_v14 = vadd.f32 %v3314_v31, %v3218_v32  ;;  %v3254_v37 = vmul.f32 %v6941_v26, %v14351_v55  ;;  %v14355_v31 = vld [vmem:[#allocation104_spill] sm:$0xff]  ;;  %v14356_v26 = vld [vmem:[#allocation27_spill] sm:$0xff]  ;;  %6962 = vrcp.f32 %v11243_v42 }
 0x36c   :  { %14350 = vst [vmem:[#allocation128_spill] sm:$0xff] %v11302_v40  ;;  %v3159_v44 = vmul.f32 %v6943_v10, %v14302_v5  ;;  %v11309_v41 = vpop.eup %6946  ;;  %v3377_v36 = vadd.f32 %v3313_v39, %v3217_v38  ;;  %v3255_v11 = vmul.f32 %v6943_v10, %v14303_v22  ;;  %v3673_v35 = vmul.f32 %v14353_v54, %v14352_v49  ;;  %v14358_v60 = vld [vmem:[#allocation40_spill] sm:$0xff] }
 0x36d   :  { %v11316_v13 = vpop.eup %6948  ;;  %v3376_v12 = vadd.f32 %v3312_v58, %v3216_v1  ;;  %v11320_v61 = vadd.f32 %v11197_v18, %v9445_v50  ;;  %v3317_v5 = vmul.f32 %v3254_v37, %v11294_v20  ;;  %v3672_v3 = vmul.f32 %v14356_v26, %v14355_v31  ;;  %v14357_v18 = vld [vmem:[#allocation106_spill] sm:$0xff] }
 0x36e   :  { %v11325_v38 = vpop.eup %6950  ;;  %v3221_v39 = vmul.f32 %v3158_v46, %v11224_v51  ;;  %v3223_v22 = vmul.f32 %v3159_v44, %v11237_v7  ;;  %v3319_v32 = vmul.f32 %v3255_v11, %v11302_v40  ;;  %v3957_v10 = vpack.c.bf16 %v3379_v17, %v3377_v36  ;;  %v14359_v51 = vld [vmem:[#allocation15_spill] sm:$0xff] }
 0x36f   :  { %14354 = vst [vmem:[#allocation130_spill] sm:$0xff] %v11320_v61  ;;  %v11330_v55 = vpop.eup %6952  ;;  %v3492_v58 = vmul.f32 1.442695, %v3438_v63  ;;  %v3956_v1 = vpack.c.bf16 %v3378_v14, %v3376_v12  ;;  %v3318_v50 = vmul.f32 %v3255_v11, %v11297_v48  ;;  %v3768_v49 = vmul.f32 %v14356_v26, %v14357_v18  ;;  %v2690_v63 = vpop.xlane.xlu0 %2689  ;;  %v14362_v26 = vld [vmem:[#allocation41_spill] sm:$0xff]  ;;  %v14366_v18 = vld [vmem:[#allocation134_spill] sm:$0xff]  ;;  %v14387_v40 = vld [vmem:[#allocation19_spill] sm:$0xff] }
 0x370   :  { %v3381_v20 = vadd.f32 %v3317_v5, %v3221_v39  ;;  %v3383_v31 = vadd.f32 %v3319_v32, %v3223_v22  ;;  %4368 = vmatprep.mubr.bf16.mxu1 %v3957_v10  ;;  %v3707_v9 = vmul.f32 %v3673_v35, %v14358_v60  ;;  %v3769_v7 = vmul.f32 %v14353_v54, %v14359_v51  ;;  %v11338_v33 = vpop.eup %6954  ;;  %v2693_v11 = vpop.xlane.xlu1 %2692  ;;  %v14363_v39 = vld [vmem:[#allocation13_spill] sm:$0xff]  ;;  %v14364_v51 = vld [vmem:[#allocation16_spill] sm:$0xff] }
 0x371   :  { %14360 = vst [vmem:[#allocation133_spill] sm:$0xff] %v11338_v33  ;;  %v3588_v17 = vmul.f32 1.442695, %v3534_v57  ;;  %v3316_v12 = vmul.f32 %v3254_v37, %v11320_v61  ;;  %v3222_v36 = vmul.f32 %v3159_v44, %v11233_v45  ;;  %4369 = vmatmul.mubr.bf16.gmra.mxu1 %v3956_v1  ;;  %v3705_v60 = vmul.f32 %v3672_v3, %v14362_v26  ;;  %v14383_v61 = vld [vmem:[#allocation119_spill] sm:$0xff] }
 0x372   :  { %v11343_v14 = vpop.eup %6956  ;;  %v3959_v5 = vpack.c.bf16 %v3383_v31, %v3381_v20  ;;  %v3801_v22 = vmul.f32 %v3768_v49, %v14363_v39  ;;  %v3803_v54 = vmul.f32 %v3769_v7, %v14364_v51  ;;  %6964 = vrcp.f32 %v11267_v52 }
 0x373   :  { %14361 = vst [vmem:[#allocation142_spill] sm:$0xff] %v11343_v14  ;;  %v3220_v42 = vmul.f32 %v3158_v46, %v11220_v59  ;;  %v3382_v57 = vadd.f32 %v3318_v50, %v3222_v36  ;;  %v11350_v32 = vpop.eup %6958  ;;  %6966 = vpow2.f32 %v3492_v58  ;;  %v3439_v37 = vsub.f32 %v11239_v25, %v11285_v21  ;;  %v14367_v58 = vld [vmem:[#allocation143_spill] sm:$0xff]  ;;  %v2600_v26 = vpop.xlane.xlu0 %2599 }
 0x374   :  { %14365 = vst [vmem:[#allocation104_spill] sm:$0xff] %v11350_v32  ;;  %v11354_v44 = vmul.f32 0.0625, %v2690_v63  ;;  %4378 = vmatprep.mubr.bf16.mxu1 %v3959_v5  ;;  %v3867_v20 = vadd.f32 %v3803_v54, %v3707_v9  ;;  %6968 = vpow2.f32 %v3588_v17  ;;  %v11356_v10 = vmul.f32 0.0625, %v2594_v15  ;;  %v14368_v36 = vld [vmem:[#allocation43_spill] sm:$0xff]  ;;  %v14369_v17 = vld [vmem:[#allocation9_spill] sm:$0xff]  ;;  %v11372_v39 = vpop.xlane.xlu1 %2602  ;;  %v11376_v51 = vpop.eup %6960  ;;  %v14373_v54 = vld [vmem:[#allocation44_spill] sm:$0xff] }
 0x375   :  { %v3380_v1 = vadd.f32 %v3316_v12, %v3220_v42  ;;  %v3626_v52 = vadd.f32 %v11316_v13, %v11304_v29  ;;  %v3535_v46 = vsub.f32 %v11249_v6, %v11285_v21  ;;  %v3865_v50 = vadd.f32 %v3801_v22, %v3705_v60  ;;  %v14370_v21 = vld [vmem:[#allocation122_spill] sm:$0xff]  ;;  %v14371_v60 = vld [vmem:[#allocation144_spill] sm:$0xff]  ;;  %14372 = vst [vmem:[#allocation27_spill] sm:$0xff] %v11376_v51  ;;  %v14384_v59 = vld [vmem:[#allocation147_spill] sm:$0xff] }
 0x376   :  { %v3674_v31 = vmul.f32 %v14367_v58, %v14366_v18  ;;  %v3627_v25 = vadd.f32 %v11330_v55, %v11325_v38  ;;  %v3706_v9 = vmul.f32 %v3673_v35, %v14368_v36  ;;  %v3802_v15 = vmul.f32 %v3769_v7, %v14369_v17  ;;  %v14374_v35 = vld [vmem:[#allocation38_spill] sm:$0xff]  ;;  %v14375_v7 = vld [vmem:[#allocation123_spill] sm:$0xff] }
 0x377   :  { %v3958_v63 = vpack.c.bf16 %v3382_v57, %v3380_v1  ;;  %v3494_v5 = vmul.f32 1.442695, %v3439_v37  ;;  %v11370_v12 = vmax.f32 %v11356_v10, %v11354_v44  ;;  %v3961_v6 = vpack.c.bf16 %v3867_v20, %v3865_v50  ;;  %v14376_v1 = vld [vmem:[#allocation111_spill] sm:$0xff]  ;;  %v14377_v20 = vld [vmem:[#allocation48_spill] sm:$0xff] }
 0x378   :  { %v3675_v22 = vmul.f32 %v14371_v60, %v14370_v21  ;;  %v3704_v42 = vmul.f32 %v3672_v3, %v14373_v54  ;;  %v3800_v57 = vmul.f32 %v3768_v49, %v14374_v35  ;;  %v3770_v37 = vmul.f32 %v14367_v58, %v14375_v7  ;;  %v14378_v17 = vld [vmem:[#allocation47_spill] sm:$0xff]  ;;  %v14380_v49 = vld [vmem:[#allocation17_spill] sm:$0xff] }
 0x379   :  { %4379 = vmatmul.mubr.bf16.gmra.mxu1 %v3958_v63  ;;  %v3771_v18 = vmul.f32 %v14371_v60, %v14376_v1  ;;  %6970 = vrcp.f32 %v3626_v52  ;;  %v11385_v36 = vmul.f32 0.0625, %v11311_v56  ;;  %v3709_v50 = vmul.f32 %v3674_v31, %v14377_v20  ;;  %v14379_v3 = vld [vmem:[#allocation23_spill] sm:$0xff]  ;;  %v2699_v1 = vpop.xlane.xlu1 %2698 }
 0x37a   :  { %4388 = vmatprep.mubr.bf16.mxu1 %v3961_v6  ;;  %v3711_v21 = vmul.f32 %v3675_v22, %v14378_v17  ;;  %6972 = vrcp.f32 %v3627_v25  ;;  %v3866_v63 = vadd.f32 %v3802_v15, %v3706_v9  ;;  %v3805_v54 = vmul.f32 %v3770_v37, %v14379_v3  ;;  %v11399_v9 = vpop.eup %6962  ;;  %v2696_v15 = vpop.xlane.xlu0 %2695  ;;  %v14381_v17 = vld [vmem:[#allocation42_spill] sm:$0xff] }
 0x37b   :  { %v3807_v35 = vmul.f32 %v3771_v18, %v14380_v49  ;;  %v3628_v58 = vadd.f32 %v11343_v14, %v11338_v33  ;;  %v3629_v52 = vadd.f32 %v11376_v51, %v11350_v32  ;;  %6974 = vpow2.f32 %v3494_v5  ;;  %v14382_v3 = vld [vmem:[#allocation146_spill] sm:$0xff]  ;;  %v14385_v5 = vld [vmem:[#allocation7_spill] sm:$0xff] }
 0x37c   :  { %v3590_v56 = vmul.f32 1.442695, %v3535_v46  ;;  %v3440_v6 = vsub.f32 %v11356_v10, %v11370_v12  ;;  %v11397_v60 = vmul.f32 0.0625, %v2693_v11  ;;  %v3864_v7 = vadd.f32 %v3800_v57, %v3704_v42  ;;  %v14386_v10 = vld [vmem:[#allocation45_spill] sm:$0xff]  ;;  %v14419_v51 = vld [vmem:[#allocation55_spill] sm:$0xff] }
 0x37d   :  { %v3871_v25 = vadd.f32 %v3807_v35, %v3711_v21  ;;  %v3869_v20 = vadd.f32 %v3805_v54, %v3709_v50  ;;  %v3676_v49 = vmul.f32 %v14382_v3, %v14381_v17  ;;  %v3677_v48 = vmul.f32 %v14384_v59, %v14383_v61  ;;  %v14388_v57 = vld [vmem:[#allocation137_spill] sm:$0xff] }
 0x37e   :  { %v3772_v46 = vmul.f32 %v14382_v3, %v14385_v5  ;;  %v3960_v45 = vpack.c.bf16 %v3866_v63, %v3864_v7  ;;  %v3710_v11 = vmul.f32 %v3675_v22, %v14386_v10  ;;  %v3806_v42 = vmul.f32 %v3771_v18, %v14387_v40  ;;  %v14389_v17 = vld [vmem:[#allocation49_spill] sm:$0xff]  ;;  %v14391_v22 = vld [vmem:[#allocation46_spill] sm:$0xff] }
 0x37f   :  { %v3773_v21 = vmul.f32 %v14384_v59, %v14388_v57  ;;  %v11411_v35 = vpop.eup %6964  ;;  %6976 = vpow2.f32 %v3590_v56  ;;  %v3536_v50 = vsub.f32 %v11354_v44, %v11370_v12  ;;  %v3963_v54 = vpack.c.bf16 %v3871_v25, %v3869_v20  ;;  %v14392_v18 = vld [vmem:[#allocation22_spill] sm:$0xff]  ;;  %v14396_v56 = vld [vmem:[#allocation35_spill] sm:$0xff] }
 0x380   :  { %v3715_v61 = vmul.f32 %v3677_v48, %v14389_v17  ;;  %v11416_v47 = vpop.eup %6966  ;;  %v3409_v63 = vmax.f32 %v11385_v36, %v11397_v60  ;;  %v3708_v40 = vmul.f32 %v3674_v31, %v14391_v22  ;;  %v3804_v7 = vmul.f32 %v3770_v37, %v14392_v18  ;;  %v14393_v59 = vld [vmem:[#allocation34_spill] sm:$0xff]  ;;  %v2606_v31 = vpop.xlane.xlu0 %2605  ;;  %v14397_v22 = vld [vmem:[#allocation140_spill] sm:$0xff] }
 0x381   :  { %14390 = vst [vmem:[#allocation106_spill] sm:$0xff] %v11416_v47  ;;  %4389 = vmatmul.mubr.bf16.gmra.mxu1 %v3960_v45  ;;  %v3811_v3 = vmul.f32 %v3773_v21, %v14393_v59  ;;  %v11423_v5 = vpop.eup %6968  ;;  %6978 = vrcp.f32 %v3628_v58  ;;  %v14395_v44 = vld [vmem:[#allocation50_spill] sm:$0xff]  ;;  %v3809_v25 = vmul.f32 %v3772_v46, %v14396_v56  ;;  %v3496_v20 = vmul.f32 1.442695, %v3440_v6  ;;  %v11431_v17 = vpop.xlane.xlu1 %2608  ;;  %v14401_v56 = vld [vmem:[#allocation149_spill] sm:$0xff] }
 0x382   :  { %14394 = vst [vmem:[#allocation40_spill] sm:$0xff] %v11423_v5  ;;  %4398 = vmatprep.mubr.bf16.mxu1 %v3963_v54  ;;  %v3713_v12 = vmul.f32 %v3676_v49, %v14395_v44  ;;  %6980 = vrcp.f32 %v3629_v52  ;;  %v11427_v10 = vmul.f32 0.0625, %v2600_v26  ;;  %v3870_v57 = vadd.f32 %v3806_v42, %v3710_v11  ;;  %v14398_v18 = vld [vmem:[#allocation154_spill] sm:$0xff] }
 0x383   :  { %v11429_v45 = vmul.f32 0.0625, %v2696_v15  ;;  %v3875_v37 = vadd.f32 %v3811_v3, %v3715_v61  ;;  %v3679_v59 = vmul.f32 %v14398_v18, %v14397_v22  ;;  %v14399_v58 = vld [vmem:[#allocation18_spill] sm:$0xff]  ;;  %v11439_v44 = vadd.f32 %v11423_v5, %v11416_v47  ;;  %v14402_v3 = vld [vmem:[#allocation139_spill] sm:$0xff] }
 0x384   :  { %v3775_v54 = vmul.f32 %v14398_v18, %v14399_v58  ;;  %v3592_v52 = vmul.f32 1.442695, %v3536_v50  ;;  %v3441_v26 = vsub.f32 %v11385_v36, %v3409_v63  ;;  %v3868_v6 = vadd.f32 %v3804_v7, %v3708_v40  ;;  %v14400_v42 = vld [vmem:[#allocation138_spill] sm:$0xff]  ;;  %v14404_v50 = vld [vmem:[#allocation28_spill] sm:$0xff]  ;;  %v14405_v40 = vld [vmem:[#allocation57_spill] sm:$0xff] }
 0x385   :  { %v3537_v15 = vsub.f32 %v11397_v60, %v3409_v63  ;;  %v3873_v11 = vadd.f32 %v3809_v25, %v3713_v12  ;;  %v3678_v61 = vmul.f32 %v14401_v56, %v14400_v42  ;;  %v3774_v22 = vmul.f32 %v14401_v56, %v14402_v3  ;;  %v14406_v12 = vld [vmem:[#allocation37_spill] sm:$0xff]  ;;  %v2702_v56 = vpop.xlane.xlu0 %2701  ;;  %v2705_v3 = vpop.xlane.xlu1 %2704 }
 0x386   :  { %v11447_v30 = vpop.eup %6970  ;;  %v11449_v18 = vmul.f32 0.0625, %v2699_v1  ;;  %v3962_v58 = vpack.c.bf16 %v3870_v57, %v3868_v6  ;;  %v3714_v5 = vmul.f32 %v3677_v48, %v14403_v43  ;;  %v3810_v47 = vmul.f32 %v3773_v21, %v14404_v50  ;;  %v14408_v57 = vld [vmem:[#allocation53_spill] sm:$0xff]  ;;  %v14409_v48 = vld [vmem:[#allocation31_spill] sm:$0xff] }
 0x387   :  { %v11453_v36 = vpop.eup %6972  ;;  %v3410_v60 = vmax.f32 %v11427_v10, %v11429_v45  ;;  %v3965_v63 = vpack.c.bf16 %v3875_v37, %v3873_v11  ;;  %v3719_v7 = vmul.f32 %v3679_v59, %v14405_v40  ;;  %v3815_v25 = vmul.f32 %v3775_v54, %v14406_v12  ;;  %v14410_v37 = vld [vmem:[#allocation51_spill] sm:$0xff] }
 0x388   :  { %v11459_v42 = vpop.eup %6974  ;;  %6982 = vpow2.f32 %v3496_v20  ;;  %v2803_v1 = vmul.f32 0.0625, %v11372_v39  ;;  %v3712_v43 = vmul.f32 %v3676_v49, %v14408_v57  ;;  %v3808_v21 = vmul.f32 %v3772_v46, %v14409_v48  ;;  %v14411_v50 = vld [vmem:[#allocation39_spill] sm:$0xff]  ;;  %v14412_v57 = vld [vmem:[#allocation145_spill] sm:$0xff]  ;;  %v14413_v46 = vld [vmem:[#allocation158_spill] sm:$0xff] }
 0x389   :  { %14407 = vst [vmem:[#allocation15_spill] sm:$0xff] %v11459_v42  ;;  %4399 = vmatmul.mubr.bf16.gmra.mxu1 %v3962_v58  ;;  %6984 = vpow2.f32 %v3592_v52  ;;  %v3498_v6 = vmul.f32 1.442695, %v3441_v26  ;;  %v3717_v11 = vmul.f32 %v3678_v61, %v14410_v37  ;;  %v3813_v40 = vmul.f32 %v3774_v22, %v14411_v50  ;;  %v14414_v26 = vld [vmem:[#allocation32_spill] sm:$0xff] }
 0x38a   :  { %4408 = vmatprep.mubr.bf16.mxu1 %v3965_v63  ;;  %v3594_v12 = vmul.f32 1.442695, %v3537_v15  ;;  %v3411_v14 = vmax.f32 %v2803_v1, %v11449_v18  ;;  %v11467_v20 = vmul.f32 0.0625, %v2606_v31  ;;  %v3874_v39 = vadd.f32 %v3810_v47, %v3714_v5  ;;  %v14416_v5 = vld [vmem:[#allocation25_spill] sm:$0xff] }
 0x38b   :  { %v3442_v58 = vsub.f32 %v11427_v10, %v3410_v60  ;;  %v3879_v49 = vadd.f32 %v3815_v25, %v3719_v7  ;;  %v3681_v52 = vmul.f32 %v14413_v46, %v14412_v57  ;;  %v3777_v48 = vmul.f32 %v14413_v46, %v14414_v26  ;;  %v14417_v10 = vld [vmem:[#allocation75_spill] sm:$0xff]  ;;  %v14418_v25 = vld [vmem:[#allocation97_spill] sm:$0xff] }
 0x38c   :  { %v11474_v63 = vpop.eup %6976  ;;  %v3538_v37 = vsub.f32 %v11429_v45, %v3410_v60  ;;  %v11477_v50 = vmul.f32 0.0625, %v2702_v56  ;;  %v11479_v15 = vmul.f32 0.0625, %v2705_v3  ;;  %v3872_v31 = vadd.f32 %v3808_v21, %v3712_v43  ;;  %v14420_v45 = vld [vmem:[#allocation33_spill] sm:$0xff] }
 0x38d   :  { %14415 = vst [vmem:[#allocation41_spill] sm:$0xff] %v11474_v63  ;;  %6986 = vpow2.f32 %v3498_v6  ;;  %v3877_v47 = vadd.f32 %v3813_v40, %v3717_v11  ;;  %v3680_v7 = vmul.f32 %v14417_v10, %v14416_v5  ;;  %v3776_v57 = vmul.f32 %v14417_v10, %v14418_v25  ;;  %v14421_v6 = vld [vmem:[#allocation60_spill] sm:$0xff]  ;;  %v14422_v11 = vld [vmem:[#allocation77_spill] sm:$0xff] }
 0x38e   :  { %v11485_v33 = vpop.eup %6978  ;;  %v3443_v46 = vsub.f32 %v2803_v1, %v3411_v14  ;;  %v3964_v26 = vpack.c.bf16 %v3874_v39, %v3872_v31  ;;  %v3718_v32 = vmul.f32 %v3679_v59, %v14419_v51  ;;  %v3814_v60 = vmul.f32 %v3775_v54, %v14420_v45  ;;  %v14423_v1 = vld [vmem:[#allocation58_spill] sm:$0xff]  ;;  %v14424_v31 = vld [vmem:[#allocation36_spill] sm:$0xff] }
 0x38f   :  { %v11489_v56 = vpop.eup %6980  ;;  %v3539_v43 = vsub.f32 %v11449_v18, %v3411_v14  ;;  %v3967_v21 = vpack.c.bf16 %v3879_v49, %v3877_v47  ;;  %v3723_v3 = vmul.f32 %v3681_v52, %v14421_v6  ;;  %v3819_v40 = vmul.f32 %v3777_v48, %v14422_v11  ;;  %v14425_v54 = vld [vmem:[#allocation56_spill] sm:$0xff]  ;;  %v14426_v18 = vld [vmem:[#allocation69_spill] sm:$0xff] }
 0x390   :  { %6988 = vpow2.f32 %v3594_v12  ;;  %v3412_v5 = vmax.f32 %v11467_v20, %v11477_v50  ;;  %v3716_v39 = vmul.f32 %v3678_v61, %v14423_v1  ;;  %v3812_v51 = vmul.f32 %v3774_v22, %v14424_v31  ;;  %v14427_v45 = vld [vmem:[#allocation156_spill] sm:$0xff]  ;;  %v14433_v31 = vld [vmem:[#allocation63_spill] sm:$0xff] }
 0x391   :  { %4409 = vmatmul.mubr.bf16.gmra.mxu1 %v3964_v26  ;;  %6990 = vrcp.f32 %v11439_v44  ;;  %v3500_v59 = vmul.f32 1.442695, %v3442_v58  ;;  %v3721_v14 = vmul.f32 %v3680_v7, %v14425_v54  ;;  %v3817_v49 = vmul.f32 %v3776_v57, %v14426_v18  ;;  %v14428_v44 = vld [vmem:[#allocation76_spill] sm:$0xff] }
 0x392   :  { %4418 = vmatprep.mubr.bf16.mxu1 %v3967_v21  ;;  %v3631_v47 = vadd.f32 %v11474_v63, %v11459_v42  ;;  %v3596_v12 = vmul.f32 1.442695, %v3538_v37  ;;  %v11504_v10 = vmul.f32 0.0625, %v11431_v17  ;;  %v3878_v25 = vadd.f32 %v3814_v60, %v3718_v32 }
 0x393   :  { %v3502_v26 = vmul.f32 1.442695, %v3443_v46  ;;  %v3883_v61 = vadd.f32 %v3819_v40, %v3723_v3  ;;  %v3683_v22 = vmul.f32 %v11121_v34, %v14427_v45  ;;  %v3779_v58 = vmul.f32 %v11121_v34, %v14428_v44  ;;  %v14430_v46 = vld [vmem:[#allocation151_spill] sm:$0xff]  ;;  %v14436_v45 = vld [vmem:[#allocation8_spill] sm:$0xff] }
 0x394   :  { %v3598_v21 = vmul.f32 1.442695, %v3539_v43  ;;  %v3444_v6 = vsub.f32 %v11467_v20, %v3412_v5  ;;  %v11513_v11 = vmax.f32 %v11504_v10, %v11479_v15  ;;  %v3876_v37 = vadd.f32 %v3812_v51, %v3716_v39  ;;  %v14431_v3 = vld [vmem:[#allocation155_spill] sm:$0xff] }
 0x395   :  { %v11515_v1 = vpop.f32.mrf.mxu1  ;;  %v11517_v17 = vpop.eup %6982  ;;  %6992 = vpow2.f32 %v3500_v59  ;;  %v3881_v32 = vadd.f32 %v3817_v49, %v3721_v14  ;;  %v3682_v60 = vmul.f32 %v11093_v24, %v14430_v46  ;;  %v3778_v34 = vmul.f32 %v11093_v24, %v14431_v3  ;;  %v14434_v39 = vld [vmem:[#allocation83_spill] sm:$0xff]  ;;  %v14435_v14 = vld [vmem:[#allocation61_spill] sm:$0xff]  ;;  %v14437_v3 = vld [vmem:[#allocation54_spill] sm:$0xff] }
 0x396   :  { %14429 = vst [vmem:[#allocation13_spill] sm:$0xff] %v11517_v17  ;;  %v11523_v43 = vpop.eup %6984  ;;  %v3540_v20 = vsub.f32 %v11477_v50, %v3412_v5  ;;  %v3966_v40 = vpack.c.bf16 %v3878_v25, %v3876_v37  ;;  %v3722_v54 = vmul.f32 %v3681_v52, %v14433_v31  ;;  %v3818_v51 = vmul.f32 %v3777_v48, %v14434_v39  ;;  %v11532_v24 = vpop.xlane.xlu0 %2611  ;;  %v14438_v5 = vld [vmem:[#allocation89_spill] sm:$0xff]  ;;  %v14439_v48 = vld [vmem:[#allocation59_spill] sm:$0xff]  ;;  %v14441_v39 = vld [vmem:[#allocation88_spill] sm:$0xff] }
 0x397   :  { %14432 = vst [vmem:[#allocation16_spill] sm:$0xff] %v11523_v43  ;;  %v11528_v18 = vpop.f32.mrf.mxu1  ;;  %6994 = vrcp.f32 %v3631_v47  ;;  %v3969_v59 = vpack.c.bf16 %v3883_v61, %v3881_v32  ;;  %v3727_v49 = vmul.f32 %v3683_v22, %v14435_v14  ;;  %v3823_v44 = vmul.f32 %v3779_v58, %v14436_v45  ;;  %v14440_v61 = vld [vmem:[#allocation109_spill] sm:$0xff] }
 0x398   :  { %6996 = vpow2.f32 %v3596_v12  ;;  %v3504_v46 = vmul.f32 1.442695, %v3444_v6  ;;  %v3720_v50 = vmul.f32 %v3680_v7, %v14437_v3  ;;  %v3816_v25 = vmul.f32 %v3776_v57, %v14438_v5  ;;  %v14444_v3 = vld [vmem:[#allocation11_spill] sm:$0xff] }
 0x399   :  { %4419 = vmatmul.mubr.bf16.gmra.mxu1 %v3966_v40  ;;  %v11536_v52 = vpop.f32.mrf.mxu1  ;;  %6998 = vpow2.f32 %v3502_v26  ;;  %v3725_v47 = vmul.f32 %v3682_v60, %v14439_v48  ;;  %v3821_v37 = vmul.f32 %v3778_v34, %v14440_v61  ;;  %v3600_v12 = vmul.f32 1.442695, %v3540_v20  ;;  %v11555_v20 = vpop.xlane.xlu1 %2614  ;;  %v14445_v48 = vld [vmem:[#allocation92_spill] sm:$0xff] }
 0x39a   :  { %4428 = vmatprep.mubr.bf16.mxu1 %v3969_v59  ;;  %v11540_v32 = vpop.eup %6986  ;;  %7000 = vpow2.f32 %v3598_v21  ;;  %v3445_v6 = vsub.f32 %v11504_v10, %v11513_v11  ;;  %v3882_v40 = vadd.f32 %v3818_v51, %v3722_v54  ;;  %v3632_v7 = vadd.f32 %v11523_v43, %v11517_v17  ;;  %v14442_v59 = vld [vmem:[#allocation21_spill] sm:$0xff]  ;;  %v14443_v51 = vld [vmem:[#allocation62_spill] sm:$0xff]  ;;  %v14446_v61 = vld [vmem:[#allocation84_spill] sm:$0xff] }
 0x39b   :  { %v4236_v31 = vpop.f32.mrf.mxu1  ;;  %v3887_v57 = vadd.f32 %v3823_v44, %v3727_v49  ;;  %v3685_v26 = vmul.f32 %v11263_v23, %v14441_v39  ;;  %v3781_v14 = vmul.f32 %v11263_v23, %v14442_v59  ;;  %v4024_v21 = vld [vmem:[%s13191_s4] sm:$0x3]  ;;  %7002 = vpow2.f32 %v3504_v46  ;;  %v2708_v59 = vpop.xlane.xlu0 %2707  ;;  %v14447_v43 = vld [vmem:[#allocation68_spill] sm:$0xff]  ;;  %s7497_s4 = smov [#allocation2]  }
 0x39c   :  { %v3880_v54 = vadd.f32 %v3816_v25, %v3720_v50  ;;  %v3724_v45 = vmul.f32 %v3682_v60, %v14443_v51  ;;  %v3885_v44 = vadd.f32 %v3821_v37, %v3725_v47  ;;  %v3820_v5 = vmul.f32 %v3778_v34, %v14444_v3  ;;  %v14448_v50 = vld [vmem:[#allocation105_spill] sm:$0xff]  ;;  %v14451_v37 = vld [vmem:[#allocation66_spill] sm:$0xff]  ;;  %s6156_s7 = sshll.u32 %s7497_s4, 4  ;;  %s6157_s7 = int_to_ptr.vmem [resolvable:$true] %s6156_s7 }
 0x39d   :  { %v11558_v49 = vpop.eup %6988  ;;  %v3684_v23 = vmul.f32 %v11152_v19, %v14445_v48  ;;  %v3780_v39 = vmul.f32 %v11152_v19, %v14446_v61  ;;  %v3726_v17 = vmul.f32 %v3683_v22, %v14447_v43  ;;  %v3822_v25 = vmul.f32 %v3779_v58, %v14448_v50  ;;  %v14449_v60 = vld [vmem:[#allocation5_spill] sm:$0xff]  ;;  %v14455_v61 = vld [vmem:[#allocation127_spill] sm:$0xff]  ;;  %s7475_s8 = scalar_lea.vmem %s6157_s7, 16384  ;;  %p7480_p1 = scmp.lt.s32.totalorder %s6157_s7, %s6157_s7 }
 0x39e   :  { %v11565_v46 = vpop.eup %6990  ;;  %v3968_v10 = vpack.c.bf16 %v3882_v40, %v3880_v54  ;;  %v14450_v51 = vsub.s32 0, %v14449_v60  ;;  %7004 = vrcp.f32 %v3632_v7  ;;  %v3971_v34 = vpack.c.bf16 %v3887_v57, %v3885_v44  ;;  %v14452_v48 = vld [vmem:[#allocation125_spill] sm:$0xff]  ;;  %v14454_v57 = vld [vmem:[#allocation67_spill] sm:$0xff]  ;;  %p7476_p0 = scmp.ne.s32.totalorder %s6157_s7, %s7475_s8  ;;  %p7481_p2 = scmp.lt.s32.totalorder %s7475_s8, %s7475_s8 }
 0x39f   :  { %v4240_v47 = vpop.f32.mrf.mxu1  ;;  %v3731_v3 = vmul.f32 %v3685_v26, %v14451_v37  ;;  %v3827_v42 = vmul.f32 %v3781_v14, %v14452_v48  ;;  %v3633_v19 = vadd.f32 %v11558_v49, %v11540_v32  ;;  %7006 = vpow2.f32 %v3600_v12  ;;  %v2711_v37 = vpop.xlane.xlu1 %2710  ;;  %v14456_v12 = vld [vmem:[#allocation64_spill] sm:$0xff] }
 0x3a0   :  { %v11571_v63 = vrot.slane %v4024_v21, %v14450_v51  ;;  %v3506_v40 = vmul.f32 1.442695, %v3445_v6  ;;  %v14453_v22 = vsub.s32 1, %v14449_v60  ;;  %v11581_v54 = vmul.f32 0.0625, %v2708_v59  ;;  %p7482_p3 = por %p7481_p2, %p7480_p1 }
 0x3a1   :  { %4429 = vmatmul.mubr.bf16.gmra.mxu1 %v3968_v10  ;;  %v4242_v43 = vpop.f32.mrf.mxu1  ;;  %v3884_v7 = vadd.f32 %v3820_v5, %v3724_v45  ;;  %v3729_v44 = vmul.f32 %v3684_v23, %v14454_v57  ;;  %v3825_v50 = vmul.f32 %v3780_v39, %v14455_v61  ;;  %v3886_v48 = vadd.f32 %v3822_v25, %v3726_v17  ;;  %v14460_v25 = vld [vmem:[#allocation126_spill] sm:$0xff] }
 0x3a2   :  { %v11579_v58 = vrot.slane %v4024_v21, %v14453_v22  ;;  %4438 = vmatprep.mubr.bf16.mxu1 %v3971_v34  ;;  %v11585_v51 = vpop.eup %6992  ;;  %v3730_v6 = vmul.f32 %v3685_v26, %v14456_v12  ;;  %v11590_v10 = vadd.f32 %v11515_v1, %v11571_v63  ;;  %v3891_v45 = vadd.f32 %v3827_v42, %v3731_v3  ;;  %v14461_v3 = vld [vmem:[#allocation65_spill] sm:$0xff]  ;;  %p7483_p4 = pnand %p7482_p3, %p7476_p0 }
 0x3a3   :  { %v4244_v59 = vpop.f32.mrf.mxu1  ;;  %v3687_v5 = vmul.f32 %v11309_v41, %v11134_v4  ;;  %v3783_v60 = vmul.f32 %v11309_v41, %v11139_v8  ;;  %v3826_v1 = vmul.f32 %v3781_v14, %v14460_v25  ;;  %v11608_v34 = vmul.f32 %v11277_v16, %v11102_v0 }
 0x3a4   :  { %14457 = vst [vmem:[#allocation134_spill] sm:$0xff] %v11590_v10  ;;  %v11594_v21 = vadd.f32 %v11528_v18, %v11579_v58  ;;  %v11601_v17 = vadd.f32 %v4236_v31, %v11579_v58  ;;  %v11603_v26 = vpop.eup %6994  ;;  %v11612_v42 = vmul.f32 %v11277_v16, %v11128_v28  ;;  %v11618_v41 = vmul.f32 0.0625, %v2711_v37  ;;  %v14463_v28 = vld [vmem:[#allocation129_spill] sm:$0xff] }
 0x3a5   :  { %v4246_v18 = vpop.f32.mrf.mxu1  ;;  %v11616_v8 = vpop.eup %6996  ;;  %v3889_v31 = vadd.f32 %v3825_v50, %v3729_v44  ;;  %v3728_v22 = vmul.f32 %v3684_v23, %v14461_v3  ;;  %v11623_v14 = vadd.f32 %v11536_v52, %v11571_v63  ;;  %v3970_v57 = vpack.c.bf16 %v3886_v48, %v3884_v7  ;;  %v14465_v50 = vld [vmem:[#allocation78_spill] sm:$0xff]  ;;  %v14466_v52 = vld [vmem:[#allocation12_spill] sm:$0xff] }
 0x3a6   :  { %14458 = vst [vmem:[#allocation143_spill] sm:$0xff] %v11594_v21  ;;  %14459 = vst [vmem:[#allocation43_spill] sm:$0xff] %v11601_v17  ;;  %v4549_v4 = vmax.f32 %v11590_v10, %v11594_v21  ;;  %v11625_v0 = vpop.eup %6998  ;;  %v3824_v16 = vmul.f32 %v3780_v39, %v14463_v28  ;;  %v11629_v61 = vadd.f32 %v4240_v47, %v11571_v63  ;;  %v14467_v48 = vld [vmem:[#allocation70_spill] sm:$0xff]  ;;  %7008 = vrcp.f32 %v3633_v19 }
 0x3a7   :  { %14462 = vst [vmem:[#allocation9_spill] sm:$0xff] %v11623_v14  ;;  %v11632_v12 = vadd.f32 %v4242_v43, %v11579_v58  ;;  %v4250_v37 = vpop.f32.mrf.mxu1  ;;  %v11634_v44 = vpop.eup %7000  ;;  %v3973_v23 = vpack.c.bf16 %v3891_v45, %v3889_v31  ;;  %v3735_v25 = vmul.f32 %v3687_v5, %v14465_v50  ;;  %v3831_v3 = vmul.f32 %v3783_v60, %v14466_v52  ;;  %v14526_v21 = vld [vmem:[#allocation86_spill] sm:$0xff] }
 0x3a8   :  { %4550 = vmax.xlane.f32.xlu0 %v4549_v4  ;;  %14464 = vst [vmem:[#allocation122_spill] sm:$0xff] %v11629_v61  ;;  %v4552_v7 = vmax.f32 %v11623_v14, %v11601_v17  ;;  %v3890_v39 = vadd.f32 %v3826_v1, %v3730_v6  ;;  %v3733_v47 = vmul.f32 %v11608_v34, %v14467_v48  ;;  %v14468_v4 = vld [vmem:[#allocation136_spill] sm:$0xff]  ;;  %v11646_v45 = vpop.eup %7002  ;;  %v2807_v1 = vmul.f32 0.0625, %v11555_v20  ;;  %v14478_v17 = vld [vmem:[#allocation14_spill] sm:$0xff] }
 0x3a9   :  { %4439 = vmatmul.mubr.bf16.gmra.mxu1 %v3970_v57  ;;  %v3829_v43 = vmul.f32 %v11612_v42, %v14468_v4  ;;  %v4555_v28 = vmax.f32 %v11629_v61, %v11632_v12  ;;  %v4252_v10 = vpop.f32.mrf.mxu1  ;;  %v14469_v31 = vsub.f32 %v11479_v15, %v11513_v11  ;;  %v11652_v57 = vmul.f32 0.0625, %v11532_v24  ;;  %v14473_v4 = vld [vmem:[#allocation82_spill] sm:$0xff] }
 0x3aa   :  { %4448 = vmatprep.mubr.bf16.mxu1 %v3973_v23  ;;  %4553 = vmax.xlane.f32.xlu1 %v4552_v7  ;;  %v11655_v6 = vadd.f32 %v4246_v18, %v11579_v58  ;;  %v3888_v52 = vadd.f32 %v3824_v16, %v3728_v22  ;;  %v3689_v48 = vmul.f32 %v11411_v35, %v11214_v62  ;;  %7010 = vpow2.f32 %v3506_v40  ;;  %v14471_v7 = vld [vmem:[#allocation72_spill] sm:$0xff] }
 0x3ab   :  { %v3602_v50 = vmul.f32 1.442695, %v14469_v31  ;;  %v3785_v19 = vmul.f32 %v11411_v35, %v11226_v53  ;;  %v4254_v15 = vpop.f32.mrf.mxu1  ;;  %v11664_v11 = vmax.f32 %v11652_v57, %v11581_v54  ;;  %v3895_v24 = vadd.f32 %v3831_v3, %v3735_v25  ;;  %v11669_v23 = vpop.eup %7004 }
 0x3ac   :  { %4556 = vmax.xlane.f32.xlu0 %v4555_v28  ;;  %v11667_v18 = vadd.f32 %v4244_v59, %v11571_v63  ;;  %v11672_v20 = vmax.f32 %v2807_v1, %v11618_v41  ;;  %v3972_v62 = vpack.c.bf16 %v3890_v39, %v3888_v52  ;;  %v3893_v22 = vadd.f32 %v3829_v43, %v3733_v47  ;;  %v11677_v40 = vpop.eup %7006  ;;  %v14472_v47 = vld [vmem:[#allocation135_spill] sm:$0xff]  ;;  %v14474_v28 = vld [vmem:[#allocation10_spill] sm:$0xff] }
 0x3ad   :  { %v11675_v53 = vadd.f32 %v4252_v10, %v11579_v58  ;;  %v4256_v35 = vpop.f32.mrf.mxu1  ;;  %v3688_v16 = vmul.f32 %v11399_v9, %v11160_v2  ;;  %v3784_v59 = vmul.f32 %v11399_v9, %v11183_v27  ;;  %v11684_v25 = vadd.f32 %v4250_v37, %v11571_v63  ;;  %v14475_v37 = vld [vmem:[#allocation73_spill] sm:$0xff] }
 0x3ae   :  { %14470 = vst [vmem:[#allocation144_spill] sm:$0xff] %v11667_v18  ;;  %v4558_v3 = vmax.f32 %v11667_v18, %v11655_v6  ;;  %v3734_v39 = vmul.f32 %v3687_v5, %v14471_v7  ;;  %v3830_v10 = vmul.f32 %v3783_v60, %v14472_v47  ;;  %v3739_v43 = vmul.f32 %v3689_v48, %v14473_v4  ;;  %v14476_v47 = vld [vmem:[#allocation29_spill] sm:$0xff] }
 0x3af   :  { %v3835_v31 = vmul.f32 %v3785_v19, %v14474_v28  ;;  %v4260_v52 = vpop.f32.mrf.mxu1  ;;  %v11694_v2 = vadd.f32 %v11616_v8, %v11585_v51  ;;  %v11698_v27 = vadd.f32 %v11634_v44, %v11625_v0  ;;  %v3975_v9 = vpack.c.bf16 %v3895_v24, %v3893_v22  ;;  %v14477_v22 = vld [vmem:[#allocation74_spill] sm:$0xff] }
 0x3b0   :  { %4559 = vmax.xlane.f32.xlu1 %v4558_v3  ;;  %v4561_v5 = vmax.f32 %v11684_v25, %v11675_v53  ;;  %v3447_v60 = vsub.f32 %v2807_v1, %v11672_v20  ;;  %v3732_v7 = vmul.f32 %v11608_v34, %v14475_v37  ;;  %v3828_v4 = vmul.f32 %v11612_v42, %v14476_v47 }
 0x3b1   :  { %4449 = vmatmul.mubr.bf16.gmra.mxu1 %v3972_v62  ;;  %v11708_v28 = vadd.f32 %v4256_v35, %v11579_v58  ;;  %v4262_v14 = vpop.f32.mrf.mxu1  ;;  %7012 = vpow2.f32 %v3602_v50  ;;  %v3446_v24 = vsub.f32 %v11652_v57, %v11664_v11  ;;  %v3737_v3 = vmul.f32 %v3688_v16, %v14477_v22 }
 0x3b2   :  { %4458 = vmatprep.mubr.bf16.mxu1 %v3975_v9  ;;  %v3833_v1 = vmul.f32 %v3784_v59, %v14478_v17  ;;  %4562 = vmax.xlane.f32.xlu0 %v4561_v5  ;;  %v3542_v34 = vsub.f32 %v11581_v54, %v11664_v11  ;;  %v3894_v62 = vadd.f32 %v3830_v10, %v3734_v39  ;;  %v3510_v5 = vmul.f32 1.442695, %v3447_v60 }
 0x3b3   :  { %v3899_v37 = vadd.f32 %v3835_v31, %v3739_v43  ;;  %v11717_v42 = vadd.f32 %v4254_v15, %v11571_v63  ;;  %v4264_v35 = vpop.f32.mrf.mxu1  ;;  %v3691_v50 = vmul.f32 %v11453_v36, %v11325_v38  ;;  %v3787_v57 = vmul.f32 %v11453_v36, %v11330_v55  ;;  %v14480_v31 = vld [vmem:[#allocation80_spill] sm:$0xff] }
 0x3b4   :  { %v11724_v9 = vadd.f32 %v4260_v52, %v11571_v63  ;;  %v11727_v17 = vadd.f32 %v4262_v14, %v11579_v58  ;;  %v3543_v54 = vsub.f32 %v11618_v41, %v11672_v20  ;;  %v3892_v11 = vadd.f32 %v3828_v4, %v3732_v7  ;;  %v11739_v14 = vpop.eup %7008  ;;  %v14481_v20 = vld [vmem:[#allocation117_spill] sm:$0xff]  ;;  %v14483_v4 = vld [vmem:[#allocation98_spill] sm:$0xff] }
 0x3b5   :  { %v4564_v15 = vmax.f32 %v11717_v42, %v11708_v28  ;;  %v4266_v39 = vpop.f32.mrf.mxu1  ;;  %v3897_v10 = vadd.f32 %v3833_v1, %v3737_v3  ;;  %v3690_v38 = vmul.f32 %v11447_v30, %v11304_v29  ;;  %v3786_v55 = vmul.f32 %v11447_v30, %v11316_v13  ;;  %v14484_v30 = vld [vmem:[#allocation141_spill] sm:$0xff] }
 0x3b6   :  { %14479 = vst [vmem:[#allocation44_spill] sm:$0xff] %v11727_v17  ;;  %v4567_v36 = vmax.f32 %v11724_v9, %v11727_v17  ;;  %v3974_v43 = vpack.c.bf16 %v3894_v62, %v3892_v11  ;;  %v3738_v41 = vmul.f32 %v3689_v48, %v14480_v31  ;;  %v3834_v52 = vmul.f32 %v3785_v19, %v14481_v20  ;;  %v14485_v62 = vld [vmem:[#allocation71_spill] sm:$0xff]  ;;  %v14486_v11 = vld [vmem:[#allocation121_spill] sm:$0xff] }
 0x3b7   :  { %4565 = vmax.xlane.f32.xlu1 %v4564_v15  ;;  %v11744_v60 = vadd.f32 %v4266_v39, %v11579_v58  ;;  %v4270_v7 = vpop.f32.mrf.mxu1  ;;  %v3508_v47 = vmul.f32 1.442695, %v3446_v24  ;;  %v3977_v29 = vpack.c.bf16 %v3899_v37, %v3897_v10  ;;  %v3743_v22 = vmul.f32 %v3691_v50, %v14483_v4  ;;  %v11748_v3 = vpop.eup %7010  ;;  %v14488_v24 = vld [vmem:[#allocation87_spill] sm:$0xff]  ;;  %v14489_v10 = vld [vmem:[#allocation30_spill] sm:$0xff]  ;;  %v14492_v4 = vld [vmem:[#allocation104_spill] sm:$0xff] }
 0x3b8   :  { %v3839_v13 = vmul.f32 %v3787_v57, %v14484_v30  ;;  %4568 = vmax.xlane.f32.xlu0 %v4567_v36  ;;  %v3606_v1 = vmul.f32 1.442695, %v3543_v54  ;;  %v3736_v48 = vmul.f32 %v3688_v16, %v14485_v62  ;;  %v3832_v19 = vmul.f32 %v3784_v59, %v14486_v11  ;;  %v14493_v30 = vld [vmem:[#allocation27_spill] sm:$0xff] }
 0x3b9   :  { %14482 = vst [vmem:[#allocation38_spill] sm:$0xff] %v11744_v60  ;;  %4459 = vmatmul.mubr.bf16.gmra.mxu1 %v3974_v43  ;;  %v11753_v15 = vadd.f32 %v4264_v35, %v11571_v63  ;;  %v4272_v39 = vpop.f32.mrf.mxu1  ;;  %v3741_v37 = vmul.f32 %v3690_v38, %v14488_v24  ;;  %v3837_v31 = vmul.f32 %v3786_v55, %v14489_v10  ;;  %v3604_v54 = vmul.f32 1.442695, %v3542_v34  ;;  %v14499_v10 = vld [vmem:[#allocation24_spill] sm:$0xff] }
 0x3ba   :  { %4468 = vmatprep.mubr.bf16.mxu1 %v3977_v29  ;;  %v11758_v20 = vadd.f32 %v4270_v7, %v11571_v63  ;;  %v11761_v36 = vadd.f32 %v4272_v39, %v11579_v58  ;;  %7014 = vpow2.f32 %v3510_v5  ;;  %v3898_v16 = vadd.f32 %v3834_v52, %v3738_v41  ;;  %v14494_v39 = vld [vmem:[#allocation133_spill] sm:$0xff]  ;;  %v14495_v5 = vld [vmem:[#allocation142_spill] sm:$0xff] }
 0x3bb   :  { %14487 = vst [vmem:[#allocation123_spill] sm:$0xff] %v11753_v15  ;;  %v4570_v59 = vmax.f32 %v11753_v15, %v11744_v60  ;;  %v4274_v35 = vpop.f32.mrf.mxu1  ;;  %v3903_v43 = vadd.f32 %v3839_v13, %v3743_v22  ;;  %v3693_v29 = vmul.f32 %v11489_v56, %v14492_v4  ;;  %v3789_v62 = vmul.f32 %v11489_v56, %v14493_v30 }
 0x3bc   :  { %14490 = vst [vmem:[#allocation111_spill] sm:$0xff] %v11758_v20  ;;  %14491 = vst [vmem:[#allocation48_spill] sm:$0xff] %v11761_v36  ;;  %v4573_v7 = vmax.f32 %v11758_v20, %v11761_v36  ;;  %7016 = vpow2.f32 %v3606_v1  ;;  %v3896_v11 = vadd.f32 %v3832_v19, %v3736_v48  ;;  %v3692_v34 = vmul.f32 %v11485_v33, %v14494_v39  ;;  %v14498_v48 = vld [vmem:[#allocation93_spill] sm:$0xff] }
 0x3bd   :  { %v3788_v41 = vmul.f32 %v11485_v33, %v14495_v5  ;;  %4571 = vmax.xlane.f32.xlu1 %v4570_v59  ;;  %v4276_v52 = vpop.f32.mrf.mxu1  ;;  %7018 = vpow2.f32 %v3508_v47  ;;  %v3901_v22 = vadd.f32 %v3837_v31, %v3741_v37  ;;  %v11776_v13 = vadd.f32 %v4274_v35, %v11571_v63  ;;  %v14500_v59 = vld [vmem:[#allocation102_spill] sm:$0xff]  ;;  %v14501_v47 = vld [vmem:[#allocation153_spill] sm:$0xff]  ;;  %v14503_v5 = vld [vmem:[#allocation96_spill] sm:$0xff] }
 0x3be   :  { %v11779_v56 = vadd.f32 %v4276_v52, %v11579_v58  ;;  %4574 = vmax.xlane.f32.xlu0 %v4573_v7  ;;  %v11781_v24 = vpop.eup %7012  ;;  %7020 = vpow2.f32 %v3604_v54  ;;  %v3976_v1 = vpack.c.bf16 %v3898_v16, %v3896_v11  ;;  %v3742_v19 = vmul.f32 %v3691_v50, %v14498_v48  ;;  %v14502_v39 = vld [vmem:[#allocation81_spill] sm:$0xff]  ;;  %v14504_v54 = vld [vmem:[#allocation94_spill] sm:$0xff]  ;;  %v14505_v11 = vld [vmem:[#allocation148_spill] sm:$0xff] }
 0x3bf   :  { %14496 = vst [vmem:[#allocation47_spill] sm:$0xff] %v11776_v13  ;;  %v3838_v4 = vmul.f32 %v3787_v57, %v14499_v10  ;;  %v3979_v33 = vpack.c.bf16 %v3903_v43, %v3901_v22  ;;  %v3747_v30 = vmul.f32 %v3693_v29, %v14500_v59  ;;  %v3843_v37 = vmul.f32 %v3789_v62, %v14501_v47  ;;  %v14509_v10 = vld [vmem:[#allocation41_spill] sm:$0xff] }
 0x3c0   :  { %14497 = vst [vmem:[#allocation23_spill] sm:$0xff] %v11779_v56  ;;  %v4280_v31 = vpop.f32.mrf.mxu1  ;;  %v4576_v35 = vmax.f32 %v11776_v13, %v11779_v56  ;;  %v3740_v7 = vmul.f32 %v3690_v38, %v14502_v39  ;;  %v3836_v52 = vmul.f32 %v3786_v55, %v14503_v5  ;;  %v3745_v16 = vmul.f32 %v3692_v34, %v14504_v54  ;;  %v14508_v55 = vld [vmem:[#allocation15_spill] sm:$0xff]  ;;  %v14511_v39 = vld [vmem:[#allocation152_spill] sm:$0xff] }
 0x3c1   :  { %4469 = vmatmul.mubr.bf16.gmra.mxu1 %v3976_v1  ;;  %v3841_v50 = vmul.f32 %v3788_v41, %v14505_v11  ;;  %7022 = vrcp.f32 %v11694_v2  ;;  %v3902_v43 = vadd.f32 %v3838_v4, %v3742_v19  ;;  %v11795_v22 = vadd.f32 %v4280_v31, %v11571_v63  ;;  %v14510_v31 = vld [vmem:[#allocation103_spill] sm:$0xff]  ;;  %v14513_v5 = vld [vmem:[#allocation40_spill] sm:$0xff] }
 0x3c2   :  { %4478 = vmatprep.mubr.bf16.mxu1 %v3979_v33  ;;  %v4282_v57 = vpop.f32.mrf.mxu1  ;;  %4577 = vmax.xlane.f32.xlu1 %v4576_v35  ;;  %7024 = vrcp.f32 %v11698_v27  ;;  %v3907_v38 = vadd.f32 %v3843_v37, %v3747_v30  ;;  %v3695_v1 = vmul.f32 %v11603_v26, %v14508_v55  ;;  %v3791_v33 = vmul.f32 %v11603_v26, %v14509_v10  ;;  %v14512_v30 = vld [vmem:[#allocation106_spill] sm:$0xff] }
 0x3c3   :  { %14506 = vst [vmem:[#allocation17_spill] sm:$0xff] %v11795_v22  ;;  %v11798_v48 = vadd.f32 %v4282_v57, %v11579_v58  ;;  %v3637_v2 = vadd.f32 %v11781_v24, %v11748_v3  ;;  %v3900_v19 = vadd.f32 %v3836_v52, %v3740_v7  ;;  %v3905_v4 = vadd.f32 %v3841_v50, %v3745_v16  ;;  %v14514_v57 = vld [vmem:[#allocation95_spill] sm:$0xff]  ;;  %v14517_v16 = vld [vmem:[#allocation150_spill] sm:$0xff] }
 0x3c4   :  { %v4284_v59 = vpop.f32.mrf.mxu1  ;;  %v3746_v35 = vmul.f32 %v3693_v29, %v14510_v31  ;;  %v3842_v27 = vmul.f32 %v3789_v62, %v14511_v39  ;;  %v3694_v37 = vmul.f32 %v11565_v46, %v14512_v30  ;;  %v3790_v54 = vmul.f32 %v11565_v46, %v14513_v5  ;;  %v14518_v10 = vld [vmem:[#allocation114_spill] sm:$0xff]  ;;  %v14519_v39 = vld [vmem:[#allocation157_spill] sm:$0xff] }
 0x3c5   :  { %14507 = vst [vmem:[#allocation42_spill] sm:$0xff] %v11798_v48  ;;  %v4579_v47 = vmax.f32 %v11795_v22, %v11798_v48  ;;  %v3978_v11 = vpack.c.bf16 %v3902_v43, %v3900_v19  ;;  %v3744_v55 = vmul.f32 %v3692_v34, %v14514_v57  ;;  %v11817_v7 = vadd.f32 %v4284_v59, %v11571_v63 }
 0x3c6   :  { %v4286_v26 = vpop.f32.mrf.mxu1  ;;  %v3981_v62 = vpack.c.bf16 %v3907_v38, %v3905_v4  ;;  %v3840_v50 = vmul.f32 %v3788_v41, %v14517_v16  ;;  %v3751_v31 = vmul.f32 %v3695_v1, %v14518_v10  ;;  %v3847_v46 = vmul.f32 %v3791_v33, %v14519_v39  ;;  %v14521_v38 = vld [vmem:[#allocation131_spill] sm:$0xff]  ;;  %v14522_v39 = vld [vmem:[#allocation13_spill] sm:$0xff] }
 0x3c7   :  { %14515 = vst [vmem:[#allocation146_spill] sm:$0xff] %v11817_v7  ;;  %v11820_v52 = vadd.f32 %v4286_v26, %v11579_v58  ;;  %4580 = vmax.xlane.f32.xlu0 %v4579_v47  ;;  %v11822_v29 = vpop.eup %7014  ;;  %v3636_v43 = vadd.f32 %v11677_v40, %v11646_v45  ;;  %v3906_v19 = vadd.f32 %v3842_v27, %v3746_v35  ;;  %v14520_v47 = vld [vmem:[#allocation113_spill] sm:$0xff]  ;;  %7026 = vrcp.f32 %v3637_v2 }
 0x3c8   :  { %v3749_v30 = vmul.f32 %v3694_v37, %v14520_v47  ;;  %v3845_v4 = vmul.f32 %v3790_v54, %v14521_v38  ;;  %v3697_v5 = vmul.f32 %v11739_v14, %v11540_v32  ;;  %v3793_v26 = vmul.f32 %v11739_v14, %v11558_v49  ;;  %v14523_v47 = vld [vmem:[#allocation16_spill] sm:$0xff] }
 0x3c9   :  { %14516 = vst [vmem:[#allocation119_spill] sm:$0xff] %v11820_v52  ;;  %4479 = vmatmul.mubr.bf16.gmra.mxu1 %v3978_v11  ;;  %v4582_v34 = vmax.f32 %v11817_v7, %v11820_v52  ;;  %v11831_v59 = vpop.eup %7016  ;;  %v3904_v57 = vadd.f32 %v3840_v50, %v3744_v55  ;;  %v3911_v16 = vadd.f32 %v3847_v46, %v3751_v31  ;;  %7028 = vrcp.f32 %v3636_v43  ;;  %v14524_v38 = vld [vmem:[#allocation112_spill] sm:$0xff] }
 0x3ca   :  { %4488 = vmatprep.mubr.bf16.mxu1 %v3981_v62  ;;  %v11835_v41 = vpop.eup %7018  ;;  %v3639_v35 = vadd.f32 %v11831_v59, %v11822_v29  ;;  %v3909_v10 = vadd.f32 %v3845_v4, %v3749_v30  ;;  %v3696_v2 = vmul.f32 %v11669_v23, %v14522_v39  ;;  %v3792_v32 = vmul.f32 %v11669_v23, %v14523_v47  ;;  %v14525_v14 = vld [vmem:[#allocation132_spill] sm:$0xff]  ;;  %v14532_v47 = vld [vmem:[#allocation79_spill] sm:$0xff] }
 0x3cb   :  { %4583 = vmax.xlane.f32.xlu1 %v4582_v34  ;;  %v11841_v11 = vpop.eup %7020  ;;  %v3980_v62 = vpack.c.bf16 %v3906_v19, %v3904_v57  ;;  %v3750_v49 = vmul.f32 %v3695_v1, %v14524_v38  ;;  %v3846_v34 = vmul.f32 %v3791_v33, %v14525_v14  ;;  %v3755_v55 = vmul.f32 %v3697_v5, %v14526_v21  ;;  %v14527_v50 = vld [vmem:[#allocation160_spill] sm:$0xff]  ;;  %v14531_v57 = vld [vmem:[#allocation6_spill] sm:$0xff] }
 0x3cc   :  { %v3851_v31 = vmul.f32 %v3793_v26, %v14527_v50  ;;  %v3983_v18 = vpack.c.bf16 %v3911_v16, %v3909_v10  ;;  %v3638_v23 = vadd.f32 %v11841_v11, %v11835_v41  ;;  %v14530_v1 = vld [vmem:[#allocation108_spill] sm:$0xff]  ;;  %v3844_v21 = vmul.f32 %v3790_v54, %v14531_v57  ;;  %v14533_v16 = vld [vmem:[#allocation159_spill] sm:$0xff] }
 0x3cd   :  { %v4290_v27 = vpop.f32.mrf.mxu1  ;;  %v3748_v33 = vmul.f32 %v3694_v37, %v14530_v1  ;;  %v3753_v38 = vmul.f32 %v3696_v2, %v14532_v47  ;;  %v3849_v10 = vmul.f32 %v3792_v32, %v14533_v16  ;;  %7030 = vrcp.f32 %v3639_v35 }
 0x3ce   :  { %v7023_v43 = vpop.eup %7022  ;;  %v11854_v19 = vadd.f32 %v4290_v27, %v11571_v63  ;;  %v3910_v14 = vadd.f32 %v3846_v34, %v3750_v49  ;;  %v3915_v50 = vadd.f32 %v3851_v31, %v3755_v55  ;;  %7032 = vrcp.f32 %v3638_v23  ;;  %v14536_v34 = vld [vmem:[#allocation20_spill] sm:$0xff]  ;;  %v14537_v55 = vld [vmem:[#allocation85_spill] sm:$0xff] }
 0x3cf   :  { %v4292_v46 = vpop.f32.mrf.mxu1  ;;  %v7025_v4 = vpop.eup %7024  ;;  %v3908_v54 = vadd.f32 %v3844_v21, %v3748_v33  ;;  %v3913_v1 = vadd.f32 %v3849_v10, %v3753_v38  ;;  %v3698_v57 = vmul.f32 %v7023_v43, %v11585_v51  ;;  %v3794_v35 = vmul.f32 %v7023_v43, %v11616_v8  ;;  %v14540_v33 = vld [vmem:[#allocation100_spill] sm:$0xff]  ;;  %v14542_v10 = vld [vmem:[#allocation91_spill] sm:$0xff] }
 0x3d0   :  { %14528 = vst [vmem:[#allocation147_spill] sm:$0xff] %v11854_v19  ;;  %v11857_v30 = vadd.f32 %v4292_v46, %v11579_v58  ;;  %v3699_v61 = vmul.f32 %v7025_v4, %v11625_v0  ;;  %v3754_v31 = vmul.f32 %v3697_v5, %v14537_v55  ;;  %v14541_v38 = vld [vmem:[#allocation164_spill] sm:$0xff] }
 0x3d1   :  { %4489 = vmatmul.mubr.bf16.gmra.mxu1 %v3980_v62  ;;  %v4294_v39 = vpop.f32.mrf.mxu1  ;;  %v3795_v62 = vmul.f32 %v7025_v4, %v11634_v44  ;;  %v3982_v0 = vpack.c.bf16 %v3910_v14, %v3908_v54  ;;  %v3752_v44 = vmul.f32 %v3696_v2, %v14536_v34  ;;  %v14538_v4 = vld [vmem:[#allocation161_spill] sm:$0xff]  ;;  %v3985_v16 = vpack.c.bf16 %v3915_v50, %v3913_v1  ;;  %v14543_v2 = vld [vmem:[#allocation163_spill] sm:$0xff] }
 0x3d2   :  { %14529 = vst [vmem:[#allocation7_spill] sm:$0xff] %v11857_v30  ;;  %4498 = vmatprep.mubr.bf16.mxu1 %v3983_v18  ;;  %v4585_v27 = vmax.f32 %v11854_v19, %v11857_v30  ;;  %v11870_v37 = vadd.f32 %v4294_v39, %v11571_v63  ;;  %v3850_v39 = vmul.f32 %v3793_v26, %v14538_v4  ;;  %v14547_v4 = vld [vmem:[#allocation165_spill] sm:$0xff] }
 0x3d3   :  { %v4296_v46 = vpop.f32.mrf.mxu1  ;;  %v3759_v21 = vmul.f32 %v3699_v61, %v14540_v33  ;;  %v3855_v51 = vmul.f32 %v3795_v62, %v14541_v38  ;;  %v3757_v14 = vmul.f32 %v3698_v57, %v14542_v10  ;;  %v14550_v38 = vld [vmem:[#allocation110_spill] sm:$0xff] }
 0x3d4   :  { %14534 = vst [vmem:[#allocation45_spill] sm:$0xff] %v11870_v37  ;;  %v11873_v18 = vadd.f32 %v4296_v46, %v11579_v58  ;;  %4586 = vmax.xlane.f32.xlu0 %v4585_v27  ;;  %v7027_v47 = vpop.eup %7026  ;;  %v14539_v27 = vld [vmem:[#allocation162_spill] sm:$0xff]  ;;  %v3853_v46 = vmul.f32 %v3794_v35, %v14543_v2  ;;  %v3914_v5 = vadd.f32 %v3850_v39, %v3754_v31  ;;  %v14555_v2 = vld [vmem:[#allocation167_spill] sm:$0xff] }
 0x3d5   :  { %v3848_v23 = vmul.f32 %v3792_v32, %v14539_v27  ;;  %v3701_v26 = vmul.f32 %v7027_v47, %v11748_v3  ;;  %v3797_v50 = vmul.f32 %v7027_v47, %v11781_v24  ;;  %v3919_v1 = vadd.f32 %v3855_v51, %v3759_v21  ;;  %v14548_v24 = vld [vmem:[#allocation90_spill] sm:$0xff] }
 0x3d6   :  { %14535 = vst [vmem:[#allocation19_spill] sm:$0xff] %v11873_v18  ;;  %v4588_v49 = vmax.f32 %v11870_v37, %v11873_v18  ;;  %v7029_v43 = vpop.eup %7028  ;;  %v3917_v39 = vadd.f32 %v3853_v46, %v3757_v14  ;;  %v3756_v47 = vmul.f32 %v3698_v57, %v14548_v24 }
 0x3d7   :  { %v3912_v32 = vadd.f32 %v3848_v23, %v3752_v44  ;;  %v3700_v27 = vmul.f32 %v7029_v43, %v11646_v45  ;;  %v3796_v31 = vmul.f32 %v7029_v43, %v11677_v40  ;;  %v14549_v44 = vld [vmem:[#allocation166_spill] sm:$0xff]  ;;  %v3763_v51 = vmul.f32 %v3701_v26, %v14550_v38 }
 0x3d8   :  { %4589 = vmax.xlane.f32.xlu1 %v4588_v49  ;;  %v3852_v23 = vmul.f32 %v3794_v35, %v14549_v44  ;;  %v3987_v40 = vpack.c.bf16 %v3919_v1, %v3917_v39  ;;  %v14554_v35 = vld [vmem:[#allocation101_spill] sm:$0xff]  ;;  %v5074_v44 = vpack.c.bf16 %v11873_v18, %v11857_v30 }
 0x3d9   :  { %4499 = vmatmul.mubr.bf16.gmra.mxu1 %v3982_v0  ;;  %v4300_v8 = vpop.f32.mrf.mxu1  ;;  %v14546_v0 = vld [vmem:[#allocation26_spill] sm:$0xff]  ;;  %v3984_v21 = vpack.c.bf16 %v3914_v5, %v3912_v32  ;;  %v3761_v14 = vmul.f32 %v3700_v27, %v14554_v35  ;;  %v3857_v46 = vmul.f32 %v3796_v31, %v14555_v2  ;;  %v14561_v2 = vld [vmem:[#allocation128_spill] sm:$0xff] }
 0x3da   :  { %4508 = vmatprep.mubr.bf16.mxu1 %v3985_v16  ;;  %v11890_v34 = vadd.f32 %v4300_v8, %v11571_v63  ;;  %v3758_v55 = vmul.f32 %v3699_v61, %v14546_v0  ;;  %v3854_v16 = vmul.f32 %v3795_v62, %v14547_v4  ;;  %v14551_v8 = vld [vmem:[#allocation169_spill] sm:$0xff]  ;;  %v7031_v10 = vpop.eup %7030  ;;  %v3916_v32 = vadd.f32 %v3852_v23, %v3756_v47 }
 0x3db   :  { %v4302_v54 = vpop.f32.mrf.mxu1  ;;  %v3859_v61 = vmul.f32 %v3797_v50, %v14551_v8  ;;  %v3799_v39 = vmul.f32 %v7031_v10, %v11831_v59  ;;  %v14558_v59 = vld [vmem:[#allocation107_spill] sm:$0xff] }
 0x3dc   :  { %14544 = vst [vmem:[#allocation137_spill] sm:$0xff] %v11890_v34  ;;  %v11893_v49 = vadd.f32 %v4302_v54, %v11579_v58  ;;  %v3918_v57 = vadd.f32 %v3854_v16, %v3758_v55  ;;  %v7033_v54 = vpop.eup %7032 }
 0x3dd   :  { %v4304_v3 = vpop.f32.mrf.mxu1  ;;  %v3923_v4 = vadd.f32 %v3859_v61, %v3763_v51  ;;  %v3702_v38 = vmul.f32 %v7033_v54, %v11835_v41  ;;  %v3798_v51 = vmul.f32 %v7033_v54, %v11841_v11  ;;  %v5072_v11 = vpack.c.bf16 %v11820_v52, %v11798_v48  ;;  %v14565_v54 = vld [vmem:[#allocation170_spill] sm:$0xff] }
 0x3de   :  { %14545 = vst [vmem:[#allocation49_spill] sm:$0xff] %v11893_v49  ;;  %v4591_v33 = vmax.f32 %v11890_v34, %v11893_v49  ;;  %v11906_v62 = vadd.f32 %v4304_v3, %v11571_v63  ;;  %v3703_v3 = vmul.f32 %v7031_v10, %v11822_v29  ;;  %v3986_v23 = vpack.c.bf16 %v3918_v57, %v3916_v32 }
 0x3df   :  { %v4306_v45 = vpop.f32.mrf.mxu1  ;;  %v5073_v57 = vpack.c.bf16 %v11870_v37, %v11854_v19  ;;  %v3856_v32 = vmul.f32 %v3796_v31, %v14565_v54 }
 0x3e0   :  { %14552 = vst [vmem:[#allocation46_spill] sm:$0xff] %v11906_v62  ;;  %v11909_v43 = vadd.f32 %v4306_v45, %v11579_v58  ;;  %4592 = vmax.xlane.f32.xlu0 %v4591_v33  ;;  %v5075_v55 = vpack.c.bf16 %v11906_v62, %v11890_v34  ;;  %v3921_v33 = vadd.f32 %v3857_v46, %v3761_v14  ;;  %v14559_v45 = vld [vmem:[#allocation168_spill] sm:$0xff] }
 0x3e1   :  { %4509 = vmatmul.mubr.bf16.gmra.mxu1 %v3984_v21  ;;  %v4310_v5 = vpop.f32.mrf.mxu1  ;;  %v3762_v21 = vmul.f32 %v3701_v26, %v14558_v59  ;;  %v3858_v10 = vmul.f32 %v3797_v50, %v14559_v45  ;;  %v3863_v46 = vmul.f32 %v3799_v39, %v14561_v2  ;;  %v14564_v50 = vld [vmem:[#allocation99_spill] sm:$0xff]  ;;  %v5069_v59 = vpack.c.bf16 %v11776_v13, %v11758_v20  ;;  %v14571_v2 = vld [vmem:[#allocation130_spill] sm:$0xff] }
 0x3e2   :  { %14553 = vst [vmem:[#allocation22_spill] sm:$0xff] %v11909_v43  ;;  %4518 = vmatprep.mubr.bf16.mxu1 %v3987_v40  ;;  %v4594_v0 = vmax.f32 %v11906_v62, %v11909_v43  ;;  %v5076_v1 = vpack.c.bf16 %v11909_v43, %v11893_v49  ;;  %v11922_v24 = vadd.f32 %v4310_v5, %v11571_v63  ;;  %v14560_v40 = vld [vmem:[#allocation120_spill] sm:$0xff] }
 0x3e3   :  { %v4312_v16 = vpop.f32.mrf.mxu1  ;;  %v3989_v61 = vpack.c.bf16 %v3923_v4, %v3921_v33  ;;  %v3767_v35 = vmul.f32 %v3703_v3, %v14560_v40  ;;  %v3760_v5 = vmul.f32 %v3700_v27, %v14564_v50  ;;  %v14567_v4 = vld [vmem:[#allocation124_spill] sm:$0xff]  ;;  %v3922_v33 = vadd.f32 %v3858_v10, %v3762_v21  ;;  %v14569_v40 = vld [vmem:[#allocation171_spill] sm:$0xff]  ;;  %v14570_v10 = vld [vmem:[#allocation118_spill] sm:$0xff] }
 0x3e4   :  { %14556 = vst [vmem:[#allocation34_spill] sm:$0xff] %v11922_v24  ;;  %v11925_v47 = vadd.f32 %v4312_v16, %v11579_v58  ;;  %4595 = vmax.xlane.f32.xlu1 %v4594_v0  ;;  %5093 = vmatprep.subr.bf16.mxu0 %v5076_v1  ;;  %v14566_v0 = vld [vmem:[#allocation115_spill] sm:$0xff]  ;;  %v5070_v27 = vpack.c.bf16 %v11779_v56, %v11761_v36 }
 0x3e5   :  { %v4314_v29 = vpop.f32.mrf.mxu1  ;;  %5094 = vmatpush1.bf16.msra.mxu0 %v5075_v55  ;;  %v3765_v1 = vmul.f32 %v3702_v38, %v14566_v0  ;;  %v3861_v55 = vmul.f32 %v3798_v51, %v14567_v4  ;;  %v3920_v31 = vadd.f32 %v3856_v32, %v3760_v5  ;;  %v5068_v21 = vpack.c.bf16 %v11744_v60, %v11727_v17 }
 0x3e6   :  { %14557 = vst [vmem:[#allocation50_spill] sm:$0xff] %v11925_v47  ;;  %5095 = vmatprep.subr.bf16.mxu0 %v5074_v44  ;;  %v4597_v8 = vmax.f32 %v11922_v24, %v11925_v47  ;;  %v11940_v26 = vadd.f32 %v4314_v29, %v11571_v63  ;;  %v5071_v44 = vpack.c.bf16 %v11817_v7, %v11795_v22 }
 0x3e7   :  { %v4316_v14 = vpop.f32.mrf.mxu1  ;;  %v3927_v29 = vadd.f32 %v3863_v46, %v3767_v35  ;;  %v3764_v35 = vmul.f32 %v3702_v38, %v14570_v10  ;;  %v3860_v46 = vmul.f32 %v3798_v51, %v14571_v2  ;;  %v5065_v51 = vpack.c.bf16 %v11717_v42, %v11684_v25 }
 0x3e8   :  { %14562 = vst [vmem:[#allocation35_spill] sm:$0xff] %v11940_v26  ;;  %v11943_v41 = vadd.f32 %v4316_v14, %v11579_v58  ;;  %4598 = vmax.xlane.f32.xlu0 %v4597_v8  ;;  %v3988_v8 = vpack.c.bf16 %v3922_v33, %v3920_v31 }
 0x3e9   :  { %4519 = vmatmul.mubr.bf16.gmra.mxu1 %v3986_v23  ;;  %5096 = vmatpush1.bf16.msra.mxu0 %v5073_v57  ;;  %v3925_v23 = vadd.f32 %v3861_v55, %v3765_v1  ;;  %v3862_v57 = vmul.f32 %v3799_v39, %v14569_v40  ;;  %v3924_v39 = vadd.f32 %v3860_v46, %v3764_v35  ;;  %v14581_v40 = vld [vmem:[#allocation9_spill] sm:$0xff] }
 0x3ea   :  { %14563 = vst [vmem:[#allocation140_spill] sm:$0xff] %v11943_v41  ;;  %4528 = vmatprep.mubr.bf16.mxu1 %v3989_v61  ;;  %5097 = vmatprep.subr.bf16.mxu0 %v5072_v11  ;;  %v4600_v16 = vmax.f32 %v11940_v26, %v11943_v41  ;;  %v14568_v61 = vld [vmem:[#allocation116_spill] sm:$0xff]  ;;  %v5067_v11 = vpack.c.bf16 %v11753_v15, %v11724_v9 }
 0x3eb   :  { %v3766_v45 = vmul.f32 %v3703_v3, %v14568_v61  ;;  %v3991_v14 = vpack.c.bf16 %v3927_v29, %v3925_v23  ;;  %v5066_v3 = vpack.c.bf16 %v11708_v28, %v11675_v53  ;;  %v5064_v55 = vpack.c.bf16 %v11655_v6, %v11632_v12  ;;  %v14576_v29 = vld [vmem:[#allocation122_spill] sm:$0xff] }
 0x3ec   :  { %4601 = vmax.xlane.f32.xlu1 %v4600_v16 }
 0x3ed   :  { %5098 = vmatpush1.bf16.msra.mxu0 %v5071_v44  ;;  %v3926_v50 = vadd.f32 %v3862_v57, %v3766_v45  ;;  %v14580_v45 = vld [vmem:[#allocation134_spill] sm:$0xff] }
 0x3ee   :  { %5099 = vmatprep.subr.bf16.mxu0 %v5070_v27  ;;  %v14577_v27 = vld [vmem:[#allocation144_spill] sm:$0xff]  ;;  %v5061_v57 = vpack.c.bf16 %v14581_v40, %v14580_v45 }
 0x3ef   :  { %v3990_v0 = vpack.c.bf16 %v3926_v50, %v3924_v39  ;;  %v5063_v31 = vpack.c.bf16 %v14577_v27, %v14576_v29 }
 0x3f1   :  { %4529 = vmatmul.mubr.bf16.gmra.mxu1 %v3988_v8  ;;  %5100 = vmatpush1.bf16.msra.mxu0 %v5069_v59  ;;  %v14578_v59 = vld [vmem:[#allocation143_spill] sm:$0xff] }
 0x3f2   :  { %4538 = vmatprep.mubr.bf16.mxu1 %v3991_v14  ;;  %5101 = vmatprep.subr.bf16.mxu0 %v5068_v21  ;;  %v14579_v8 = vld [vmem:[#allocation43_spill] sm:$0xff] }
 0x3f3   :  { %v4320_v5 = vpop.f32.mrf.mxu1  ;;  %v5062_v61 = vpack.c.bf16 %v14579_v8, %v14578_v59 }
 0x3f4   :  { %v11970_v32 = vadd.f32 %v4320_v5, %v11571_v63 }
 0x3f5   :  { %v4322_v54 = vpop.f32.mrf.mxu1  ;;  %5102 = vmatpush1.bf16.msra.mxu0 %v5067_v11 }
 0x3f6   :  { %14572 = vst [vmem:[#allocation154_spill] sm:$0xff] %v11970_v32  ;;  %v11973_v38 = vadd.f32 %v4322_v54, %v11579_v58  ;;  %5103 = vmatprep.subr.bf16.mxu0 %v5066_v3 }
 0x3f7   :  { %v4324_v1 = vpop.f32.mrf.mxu1 }
 0x3f8   :  { %14573 = vst [vmem:[#allocation18_spill] sm:$0xff] %v11973_v38  ;;  %v4603_v4 = vmax.f32 %v11970_v32, %v11973_v38  ;;  %v11982_v44 = vadd.f32 %v4324_v1, %v11571_v63 }
 0x3f9   :  { %4539 = vmatmul.mubr.bf16.gmra.mxu1 %v3990_v0  ;;  %v4326_v16 = vpop.f32.mrf.mxu1  ;;  %5104 = vmatpush1.bf16.msra.mxu0 %v5065_v51 }
 0x3fa   :  { %14574 = vst [vmem:[#allocation138_spill] sm:$0xff] %v11982_v44  ;;  %v11985_v33 = vadd.f32 %v4326_v16, %v11579_v58  ;;  %4604 = vmax.xlane.f32.xlu0 %v4603_v4  ;;  %5105 = vmatprep.subr.bf16.mxu0 %v5064_v55 }
 0x3fc   :  { %14575 = vst [vmem:[#allocation149_spill] sm:$0xff] %v11985_v33  ;;  %v4606_v23 = vmax.f32 %v11982_v44, %v11985_v33 }
 0x3fd   :  { %5106 = vmatpush1.bf16.msra.mxu0 %v5063_v31  ;;  %v4330_v14 = vpop.f32.mrf.mxu1 }
 0x3fe   :  { %4607 = vmax.xlane.f32.xlu1 %v4606_v23  ;;  %5107 = vmatprep.subr.bf16.mxu0 %v5062_v61  ;;  %v12023_v7 = vadd.f32 %v4330_v14, %v11571_v63 }
 0x3ff   :  { %v4332_v21 = vpop.f32.mrf.mxu1 }
 0x400   :  { %v12015_v52 = vadd.f32 %v4332_v21, %v11579_v58  ;;  %14589 = vst [vmem:[#allocation51_spill] sm:$0xff] %v12023_v7 }
 0x401   :  { %5108 = vmatpush1.bf16.msra.mxu0 %v5061_v57  ;;  %v4334_v10 = vpop.f32.mrf.mxu1 }
 0x402   :  { %14587 = vst [vmem:[#allocation53_spill] sm:$0xff] %v12015_v52 }
 0x403   :  { %v4336_v35 = vpop.f32.mrf.mxu1 }
 0x404   :  { %v12073_v56 = vadd.f32 %v4336_v35, %v11579_v58 }
 0x406   :  { %14597 = vst [vmem:[#allocation55_spill] sm:$0xff] %v12073_v56 }
 0x411   :  { %v11995_v2 = vpop.f32.mrf.mxu1 }
 0x412   :  { %v12109_v60 = vadd.f32 %v11995_v2, %v11571_v63 }
 0x413   :  { %v4342_v46 = vpop.f32.mrf.mxu1 }
 0x414   :  { %v12076_v13 = vadd.f32 %v4342_v46, %v11579_v58  ;;  %14604 = vst [vmem:[#allocation69_spill] sm:$0xff] %v12109_v60 }
 0x415   :  { %v11997_v11 = vpop.f32.mrf.mxu1 }
 0x416   :  { %14598 = vst [vmem:[#allocation33_spill] sm:$0xff] %v12076_v13 }
 0x417   :  { %v4346_v50 = vpop.f32.mrf.mxu1 }
 0x419   :  { %v4350_v5 = vpop.f32.mrf.mxu1 }
 0x41b   :  { %v4352_v3 = vpop.f32.mrf.mxu1 }
 0x41d   :  { %v4354_v39 = vpop.f32.mrf.mxu1 }
 0x41f   :  { %v4356_v54 = vpop.f32.mrf.mxu1 }
 0x421   :  { %v4360_v51 = vpop.f32.mrf.mxu1 }
 0x423   :  { %v4362_v0 = vpop.f32.mrf.mxu1 }
 0x425   :  { %v4364_v1 = vpop.f32.mrf.mxu1 }
 0x427   :  { %v4366_v4 = vpop.f32.mrf.mxu1 }
 0x428   :  { %v12031_v48 = vadd.f32 %v4366_v4, %v11579_v58  ;;  %v12048_v4 = vadd.f32 %v4362_v0, %v11579_v58 }
 0x42a   :  { %14591 = vst [vmem:[#allocation145_spill] sm:$0xff] %v12031_v48  ;;  %14594 = vst [vmem:[#allocation25_spill] sm:$0xff] %v12048_v4 }
 0x431   :  { %v4370_v55 = vpop.f32.mrf.mxu1 }
 0x433   :  { %v4372_v16 = vpop.f32.mrf.mxu1 }
 0x435   :  { %v4374_v31 = vpop.f32.mrf.mxu1 }
 0x437   :  { %v4376_v23 = vpop.f32.mrf.mxu1 }
 0x438   :  { %v12003_v34 = vadd.f32 %v4376_v23, %v11579_v58 }
 0x439   :  { %v4380_v61 = vpop.f32.mrf.mxu1 }
 0x43a   :  { %14583 = vst [vmem:[#allocation52_spill] sm:$0xff] %v12003_v34  ;;  %v12012_v30 = vadd.f32 %v4380_v61, %v11571_v63 }
 0x43b   :  { %v4382_v57 = vpop.f32.mrf.mxu1 }
 0x43c   :  { %v12006_v18 = vadd.f32 %v4382_v57, %v11579_v58  ;;  %14586 = vst [vmem:[#allocation37_spill] sm:$0xff] %v12012_v30  ;;  %v12026_v57 = vadd.f32 %v4374_v31, %v11571_v63  ;;  %v12042_v31 = vadd.f32 %v4370_v55, %v11571_v63  ;;  %v12058_v55 = vadd.f32 %v4364_v1, %v11571_v63  ;;  %v4554_v1 = vpop.xlane.xlu1 %4553 }
 0x43d   :  { %v4384_v43 = vpop.f32.mrf.mxu1  ;;  %v4648_v36 = vsub.f32 %v14579_v8, %v4554_v1 }
 0x43e   :  { %v12000_v62 = vadd.f32 %v4384_v43, %v11571_v63  ;;  %14584 = vst [vmem:[#allocation28_spill] sm:$0xff] %v12006_v18  ;;  %v12018_v43 = vadd.f32 %v4372_v16, %v11579_v58  ;;  %14590 = vst [vmem:[#allocation39_spill] sm:$0xff] %v12026_v57 }
 0x43f   :  { %v4386_v49 = vpop.f32.mrf.mxu1  ;;  %14592 = vst [vmem:[#allocation158_spill] sm:$0xff] %v12042_v31  ;;  %14596 = vst [vmem:[#allocation97_spill] sm:$0xff] %v12058_v55 }
 0x440   :  { %14582 = vst [vmem:[#allocation139_spill] sm:$0xff] %v12000_v62  ;;  %v12009_v37 = vadd.f32 %v4386_v49, %v11579_v58  ;;  %14588 = vst [vmem:[#allocation31_spill] sm:$0xff] %v12018_v43  ;;  %v5091_v49 = vpack.c.bf16 %v12000_v62, %v12012_v30  ;;  %v5090_v14 = vpack.c.bf16 %v12003_v34, %v12018_v43 }
 0x441   :  { %v4390_v19 = vpop.f32.mrf.mxu1  ;;  %v12045_v62 = vadd.f32 %v4334_v10, %v11571_v63  ;;  %v5089_v10 = vpack.c.bf16 %v12026_v57, %v12042_v31 }
 0x442   :  { %14585 = vst [vmem:[#allocation57_spill] sm:$0xff] %v12009_v37  ;;  %v5092_v23 = vpack.c.bf16 %v12009_v37, %v12006_v18  ;;  %v12034_v21 = vadd.f32 %v4390_v19, %v11571_v63  ;;  %v4551_v37 = vpop.xlane.xlu0 %4550 }
 0x443   :  { %v4392_v61 = vpop.f32.mrf.mxu1  ;;  %14593 = vst [vmem:[#allocation32_spill] sm:$0xff] %v12045_v62  ;;  %v4645_v0 = vsub.f32 %v14580_v45, %v4551_v37  ;;  %v4646_v22 = vsub.f32 %v14578_v59, %v4551_v37  ;;  %v12079_v45 = vadd.f32 %v4352_v3, %v11579_v58  ;;  %v12088_v37 = vadd.f32 %v4350_v5, %v11571_v63 }
 0x444   :  { %v12037_v16 = vadd.f32 %v4392_v61, %v11579_v58  ;;  %5109 = vmatprep.subr.bf16.mxu0 %v5092_v23  ;;  %v4609_v23 = vmax.f32 %v12023_v7, %v12015_v52  ;;  %v12055_v61 = vadd.f32 %v4356_v54, %v11579_v58  ;;  %v5088_v54 = vpack.c.bf16 %v12031_v48, %v12048_v4 }
 0x445   :  { %v4394_v18 = vpop.f32.mrf.mxu1  ;;  %5110 = vmatpush2.bf16.msra.mxu0 %v5091_v49  ;;  %14599 = vst [vmem:[#allocation60_spill] sm:$0xff] %v12079_v45  ;;  %14602 = vst [vmem:[#allocation36_spill] sm:$0xff] %v12088_v37  ;;  %v12091_v59 = vadd.f32 %v4354_v39, %v11571_v63 }
 0x446   :  { %5111 = vmatprep.subr.bf16.mxu0 %v5090_v14  ;;  %v5350_v19 = vmax.f32 %v12034_v21, %v12037_v16  ;;  %14595 = vst [vmem:[#allocation75_spill] sm:$0xff] %v12055_v61  ;;  %v12064_v14 = vadd.f32 %v4394_v18, %v11571_v63  ;;  %v12082_v18 = vadd.f32 %v4360_v51, %v11571_v63  ;;  %v4557_v20 = vpop.xlane.xlu0 %4556 }
 0x447   :  { %v4396_v49 = vpop.f32.mrf.mxu1  ;;  %14603 = vst [vmem:[#allocation56_spill] sm:$0xff] %v12091_v59  ;;  %v5086_v51 = vpack.c.bf16 %v12055_v61, %v12079_v45 }
 0x448   :  { %v12067_v30 = vadd.f32 %v4396_v49, %v11579_v58  ;;  %5351 = vmax.xlane.f32.xlu0 %v5350_v19  ;;  %14600 = vst [vmem:[#allocation77_spill] sm:$0xff] %v12082_v18  ;;  %v12085_v19 = vadd.f32 %v4346_v50, %v11579_v58  ;;  %v5087_v46 = vpack.c.bf16 %v12058_v55, %v12082_v18 }
 0x449   :  { %v4400_v49 = vpop.f32.mrf.mxu1  ;;  %5112 = vmatpush2.bf16.msra.mxu0 %v5089_v10  ;;  %v4709_v10 = vmul.f32 1.442695, %v4645_v0  ;;  %v4647_v50 = vsub.f32 %v14581_v40, %v4554_v1  ;;  %v4612_v40 = vmax.f32 %v12045_v62, %v12073_v56  ;;  %v12115_v0 = vadd.f32 %v11997_v11, %v11571_v63 }
 0x44a   :  { %14601 = vst [vmem:[#allocation58_spill] sm:$0xff] %v12085_v19  ;;  %5113 = vmatprep.subr.bf16.mxu0 %v5088_v54  ;;  %v5353_v35 = vmax.f32 %v12064_v14, %v12067_v30  ;;  %v12101_v5 = vadd.f32 %v4400_v49, %v11571_v63  ;;  %v4711_v54 = vmul.f32 1.442695, %v4646_v22  ;;  %v5084_v8 = vpack.c.bf16 %v12085_v19, %v12076_v13 }
 0x44b   :  { %v4402_v3 = vpop.f32.mrf.mxu1  ;;  %14605 = vst [vmem:[#allocation156_spill] sm:$0xff] %v12115_v0  ;;  %7034 = vpow2.f32 %v4709_v10  ;;  %v4713_v1 = vmul.f32 1.442695, %v4647_v50  ;;  %v4649_v49 = vsub.f32 %v14576_v29, %v4557_v20  ;;  %v5083_v10 = vpack.c.bf16 %v12115_v0, %v12109_v60 }
 0x44c   :  { %v12104_v39 = vadd.f32 %v4402_v3, %v11579_v58  ;;  %5354 = vmax.xlane.f32.xlu1 %v5353_v35  ;;  %4610 = vmax.xlane.f32.xlu0 %v4609_v23  ;;  %v5085_v23 = vpack.c.bf16 %v12091_v59, %v12088_v37  ;;  %v4650_v35 = vsub.f32 %v11632_v12, %v4557_v20  ;;  %7036 = vpow2.f32 %v4711_v54 }
 0x44d   :  { %v4404_v15 = vpop.f32.mrf.mxu1  ;;  %5114 = vmatpush2.bf16.msra.mxu0 %v5087_v46  ;;  %v4715_v3 = vmul.f32 1.442695, %v4648_v36  ;;  %v5082_v20 = vpack.c.bf16 %v12073_v56, %v12015_v52  ;;  %7038 = vpow2.f32 %v4713_v1  ;;  %v4717_v50 = vmul.f32 1.442695, %v4649_v49 }
 0x44e   :  { %5115 = vmatprep.subr.bf16.mxu0 %v5086_v51  ;;  %v5356_v22 = vmax.f32 %v12101_v5, %v12104_v39  ;;  %v12126_v11 = vadd.f32 %v4404_v15, %v11571_v63  ;;  %v4560_v51 = vpop.xlane.xlu1 %4559  ;;  %v4615_v15 = vmax.f32 %v12109_v60, %v12076_v13  ;;  %v4719_v36 = vmul.f32 1.442695, %v4650_v35 }
 0x44f   :  { %v4406_v2 = vpop.f32.mrf.mxu1  ;;  %v4651_v54 = vsub.f32 %v14577_v27, %v4560_v51  ;;  %7040 = vpow2.f32 %v4715_v3  ;;  %v5080_v49 = vpack.c.bf16 %v11985_v33, %v11973_v38 }
 0x450   :  { %v12129_v46 = vadd.f32 %v4406_v2, %v11579_v58  ;;  %4613 = vmax.xlane.f32.xlu1 %v4612_v40  ;;  %5357 = vmax.xlane.f32.xlu0 %v5356_v22  ;;  %v4652_v22 = vsub.f32 %v11655_v6, %v4560_v51  ;;  %v4618_v2 = vmax.f32 %v12115_v0, %v12085_v19  ;;  %7042 = vpow2.f32 %v4717_v50 }
 0x451   :  { %v4410_v17 = vpop.f32.mrf.mxu1  ;;  %5116 = vmatpush2.bf16.msra.mxu0 %v5085_v23  ;;  %v4721_v35 = vmul.f32 1.442695, %v4651_v54  ;;  %7044 = vpow2.f32 %v4719_v36 }
 0x452   :  { %5117 = vmatprep.subr.bf16.mxu0 %v5084_v8  ;;  %v5359_v12 = vmax.f32 %v12126_v11, %v12129_v46  ;;  %v12141_v40 = vadd.f32 %v4410_v17, %v11571_v63  ;;  %v5081_v17 = vpack.c.bf16 %v12045_v62, %v12023_v7  ;;  %v4723_v51 = vmul.f32 1.442695, %v4652_v22 }
 0x453   :  { %v4412_v29 = vpop.f32.mrf.mxu1  ;;  %7046 = vpow2.f32 %v4721_v35  ;;  %v5078_v22 = vpack.c.bf16 %v11943_v41, %v11925_v47 }
 0x454   :  { %v12144_v23 = vadd.f32 %v4412_v29, %v11579_v58  ;;  %5360 = vmax.xlane.f32.xlu1 %v5359_v12  ;;  %4616 = vmax.xlane.f32.xlu0 %v4615_v15  ;;  %v4621_v15 = vmax.f32 %v12088_v37, %v12079_v45  ;;  %7048 = vpow2.f32 %v4723_v51 }
 0x455   :  { %v4414_v8 = vpop.f32.mrf.mxu1  ;;  %5118 = vmatpush2.bf16.msra.mxu0 %v5083_v10 }
 0x456   :  { %5119 = vmatprep.subr.bf16.mxu0 %v5082_v20  ;;  %v5362_v27 = vmax.f32 %v12141_v40, %v12144_v23  ;;  %v12156_v6 = vadd.f32 %v4414_v8, %v11571_v63  ;;  %v5079_v20 = vpack.c.bf16 %v11982_v44, %v11970_v32 }
 0x457   :  { %v4416_v1 = vpop.f32.mrf.mxu1 }
 0x458   :  { %v12159_v3 = vadd.f32 %v4416_v1, %v11579_v58  ;;  %4619 = vmax.xlane.f32.xlu1 %v4618_v2  ;;  %5363 = vmax.xlane.f32.xlu0 %v5362_v27  ;;  %v12167_v50 = vpop.eup %7034  ;;  %v4624_v27 = vmax.f32 %v12091_v59, %v12055_v61  ;;  %v4563_v1 = vpop.xlane.xlu0 %4562 }
 0x459   :  { %v4420_v10 = vpop.f32.mrf.mxu1  ;;  %5120 = vmatpush2.bf16.msra.mxu0 %v5081_v17  ;;  %14606 = vst [vmem:[#allocation76_spill] sm:$0xff] %v12167_v50  ;;  %v12177_v8 = vpop.eup %7036  ;;  %v4654_v61 = vsub.f32 %v11675_v53, %v4563_v1 }
 0x45a   :  { %5121 = vmatprep.subr.bf16.mxu0 %v5080_v49  ;;  %v5365_v12 = vmax.f32 %v12156_v6, %v12159_v3  ;;  %v12170_v54 = vadd.f32 %v4420_v10, %v11571_v63  ;;  %14607 = vst [vmem:[#allocation151_spill] sm:$0xff] %v12177_v8  ;;  %v5077_v49 = vpack.c.bf16 %v11940_v26, %v11922_v24  ;;  %v12185_v51 = vpop.eup %7038  ;;  %v4566_v59 = vpop.xlane.xlu1 %4565 }
 0x45b   :  { %v4422_v29 = vpop.f32.mrf.mxu1  ;;  %14608 = vst [vmem:[#allocation155_spill] sm:$0xff] %v12185_v51  ;;  %v4727_v19 = vmul.f32 1.442695, %v4654_v61  ;;  %v4656_v0 = vsub.f32 %v11708_v28, %v4566_v59 }
 0x45c   :  { %v12173_v36 = vadd.f32 %v4422_v29, %v11579_v58  ;;  %5366 = vmax.xlane.f32.xlu1 %v5365_v12  ;;  %4622 = vmax.xlane.f32.xlu0 %v4621_v15  ;;  %v4837_v15 = vadd.f32 %v12177_v8, %v12167_v50 }
 0x45d   :  { %v4424_v2 = vpop.f32.mrf.mxu1  ;;  %5122 = vmatpush2.bf16.msra.mxu0 %v5079_v20  ;;  %v12195_v20 = vpop.eup %7040 }
 0x45e   :  { %5123 = vmatprep.subr.bf16.mxu0 %v5078_v22  ;;  %v5368_v17 = vmax.f32 %v12170_v54, %v12173_v36  ;;  %v12188_v10 = vadd.f32 %v4424_v2, %v11571_v63  ;;  %14609 = vst [vmem:[#allocation63_spill] sm:$0xff] %v12195_v20  ;;  %v4653_v22 = vsub.f32 %v11684_v25, %v4563_v1  ;;  %v12437_v26 = vpop.xlane.xlu1 %4571 }
 0x45f   :  { %v4426_v35 = vpop.f32.mrf.mxu1  ;;  %v4840_v25 = vadd.f32 %v12195_v20, %v12185_v51  ;;  %v4655_v1 = vsub.f32 %v11717_v42, %v4566_v59 }
 0x460   :  { %v12191_v12 = vadd.f32 %v4426_v35, %v11579_v58  ;;  %4625 = vmax.xlane.f32.xlu1 %v4624_v27  ;;  %5369 = vmax.xlane.f32.xlu0 %v5368_v17  ;;  %v12201_v35 = vpop.eup %7042  ;;  %v4725_v53 = vmul.f32 1.442695, %v4653_v22  ;;  %v4731_v22 = vmul.f32 1.442695, %v4656_v0 }
 0x461   :  { %v4430_v29 = vpop.f32.mrf.mxu1  ;;  %5124 = vmatpush2.bf16.msra.mxu0 %v5077_v49  ;;  %14610 = vst [vmem:[#allocation83_spill] sm:$0xff] %v12201_v35  ;;  %v12211_v49 = vpop.eup %7044  ;;  %v4729_v28 = vmul.f32 1.442695, %v4655_v1 }
 0x462   :  { %v5371_v2 = vmax.f32 %v12188_v10, %v12191_v12  ;;  %v12204_v27 = vadd.f32 %v4430_v29, %v11571_v63  ;;  %14613 = vst [vmem:[#allocation54_spill] sm:$0xff] %v12211_v49  ;;  %v4843_v42 = vadd.f32 %v12211_v49, %v12201_v35  ;;  %7050 = vpow2.f32 %v4725_v53  ;;  %v12449_v47 = vpop.xlane.xlu1 %4577 }
 0x463   :  { %v4432_v45 = vpop.f32.mrf.mxu1  ;;  %7052 = vpow2.f32 %v4727_v19 }
 0x464   :  { %14611 = vst [vmem:[#allocation61_spill] sm:$0xff] %v12204_v27  ;;  %v12207_v17 = vadd.f32 %v4432_v45, %v11579_v58  ;;  %5372 = vmax.xlane.f32.xlu1 %v5371_v2  ;;  %4838 = vadd.xlane.f32.xlu0 %v4837_v15  ;;  %v12217_v45 = vpop.eup %7046  ;;  %7054 = vpow2.f32 %v4729_v28  ;;  %v4627_v28 = vmax.f32 %v12082_v18, %v12048_v4 }
 0x465   :  { %v4434_v37 = vpop.f32.mrf.mxu1  ;;  %14614 = vst [vmem:[#allocation89_spill] sm:$0xff] %v12217_v45  ;;  %v12227_v61 = vpop.eup %7048  ;;  %7056 = vpow2.f32 %v4731_v22 }
 0x466   :  { %14612 = vst [vmem:[#allocation8_spill] sm:$0xff] %v12207_v17  ;;  %v5374_v29 = vmax.f32 %v12204_v27, %v12207_v17  ;;  %v12220_v15 = vadd.f32 %v4434_v37, %v11571_v63  ;;  %14617 = vst [vmem:[#allocation88_spill] sm:$0xff] %v12227_v61 }
 0x467   :  { %v4436_v13 = vpop.f32.mrf.mxu1 }
 0x468   :  { %14615 = vst [vmem:[#allocation59_spill] sm:$0xff] %v12220_v15  ;;  %v12223_v2 = vadd.f32 %v4436_v13, %v11579_v58  ;;  %4841 = vadd.xlane.f32.xlu1 %v4840_v25  ;;  %5375 = vmax.xlane.f32.xlu0 %v5374_v29  ;;  %v4846_v25 = vadd.f32 %v12227_v61, %v12217_v45 }
 0x469   :  { %v4440_v59 = vpop.f32.mrf.mxu1 }
 0x46a   :  { %14616 = vst [vmem:[#allocation109_spill] sm:$0xff] %v12223_v2  ;;  %v5377_v60 = vmax.f32 %v12220_v15, %v12223_v2  ;;  %v12232_v56 = vadd.f32 %v4440_v59, %v11571_v63 }
 0x46b   :  { %v4442_v37 = vpop.f32.mrf.mxu1 }
 0x46c   :  { %14618 = vst [vmem:[#allocation21_spill] sm:$0xff] %v12232_v56  ;;  %v12235_v13 = vadd.f32 %v4442_v37, %v11579_v58  ;;  %5378 = vmax.xlane.f32.xlu1 %v5377_v60  ;;  %4844 = vadd.xlane.f32.xlu0 %v4843_v42 }
 0x46d   :  { %v4444_v53 = vpop.f32.mrf.mxu1 }
 0x46e   :  { %14619 = vst [vmem:[#allocation62_spill] sm:$0xff] %v12235_v13  ;;  %v5380_v19 = vmax.f32 %v12232_v56, %v12235_v13  ;;  %v12242_v1 = vadd.f32 %v4444_v53, %v11571_v63 }
 0x46f   :  { %v4446_v0 = vpop.f32.mrf.mxu1 }
 0x470   :  { %14620 = vst [vmem:[#allocation11_spill] sm:$0xff] %v12242_v1  ;;  %v12245_v29 = vadd.f32 %v4446_v0, %v11579_v58  ;;  %4847 = vadd.xlane.f32.xlu1 %v4846_v25  ;;  %5381 = vmax.xlane.f32.xlu0 %v5380_v19  ;;  %v12257_v0 = vpop.eup %7050  ;;  %v4630_v25 = vmax.f32 %v12058_v55, %v12031_v48 }
 0x471   :  { %v4450_v60 = vpop.f32.mrf.mxu1  ;;  %14624 = vst [vmem:[#allocation105_spill] sm:$0xff] %v12257_v0  ;;  %v12263_v62 = vpop.eup %7052 }
 0x472   :  { %14621 = vst [vmem:[#allocation92_spill] sm:$0xff] %v12245_v29  ;;  %v5383_v42 = vmax.f32 %v12242_v1, %v12245_v29  ;;  %v12252_v22 = vadd.f32 %v4450_v60, %v11571_v63  ;;  %14625 = vst [vmem:[#allocation5_spill] sm:$0xff] %v12263_v62  ;;  %v4849_v55 = vadd.f32 %v12263_v62, %v12257_v0 }
 0x473   :  { %v4452_v59 = vpop.f32.mrf.mxu1 }
 0x474   :  { %14622 = vst [vmem:[#allocation84_spill] sm:$0xff] %v12252_v22  ;;  %v12255_v37 = vadd.f32 %v4452_v59, %v11579_v58  ;;  %5384 = vmax.xlane.f32.xlu1 %v5383_v42  ;;  %4628 = vmax.xlane.f32.xlu0 %v4627_v28  ;;  %v12271_v28 = vpop.eup %7054 }
 0x475   :  { %v4454_v53 = vpop.f32.mrf.mxu1  ;;  %14628 = vst [vmem:[#allocation67_spill] sm:$0xff] %v12271_v28  ;;  %v12277_v18 = vpop.eup %7056 }
 0x476   :  { %14623 = vst [vmem:[#allocation68_spill] sm:$0xff] %v12255_v37  ;;  %v5386_v19 = vmax.f32 %v12252_v22, %v12255_v37  ;;  %v12266_v60 = vadd.f32 %v4454_v53, %v11571_v63  ;;  %14629 = vst [vmem:[#allocation127_spill] sm:$0xff] %v12277_v18 }
 0x477   :  { %v4456_v4 = vpop.f32.mrf.mxu1 }
 0x478   :  { %14626 = vst [vmem:[#allocation66_spill] sm:$0xff] %v12266_v60  ;;  %v12269_v59 = vadd.f32 %v4456_v4, %v11579_v58  ;;  %4631 = vmax.xlane.f32.xlu1 %v4630_v25  ;;  %5387 = vmax.xlane.f32.xlu0 %v5386_v19  ;;  %v4852_v19 = vadd.f32 %v12277_v18, %v12271_v28 }
 0x479   :  { %v4460_v42 = vpop.f32.mrf.mxu1 }
 0x47a   :  { %14627 = vst [vmem:[#allocation125_spill] sm:$0xff] %v12269_v59  ;;  %v5389_v48 = vmax.f32 %v12266_v60, %v12269_v59  ;;  %v12280_v53 = vadd.f32 %v4460_v42, %v11571_v63 }
 0x47b   :  { %v4462_v52 = vpop.f32.mrf.mxu1 }
 0x47c   :  { %14630 = vst [vmem:[#allocation64_spill] sm:$0xff] %v12280_v53  ;;  %v12283_v4 = vadd.f32 %v4462_v52, %v11579_v58  ;;  %5390 = vmax.xlane.f32.xlu1 %v5389_v48  ;;  %4850 = vadd.xlane.f32.xlu0 %v4849_v55 }
 0x47d   :  { %v4464_v25 = vpop.f32.mrf.mxu1 }
 0x47e   :  { %14631 = vst [vmem:[#allocation126_spill] sm:$0xff] %v12283_v4  ;;  %v5392_v7 = vmax.f32 %v12280_v53, %v12283_v4  ;;  %v12290_v0 = vadd.f32 %v4464_v25, %v11571_v63  ;;  %v4633_v25 = vmax.f32 %v12042_v31, %v12018_v43  ;;  %v5874_v43 = vpack.c.bf16 %v12266_v60, %v12252_v22  ;;  %v4569_v22 = vpop.xlane.xlu0 %4568 }
 0x47f   :  { %v4466_v62 = vpop.f32.mrf.mxu1 }
 0x480   :  { %14632 = vst [vmem:[#allocation65_spill] sm:$0xff] %v12290_v0  ;;  %v12293_v33 = vadd.f32 %v4466_v62, %v11579_v58  ;;  %4853 = vadd.xlane.f32.xlu1 %v4852_v19  ;;  %5393 = vmax.xlane.f32.xlu0 %v5392_v7  ;;  %v5876_v42 = vpack.c.bf16 %v12290_v0, %v12280_v53 }
 0x481   :  { %v4470_v52 = vpop.f32.mrf.mxu1  ;;  %v5875_v7 = vpack.c.bf16 %v12269_v59, %v12255_v37 }
 0x482   :  { %14633 = vst [vmem:[#allocation129_spill] sm:$0xff] %v12293_v33  ;;  %v5877_v48 = vpack.c.bf16 %v12293_v33, %v12283_v4  ;;  %v5395_v55 = vmax.f32 %v12290_v0, %v12293_v33  ;;  %v12309_v62 = vadd.f32 %v4470_v52, %v11571_v63  ;;  %v4636_v33 = vmax.f32 %v12026_v57, %v12003_v34 }
 0x483   :  { %v4472_v28 = vpop.f32.mrf.mxu1  ;;  %v5872_v34 = vpack.c.bf16 %v12242_v1, %v12232_v56 }
 0x484   :  { %v12304_v18 = vadd.f32 %v4472_v28, %v11579_v58  ;;  %5894 = vmatprep.subr.bf16.mxu1 %v5877_v48  ;;  %5396 = vmax.xlane.f32.xlu1 %v5395_v55 }
 0x485   :  { %v4474_v19 = vpop.f32.mrf.mxu1  ;;  %5895 = vmatpush1.bf16.msra.mxu1 %v5876_v42  ;;  %4634 = vmax.xlane.f32.xlu0 %v4633_v25  ;;  %v5873_v42 = vpack.c.bf16 %v12245_v29, %v12235_v13 }
 0x486   :  { %5896 = vmatprep.subr.bf16.mxu1 %v5875_v7  ;;  %v5398_v48 = vmax.f32 %v12309_v62, %v12304_v18  ;;  %v12318_v55 = vadd.f32 %v4474_v19, %v11571_v63 }
 0x487   :  { %v4476_v28 = vpop.f32.mrf.mxu1 }
 0x488   :  { %v12321_v52 = vadd.f32 %v4476_v28, %v11579_v58  ;;  %4637 = vmax.xlane.f32.xlu1 %v4636_v33  ;;  %v5871_v33 = vpack.c.bf16 %v12223_v2, %v12207_v17  ;;  %v12462_v2 = vpop.xlane.xlu1 %4583 }
 0x489   :  { %v4480_v25 = vpop.f32.mrf.mxu1  ;;  %5897 = vmatpush1.bf16.msra.mxu1 %v5874_v43  ;;  %5399 = vmax.xlane.f32.xlu0 %v5398_v48 }
 0x48a   :  { %5898 = vmatprep.subr.bf16.mxu1 %v5873_v42  ;;  %v5401_v7 = vmax.f32 %v12318_v55, %v12321_v52  ;;  %v12330_v19 = vadd.f32 %v4480_v25, %v11571_v63  ;;  %v5870_v42 = vpack.c.bf16 %v12220_v15, %v12204_v27 }
 0x48b   :  { %v4482_v57 = vpop.f32.mrf.mxu1 }
 0x48c   :  { %v12333_v28 = vadd.f32 %v4482_v57, %v11579_v58  ;;  %5402 = vmax.xlane.f32.xlu1 %v5401_v7  ;;  %v5869_v7 = vpack.c.bf16 %v12191_v12, %v12173_v36  ;;  %v12475_v27 = vpop.xlane.xlu1 %4589 }
 0x48d   :  { %v4484_v43 = vpop.f32.mrf.mxu1  ;;  %5899 = vmatpush1.bf16.msra.mxu1 %v5872_v34 }
 0x48e   :  { %5900 = vmatprep.subr.bf16.mxu1 %v5871_v33  ;;  %v5404_v48 = vmax.f32 %v12330_v19, %v12333_v28  ;;  %v12342_v25 = vadd.f32 %v4484_v43, %v11571_v63  ;;  %v5868_v33 = vpack.c.bf16 %v12188_v10, %v12170_v54 }
 0x48f   :  { %v4486_v31 = vpop.f32.mrf.mxu1 }
 0x490   :  { %v12345_v57 = vadd.f32 %v4486_v31, %v11579_v58  ;;  %5405 = vmax.xlane.f32.xlu0 %v5404_v48  ;;  %v5867_v48 = vpack.c.bf16 %v12159_v3, %v12144_v23 }
 0x491   :  { %v4490_v0 = vpop.f32.mrf.mxu1  ;;  %5901 = vmatpush1.bf16.msra.mxu1 %v5870_v42 }
 0x492   :  { %5902 = vmatprep.subr.bf16.mxu1 %v5869_v7  ;;  %v5407_v34 = vmax.f32 %v12342_v25, %v12345_v57  ;;  %v12354_v43 = vadd.f32 %v4490_v0, %v11571_v63  ;;  %v5866_v7 = vpack.c.bf16 %v12156_v6, %v12141_v40 }
 0x493   :  { %v4492_v35 = vpop.f32.mrf.mxu1 }
 0x494   :  { %v12357_v31 = vadd.f32 %v4492_v35, %v11579_v58  ;;  %5408 = vmax.xlane.f32.xlu1 %v5407_v34  ;;  %v5865_v34 = vpack.c.bf16 %v12129_v46, %v12104_v39 }
 0x495   :  { %v4494_v44 = vpop.f32.mrf.mxu1  ;;  %5903 = vmatpush1.bf16.msra.mxu1 %v5868_v33 }
 0x496   :  { %5904 = vmatprep.subr.bf16.mxu1 %v5867_v48  ;;  %v5410_v42 = vmax.f32 %v12354_v43, %v12357_v31  ;;  %v12366_v0 = vadd.f32 %v4494_v44, %v11571_v63  ;;  %v5864_v48 = vpack.c.bf16 %v12126_v11, %v12101_v5 }
 0x497   :  { %v4496_v45 = vpop.f32.mrf.mxu1 }
 0x498   :  { %v12369_v35 = vadd.f32 %v4496_v45, %v11579_v58  ;;  %5411 = vmax.xlane.f32.xlu0 %v5410_v42  ;;  %v5863_v42 = vpack.c.bf16 %v12067_v30, %v12037_v16 }
 0x499   :  { %v4500_v38 = vpop.f32.mrf.mxu1  ;;  %5905 = vmatpush1.bf16.msra.mxu1 %v5866_v7 }
 0x49a   :  { %5906 = vmatprep.subr.bf16.mxu1 %v5865_v34  ;;  %v5413_v33 = vmax.f32 %v12366_v0, %v12369_v35  ;;  %v12378_v44 = vadd.f32 %v4500_v38, %v11571_v63  ;;  %v5862_v34 = vpack.c.bf16 %v12064_v14, %v12034_v21 }
 0x49b   :  { %v4502_v32 = vpop.f32.mrf.mxu1 }
 0x49c   :  { %v12381_v45 = vadd.f32 %v4502_v32, %v11579_v58  ;;  %5414 = vmax.xlane.f32.xlu1 %v5413_v33 }
 0x49d   :  { %v4504_v61 = vpop.f32.mrf.mxu1  ;;  %5907 = vmatpush1.bf16.msra.mxu1 %v5864_v48 }
 0x49e   :  { %5908 = vmatprep.subr.bf16.mxu1 %v5863_v42  ;;  %v5416_v7 = vmax.f32 %v12378_v44, %v12381_v45  ;;  %v12390_v38 = vadd.f32 %v4504_v61, %v11571_v63 }
 0x49f   :  { %v4506_v4 = vpop.f32.mrf.mxu1 }
 0x4a0   :  { %v12393_v32 = vadd.f32 %v4506_v4, %v11579_v58  ;;  %5417 = vmax.xlane.f32.xlu0 %v5416_v7 }
 0x4a1   :  { %v4510_v33 = vpop.f32.mrf.mxu1  ;;  %5909 = vmatpush1.bf16.msra.mxu1 %v5862_v34 }
 0x4a2   :  { %v5419_v48 = vmax.f32 %v12390_v38, %v12393_v32  ;;  %v12398_v53 = vadd.f32 %v4510_v33, %v11571_v63 }
 0x4a3   :  { %v4512_v42 = vpop.f32.mrf.mxu1 }
 0x4a4   :  { %14634 = vst [vmem:[#allocation78_spill] sm:$0xff] %v12398_v53  ;;  %v12401_v49 = vadd.f32 %v4512_v42, %v11579_v58  ;;  %5420 = vmax.xlane.f32.xlu1 %v5419_v48 }
 0x4a5   :  { %v4514_v59 = vpop.f32.mrf.mxu1 }
 0x4a6   :  { %14635 = vst [vmem:[#allocation12_spill] sm:$0xff] %v12401_v49  ;;  %v5422_v61 = vmax.f32 %v12398_v53, %v12401_v49  ;;  %v12406_v7 = vadd.f32 %v4514_v59, %v11571_v63 }
 0x4a7   :  { %v4516_v4 = vpop.f32.mrf.mxu1 }
 0x4a8   :  { %14636 = vst [vmem:[#allocation70_spill] sm:$0xff] %v12406_v7  ;;  %v12409_v34 = vadd.f32 %v4516_v4, %v11579_v58  ;;  %5423 = vmax.xlane.f32.xlu0 %v5422_v61 }
 0x4a9   :  { %v4520_v60 = vpop.f32.mrf.mxu1 }
 0x4aa   :  { %14637 = vst [vmem:[#allocation136_spill] sm:$0xff] %v12409_v34  ;;  %v5425_v33 = vmax.f32 %v12406_v7, %v12409_v34  ;;  %v12414_v42 = vadd.f32 %v4520_v60, %v11571_v63 }
 0x4ab   :  { %v4522_v20 = vpop.f32.mrf.mxu1 }
 0x4ac   :  { %14638 = vst [vmem:[#allocation72_spill] sm:$0xff] %v12414_v42  ;;  %v12417_v48 = vadd.f32 %v4522_v20, %v11579_v58  ;;  %5426 = vmax.xlane.f32.xlu1 %v5425_v33 }
 0x4ad   :  { %v4524_v8 = vpop.f32.mrf.mxu1 }
 0x4ae   :  { %14639 = vst [vmem:[#allocation135_spill] sm:$0xff] %v12417_v48  ;;  %v5428_v59 = vmax.f32 %v12414_v42, %v12417_v48  ;;  %v12422_v4 = vadd.f32 %v4524_v8, %v11571_v63 }
 0x4af   :  { %v4526_v50 = vpop.f32.mrf.mxu1 }
 0x4b0   :  { %14640 = vst [vmem:[#allocation82_spill] sm:$0xff] %v12422_v4  ;;  %v12425_v61 = vadd.f32 %v4526_v50, %v11579_v58  ;;  %5429 = vmax.xlane.f32.xlu0 %v5428_v59 }
 0x4b1   :  { %v4530_v41 = vpop.f32.mrf.mxu1 }
 0x4b2   :  { %14641 = vst [vmem:[#allocation10_spill] sm:$0xff] %v12425_v61  ;;  %v5431_v60 = vmax.f32 %v12422_v4, %v12425_v61  ;;  %v12430_v20 = vadd.f32 %v4530_v41, %v11571_v63  ;;  %v12445_v41 = vpop.xlane.xlu0 %4574 }
 0x4b3   :  { %v4532_v37 = vpop.f32.mrf.mxu1 }
 0x4b4   :  { %14642 = vst [vmem:[#allocation73_spill] sm:$0xff] %v12430_v20  ;;  %v12433_v33 = vadd.f32 %v4532_v37, %v11579_v58  ;;  %5432 = vmax.xlane.f32.xlu1 %v5431_v60 }
 0x4b5   :  { %v4534_v51 = vpop.f32.mrf.mxu1 }
 0x4b6   :  { %14643 = vst [vmem:[#allocation29_spill] sm:$0xff] %v12433_v33  ;;  %v5434_v8 = vmax.f32 %v12430_v20, %v12433_v33  ;;  %v12440_v59 = vadd.f32 %v4534_v51, %v11571_v63  ;;  %v12451_v24 = vpop.xlane.xlu0 %4580 }
 0x4b7   :  { %v4536_v50 = vpop.f32.mrf.mxu1 }
 0x4b8   :  { %14644 = vst [vmem:[#allocation74_spill] sm:$0xff] %v12440_v59  ;;  %v12443_v29 = vadd.f32 %v4536_v50, %v11579_v58  ;;  %5435 = vmax.xlane.f32.xlu0 %v5434_v8 }
 0x4b9   :  { %v4540_v37 = vpop.f32.mrf.mxu1 }
 0x4ba   :  { %14645 = vst [vmem:[#allocation14_spill] sm:$0xff] %v12443_v29  ;;  %v5437_v60 = vmax.f32 %v12440_v59, %v12443_v29  ;;  %v12464_v15 = vpop.xlane.xlu0 %4586  ;;  %v12467_v17 = vadd.f32 %v4540_v37, %v11571_v63  ;;  %v12483_v37 = vpop.xlane.xlu1 %4595 }
 0x4bb   :  { %v4542_v1 = vpop.f32.mrf.mxu1 }
 0x4bc   :  { %5438 = vmax.xlane.f32.xlu1 %v5437_v60  ;;  %v12457_v50 = vadd.f32 %v4542_v1, %v11579_v58  ;;  %14649 = vst [vmem:[#allocation141_spill] sm:$0xff] %v12467_v17  ;;  %v5891_v1 = vpack.c.bf16 %v12443_v29, %v12433_v33  ;;  %v5888_v29 = vpack.c.bf16 %v12422_v4, %v12414_v42  ;;  %v14651_v4 = vld [vmem:[#allocation123_spill] sm:$0xff] }
 0x4bd   :  { %v4544_v13 = vpop.f32.mrf.mxu1 }
 0x4be   :  { %v12454_v51 = vadd.f32 %v4544_v13, %v11571_v63  ;;  %14647 = vst [vmem:[#allocation117_spill] sm:$0xff] %v12457_v50  ;;  %v5890_v63 = vpack.c.bf16 %v12440_v59, %v12430_v20  ;;  %v12493_v59 = vpop.xlane.xlu1 %4601 }
 0x4bf   :  { %v4546_v56 = vpop.f32.mrf.mxu1 }
 0x4c0   :  { %14646 = vst [vmem:[#allocation80_spill] sm:$0xff] %v12454_v51  ;;  %v12460_v8 = vadd.f32 %v4546_v56, %v11579_v58  ;;  %v5892_v13 = vpack.c.bf16 %v12454_v51, %v12467_v17  ;;  %v12477_v58 = vpop.xlane.xlu0 %4592  ;;  %v5889_v56 = vpack.c.bf16 %v12425_v61, %v12417_v48  ;;  %v4659_v48 = vsub.f32 %v14651_v4, %v12437_v26 }
 0x4c1   :  { %v5883_v4 = vpack.c.bf16 %v12369_v35, %v12357_v31 }
 0x4c2   :  { %14648 = vst [vmem:[#allocation98_spill] sm:$0xff] %v12460_v8  ;;  %v5893_v60 = vpack.c.bf16 %v12460_v8, %v12457_v50  ;;  %v12503_v42 = vpop.xlane.xlu1 %4607 }
 0x4c4   :  { %5910 = vmatprep.subr.bf16.mxu1 %v5893_v60  ;;  %v12485_v8 = vpop.xlane.xlu0 %4598  ;;  %v4657_v60 = vsub.f32 %v11724_v9, %v4569_v22  ;;  %v5885_v9 = vpack.c.bf16 %v12393_v32, %v12381_v45 }
 0x4c5   :  { %5911 = vmatpush2.bf16.msra.mxu1 %v5892_v13  ;;  %v5887_v13 = vpack.c.bf16 %v12409_v34, %v12401_v49  ;;  %v14653_v49 = vld [vmem:[#allocation111_spill] sm:$0xff] }
 0x4c6   :  { %5912 = vmatprep.subr.bf16.mxu1 %v5891_v1  ;;  %v14650_v1 = vld [vmem:[#allocation44_spill] sm:$0xff]  ;;  %v4733_v61 = vmul.f32 1.442695, %v4657_v60  ;;  %v5884_v60 = vpack.c.bf16 %v12390_v38, %v12378_v44 }
 0x4c7   :  { %v4658_v33 = vsub.f32 %v14650_v1, %v4569_v22 }
 0x4c8   :  { %v12495_v20 = vpop.xlane.xlu0 %4604  ;;  %7058 = vpow2.f32 %v4733_v61  ;;  %v14654_v61 = vld [vmem:[#allocation48_spill] sm:$0xff] }
 0x4c9   :  { %5913 = vmatpush2.bf16.msra.mxu1 %v5890_v63  ;;  %v5886_v63 = vpack.c.bf16 %v12406_v7, %v12398_v53 }
 0x4ca   :  { %5914 = vmatprep.subr.bf16.mxu1 %v5889_v56  ;;  %v4735_v56 = vmul.f32 1.442695, %v4658_v33 }
 0x4cc   :  { %7060 = vpow2.f32 %v4735_v56 }
 0x4cd   :  { %5915 = vmatpush2.bf16.msra.mxu1 %v5888_v29 }
 0x4ce   :  { %5916 = vmatprep.subr.bf16.mxu1 %v5887_v13  ;;  %v14652_v13 = vld [vmem:[#allocation38_spill] sm:$0xff] }
 0x4cf   :  { %v4660_v34 = vsub.f32 %v14652_v13, %v12437_v26  ;;  %v5881_v13 = vpack.c.bf16 %v12345_v57, %v12333_v28 }
 0x4d1   :  { %5917 = vmatpush2.bf16.msra.mxu1 %v5886_v63  ;;  %v5352_v22 = vpop.xlane.xlu0 %5351  ;;  %v4737_v63 = vmul.f32 1.442695, %v4659_v48  ;;  %v5882_v48 = vpack.c.bf16 %v12366_v0, %v12354_v43 }
 0x4d2   :  { %v5446_v1 = vsub.f32 %v12034_v21, %v5352_v22  ;;  %v5447_v29 = vsub.f32 %v12037_v16, %v5352_v22  ;;  %5918 = vmatprep.subr.bf16.mxu1 %v5885_v9  ;;  %v4661_v21 = vsub.f32 %v14653_v49, %v12445_v41  ;;  %v4662_v9 = vsub.f32 %v14654_v61, %v12445_v41 }
 0x4d3   :  { %v4739_v49 = vmul.f32 1.442695, %v4660_v34 }
 0x4d4   :  { %v5510_v33 = vmul.f32 1.442695, %v5446_v1  ;;  %v5512_v7 = vmul.f32 1.442695, %v5447_v29  ;;  %v14655_v1 = vld [vmem:[#allocation47_spill] sm:$0xff] }
 0x4d5   :  { %v5355_v53 = vpop.xlane.xlu1 %5354  ;;  %5919 = vmatpush2.bf16.msra.mxu1 %v5884_v60  ;;  %v12515_v16 = vpop.xlane.xlu0 %4610  ;;  %v4663_v56 = vsub.f32 %v14655_v1, %v12449_v47  ;;  %v4741_v41 = vmul.f32 1.442695, %v4661_v21 }
 0x4d6   :  { %7062 = vpow2.f32 %v5510_v33  ;;  %v5448_v26 = vsub.f32 %v12064_v14, %v5355_v53  ;;  %v5449_v22 = vsub.f32 %v12067_v30, %v5355_v53  ;;  %5920 = vmatprep.subr.bf16.mxu1 %v5883_v4  ;;  %v4743_v14 = vmul.f32 1.442695, %v4662_v9  ;;  %v14657_v9 = vld [vmem:[#allocation17_spill] sm:$0xff] }
 0x4d7   :  { %7064 = vpow2.f32 %v5512_v7  ;;  %v4745_v4 = vmul.f32 1.442695, %v4663_v56  ;;  %v5880_v7 = vpack.c.bf16 %v12342_v25, %v12330_v19 }
 0x4d8   :  { %v5514_v29 = vmul.f32 1.442695, %v5448_v26  ;;  %v5516_v60 = vmul.f32 1.442695, %v5449_v22  ;;  %7066 = vpow2.f32 %v4737_v63  ;;  %v14656_v63 = vld [vmem:[#allocation23_spill] sm:$0xff]  ;;  %v5879_v26 = vpack.c.bf16 %v12321_v52, %v12304_v18 }
 0x4d9   :  { %v12527_v33 = vpop.xlane.xlu1 %4613  ;;  %5921 = vmatpush2.bf16.msra.mxu1 %v5882_v48  ;;  %v5358_v30 = vpop.xlane.xlu0 %5357  ;;  %v4664_v21 = vsub.f32 %v14656_v63, %v12449_v47 }
 0x4da   :  { %7068 = vpow2.f32 %v5514_v29  ;;  %v5450_v53 = vsub.f32 %v12101_v5, %v5358_v30  ;;  %5922 = vmatprep.subr.bf16.mxu1 %v5881_v13  ;;  %v5451_v34 = vsub.f32 %v12104_v39, %v5358_v30  ;;  %v4665_v5 = vsub.f32 %v14657_v9, %v12451_v24  ;;  %v14658_v39 = vld [vmem:[#allocation42_spill] sm:$0xff]  ;;  %v14664_v9 = vld [vmem:[#allocation119_spill] sm:$0xff] }
 0x4db   :  { %7070 = vpow2.f32 %v5516_v60  ;;  %v4666_v48 = vsub.f32 %v14658_v39, %v12451_v24  ;;  %v14659_v29 = vld [vmem:[#allocation146_spill] sm:$0xff]  ;;  %v5878_v13 = vpack.c.bf16 %v12318_v55, %v12309_v62  ;;  %v4747_v30 = vmul.f32 1.442695, %v4664_v21 }
 0x4dc   :  { %7072 = vpow2.f32 %v4739_v49  ;;  %v5518_v61 = vmul.f32 1.442695, %v5450_v53  ;;  %v5520_v22 = vmul.f32 1.442695, %v5451_v34  ;;  %v4667_v60 = vsub.f32 %v14659_v29, %v12462_v2 }
 0x4dd   :  { %7074 = vpow2.f32 %v4741_v41  ;;  %v5361_v1 = vpop.xlane.xlu1 %5360  ;;  %5923 = vmatpush2.bf16.msra.mxu1 %v5880_v7  ;;  %v12539_v56 = vpop.xlane.xlu0 %4616  ;;  %v4749_v7 = vmul.f32 1.442695, %v4665_v5  ;;  %v4668_v5 = vsub.f32 %v14664_v9, %v12462_v2 }
 0x4de   :  { %7076 = vpow2.f32 %v4743_v14  ;;  %v5452_v49 = vsub.f32 %v12126_v11, %v5361_v1  ;;  %v5453_v47 = vsub.f32 %v12129_v46, %v5361_v1  ;;  %5924 = vmatprep.subr.bf16.mxu1 %v5879_v26  ;;  %v12549_v41 = vpop.eup %7058  ;;  %v4753_v26 = vmul.f32 1.442695, %v4667_v60  ;;  %v14665_v1 = vld [vmem:[#allocation147_spill] sm:$0xff] }
 0x4df   :  { %7078 = vpow2.f32 %v4745_v4  ;;  %14660 = vst [vmem:[#allocation71_spill] sm:$0xff] %v12549_v41  ;;  %v12553_v46 = vpop.eup %7060  ;;  %v4751_v4 = vmul.f32 1.442695, %v4666_v48  ;;  %v4669_v39 = vsub.f32 %v14665_v1, %v12464_v15 }
 0x4e0   :  { %7080 = vpow2.f32 %v5518_v61  ;;  %v5522_v14 = vmul.f32 1.442695, %v5452_v49  ;;  %v5524_v53 = vmul.f32 1.442695, %v5453_v47  ;;  %14661 = vst [vmem:[#allocation121_spill] sm:$0xff] %v12553_v46  ;;  %v4855_v9 = vadd.f32 %v12553_v46, %v12549_v41  ;;  %v14693_v46 = vld [vmem:[#allocation59_spill] sm:$0xff] }
 0x4e1   :  { %7082 = vpow2.f32 %v5520_v22  ;;  %v12551_v24 = vpop.xlane.xlu1 %4619  ;;  %5925 = vmatpush2.bf16.msra.mxu1 %v5878_v13  ;;  %v5364_v11 = vpop.xlane.xlu0 %5363 }
 0x4e2   :  { %7084 = vpow2.f32 %v5522_v14  ;;  %v5454_v34 = vsub.f32 %v12141_v40, %v5364_v11  ;;  %v5455_v21 = vsub.f32 %v12144_v23, %v5364_v11  ;;  %v14667_v23 = vld [vmem:[#allocation7_spill] sm:$0xff]  ;;  %v14669_v14 = vld [vmem:[#allocation45_spill] sm:$0xff]  ;;  %v4755_v11 = vmul.f32 1.442695, %v4668_v5 }
 0x4e3   :  { %v12556_v63 = vpop.eup %7062  ;;  %7086 = vpow2.f32 %v5524_v53  ;;  %v4670_v60 = vsub.f32 %v14667_v23, %v12464_v15  ;;  %v4671_v53 = vsub.f32 %v14669_v14, %v12475_v27  ;;  %v4757_v15 = vmul.f32 1.442695, %v4669_v39 }
 0x4e4   :  { %14662 = vst [vmem:[#allocation87_spill] sm:$0xff] %v12556_v63  ;;  %v12559_v61 = vpop.eup %7064  ;;  %7088 = vpow2.f32 %v4747_v30  ;;  %v5526_v22 = vmul.f32 1.442695, %v5454_v34  ;;  %v5528_v48 = vmul.f32 1.442695, %v5455_v21 }
 0x4e5   :  { %14663 = vst [vmem:[#allocation30_spill] sm:$0xff] %v12559_v61  ;;  %7090 = vpow2.f32 %v4749_v7  ;;  %v5367_v49 = vpop.xlane.xlu1 %5366  ;;  %v12565_v40 = vpop.xlane.xlu0 %4622  ;;  %v5638_v47 = vadd.f32 %v12559_v61, %v12556_v63 }
 0x4e6   :  { %v12569_v29 = vpop.eup %7066  ;;  %7092 = vpow2.f32 %v4751_v4  ;;  %v5456_v2 = vsub.f32 %v12156_v6, %v5367_v49  ;;  %v5457_v13 = vsub.f32 %v12159_v3, %v5367_v49  ;;  %v4759_v49 = vmul.f32 1.442695, %v4670_v60 }
 0x4e7   :  { %14666 = vst [vmem:[#allocation104_spill] sm:$0xff] %v12569_v29  ;;  %v12575_v30 = vpop.eup %7068  ;;  %7094 = vpow2.f32 %v4753_v26  ;;  %5639 = vadd.xlane.f32.xlu0 %v5638_v47  ;;  %v4761_v47 = vmul.f32 1.442695, %v4671_v53 }
 0x4e8   :  { %14668 = vst [vmem:[#allocation27_spill] sm:$0xff] %v12575_v30  ;;  %v12579_v7 = vpop.eup %7070  ;;  %7096 = vpow2.f32 %v5526_v22  ;;  %v5530_v34 = vmul.f32 1.442695, %v5456_v2  ;;  %v5532_v4 = vmul.f32 1.442695, %v5457_v13 }
 0x4e9   :  { %14670 = vst [vmem:[#allocation133_spill] sm:$0xff] %v12579_v7  ;;  %v12581_v21 = vpop.eup %7072  ;;  %7098 = vpow2.f32 %v5528_v48  ;;  %v12583_v6 = vpop.xlane.xlu1 %4625  ;;  %v5641_v26 = vadd.f32 %v12579_v7, %v12575_v30 }
 0x4ea   :  { %14671 = vst [vmem:[#allocation142_spill] sm:$0xff] %v12581_v21  ;;  %v5370_v3 = vpop.xlane.xlu0 %5369  ;;  %v12589_v1 = vpop.eup %7074  ;;  %7100 = vpow2.f32 %v5530_v34 }
 0x4eb   :  { %14672 = vst [vmem:[#allocation93_spill] sm:$0xff] %v12589_v1  ;;  %v5458_v5 = vsub.f32 %v12170_v54, %v5370_v3  ;;  %v12592_v22 = vpop.eup %7076  ;;  %7102 = vpow2.f32 %v5532_v4  ;;  %v5459_v39 = vsub.f32 %v12173_v36, %v5370_v3  ;;  %5642 = vadd.xlane.f32.xlu1 %v5641_v26  ;;  %4856 = vadd.xlane.f32.xlu0 %v4855_v9  ;;  %v14679_v3 = vld [vmem:[#allocation19_spill] sm:$0xff] }
 0x4ec   :  { %14673 = vst [vmem:[#allocation24_spill] sm:$0xff] %v12592_v22  ;;  %v12595_v48 = vpop.eup %7078  ;;  %7104 = vpow2.f32 %v4755_v11  ;;  %v4858_v54 = vadd.f32 %v12581_v21, %v12569_v29  ;;  %v4672_v26 = vsub.f32 %v14679_v3, %v12475_v27  ;;  %v14696_v21 = vld [vmem:[#allocation49_spill] sm:$0xff] }
 0x4ed   :  { %14674 = vst [vmem:[#allocation102_spill] sm:$0xff] %v12595_v48  ;;  %v5534_v23 = vmul.f32 1.442695, %v5458_v5  ;;  %v12597_v2 = vpop.eup %7080  ;;  %7106 = vpow2.f32 %v4757_v15  ;;  %v5536_v13 = vmul.f32 1.442695, %v5459_v39  ;;  %v5373_v60 = vpop.xlane.xlu1 %5372  ;;  %v4674_v7 = vsub.f32 %v14696_v21, %v12477_v58 }
 0x4ee   :  { %14675 = vst [vmem:[#allocation153_spill] sm:$0xff] %v12597_v2  ;;  %v4839_v14 = vpop.xlane.xlu0 %4838  ;;  %v12601_v34 = vpop.eup %7082  ;;  %7108 = vpow2.f32 %v4759_v49  ;;  %v5460_v36 = vsub.f32 %v12188_v10, %v5373_v60  ;;  %v5461_v53 = vsub.f32 %v12191_v12, %v5373_v60  ;;  %v14682_v60 = vld [vmem:[#allocation61_spill] sm:$0xff] }
 0x4ef   :  { %14676 = vst [vmem:[#allocation81_spill] sm:$0xff] %v12601_v34  ;;  %v12605_v4 = vpop.eup %7084  ;;  %7110 = vpow2.f32 %v4761_v47  ;;  %4859 = vadd.xlane.f32.xlu1 %v4858_v54  ;;  %v5644_v11 = vadd.f32 %v12601_v34, %v12597_v2  ;;  %v14683_v2 = vld [vmem:[#allocation8_spill] sm:$0xff] }
 0x4f0   :  { %14677 = vst [vmem:[#allocation96_spill] sm:$0xff] %v12605_v4  ;;  %v12609_v15 = vpop.eup %7086  ;;  %7112 = vpow2.f32 %v5534_v23  ;;  %v5538_v9 = vmul.f32 1.442695, %v5460_v36  ;;  %v5540_v5 = vmul.f32 1.442695, %v5461_v53  ;;  %v14685_v23 = vld [vmem:[#allocation28_spill] sm:$0xff] }
 0x4f1   :  { %14678 = vst [vmem:[#allocation94_spill] sm:$0xff] %v12609_v15  ;;  %v12613_v49 = vpop.eup %7088  ;;  %7114 = vpow2.f32 %v5536_v13  ;;  %5645 = vadd.xlane.f32.xlu0 %v5644_v11  ;;  %v5647_v10 = vadd.f32 %v12609_v15, %v12605_v4  ;;  %v4842_v12 = vpop.xlane.xlu1 %4841  ;;  %v14686_v36 = vld [vmem:[#allocation37_spill] sm:$0xff]  ;;  %v4763_v11 = vmul.f32 1.442695, %v4672_v26 }
 0x4f2   :  { %14680 = vst [vmem:[#allocation148_spill] sm:$0xff] %v12613_v49  ;;  %v5376_v47 = vpop.xlane.xlu0 %5375  ;;  %v12617_v39 = vpop.eup %7090  ;;  %7116 = vpow2.f32 %v5538_v9  ;;  %v4639_v13 = vmax.f32 %v14686_v36, %v14685_v23  ;;  %v14689_v9 = vld [vmem:[#allocation137_spill] sm:$0xff] }
 0x4f3   :  { %14681 = vst [vmem:[#allocation15_spill] sm:$0xff] %v12617_v39  ;;  %v5462_v54 = vsub.f32 %v14682_v60, %v5376_v47  ;;  %v5463_v34 = vsub.f32 %v14683_v2, %v5376_v47  ;;  %v12621_v27 = vpop.eup %7092  ;;  %7118 = vpow2.f32 %v5540_v5  ;;  %5648 = vadd.xlane.f32.xlu1 %v5647_v10  ;;  %v4673_v60 = vsub.f32 %v14689_v9, %v12477_v58  ;;  %v14690_v2 = vld [vmem:[#allocation57_spill] sm:$0xff]  ;;  %v14691_v47 = vld [vmem:[#allocation139_spill] sm:$0xff] }
 0x4f4   :  { %14684 = vst [vmem:[#allocation41_spill] sm:$0xff] %v12621_v27  ;;  %v12625_v53 = vpop.eup %7094  ;;  %7120 = vrcp.f32 %v4839_v14  ;;  %v4642_v5 = vmax.f32 %v14691_v47, %v14690_v2  ;;  %v14694_v14 = vld [vmem:[#allocation109_spill] sm:$0xff] }
 0x4f5   :  { %14687 = vst [vmem:[#allocation103_spill] sm:$0xff] %v12625_v53  ;;  %v5542_v3 = vmul.f32 1.442695, %v5462_v54  ;;  %v5544_v4 = vmul.f32 1.442695, %v5463_v34  ;;  %v12627_v15 = vpop.eup %7096  ;;  %4640 = vmax.xlane.f32.xlu0 %v4639_v13  ;;  %7122 = vrcp.f32 %v4842_v12  ;;  %v5379_v10 = vpop.xlane.xlu1 %5378 }
 0x4f6   :  { %14688 = vst [vmem:[#allocation152_spill] sm:$0xff] %v12627_v15  ;;  %v4845_v29 = vpop.xlane.xlu0 %4844  ;;  %v12633_v41 = vpop.eup %7098  ;;  %v5464_v26 = vsub.f32 %v14693_v46, %v5379_v10  ;;  %v5465_v54 = vsub.f32 %v14694_v14, %v5379_v10  ;;  %v4765_v46 = vmul.f32 1.442695, %v4673_v60  ;;  %v14699_v10 = vld [vmem:[#allocation46_spill] sm:$0xff]  ;;  %v4767_v60 = vmul.f32 1.442695, %v4674_v7 }
 0x4f7   :  { %14692 = vst [vmem:[#allocation106_spill] sm:$0xff] %v12633_v41  ;;  %7124 = vpow2.f32 %v5542_v3  ;;  %v12637_v34 = vpop.eup %7100  ;;  %4643 = vmax.xlane.f32.xlu1 %v4642_v5  ;;  %v5650_v12 = vadd.f32 %v12633_v41, %v12627_v15  ;;  %v4675_v14 = vsub.f32 %v14699_v10, %v12483_v37  ;;  %v14700_v15 = vld [vmem:[#allocation21_spill] sm:$0xff]  ;;  %v14702_v10 = vld [vmem:[#allocation22_spill] sm:$0xff] }
 0x4f8   :  { %14695 = vst [vmem:[#allocation40_spill] sm:$0xff] %v12637_v34  ;;  %7126 = vpow2.f32 %v5544_v4  ;;  %v12643_v13 = vpop.eup %7102  ;;  %v5546_v9 = vmul.f32 1.442695, %v5464_v26  ;;  %v5548_v61 = vmul.f32 1.442695, %v5465_v54  ;;  %v14701_v26 = vld [vmem:[#allocation62_spill] sm:$0xff] }
 0x4f9   :  { %14697 = vst [vmem:[#allocation95_spill] sm:$0xff] %v12643_v13  ;;  %7128 = vpow2.f32 %v4763_v11  ;;  %v12645_v3 = vpop.eup %7104  ;;  %5651 = vadd.xlane.f32.xlu0 %v5650_v12  ;;  %v5653_v58 = vadd.f32 %v12643_v13, %v12637_v34  ;;  %v4848_v21 = vpop.xlane.xlu1 %4847  ;;  %v4676_v34 = vsub.f32 %v14702_v10, %v12483_v37  ;;  %v14707_v37 = vld [vmem:[#allocation50_spill] sm:$0xff] }
 0x4fa   :  { %14698 = vst [vmem:[#allocation150_spill] sm:$0xff] %v12645_v3  ;;  %7130 = vrcp.f32 %v4845_v29  ;;  %v5382_v4 = vpop.xlane.xlu0 %5381  ;;  %v12651_v5 = vpop.eup %7106  ;;  %v5440_v29 = vmax.f32 %v12467_v17, %v12457_v50 }
 0x4fb   :  { %7132 = vpow2.f32 %v5546_v9  ;;  %v5466_v11 = vsub.f32 %v14700_v15, %v5382_v4  ;;  %v5467_v54 = vsub.f32 %v14701_v26, %v5382_v4  ;;  %v12655_v41 = vpop.eup %7108  ;;  %5654 = vadd.xlane.f32.xlu1 %v5653_v58  ;;  %v4769_v15 = vmul.f32 1.442695, %v4675_v14  ;;  %v14704_v4 = vld [vmem:[#allocation34_spill] sm:$0xff] }
 0x4fc   :  { %7134 = vpow2.f32 %v5548_v61  ;;  %v12659_v12 = vpop.eup %7110  ;;  %v4677_v7 = vsub.f32 %v14704_v4, %v12485_v8  ;;  %v14705_v61 = vld [vmem:[#allocation98_spill] sm:$0xff] }
 0x4fd   :  { %7136 = vrcp.f32 %v4848_v21  ;;  %v5550_v13 = vmul.f32 1.442695, %v5466_v11  ;;  %v5552_v9 = vmul.f32 1.442695, %v5467_v54  ;;  %v12663_v30 = vpop.eup %7112  ;;  %5441 = vmax.xlane.f32.xlu0 %v5440_v29  ;;  %v5443_v58 = vmax.f32 %v12454_v51, %v14705_v61  ;;  %v5385_v26 = vpop.xlane.xlu1 %5384  ;;  %v14708_v11 = vld [vmem:[#allocation11_spill] sm:$0xff] }
 0x4fe   :  { %14703 = vst [vmem:[#allocation114_spill] sm:$0xff] %v12663_v30  ;;  %7138 = vpow2.f32 %v4765_v46  ;;  %v12669_v50 = vpop.xlane.xlu0 %4628  ;;  %v12671_v17 = vpop.eup %7114  ;;  %v4678_v21 = vsub.f32 %v14707_v37, %v12485_v8  ;;  %v5468_v54 = vsub.f32 %v14708_v11, %v5385_v26  ;;  %v14709_v46 = vld [vmem:[#allocation92_spill] sm:$0xff]  ;;  %v4771_v61 = vmul.f32 1.442695, %v4676_v34 }
 0x4ff   :  { %14706 = vst [vmem:[#allocation157_spill] sm:$0xff] %v12671_v17  ;;  %7140 = vpow2.f32 %v5550_v13  ;;  %v5469_v14 = vsub.f32 %v14709_v46, %v5385_v26  ;;  %v12677_v10 = vpop.eup %7116  ;;  %5444 = vmax.xlane.f32.xlu1 %v5443_v58  ;;  %v5656_v29 = vadd.f32 %v12671_v17, %v12663_v30  ;;  %v4773_v8 = vmul.f32 1.442695, %v4677_v7  ;;  %v14719_v30 = vld [vmem:[#allocation151_spill] sm:$0xff]  ;;  %v14722_v17 = vld [vmem:[#allocation125_spill] sm:$0xff] }
 0x500   :  { %14710 = vst [vmem:[#allocation113_spill] sm:$0xff] %v12677_v10  ;;  %7142 = vpow2.f32 %v5552_v9  ;;  %v12681_v4 = vpop.eup %7118  ;;  %v5554_v51 = vmul.f32 1.442695, %v5468_v54  ;;  %v4861_v9 = vadd.f32 %v12592_v22, %v12589_v1  ;;  %v4775_v11 = vmul.f32 1.442695, %v4678_v21  ;;  %v14714_v54 = vld [vmem:[#allocation155_spill] sm:$0xff] }
 0x501   :  { %14711 = vst [vmem:[#allocation131_spill] sm:$0xff] %v12681_v4  ;;  %7144 = vpow2.f32 %v4767_v60  ;;  %v5556_v63 = vmul.f32 1.442695, %v5469_v14  ;;  %v7121_v2 = vpop.eup %7120  ;;  %5657 = vadd.xlane.f32.xlu0 %v5656_v29  ;;  %v5659_v13 = vadd.f32 %v12681_v4, %v12677_v10  ;;  %v12687_v58 = vpop.xlane.xlu1 %4631  ;;  %v14712_v60 = vld [vmem:[#allocation35_spill] sm:$0xff]  ;;  %v14715_v14 = vld [vmem:[#allocation84_spill] sm:$0xff] }
 0x502   :  { %7146 = vpow2.f32 %v4769_v15  ;;  %v5388_v26 = vpop.xlane.xlu0 %5387  ;;  %v7123_v37 = vpop.eup %7122  ;;  %v4679_v34 = vsub.f32 %v14712_v60, %v12493_v59  ;;  %v4864_v15 = vadd.f32 %v12613_v49, %v12595_v48  ;;  %v14716_v1 = vld [vmem:[#allocation68_spill] sm:$0xff]  ;;  %v12706_v48 = vadd.f32 %v12645_v3, %v12625_v53 }
 0x503   :  { %7148 = vpow2.f32 %v5554_v51  ;;  %v4967_v46 = vmul.f32 %v7123_v37, %v14714_v54  ;;  %5660 = vadd.xlane.f32.xlu1 %v5659_v13  ;;  %v5470_v29 = vsub.f32 %v14715_v14, %v5388_v26  ;;  %v5471_v22 = vsub.f32 %v14716_v1, %v5388_v26  ;;  %v14717_v21 = vld [vmem:[#allocation140_spill] sm:$0xff] }
 0x504   :  { %v12693_v7 = vpop.eup %7124  ;;  %7150 = vpow2.f32 %v5556_v63  ;;  %v4680_v60 = vsub.f32 %v14717_v21, %v12493_v59  ;;  %v4867_v51 = vadd.f32 %v12621_v27, %v12617_v39  ;;  %v14718_v63 = vld [vmem:[#allocation76_spill] sm:$0xff]  ;;  %v4966_v59 = vmul.f32 %v7121_v2, %v14719_v30  ;;  %v14720_v21 = vld [vmem:[#allocation63_spill] sm:$0xff]  ;;  %v14721_v39 = vld [vmem:[#allocation66_spill] sm:$0xff] }
 0x505   :  { %14713 = vst [vmem:[#allocation13_spill] sm:$0xff] %v12693_v7  ;;  %v12698_v10 = vpop.eup %7126  ;;  %7152 = vpow2.f32 %v4771_v61  ;;  %v4965_v13 = vmul.f32 %v7121_v2, %v14718_v63  ;;  %4862 = vadd.xlane.f32.xlu0 %v4861_v9  ;;  %v5558_v1 = vmul.f32 1.442695, %v5470_v29  ;;  %v5560_v26 = vmul.f32 1.442695, %v5471_v22  ;;  %v5391_v14 = vpop.xlane.xlu1 %5390 }
 0x506   :  { %v12708_v54 = vpop.eup %7128  ;;  %7154 = vpow2.f32 %v4773_v8  ;;  %v4851_v61 = vpop.xlane.xlu0 %4850  ;;  %v4968_v4 = vmul.f32 %v7123_v37, %v14720_v21  ;;  %v5472_v27 = vsub.f32 %v14721_v39, %v5391_v14  ;;  %v5473_v53 = vsub.f32 %v14722_v17, %v5391_v14  ;;  %v14730_v21 = vld [vmem:[#allocation18_spill] sm:$0xff] }
 0x507   :  { %v7131_v49 = vpop.eup %7130  ;;  %7156 = vpow2.f32 %v4775_v11  ;;  %v4777_v8 = vmul.f32 1.442695, %v4679_v34  ;;  %v5029_v47 = vpack.c.bf16 %v4967_v46, %v4965_v13  ;;  %4865 = vadd.xlane.f32.xlu1 %v4864_v15  ;;  %v5662_v22 = vadd.f32 %v12698_v10, %v12693_v7  ;;  %v14724_v34 = vld [vmem:[#allocation54_spill] sm:$0xff]  ;;  %v14726_v13 = vld [vmem:[#allocation64_spill] sm:$0xff] }
 0x508   :  { %v12715_v3 = vpop.eup %7132  ;;  %7158 = vpow2.f32 %v5558_v1  ;;  %v5030_v29 = vpack.c.bf16 %v4968_v4, %v4966_v59  ;;  %v5562_v30 = vmul.f32 1.442695, %v5472_v27  ;;  %v5564_v2 = vmul.f32 1.442695, %v5473_v53  ;;  %v14727_v4 = vld [vmem:[#allocation126_spill] sm:$0xff]  ;;  %v14728_v53 = vld [vmem:[#allocation88_spill] sm:$0xff] }
 0x509   :  { %14723 = vst [vmem:[#allocation16_spill] sm:$0xff] %v12715_v3  ;;  %v12719_v9 = vpop.eup %7134  ;;  %v4779_v63 = vmul.f32 1.442695, %v4680_v60  ;;  %7160 = vpow2.f32 %v5560_v26  ;;  %5663 = vadd.xlane.f32.xlu0 %v5662_v22  ;;  %v4854_v17 = vpop.xlane.xlu1 %4853  ;;  %v4970_v15 = vmul.f32 %v7131_v49, %v14724_v34  ;;  %v14729_v26 = vld [vmem:[#allocation154_spill] sm:$0xff]  ;;  %v4682_v22 = vsub.f32 %v14730_v21, %v12495_v20  ;;  %v14731_v34 = vld [vmem:[#allocation89_spill] sm:$0xff] }
 0x50a   :  { %v7137_v37 = vpop.eup %7136  ;;  %v5394_v39 = vpop.xlane.xlu0 %5393  ;;  %v5665_v11 = vadd.f32 %v12719_v9, %v12715_v3  ;;  %5125 = vmatprep.mubr.bf16.mxu0 %v5030_v29  ;;  %7162 = vpow2.f32 %v5562_v30  ;;  %v4681_v59 = vsub.f32 %v14729_v26, %v12495_v20  ;;  %v14733_v7 = vld [vmem:[#allocation138_spill] sm:$0xff]  ;;  %v14734_v20 = vld [vmem:[#allocation83_spill] sm:$0xff] }
 0x50b   :  { %v12724_v46 = vpop.eup %7138  ;;  %v5474_v1 = vsub.f32 %v14726_v13, %v5394_v39  ;;  %v5475_v27 = vsub.f32 %v14727_v4, %v5394_v39  ;;  %v4972_v14 = vmul.f32 %v7137_v37, %v14728_v53  ;;  %7164 = vpow2.f32 %v5564_v2  ;;  %5126 = vmatmul.mubr.bf16.vlgmr.msra.gmra.mxu0 %v5029_v47 }
 0x50c   :  { %14725 = vst [vmem:[#allocation112_spill] sm:$0xff] %v12724_v46  ;;  %v12729_v60 = vpop.eup %7140  ;;  %5666 = vadd.xlane.f32.xlu1 %v5665_v11  ;;  %v4971_v29 = vmul.f32 %v7137_v37, %v14731_v34  ;;  %7166 = vrcp.f32 %v4851_v61  ;;  %v4683_v3 = vsub.f32 %v14733_v7, %v12503_v42  ;;  %v4969_v2 = vmul.f32 %v7131_v49, %v14734_v20  ;;  %v14736_v61 = vld [vmem:[#allocation149_spill] sm:$0xff] }
 0x50d   :  { %v12736_v30 = vpop.eup %7142  ;;  %v5566_v13 = vmul.f32 1.442695, %v5474_v1  ;;  %v5568_v39 = vmul.f32 1.442695, %v5475_v27  ;;  %v5032_v4 = vpack.c.bf16 %v4972_v14, %v4970_v15  ;;  %7168 = vrcp.f32 %v4854_v17  ;;  %4868 = vadd.xlane.f32.xlu0 %v4867_v51  ;;  %v5397_v26 = vpop.xlane.xlu1 %5396  ;;  %v14737_v15 = vld [vmem:[#allocation65_spill] sm:$0xff] }
 0x50e   :  { %v12738_v53 = vpop.eup %7144  ;;  %v5668_v47 = vadd.f32 %v12736_v30, %v12729_v60  ;;  %v4684_v11 = vsub.f32 %v14736_v61, %v12503_v42  ;;  %v5476_v1 = vsub.f32 %v14737_v15, %v5397_v26  ;;  %v14738_v27 = vld [vmem:[#allocation129_spill] sm:$0xff]  ;;  %v12751_v7 = vpop.xlane.xlu0 %4634  ;;  %v5031_v49 = vpack.c.bf16 %v4971_v29, %v4969_v2 }
 0x50f   :  { %14732 = vst [vmem:[#allocation132_spill] sm:$0xff] %v12738_v53  ;;  %v12745_v37 = vpop.eup %7146  ;;  %7170 = vpow2.f32 %v5566_v13  ;;  %5135 = vmatprep.mubr.bf16.mxu0 %v5032_v4  ;;  %v5477_v14 = vsub.f32 %v14738_v27, %v5397_v26  ;;  %v4781_v21 = vmul.f32 1.442695, %v4681_v59  ;;  %v4783_v4 = vmul.f32 1.442695, %v4682_v22  ;;  %v14740_v59 = vld [vmem:[#allocation51_spill] sm:$0xff] }
 0x510   :  { %14735 = vst [vmem:[#allocation86_spill] sm:$0xff] %v12745_v37  ;;  %v12753_v51 = vpop.eup %7148  ;;  %7172 = vpow2.f32 %v5568_v39  ;;  %4871 = vadd.xlane.f32.xlu1 %v12706_v48  ;;  %v5570_v34 = vmul.f32 1.442695, %v5476_v1  ;;  %v4785_v29 = vmul.f32 1.442695, %v4683_v3  ;;  %v4685_v61 = vsub.f32 %v14740_v59, %v12515_v16  ;;  %v14741_v15 = vld [vmem:[#allocation53_spill] sm:$0xff] }
 0x511   :  { %v12756_v17 = vpop.eup %7150  ;;  %7174 = vpow2.f32 %v4777_v8  ;;  %v5572_v42 = vmul.f32 1.442695, %v5477_v14  ;;  %5669 = vadd.xlane.f32.xlu0 %v5668_v47  ;;  %v12760_v26 = vpop.xlane.xlu1 %4637  ;;  %v4787_v48 = vmul.f32 1.442695, %v4684_v11  ;;  %v4873_v8 = vadd.f32 %v12655_v41, %v12651_v5 }
 0x512   :  { %v12758_v13 = vpop.eup %7152  ;;  %7176 = vpow2.f32 %v4779_v63  ;;  %v5671_v20 = vadd.f32 %v12756_v17, %v12753_v51  ;;  %v5400_v2 = vpop.xlane.xlu0 %5399  ;;  %v4876_v3 = vadd.f32 %v12708_v54, %v12659_v12  ;;  %v4686_v1 = vsub.f32 %v14741_v15, %v12515_v16 }
 0x513   :  { %14739 = vst [vmem:[#allocation160_spill] sm:$0xff] %v12758_v13  ;;  %v12764_v39 = vpop.eup %7154  ;;  %7178 = vpow2.f32 %v5570_v34  ;;  %5136 = vmatmul.mubr.bf16.gmra.mxu0 %v5031_v49  ;;  %v5478_v63 = vsub.f32 %v12309_v62, %v5400_v2  ;;  %v5479_v22 = vsub.f32 %v12304_v18, %v5400_v2  ;;  %v4879_v34 = vadd.f32 %v12738_v53, %v12724_v46 }
 0x514   :  { %7180 = vpow2.f32 %v5572_v42  ;;  %5672 = vadd.xlane.f32.xlu1 %v5671_v20  ;;  %v12772_v47 = vpop.eup %7156  ;;  %v4882_v20 = vadd.f32 %v12758_v13, %v12745_v37 }
 0x515   :  { %7182 = vpow2.f32 %v4781_v21  ;;  %v12776_v11 = vpop.eup %7158  ;;  %v5574_v27 = vmul.f32 1.442695, %v5478_v63  ;;  %v5576_v14 = vmul.f32 1.442695, %v5479_v22  ;;  %4874 = vadd.xlane.f32.xlu0 %v4873_v8  ;;  %v5403_v49 = vpop.xlane.xlu1 %5402  ;;  %v4791_v63 = vmul.f32 1.442695, %v4686_v1 }
 0x516   :  { %7184 = vpow2.f32 %v4783_v4  ;;  %v12780_v62 = vpop.eup %7160  ;;  %v5480_v18 = vsub.f32 %v12318_v55, %v5403_v49  ;;  %v5481_v21 = vsub.f32 %v12321_v52, %v5403_v49  ;;  %v4789_v4 = vmul.f32 1.442695, %v4685_v61  ;;  %v14742_v55 = vld [vmem:[#allocation32_spill] sm:$0xff]  ;;  %v14745_v1 = vld [vmem:[#allocation127_spill] sm:$0xff] }
 0x517   :  { %7186 = vpow2.f32 %v4785_v29  ;;  %v12786_v42 = vpop.eup %7162  ;;  %v5674_v16 = vadd.f32 %v12780_v62, %v12776_v11  ;;  %v4687_v29 = vsub.f32 %v14742_v55, %v12527_v33 }
 0x518   :  { %7188 = vpow2.f32 %v4787_v48  ;;  %4877 = vadd.xlane.f32.xlu1 %v4876_v3  ;;  %v12792_v2 = vpop.eup %7164  ;;  %v5578_v52 = vmul.f32 1.442695, %v5480_v18  ;;  %v5580_v8 = vmul.f32 1.442695, %v5481_v21  ;;  %v14743_v48 = vld [vmem:[#allocation55_spill] sm:$0xff] }
 0x519   :  { %7190 = vpow2.f32 %v5574_v27  ;;  %v7167_v59 = vpop.eup %7166  ;;  %v4688_v61 = vsub.f32 %v14743_v48, %v12527_v33  ;;  %5675 = vadd.xlane.f32.xlu0 %v5674_v16  ;;  %v5406_v22 = vpop.xlane.xlu0 %5405  ;;  %v5677_v3 = vadd.f32 %v12792_v2, %v12786_v42  ;;  %v14744_v27 = vld [vmem:[#allocation5_spill] sm:$0xff]  ;;  %v14747_v48 = vld [vmem:[#allocation67_spill] sm:$0xff] }
 0x51a   :  { %7192 = vpow2.f32 %v5576_v14  ;;  %v7169_v15 = vpop.eup %7168  ;;  %v5482_v49 = vsub.f32 %v12330_v19, %v5406_v22  ;;  %v5483_v55 = vsub.f32 %v12333_v28, %v5406_v22  ;;  %v4974_v18 = vmul.f32 %v7167_v59, %v14744_v27  ;;  %v14746_v14 = vld [vmem:[#allocation105_spill] sm:$0xff] }
 0x51b   :  { %7194 = vpow2.f32 %v5578_v52  ;;  %v4976_v33 = vmul.f32 %v7169_v15, %v14745_v1  ;;  %v4973_v16 = vmul.f32 %v7167_v59, %v14746_v14  ;;  %v4975_v37 = vmul.f32 %v7169_v15, %v14747_v48  ;;  %v14748_v28 = vld [vmem:[#allocation69_spill] sm:$0xff] }
 0x51c   :  { %v12803_v21 = vpop.eup %7170  ;;  %7196 = vpow2.f32 %v5580_v8  ;;  %5678 = vadd.xlane.f32.xlu1 %v5677_v3  ;;  %v4793_v52 = vmul.f32 1.442695, %v4687_v29  ;;  %v5582_v13 = vmul.f32 1.442695, %v5482_v49  ;;  %v5584_v19 = vmul.f32 1.442695, %v5483_v55 }
 0x51d   :  { %v12808_v46 = vpop.eup %7172  ;;  %7198 = vpow2.f32 %v4789_v4  ;;  %v4689_v22 = vsub.f32 %v14748_v28, %v12539_v56  ;;  %4880 = vadd.xlane.f32.xlu0 %v4879_v34  ;;  %v5409_v8 = vpop.xlane.xlu1 %5408  ;;  %v5034_v3 = vpack.c.bf16 %v4976_v33, %v4974_v18  ;;  %v5033_v27 = vpack.c.bf16 %v4975_v37, %v4973_v16  ;;  %v14749_v37 = vld [vmem:[#allocation33_spill] sm:$0xff] }
 0x51e   :  { %v12810_v53 = vpop.eup %7174  ;;  %v5680_v59 = vadd.f32 %v12808_v46, %v12803_v21  ;;  %7200 = vpow2.f32 %v5582_v13  ;;  %v5484_v4 = vsub.f32 %v12342_v25, %v5409_v8  ;;  %v5485_v29 = vsub.f32 %v12345_v57, %v5409_v8  ;;  %v14750_v57 = vld [vmem:[#allocation156_spill] sm:$0xff] }
 0x51f   :  { %v12816_v1 = vpop.eup %7176  ;;  %v4795_v49 = vmul.f32 1.442695, %v4688_v61  ;;  %7202 = vpow2.f32 %v5584_v19  ;;  %5145 = vmatprep.mubr.bf16.mxu0 %v5034_v3  ;;  %v4690_v55 = vsub.f32 %v14749_v37, %v12539_v56  ;;  %v4797_v25 = vmul.f32 1.442695, %v4689_v22 }
 0x520   :  { %v12820_v15 = vpop.eup %7178  ;;  %4883 = vadd.xlane.f32.xlu1 %v4882_v20  ;;  %7204 = vpow2.f32 %v4791_v63  ;;  %v5586_v18 = vmul.f32 1.442695, %v5484_v4  ;;  %v5588_v33 = vmul.f32 1.442695, %v5485_v29  ;;  %5146 = vmatmul.mubr.bf16.gmra.mxu0 %v5033_v27  ;;  %v4691_v14 = vsub.f32 %v14750_v57, %v12551_v24 }
 0x521   :  { %v12822_v34 = vpop.eup %7180  ;;  %7206 = vpow2.f32 %v4793_v52  ;;  %5681 = vadd.xlane.f32.xlu0 %v5680_v59  ;;  %v5412_v61 = vpop.xlane.xlu0 %5411  ;;  %v14751_v52 = vld [vmem:[#allocation58_spill] sm:$0xff]  ;;  %v4885_v28 = vadd.f32 %v12772_v47, %v12764_v39  ;;  %v4799_v8 = vmul.f32 1.442695, %v4690_v55  ;;  %v4888_v29 = vadd.f32 %v12816_v1, %v12810_v53 }
 0x522   :  { %v12826_v13 = vpop.eup %7182  ;;  %v5683_v20 = vadd.f32 %v12822_v34, %v12820_v15  ;;  %7208 = vpow2.f32 %v5586_v18  ;;  %v5486_v56 = vsub.f32 %v12354_v43, %v5412_v61  ;;  %v5487_v63 = vsub.f32 %v12357_v31, %v5412_v61  ;;  %v14752_v31 = vld [vmem:[#allocation36_spill] sm:$0xff] }
 0x523   :  { %v12832_v16 = vpop.eup %7184  ;;  %v4692_v19 = vsub.f32 %v14751_v52, %v12551_v24  ;;  %7210 = vpow2.f32 %v5588_v33  ;;  %v4801_v43 = vmul.f32 1.442695, %v4691_v14  ;;  %v4693_v4 = vsub.f32 %v14752_v31, %v12565_v40  ;;  %v14753_v14 = vld [vmem:[#allocation60_spill] sm:$0xff] }
 0x524   :  { %v12836_v48 = vpop.eup %7186  ;;  %5684 = vadd.xlane.f32.xlu1 %v5683_v20  ;;  %7212 = vpow2.f32 %v4795_v49  ;;  %v5590_v3 = vmul.f32 1.442695, %v5486_v56  ;;  %v5592_v27 = vmul.f32 1.442695, %v5487_v63  ;;  %v4694_v61 = vsub.f32 %v14753_v14, %v12565_v40 }
 0x525   :  { %v12842_v22 = vpop.eup %7188  ;;  %7214 = vpow2.f32 %v4797_v25  ;;  %4886 = vadd.xlane.f32.xlu0 %v4885_v28  ;;  %v5415_v24 = vpop.xlane.xlu1 %5414  ;;  %v4803_v33 = vmul.f32 1.442695, %v4692_v19 }
 0x526   :  { %v12844_v59 = vpop.eup %7190  ;;  %7216 = vpow2.f32 %v5590_v3  ;;  %v5488_v49 = vsub.f32 %v12366_v0, %v5415_v24  ;;  %v5489_v55 = vsub.f32 %v12369_v35, %v5415_v24  ;;  %v4805_v0 = vmul.f32 1.442695, %v4693_v4  ;;  %v14755_v35 = vld [vmem:[#allocation56_spill] sm:$0xff] }
 0x527   :  { %v12850_v37 = vpop.eup %7192  ;;  %7218 = vpow2.f32 %v5592_v27  ;;  %v4695_v52 = vsub.f32 %v14755_v35, %v12583_v6  ;;  %v14756_v27 = vld [vmem:[#allocation75_spill] sm:$0xff]  ;;  %v4807_v24 = vmul.f32 1.442695, %v4694_v61  ;;  %v4894_v14 = vadd.f32 %v12842_v22, %v12836_v48 }
 0x528   :  { %v12854_v18 = vpop.eup %7194  ;;  %4889 = vadd.xlane.f32.xlu1 %v4888_v29  ;;  %v5686_v25 = vadd.f32 %v12850_v37, %v12844_v59  ;;  %7220 = vpow2.f32 %v4799_v8  ;;  %v5594_v20 = vmul.f32 1.442695, %v5488_v49  ;;  %v5596_v56 = vmul.f32 1.442695, %v5489_v55 }
 0x529   :  { %v12858_v57 = vpop.eup %7196  ;;  %7222 = vpow2.f32 %v4801_v43  ;;  %v5418_v19 = vpop.xlane.xlu0 %5417  ;;  %v4696_v31 = vsub.f32 %v14756_v27, %v12583_v6  ;;  %v4891_v43 = vadd.f32 %v12832_v16, %v12826_v13 }
 0x52a   :  { %v12862_v63 = vpop.eup %7198  ;;  %5687 = vadd.xlane.f32.xlu0 %v5686_v25  ;;  %v5689_v28 = vadd.f32 %v12858_v57, %v12854_v18  ;;  %7224 = vpow2.f32 %v5594_v20  ;;  %v5490_v8 = vsub.f32 %v12378_v44, %v5418_v19  ;;  %v5491_v3 = vsub.f32 %v12381_v45, %v5418_v19  ;;  %v14757_v45 = vld [vmem:[#allocation77_spill] sm:$0xff] }
 0x52b   :  { %14754 = vst [vmem:[#allocation108_spill] sm:$0xff] %v12862_v63  ;;  %v12870_v40 = vpop.eup %7200  ;;  %7226 = vpow2.f32 %v5596_v56  ;;  %v4809_v44 = vmul.f32 1.442695, %v4695_v52  ;;  %v4697_v25 = vsub.f32 %v14757_v45, %v12669_v50  ;;  %v4811_v35 = vmul.f32 1.442695, %v4696_v31  ;;  %v14759_v19 = vld [vmem:[#allocation25_spill] sm:$0xff] }
 0x52c   :  { %5690 = vadd.xlane.f32.xlu1 %v5689_v28  ;;  %v12876_v4 = vpop.eup %7202  ;;  %7228 = vpow2.f32 %v4803_v33  ;;  %v5598_v29 = vmul.f32 1.442695, %v5490_v8  ;;  %v5600_v49 = vmul.f32 1.442695, %v5491_v3  ;;  %v4698_v28 = vsub.f32 %v14759_v19, %v12669_v50  ;;  %v14763_v50 = vld [vmem:[#allocation12_spill] sm:$0xff] }
 0x52d   :  { %v12878_v55 = vpop.eup %7204  ;;  %7230 = vpow2.f32 %v4805_v0  ;;  %v5421_v6 = vpop.xlane.xlu1 %5420  ;;  %v5692_v0 = vadd.f32 %v12876_v4, %v12870_v40 }
 0x52e   :  { %4892 = vadd.xlane.f32.xlu0 %v4891_v43  ;;  %v12884_v20 = vpop.eup %7206  ;;  %7232 = vpow2.f32 %v5598_v29  ;;  %v5492_v33 = vsub.f32 %v12390_v38, %v5421_v6  ;;  %v5493_v61 = vsub.f32 %v12393_v32, %v5421_v6  ;;  %v4813_v38 = vmul.f32 1.442695, %v4697_v25  ;;  %v14760_v32 = vld [vmem:[#allocation97_spill] sm:$0xff] }
 0x52f   :  { %14758 = vst [vmem:[#allocation6_spill] sm:$0xff] %v12884_v20  ;;  %v12888_v56 = vpop.eup %7208  ;;  %7234 = vpow2.f32 %v5600_v49  ;;  %v4699_v31 = vsub.f32 %v14760_v32, %v12687_v58 }
 0x530   :  { %4895 = vadd.xlane.f32.xlu1 %v4894_v14  ;;  %v12892_v52 = vpop.eup %7210  ;;  %7236 = vpow2.f32 %v4807_v24  ;;  %v5602_v8 = vmul.f32 1.442695, %v5492_v33  ;;  %v5604_v3 = vmul.f32 1.442695, %v5493_v61  ;;  %v14762_v24 = vld [vmem:[#allocation78_spill] sm:$0xff] }
 0x531   :  { %v12896_v27 = vpop.eup %7212  ;;  %7238 = vpow2.f32 %v4809_v44  ;;  %v5424_v43 = vpop.xlane.xlu0 %5423  ;;  %v5695_v29 = vadd.f32 %v12892_v52, %v12888_v56  ;;  %v4897_v44 = vadd.f32 %v12878_v55, %v12862_v63  ;;  %v4815_v33 = vmul.f32 1.442695, %v4698_v28  ;;  %v14770_v28 = vld [vmem:[#allocation136_spill] sm:$0xff]  ;;  %v14829_v63 = vld [vmem:[#allocation94_spill] sm:$0xff] }
 0x532   :  { %5693 = vadd.xlane.f32.xlu0 %v5692_v0  ;;  %v12902_v49 = vpop.eup %7214  ;;  %7240 = vpow2.f32 %v5602_v8  ;;  %v5494_v45 = vsub.f32 %v14762_v24, %v5424_v43  ;;  %v5495_v6 = vsub.f32 %v14763_v50, %v5424_v43  ;;  %v14767_v8 = vld [vmem:[#allocation145_spill] sm:$0xff]  ;;  %v4817_v43 = vmul.f32 1.442695, %v4699_v31  ;;  %v14769_v50 = vld [vmem:[#allocation70_spill] sm:$0xff] }
 0x533   :  { %14761 = vst [vmem:[#allocation79_spill] sm:$0xff] %v12902_v49  ;;  %v12906_v14 = vpop.eup %7216  ;;  %7242 = vpow2.f32 %v5604_v3  ;;  %v4700_v32 = vsub.f32 %v14767_v8, %v12687_v58  ;;  %v4900_v3 = vadd.f32 %v12896_v27, %v12884_v20  ;;  %v14773_v31 = vld [vmem:[#allocation158_spill] sm:$0xff] }
 0x534   :  { %14764 = vst [vmem:[#allocation159_spill] sm:$0xff] %v12906_v14  ;;  %5696 = vadd.xlane.f32.xlu1 %v5695_v29  ;;  %v12910_v25 = vpop.eup %7218  ;;  %7244 = vpow2.f32 %v4811_v35  ;;  %v5606_v61 = vmul.f32 1.442695, %v5494_v45  ;;  %v5608_v0 = vmul.f32 1.442695, %v5495_v6 }
 0x535   :  { %14765 = vst [vmem:[#allocation20_spill] sm:$0xff] %v12910_v25  ;;  %v12912_v19 = vpop.eup %7220  ;;  %7246 = vpow2.f32 %v4813_v38  ;;  %v5427_v24 = vpop.xlane.xlu1 %5426  ;;  %v5698_v58 = vadd.f32 %v12910_v25, %v12906_v14 }
 0x536   :  { %14766 = vst [vmem:[#allocation85_spill] sm:$0xff] %v12912_v19  ;;  %4898 = vadd.xlane.f32.xlu0 %v4897_v44  ;;  %v12918_v29 = vpop.eup %7222  ;;  %7248 = vpow2.f32 %v5606_v61  ;;  %v5496_v35 = vsub.f32 %v14769_v50, %v5427_v24  ;;  %v5497_v45 = vsub.f32 %v14770_v28, %v5427_v24  ;;  %v4701_v44 = vsub.f32 %v14773_v31, %v12751_v7  ;;  %v14775_v24 = vld [vmem:[#allocation31_spill] sm:$0xff] }
 0x537   :  { %14768 = vst [vmem:[#allocation161_spill] sm:$0xff] %v12918_v29  ;;  %v12922_v6 = vpop.eup %7224  ;;  %7250 = vpow2.f32 %v5608_v0  ;;  %v4819_v50 = vmul.f32 1.442695, %v4700_v32  ;;  %v4702_v28 = vsub.f32 %v14775_v24, %v12751_v7  ;;  %v14778_v31 = vld [vmem:[#allocation135_spill] sm:$0xff]  ;;  %v4903_v32 = vadd.f32 %v12912_v19, %v12902_v49 }
 0x538   :  { %14771 = vst [vmem:[#allocation162_spill] sm:$0xff] %v12922_v6  ;;  %4901 = vadd.xlane.f32.xlu1 %v4900_v3  ;;  %v12926_v38 = vpop.eup %7226  ;;  %7252 = vpow2.f32 %v4815_v33  ;;  %v5610_v8 = vmul.f32 1.442695, %v5496_v35  ;;  %v5612_v20 = vmul.f32 1.442695, %v5497_v45  ;;  %v14777_v33 = vld [vmem:[#allocation72_spill] sm:$0xff] }
 0x539   :  { %14772 = vst [vmem:[#allocation100_spill] sm:$0xff] %v12926_v38  ;;  %v12930_v61 = vpop.eup %7228  ;;  %7254 = vpow2.f32 %v4817_v43  ;;  %v5430_v0 = vpop.xlane.xlu0 %5429  ;;  %v5701_v3 = vadd.f32 %v12926_v38, %v12922_v6  ;;  %v4821_v43 = vmul.f32 1.442695, %v4701_v44  ;;  %v14785_v44 = vld [vmem:[#allocation82_spill] sm:$0xff] }
 0x53a   :  { %14774 = vst [vmem:[#allocation164_spill] sm:$0xff] %v12930_v61  ;;  %5699 = vadd.xlane.f32.xlu0 %v5698_v58  ;;  %v12936_v14 = vpop.eup %7230  ;;  %7256 = vpow2.f32 %v5610_v8  ;;  %v5498_v25 = vsub.f32 %v14777_v33, %v5430_v0  ;;  %v5499_v35 = vsub.f32 %v14778_v31, %v5430_v0  ;;  %v14781_v58 = vld [vmem:[#allocation39_spill] sm:$0xff]  ;;  %v4823_v33 = vmul.f32 1.442695, %v4702_v28  ;;  %v14783_v0 = vld [vmem:[#allocation52_spill] sm:$0xff] }
 0x53b   :  { %14776 = vst [vmem:[#allocation91_spill] sm:$0xff] %v12936_v14  ;;  %v12940_v45 = vpop.eup %7232  ;;  %7258 = vpow2.f32 %v5612_v20  ;;  %v4703_v24 = vsub.f32 %v14781_v58, %v12760_v26  ;;  %v4704_v31 = vsub.f32 %v14783_v0, %v12760_v26  ;;  %v14786_v58 = vld [vmem:[#allocation10_spill] sm:$0xff] }
 0x53c   :  { %14779 = vst [vmem:[#allocation163_spill] sm:$0xff] %v12940_v45  ;;  %5702 = vadd.xlane.f32.xlu1 %v5701_v3  ;;  %v12944_v7 = vpop.eup %7234  ;;  %v5614_v6 = vmul.f32 1.442695, %v5498_v25  ;;  %v5616_v38 = vmul.f32 1.442695, %v5499_v35  ;;  %7260 = vpow2.f32 %v4819_v50  ;;  %v4906_v3 = vadd.f32 %v12930_v61, %v12918_v29 }
 0x53d   :  { %14780 = vst [vmem:[#allocation26_spill] sm:$0xff] %v12944_v7  ;;  %v12948_v8 = vpop.eup %7236  ;;  %v5433_v20 = vpop.xlane.xlu1 %5432  ;;  %v5704_v50 = vadd.f32 %v12944_v7, %v12940_v45  ;;  %v4825_v28 = vmul.f32 1.442695, %v4703_v24  ;;  %v14792_v45 = vld [vmem:[#allocation29_spill] sm:$0xff] }
 0x53e   :  { %14782 = vst [vmem:[#allocation165_spill] sm:$0xff] %v12948_v8  ;;  %4904 = vadd.xlane.f32.xlu0 %v4903_v32  ;;  %v12954_v49 = vpop.eup %7238  ;;  %7262 = vpow2.f32 %v5614_v6  ;;  %v5500_v19 = vsub.f32 %v14785_v44, %v5433_v20  ;;  %v5501_v25 = vsub.f32 %v14786_v58, %v5433_v20  ;;  %v4827_v6 = vmul.f32 1.442695, %v4704_v31 }
 0x53f   :  { %14784 = vst [vmem:[#allocation90_spill] sm:$0xff] %v12954_v49  ;;  %v12958_v35 = vpop.eup %7240  ;;  %7264 = vpow2.f32 %v5616_v38 }
 0x540   :  { %14787 = vst [vmem:[#allocation166_spill] sm:$0xff] %v12958_v35  ;;  %4907 = vadd.xlane.f32.xlu1 %v4906_v3  ;;  %v12962_v26 = vpop.eup %7242  ;;  %7266 = vpow2.f32 %v4821_v43  ;;  %v5618_v32 = vmul.f32 1.442695, %v5500_v19  ;;  %v5620_v0 = vmul.f32 1.442695, %v5501_v25  ;;  %v14791_v3 = vld [vmem:[#allocation73_spill] sm:$0xff]  ;;  %v4909_v19 = vadd.f32 %v12948_v8, %v12936_v14 }
 0x541   :  { %14788 = vst [vmem:[#allocation110_spill] sm:$0xff] %v12962_v26  ;;  %v12964_v29 = vpop.eup %7244  ;;  %7268 = vpow2.f32 %v4823_v33  ;;  %v5436_v44 = vpop.xlane.xlu0 %5435  ;;  %v5707_v20 = vadd.f32 %v12962_v26, %v12958_v35 }
 0x542   :  { %14789 = vst [vmem:[#allocation169_spill] sm:$0xff] %v12964_v29  ;;  %5705 = vadd.xlane.f32.xlu0 %v5704_v50  ;;  %v12968_v38 = vpop.eup %7246  ;;  %7270 = vpow2.f32 %v5618_v32  ;;  %v5502_v58 = vsub.f32 %v14791_v3, %v5436_v44  ;;  %v5503_v7 = vsub.f32 %v14792_v45, %v5436_v44  ;;  %v4912_v45 = vadd.f32 %v12964_v29, %v12954_v49  ;;  %v14818_v49 = vld [vmem:[#allocation30_spill] sm:$0xff] }
 0x543   :  { %14790 = vst [vmem:[#allocation101_spill] sm:$0xff] %v12968_v38  ;;  %v12972_v43 = vpop.eup %7248  ;;  %7272 = vpow2.f32 %v5620_v0  ;;  %v14797_v0 = vld [vmem:[#allocation74_spill] sm:$0xff] }
 0x544   :  { %14793 = vst [vmem:[#allocation167_spill] sm:$0xff] %v12972_v43  ;;  %5708 = vadd.xlane.f32.xlu1 %v5707_v20  ;;  %v12976_v24 = vpop.eup %7250  ;;  %7274 = vpow2.f32 %v4825_v28  ;;  %v5622_v33 = vmul.f32 1.442695, %v5502_v58  ;;  %v5624_v31 = vmul.f32 1.442695, %v5503_v7  ;;  %v14798_v20 = vld [vmem:[#allocation14_spill] sm:$0xff] }
 0x545   :  { %14794 = vst [vmem:[#allocation107_spill] sm:$0xff] %v12976_v24  ;;  %v12978_v25 = vpop.eup %7252  ;;  %7276 = vpow2.f32 %v4827_v6  ;;  %v5439_v50 = vpop.xlane.xlu1 %5438  ;;  %v5710_v7 = vadd.f32 %v12976_v24, %v12972_v43  ;;  %v14816_v43 = vld [vmem:[#allocation87_spill] sm:$0xff] }
 0x546   :  { %14795 = vst [vmem:[#allocation168_spill] sm:$0xff] %v12978_v25  ;;  %4910 = vadd.xlane.f32.xlu0 %v4909_v19  ;;  %v12982_v32 = vpop.eup %7254  ;;  %7278 = vpow2.f32 %v5622_v33  ;;  %v5504_v44 = vsub.f32 %v14797_v0, %v5439_v50  ;;  %v5505_v3 = vsub.f32 %v14798_v20, %v5439_v50 }
 0x547   :  { %14796 = vst [vmem:[#allocation120_spill] sm:$0xff] %v12982_v32  ;;  %v12986_v14 = vpop.eup %7256  ;;  %7280 = vpow2.f32 %v5624_v31  ;;  %v4915_v31 = vadd.f32 %v12978_v25, %v12968_v38  ;;  %v14815_v25 = vld [vmem:[#allocation57_spill] sm:$0xff] }
 0x548   :  { %14799 = vst [vmem:[#allocation128_spill] sm:$0xff] %v12986_v14  ;;  %4913 = vadd.xlane.f32.xlu1 %v4912_v45  ;;  %v12990_v28 = vpop.eup %7258  ;;  %v5626_v6 = vmul.f32 1.442695, %v5504_v44  ;;  %v5628_v58 = vmul.f32 1.442695, %v5505_v3 }
 0x549   :  { %14800 = vst [vmem:[#allocation99_spill] sm:$0xff] %v12990_v28  ;;  %v5713_v19 = vadd.f32 %v12990_v28, %v12986_v14  ;;  %v12994_v33 = vpop.eup %7260 }
 0x54a   :  { %5711 = vadd.xlane.f32.xlu0 %v5710_v7  ;;  %14801 = vst [vmem:[#allocation170_spill] sm:$0xff] %v12994_v33  ;;  %7282 = vpow2.f32 %v5626_v6  ;;  %v4918_v44 = vadd.f32 %v12994_v33, %v12982_v32 }
 0x54b   :  { %v12996_v0 = vpop.eup %7262  ;;  %7284 = vpow2.f32 %v5628_v58 }
 0x54c   :  { %14802 = vst [vmem:[#allocation115_spill] sm:$0xff] %v12996_v0  ;;  %5714 = vadd.xlane.f32.xlu1 %v5713_v19  ;;  %v13000_v50 = vpop.eup %7264 }
 0x54d   :  { %14803 = vst [vmem:[#allocation124_spill] sm:$0xff] %v13000_v50  ;;  %v13002_v45 = vpop.eup %7266  ;;  %v5716_v7 = vadd.f32 %v13000_v50, %v12996_v0 }
 0x54e   :  { %14804 = vst [vmem:[#allocation116_spill] sm:$0xff] %v13002_v45  ;;  %4916 = vadd.xlane.f32.xlu0 %v4915_v31  ;;  %v13006_v20 = vpop.eup %7268 }
 0x54f   :  { %14805 = vst [vmem:[#allocation171_spill] sm:$0xff] %v13006_v20  ;;  %v13008_v3 = vpop.eup %7270  ;;  %v4921_v32 = vadd.f32 %v13006_v20, %v13002_v45 }
 0x550   :  { %14806 = vst [vmem:[#allocation118_spill] sm:$0xff] %v13008_v3  ;;  %4919 = vadd.xlane.f32.xlu1 %v4918_v44  ;;  %v13012_v6 = vpop.eup %7272 }
 0x551   :  { %14807 = vst [vmem:[#allocation130_spill] sm:$0xff] %v13012_v6  ;;  %v13014_v58 = vpop.eup %7274  ;;  %v5719_v19 = vadd.f32 %v13012_v6, %v13008_v3 }
 0x552   :  { %14808 = vst [vmem:[#allocation122_spill] sm:$0xff] %v13014_v58  ;;  %5717 = vadd.xlane.f32.xlu0 %v5716_v7  ;;  %v13018_v31 = vpop.eup %7276 }
 0x553   :  { %14809 = vst [vmem:[#allocation144_spill] sm:$0xff] %v13018_v31  ;;  %v13020_v38 = vpop.eup %7278  ;;  %v4924_v0 = vadd.f32 %v13018_v31, %v13014_v58 }
 0x554   :  { %14810 = vst [vmem:[#allocation143_spill] sm:$0xff] %v13020_v38  ;;  %5720 = vadd.xlane.f32.xlu1 %v5719_v19  ;;  %v13024_v44 = vpop.eup %7280 }
 0x555   :  { %14811 = vst [vmem:[#allocation43_spill] sm:$0xff] %v13024_v44  ;;  %v5722_v7 = vadd.f32 %v13024_v44, %v13020_v38 }
 0x556   :  { %4922 = vadd.xlane.f32.xlu0 %v4921_v32 }
 0x557   :  { %v13028_v50 = vpop.eup %7282 }
 0x558   :  { %14812 = vst [vmem:[#allocation134_spill] sm:$0xff] %v13028_v50  ;;  %4925 = vadd.xlane.f32.xlu1 %v4924_v0  ;;  %v13032_v3 = vpop.eup %7284 }
 0x559   :  { %14813 = vst [vmem:[#allocation9_spill] sm:$0xff] %v13032_v3  ;;  %v5725_v19 = vadd.f32 %v13032_v3, %v13028_v50 }
 0x55a   :  { %5723 = vadd.xlane.f32.xlu0 %v5722_v7 }
 0x55c   :  { %5726 = vadd.xlane.f32.xlu1 %v5725_v19 }
 0x570   :  { %v5640_v45 = vpop.xlane.xlu0 %5639 }
 0x571   :  { %7286 = vrcp.f32 %v5640_v45  ;;  %v14814_v45 = vld [vmem:[#allocation139_spill] sm:$0xff] }
 0x574   :  { %v5643_v20 = vpop.xlane.xlu1 %5642  ;;  %v4857_v32 = vpop.xlane.xlu0 %4856 }
 0x575   :  { %7288 = vrcp.f32 %v5643_v20 }
 0x576   :  { %7290 = vrcp.f32 %v4857_v32 }
 0x578   :  { %v4860_v58 = vpop.xlane.xlu1 %4859 }
 0x579   :  { %7292 = vrcp.f32 %v4860_v58 }
 0x57a   :  { %v5646_v31 = vpop.xlane.xlu0 %5645 }
 0x57b   :  { %7294 = vrcp.f32 %v5646_v31  ;;  %v14817_v31 = vld [vmem:[#allocation27_spill] sm:$0xff] }
 0x57c   :  { %v5649_v0 = vpop.xlane.xlu1 %5648 }
 0x57d   :  { %7296 = vrcp.f32 %v5649_v0 }
 0x57e   :  { %v4641_v38 = vpop.xlane.xlu0 %4640  ;;  %v7287_v44 = vpop.eup %7286 }
 0x57f   :  { %v4705_v7 = vsub.f32 %v14686_v36, %v4641_v38  ;;  %v4706_v6 = vsub.f32 %v14685_v23, %v4641_v38  ;;  %v5766_v58 = vmul.f32 %v7287_v44, %v14816_v43  ;;  %v5767_v23 = vmul.f32 %v7287_v44, %v14818_v49  ;;  %v14819_v38 = vld [vmem:[#allocation133_spill] sm:$0xff] }
 0x580   :  { %v4644_v50 = vpop.xlane.xlu1 %4643  ;;  %v14820_v43 = vld [vmem:[#allocation141_spill] sm:$0xff] }
 0x581   :  { %v4829_v19 = vmul.f32 1.442695, %v4705_v7  ;;  %v4831_v3 = vmul.f32 1.442695, %v4706_v6  ;;  %v4707_v33 = vsub.f32 %v14814_v45, %v4644_v50  ;;  %v4708_v20 = vsub.f32 %v14815_v25, %v4644_v50  ;;  %v14823_v44 = vld [vmem:[#allocation121_spill] sm:$0xff] }
 0x582   :  { %v7289_v32 = vpop.eup %7288  ;;  %v5652_v14 = vpop.xlane.xlu0 %5651 }
 0x583   :  { %v5768_v28 = vmul.f32 %v7289_v32, %v14817_v31  ;;  %7298 = vpow2.f32 %v4829_v19  ;;  %v4833_v0 = vmul.f32 1.442695, %v4707_v33  ;;  %v4835_v24 = vmul.f32 1.442695, %v4708_v20  ;;  %v7291_v6 = vpop.eup %7290  ;;  %v14821_v31 = vld [vmem:[#allocation117_spill] sm:$0xff]  ;;  %v14822_v33 = vld [vmem:[#allocation142_spill] sm:$0xff] }
 0x584   :  { %7300 = vpow2.f32 %v4831_v3  ;;  %v5655_v36 = vpop.xlane.xlu1 %5654  ;;  %v5769_v7 = vmul.f32 %v7289_v32, %v14819_v38  ;;  %v4978_v32 = vmul.f32 %v7291_v6, %v14823_v44  ;;  %v14824_v38 = vld [vmem:[#allocation71_spill] sm:$0xff] }
 0x585   :  { %v5830_v29 = vpack.c.bf16 %v5768_v28, %v5766_v58  ;;  %7302 = vpow2.f32 %v4833_v0  ;;  %v4977_v28 = vmul.f32 %v7291_v6, %v14824_v38  ;;  %v14825_v58 = vld [vmem:[#allocation104_spill] sm:$0xff] }
 0x586   :  { %v7293_v45 = vpop.eup %7292  ;;  %7304 = vpow2.f32 %v4835_v24  ;;  %v5442_v25 = vpop.xlane.xlu0 %5441  ;;  %v5831_v50 = vpack.c.bf16 %v5769_v7, %v5767_v23  ;;  %v14826_v23 = vld [vmem:[#allocation80_spill] sm:$0xff]  ;;  %v14827_v7 = vld [vmem:[#allocation98_spill] sm:$0xff] }
 0x587   :  { %7306 = vrcp.f32 %v5652_v14  ;;  %v5506_v8 = vsub.f32 %v14820_v43, %v5442_v25  ;;  %v5507_v19 = vsub.f32 %v14821_v31, %v5442_v25  ;;  %v4980_v20 = vmul.f32 %v7293_v45, %v14822_v33  ;;  %v14831_v38 = vld [vmem:[#allocation96_spill] sm:$0xff] }
 0x588   :  { %v7295_v3 = vpop.eup %7294  ;;  %7308 = vrcp.f32 %v5655_v36  ;;  %5926 = vmatprep.mubr.bf16.mxu1 %v5831_v50  ;;  %v5445_v49 = vpop.xlane.xlu1 %5444  ;;  %v4979_v0 = vmul.f32 %v7293_v45, %v14825_v58  ;;  %v14828_v36 = vld [vmem:[#allocation81_spill] sm:$0xff] }
 0x589   :  { %v5630_v24 = vmul.f32 1.442695, %v5506_v8  ;;  %v5632_v35 = vmul.f32 1.442695, %v5507_v19  ;;  %v5508_v14 = vsub.f32 %v14826_v23, %v5445_v49  ;;  %v5509_v43 = vsub.f32 %v14827_v7, %v5445_v49  ;;  %5927 = vmatmul.mubr.bf16.vlgmr.msra.gmra.mxu1 %v5830_v29  ;;  %v14830_v45 = vld [vmem:[#allocation153_spill] sm:$0xff] }
 0x58a   :  { %v7297_v25 = vpop.eup %7296  ;;  %v5658_v31 = vpop.xlane.xlu0 %5657  ;;  %v5036_v33 = vpack.c.bf16 %v4980_v20, %v4978_v32  ;;  %v5035_v26 = vpack.c.bf16 %v4979_v0, %v4977_v28  ;;  %v5771_v50 = vmul.f32 %v7295_v3, %v14828_v36  ;;  %v5770_v19 = vmul.f32 %v7295_v3, %v14830_v45  ;;  %v14834_v36 = vld [vmem:[#allocation152_spill] sm:$0xff] }
 0x58b   :  { %7310 = vpow2.f32 %v5630_v24  ;;  %v5634_v61 = vmul.f32 1.442695, %v5508_v14  ;;  %v5636_v44 = vmul.f32 1.442695, %v5509_v43  ;;  %v5773_v6 = vmul.f32 %v7297_v25, %v14829_v63  ;;  %v14832_v43 = vld [vmem:[#allocation106_spill] sm:$0xff] }
 0x58c   :  { %7312 = vpow2.f32 %v5632_v35  ;;  %5155 = vmatprep.mubr.bf16.mxu0 %v5036_v33  ;;  %v5661_v8 = vpop.xlane.xlu1 %5660  ;;  %v5772_v58 = vmul.f32 %v7297_v25, %v14831_v38 }
 0x58d   :  { %7314 = vpow2.f32 %v5634_v61  ;;  %5156 = vmatmul.mubr.bf16.gmra.mxu0 %v5035_v26  ;;  %v5833_v29 = vpack.c.bf16 %v5773_v6, %v5771_v50 }
 0x58e   :  { %7316 = vpow2.f32 %v5636_v44  ;;  %v4863_v20 = vpop.xlane.xlu0 %4862  ;;  %v5832_v49 = vpack.c.bf16 %v5772_v58, %v5770_v19  ;;  %v14835_v44 = vld [vmem:[#allocation40_spill] sm:$0xff] }
 0x58f   :  { %7318 = vrcp.f32 %v5658_v31  ;;  %5936 = vmatprep.mubr.bf16.mxu1 %v5833_v29  ;;  %v14833_v31 = vld [vmem:[#allocation95_spill] sm:$0xff] }
 0x590   :  { %v13056_v32 = vpop.eup %7298  ;;  %7320 = vrcp.f32 %v5661_v8  ;;  %v4866_v28 = vpop.xlane.xlu1 %4865 }
 0x591   :  { %v13058_v63 = vpop.eup %7300  ;;  %7322 = vrcp.f32 %v4863_v20  ;;  %5937 = vmatmul.mubr.bf16.gmra.mxu1 %v5832_v49 }
 0x592   :  { %v13060_v35 = vpop.eup %7302  ;;  %7324 = vrcp.f32 %v4866_v28  ;;  %v4927_v61 = vadd.f32 %v13058_v63, %v13056_v32  ;;  %v5664_v26 = vpop.xlane.xlu0 %5663 }
 0x593   :  { %v13064_v3 = vpop.eup %7304  ;;  %7326 = vrcp.f32 %v5664_v26 }
 0x594   :  { %v7307_v0 = vpop.eup %7306  ;;  %4928 = vadd.xlane.f32.xlu0 %v4927_v61  ;;  %v4930_v24 = vadd.f32 %v13064_v3, %v13060_v35 }
 0x595   :  { %v5667_v23 = vpop.xlane.xlu1 %5666  ;;  %v7309_v14 = vpop.eup %7308  ;;  %v5775_v25 = vmul.f32 %v7307_v0, %v14832_v43  ;;  %v5774_v50 = vmul.f32 %v7307_v0, %v14834_v36 }
 0x596   :  { %7328 = vrcp.f32 %v5667_v23  ;;  %4931 = vadd.xlane.f32.xlu1 %v4930_v24  ;;  %v4869_v7 = vpop.xlane.xlu0 %4868  ;;  %v5777_v33 = vmul.f32 %v7309_v14, %v14833_v31  ;;  %v5776_v6 = vmul.f32 %v7309_v14, %v14835_v44 }
 0x597   :  { %7330 = vrcp.f32 %v4869_v7  ;;  %v14840_v7 = vld [vmem:[#allocation157_spill] sm:$0xff] }
 0x598   :  { %v13072_v8 = vpop.eup %7310  ;;  %v5835_v45 = vpack.c.bf16 %v5777_v33, %v5775_v25  ;;  %v5834_v19 = vpack.c.bf16 %v5776_v6, %v5774_v50  ;;  %v14841_v25 = vld [vmem:[#allocation131_spill] sm:$0xff]  ;;  %v14842_v33 = vld [vmem:[#allocation114_spill] sm:$0xff]  ;;  %v14843_v50 = vld [vmem:[#allocation113_spill] sm:$0xff] }
 0x599   :  { %14836 = vst [vmem:[#allocation44_spill] sm:$0xff] %v13072_v8  ;;  %v4872_v38 = vpop.xlane.xlu1 %4871  ;;  %v13074_v58 = vpop.eup %7312 }
 0x59a   :  { %14837 = vst [vmem:[#allocation123_spill] sm:$0xff] %v13074_v58  ;;  %7332 = vrcp.f32 %v4872_v38  ;;  %v13076_v29 = vpop.eup %7314  ;;  %5946 = vmatprep.mubr.bf16.mxu1 %v5835_v45  ;;  %v5728_v20 = vadd.f32 %v13074_v58, %v13072_v8  ;;  %v5670_v49 = vpop.xlane.xlu0 %5669  ;;  %v14844_v45 = vld [vmem:[#allocation24_spill] sm:$0xff]  ;;  %v14845_v38 = vld [vmem:[#allocation93_spill] sm:$0xff]  ;;  %v14847_v58 = vld [vmem:[#allocation102_spill] sm:$0xff] }
 0x59b   :  { %14838 = vst [vmem:[#allocation38_spill] sm:$0xff] %v13076_v29  ;;  %v13080_v28 = vpop.eup %7316  ;;  %5947 = vmatmul.mubr.bf16.gmra.mxu1 %v5834_v19  ;;  %7334 = vrcp.f32 %v5670_v49 }
 0x59c   :  { %14839 = vst [vmem:[#allocation111_spill] sm:$0xff] %v13080_v28  ;;  %v7319_v61 = vpop.eup %7318  ;;  %5729 = vadd.xlane.f32.xlu0 %v5728_v20  ;;  %v5731_v26 = vadd.f32 %v13080_v28, %v13076_v29 }
 0x59d   :  { %v5673_v0 = vpop.xlane.xlu1 %5672  ;;  %v7321_v24 = vpop.eup %7320  ;;  %v5779_v43 = vmul.f32 %v7319_v61, %v14840_v7  ;;  %v5778_v36 = vmul.f32 %v7319_v61, %v14842_v33 }
 0x59e   :  { %7336 = vrcp.f32 %v5673_v0  ;;  %v7323_v23 = vpop.eup %7322  ;;  %5732 = vadd.xlane.f32.xlu1 %v5731_v26  ;;  %v4875_v14 = vpop.xlane.xlu0 %4874  ;;  %v5781_v31 = vmul.f32 %v7321_v24, %v14841_v25  ;;  %v5780_v44 = vmul.f32 %v7321_v24, %v14843_v50  ;;  %v14846_v26 = vld [vmem:[#allocation148_spill] sm:$0xff] }
 0x59f   :  { %v7325_v6 = vpop.eup %7324  ;;  %7338 = vrcp.f32 %v4875_v14  ;;  %v4982_v19 = vmul.f32 %v7323_v23, %v14844_v45  ;;  %v4981_v20 = vmul.f32 %v7323_v23, %v14845_v38  ;;  %v14848_v50 = vld [vmem:[#allocation16_spill] sm:$0xff] }
 0x5a0   :  { %v7327_v49 = vpop.eup %7326  ;;  %v5837_v29 = vpack.c.bf16 %v5781_v31, %v5779_v43  ;;  %v5836_v0 = vpack.c.bf16 %v5780_v44, %v5778_v36  ;;  %v4984_v28 = vmul.f32 %v7325_v6, %v14846_v26  ;;  %v4983_v7 = vmul.f32 %v7325_v6, %v14847_v58  ;;  %v14849_v44 = vld [vmem:[#allocation13_spill] sm:$0xff] }
 0x5a1   :  { %v4878_v8 = vpop.xlane.xlu1 %4877  ;;  %v5783_v14 = vmul.f32 %v7327_v49, %v12698_v10  ;;  %v5782_v45 = vmul.f32 %v7327_v49, %v14849_v44  ;;  %v14850_v6 = vld [vmem:[#allocation41_spill] sm:$0xff]  ;;  %v14851_v10 = vld [vmem:[#allocation150_spill] sm:$0xff] }
 0x5a2   :  { %7340 = vrcp.f32 %v4878_v8  ;;  %5956 = vmatprep.mubr.bf16.mxu1 %v5837_v29  ;;  %v5676_v61 = vpop.xlane.xlu0 %5675  ;;  %v5038_v33 = vpack.c.bf16 %v4984_v28, %v4982_v19  ;;  %v5037_v24 = vpack.c.bf16 %v4983_v7, %v4981_v20 }
 0x5a3   :  { %v7329_v25 = vpop.eup %7328  ;;  %5957 = vmatmul.mubr.bf16.gmra.mxu1 %v5836_v0  ;;  %7342 = vrcp.f32 %v5676_v61  ;;  %v14853_v0 = vld [vmem:[#allocation103_spill] sm:$0xff] }
 0x5a4   :  { %v5785_v23 = vmul.f32 %v7329_v25, %v12719_v9  ;;  %v5784_v43 = vmul.f32 %v7329_v25, %v14848_v50  ;;  %v7331_v31 = vpop.eup %7330  ;;  %5165 = vmatprep.mubr.bf16.mxu0 %v5038_v33  ;;  %v14852_v9 = vld [vmem:[#allocation15_spill] sm:$0xff] }
 0x5a5   :  { %v5679_v36 = vpop.xlane.xlu1 %5678  ;;  %5166 = vmatmul.mubr.bf16.gmra.mxu0 %v5037_v24  ;;  %v4986_v19 = vmul.f32 %v7331_v31, %v14850_v6  ;;  %v4985_v20 = vmul.f32 %v7331_v31, %v14852_v9 }
 0x5a6   :  { %7344 = vrcp.f32 %v5679_v36  ;;  %v5839_v8 = vpack.c.bf16 %v5785_v23, %v5783_v14  ;;  %v4881_v29 = vpop.xlane.xlu0 %4880  ;;  %v5838_v28 = vpack.c.bf16 %v5784_v43, %v5782_v45 }
 0x5a7   :  { %v7333_v58 = vpop.eup %7332  ;;  %7346 = vrcp.f32 %v4881_v29 }
 0x5a8   :  { %5966 = vmatprep.mubr.bf16.mxu1 %v5839_v8  ;;  %v4988_v38 = vmul.f32 %v7333_v58, %v14851_v10  ;;  %v4987_v26 = vmul.f32 %v7333_v58, %v14853_v0  ;;  %v7335_v7 = vpop.eup %7334 }
 0x5a9   :  { %v4884_v25 = vpop.xlane.xlu1 %4883  ;;  %v5787_v14 = vmul.f32 %v7335_v7, %v12736_v30  ;;  %v5786_v36 = vmul.f32 %v7335_v7, %v12729_v60 }
 0x5aa   :  { %7348 = vrcp.f32 %v4884_v25  ;;  %v5040_v49 = vpack.c.bf16 %v4988_v38, %v4986_v19  ;;  %v5039_v61 = vpack.c.bf16 %v4987_v26, %v4985_v20  ;;  %v5682_v24 = vpop.xlane.xlu0 %5681 }
 0x5ab   :  { %v7337_v33 = vpop.eup %7336  ;;  %5967 = vmatmul.mubr.bf16.gmra.mxu1 %v5838_v28  ;;  %7350 = vrcp.f32 %v5682_v24  ;;  %v14856_v24 = vld [vmem:[#allocation112_spill] sm:$0xff] }
 0x5ac   :  { %5175 = vmatprep.mubr.bf16.mxu0 %v5040_v49  ;;  %v5789_v23 = vmul.f32 %v7337_v33, %v12756_v17  ;;  %v5788_v50 = vmul.f32 %v7337_v33, %v12753_v51  ;;  %v7339_v43 = vpop.eup %7338  ;;  %v14854_v49 = vld [vmem:[#allocation132_spill] sm:$0xff] }
 0x5ad   :  { %v5685_v31 = vpop.xlane.xlu1 %5684  ;;  %5176 = vmatmul.mubr.bf16.gmra.mxu0 %v5039_v61  ;;  %v4990_v29 = vmul.f32 %v7339_v43, %v12655_v41  ;;  %v4989_v17 = vmul.f32 %v7339_v43, %v12651_v5  ;;  %v14855_v33 = vld [vmem:[#allocation160_spill] sm:$0xff] }
 0x5ae   :  { %7352 = vrcp.f32 %v5685_v31  ;;  %v5841_v44 = vpack.c.bf16 %v5789_v23, %v5787_v14  ;;  %v4887_v8 = vpop.xlane.xlu0 %4886  ;;  %v5840_v58 = vpack.c.bf16 %v5788_v50, %v5786_v36  ;;  %v14857_v14 = vld [vmem:[#allocation86_spill] sm:$0xff] }
 0x5af   :  { %v7341_v45 = vpop.eup %7340  ;;  %7354 = vrcp.f32 %v4887_v8 }
 0x5b0   :  { %5976 = vmatprep.mubr.bf16.mxu1 %v5841_v44  ;;  %v4992_v30 = vmul.f32 %v7341_v45, %v12708_v54  ;;  %v4991_v51 = vmul.f32 %v7341_v45, %v12659_v12  ;;  %v7343_v28 = vpop.eup %7342 }
 0x5b1   :  { %v4890_v6 = vpop.xlane.xlu1 %4889  ;;  %v5791_v41 = vmul.f32 %v7343_v28, %v12780_v62  ;;  %v5790_v12 = vmul.f32 %v7343_v28, %v12776_v11 }
 0x5b2   :  { %7356 = vrcp.f32 %v4890_v6  ;;  %v5042_v60 = vpack.c.bf16 %v4992_v30, %v4990_v29  ;;  %v5041_v19 = vpack.c.bf16 %v4991_v51, %v4989_v17 }
 0x5b3   :  { %v7345_v10 = vpop.eup %7344  ;;  %v5688_v38 = vpop.xlane.xlu0 %5687  ;;  %5977 = vmatmul.mubr.bf16.gmra.mxu1 %v5840_v58 }
 0x5b4   :  { %7358 = vrcp.f32 %v5688_v38  ;;  %5185 = vmatprep.mubr.bf16.mxu0 %v5042_v60  ;;  %v5793_v9 = vmul.f32 %v7345_v10, %v12792_v2  ;;  %v5792_v54 = vmul.f32 %v7345_v10, %v12786_v42  ;;  %v7347_v20 = vpop.eup %7346 }
 0x5b5   :  { %v5691_v5 = vpop.xlane.xlu1 %5690  ;;  %5186 = vmatmul.mubr.bf16.gmra.mxu0 %v5041_v19  ;;  %v4994_v61 = vmul.f32 %v7347_v20, %v14854_v49  ;;  %v4993_v2 = vmul.f32 %v7347_v20, %v14856_v24 }
 0x5b6   :  { %7360 = vrcp.f32 %v5691_v5  ;;  %v5843_v0 = vpack.c.bf16 %v5793_v9, %v5791_v41  ;;  %v5842_v25 = vpack.c.bf16 %v5792_v54, %v5790_v12 }
 0x5b7   :  { %v7349_v26 = vpop.eup %7348  ;;  %v4893_v7 = vpop.xlane.xlu0 %4892 }
 0x5b8   :  { %7362 = vrcp.f32 %v4893_v7  ;;  %5986 = vmatprep.mubr.bf16.mxu1 %v5843_v0  ;;  %v4996_v62 = vmul.f32 %v7349_v26, %v14855_v33  ;;  %v4995_v42 = vmul.f32 %v7349_v26, %v14857_v14  ;;  %v7351_v23 = vpop.eup %7350 }
 0x5b9   :  { %v4896_v50 = vpop.xlane.xlu1 %4895  ;;  %v5795_v44 = vmul.f32 %v7351_v23, %v12808_v46  ;;  %v5794_v30 = vmul.f32 %v7351_v23, %v12803_v21 }
 0x5ba   :  { %7364 = vrcp.f32 %v4896_v50  ;;  %v5044_v11 = vpack.c.bf16 %v4996_v62, %v4994_v61  ;;  %v5043_v43 = vpack.c.bf16 %v4995_v42, %v4993_v2 }
 0x5bb   :  { %v7353_v31 = vpop.eup %7352  ;;  %v5694_v36 = vpop.xlane.xlu0 %5693  ;;  %5987 = vmatmul.mubr.bf16.gmra.mxu1 %v5842_v25 }
 0x5bc   :  { %7366 = vrcp.f32 %v5694_v36  ;;  %5195 = vmatprep.mubr.bf16.mxu0 %v5044_v11  ;;  %v5797_v45 = vmul.f32 %v7353_v31, %v12822_v34  ;;  %v5796_v8 = vmul.f32 %v7353_v31, %v12820_v15  ;;  %v7355_v58 = vpop.eup %7354 }
 0x5bd   :  { %v5697_v29 = vpop.xlane.xlu1 %5696  ;;  %5196 = vmatmul.mubr.bf16.gmra.mxu0 %v5043_v43  ;;  %v4998_v60 = vmul.f32 %v7355_v58, %v12772_v47  ;;  %v4997_v34 = vmul.f32 %v7355_v58, %v12764_v39 }
 0x5be   :  { %7368 = vrcp.f32 %v5697_v29  ;;  %v5845_v17 = vpack.c.bf16 %v5797_v45, %v5795_v44  ;;  %v5844_v6 = vpack.c.bf16 %v5796_v8, %v5794_v30  ;;  %v14859_v44 = vld [vmem:[#allocation6_spill] sm:$0xff] }
 0x5bf   :  { %v7357_v51 = vpop.eup %7356  ;;  %v4899_v28 = vpop.xlane.xlu0 %4898 }
 0x5c0   :  { %7370 = vrcp.f32 %v4899_v28  ;;  %5996 = vmatprep.mubr.bf16.mxu1 %v5845_v17  ;;  %v5000_v46 = vmul.f32 %v7357_v51, %v12816_v1  ;;  %v4999_v15 = vmul.f32 %v7357_v51, %v12810_v53  ;;  %v14860_v28 = vld [vmem:[#allocation20_spill] sm:$0xff] }
 0x5c1   :  { %v7359_v19 = vpop.eup %7358  ;;  %v4902_v10 = vpop.xlane.xlu1 %4901 }
 0x5c2   :  { %7372 = vrcp.f32 %v4902_v10  ;;  %v5046_v21 = vpack.c.bf16 %v5000_v46, %v4998_v60  ;;  %v5045_v38 = vpack.c.bf16 %v4999_v15, %v4997_v34  ;;  %v5799_v47 = vmul.f32 %v7359_v19, %v12850_v37  ;;  %v14862_v46 = vld [vmem:[#allocation162_spill] sm:$0xff]  ;;  %v14863_v10 = vld [vmem:[#allocation159_spill] sm:$0xff] }
 0x5c3   :  { %v7361_v41 = vpop.eup %7360  ;;  %v5700_v9 = vpop.xlane.xlu0 %5699  ;;  %5997 = vmatmul.mubr.bf16.gmra.mxu1 %v5844_v6  ;;  %v5798_v53 = vmul.f32 %v7359_v19, %v12844_v59  ;;  %v14861_v6 = vld [vmem:[#allocation100_spill] sm:$0xff] }
 0x5c4   :  { %7374 = vrcp.f32 %v5700_v9  ;;  %5205 = vmatprep.mubr.bf16.mxu0 %v5046_v21  ;;  %v5801_v54 = vmul.f32 %v7361_v41, %v12858_v57  ;;  %v5800_v1 = vmul.f32 %v7361_v41, %v12854_v18 }
 0x5c5   :  { %v7363_v20 = vpop.eup %7362  ;;  %v5703_v39 = vpop.xlane.xlu1 %5702  ;;  %5206 = vmatmul.mubr.bf16.gmra.mxu0 %v5045_v38 }
 0x5c6   :  { %7376 = vrcp.f32 %v5703_v39  ;;  %v5847_v5 = vpack.c.bf16 %v5801_v54, %v5799_v47  ;;  %v5846_v26 = vpack.c.bf16 %v5800_v1, %v5798_v53  ;;  %v5002_v7 = vmul.f32 %v7363_v20, %v12832_v16  ;;  %v14864_v1 = vld [vmem:[#allocation85_spill] sm:$0xff]  ;;  %v14865_v53 = vld [vmem:[#allocation164_spill] sm:$0xff] }
 0x5c7   :  { %v7365_v12 = vpop.eup %7364  ;;  %v4905_v0 = vpop.xlane.xlu0 %4904  ;;  %v5001_v57 = vmul.f32 %v7363_v20, %v12826_v13 }
 0x5c8   :  { %7378 = vrcp.f32 %v4905_v0  ;;  %6006 = vmatprep.mubr.bf16.mxu1 %v5847_v5  ;;  %v5004_v37 = vmul.f32 %v7365_v12, %v12842_v22  ;;  %v5003_v18 = vmul.f32 %v7365_v12, %v12836_v48  ;;  %v14866_v12 = vld [vmem:[#allocation79_spill] sm:$0xff] }
 0x5c9   :  { %v7367_v25 = vpop.eup %7366  ;;  %v4908_v49 = vpop.xlane.xlu1 %4907 }
 0x5ca   :  { %7380 = vrcp.f32 %v4908_v49  ;;  %v5048_v59 = vpack.c.bf16 %v5004_v37, %v5002_v7  ;;  %v5047_v61 = vpack.c.bf16 %v5003_v18, %v5001_v57  ;;  %v5803_v16 = vmul.f32 %v7367_v25, %v12876_v4 }
 0x5cb   :  { %v7369_v33 = vpop.eup %7368  ;;  %v5706_v62 = vpop.xlane.xlu0 %5705  ;;  %6007 = vmatmul.mubr.bf16.gmra.mxu1 %v5846_v26  ;;  %v5802_v14 = vmul.f32 %v7367_v25, %v12870_v40  ;;  %v14867_v26 = vld [vmem:[#allocation161_spill] sm:$0xff] }
 0x5cc   :  { %v5127_v24 = vpop.f32.mrf.mxu0  ;;  %7382 = vrcp.f32 %v5706_v62  ;;  %5215 = vmatprep.mubr.bf16.mxu0 %v5048_v59  ;;  %v5805_v2 = vmul.f32 %v7369_v33, %v12892_v52  ;;  %v5804_v22 = vmul.f32 %v7369_v33, %v12888_v56  ;;  %v14858_v52 = vld [vmem:[#allocation108_spill] sm:$0xff]  ;;  %v14868_v33 = vld [vmem:[#allocation26_spill] sm:$0xff] }
 0x5cd   :  { %v7371_v13 = vpop.eup %7370  ;;  %5286 = vst [vmem:[#allocation2] sm:$0xff] %v5127_v24  ;;  %v5709_v48 = vpop.xlane.xlu1 %5708  ;;  %5216 = vmatmul.mubr.bf16.gmra.mxu0 %v5047_v61  ;;  %v14869_v24 = vld [vmem:[#allocation110_spill] sm:$0xff] }
 0x5ce   :  { %v5129_v42 = vpop.f32.mrf.mxu0  ;;  %7384 = vrcp.f32 %v5709_v48  ;;  %v5849_v23 = vpack.c.bf16 %v5805_v2, %v5803_v16  ;;  %v5848_v43 = vpack.c.bf16 %v5804_v22, %v5802_v14  ;;  %v5006_v31 = vmul.f32 %v7371_v13, %v12878_v55  ;;  %v14870_v2 = vld [vmem:[#allocation166_spill] sm:$0xff]  ;;  %v14871_v14 = vld [vmem:[#allocation163_spill] sm:$0xff] }
 0x5cf   :  { %v7373_v50 = vpop.eup %7372  ;;  %5287 = vst [vmem:[#allocation2 + $0x8] sm:$0xff] %v5129_v42  ;;  %v4911_v11 = vpop.xlane.xlu0 %4910  ;;  %v5005_v36 = vmul.f32 %v7371_v13, %v14858_v52 }
 0x5d0   :  { %v5131_v4 = vpop.f32.mrf.mxu0  ;;  %7386 = vrcp.f32 %v4911_v11  ;;  %6016 = vmatprep.mubr.bf16.mxu1 %v5849_v23  ;;  %v5008_v56 = vmul.f32 %v7373_v50, %v12896_v27  ;;  %v5007_v45 = vmul.f32 %v7373_v50, %v14859_v44 }
 0x5d1   :  { %v7375_v40 = vpop.eup %7374  ;;  %5288 = vst [vmem:[#allocation2 + $0x10] sm:$0xff] %v5131_v4  ;;  %v4914_v8 = vpop.xlane.xlu1 %4913 }
 0x5d2   :  { %v5133_v58 = vpop.f32.mrf.mxu0  ;;  %7388 = vrcp.f32 %v4914_v8  ;;  %v5050_v29 = vpack.c.bf16 %v5008_v56, %v5006_v31  ;;  %v5049_v30 = vpack.c.bf16 %v5007_v45, %v5005_v36  ;;  %v5807_v27 = vmul.f32 %v7375_v40, %v14860_v28  ;;  %v14872_v31 = vld [vmem:[#allocation165_spill] sm:$0xff]  ;;  %v14874_v36 = vld [vmem:[#allocation91_spill] sm:$0xff]  ;;  %v14875_v45 = vld [vmem:[#allocation90_spill] sm:$0xff] }
 0x5d3   :  { %v7377_v17 = vpop.eup %7376  ;;  %5289 = vst [vmem:[#allocation2 + $0x18] sm:$0xff] %v5133_v58  ;;  %v5712_v51 = vpop.xlane.xlu0 %5711  ;;  %6017 = vmatmul.mubr.bf16.gmra.mxu1 %v5848_v43  ;;  %v5806_v21 = vmul.f32 %v7375_v40, %v14863_v10  ;;  %v14873_v56 = vld [vmem:[#allocation169_spill] sm:$0xff] }
 0x5d4   :  { %v5137_v55 = vpop.f32.mrf.mxu0  ;;  %7390 = vrcp.f32 %v5712_v51  ;;  %5225 = vmatprep.mubr.bf16.mxu0 %v5050_v29  ;;  %v5809_v60 = vmul.f32 %v7377_v17, %v14861_v6  ;;  %v5808_v34 = vmul.f32 %v7377_v17, %v14862_v46 }
 0x5d5   :  { %v7379_v15 = vpop.eup %7378  ;;  %5290 = vst [vmem:[#allocation2 + $0x20] sm:$0xff] %v5137_v55  ;;  %v5715_v19 = vpop.xlane.xlu1 %5714  ;;  %5226 = vmatmul.mubr.bf16.gmra.mxu0 %v5049_v30 }
 0x5d6   :  { %v5139_v38 = vpop.f32.mrf.mxu0  ;;  %7392 = vrcp.f32 %v5715_v19  ;;  %v5851_v41 = vpack.c.bf16 %v5809_v60, %v5807_v27  ;;  %v5850_v54 = vpack.c.bf16 %v5808_v34, %v5806_v21  ;;  %v5010_v20 = vmul.f32 %v7379_v15, %v14864_v1  ;;  %v14876_v27 = vld [vmem:[#allocation107_spill] sm:$0xff]  ;;  %v14878_v34 = vld [vmem:[#allocation128_spill] sm:$0xff] }
 0x5d7   :  { %v7381_v9 = vpop.eup %7380  ;;  %5291 = vst [vmem:[#allocation2 + $0x28] sm:$0xff] %v5139_v38  ;;  %v4917_v47 = vpop.xlane.xlu0 %4916  ;;  %v5009_v0 = vmul.f32 %v7379_v15, %v14866_v12  ;;  %v14877_v60 = vld [vmem:[#allocation99_spill] sm:$0xff]  ;;  %v14882_v12 = vld [vmem:[#allocation101_spill] sm:$0xff] }
 0x5d8   :  { %v5141_v39 = vpop.f32.mrf.mxu0  ;;  %7394 = vrcp.f32 %v4917_v47  ;;  %6026 = vmatprep.mubr.bf16.mxu1 %v5851_v41  ;;  %v5012_v5 = vmul.f32 %v7381_v9, %v14865_v53  ;;  %v5011_v7 = vmul.f32 %v7381_v9, %v14867_v26  ;;  %v14879_v38 = vld [vmem:[#allocation167_spill] sm:$0xff]  ;;  %v14881_v53 = vld [vmem:[#allocation170_spill] sm:$0xff]  ;;  %v14883_v26 = vld [vmem:[#allocation120_spill] sm:$0xff] }
 0x5d9   :  { %v7383_v37 = vpop.eup %7382  ;;  %5292 = vst [vmem:[#allocation2 + $0x30] sm:$0xff] %v5141_v39  ;;  %v4920_v57 = vpop.xlane.xlu1 %4919 }
 0x5da   :  { %v5143_v18 = vpop.f32.mrf.mxu0  ;;  %7396 = vrcp.f32 %v4920_v57  ;;  %v5052_v25 = vpack.c.bf16 %v5012_v5, %v5010_v20  ;;  %v5051_v49 = vpack.c.bf16 %v5011_v7, %v5009_v0  ;;  %v5811_v62 = vmul.f32 %v7383_v37, %v14868_v33  ;;  %v14880_v20 = vld [vmem:[#allocation168_spill] sm:$0xff] }
 0x5db   :  { %v7385_v59 = vpop.eup %7384  ;;  %5293 = vst [vmem:[#allocation2 + $0x38] sm:$0xff] %v5143_v18  ;;  %v5718_v61 = vpop.xlane.xlu0 %5717  ;;  %6027 = vmatmul.mubr.bf16.gmra.mxu1 %v5850_v54  ;;  %v5810_v42 = vmul.f32 %v7383_v37, %v14871_v14 }
 0x5dc   :  { %7398 = vrcp.f32 %v5718_v61  ;;  %5235 = vmatprep.mubr.bf16.mxu0 %v5052_v25  ;;  %v5813_v16 = vmul.f32 %v7385_v59, %v14869_v24  ;;  %v5812_v22 = vmul.f32 %v7385_v59, %v14870_v2  ;;  %v14885_v61 = vld [vmem:[#allocation130_spill] sm:$0xff]  ;;  %v14887_v2 = vld [vmem:[#allocation115_spill] sm:$0xff] }
 0x5dd   :  { %v7387_v13 = vpop.eup %7386  ;;  %v5721_v48 = vpop.xlane.xlu1 %5720  ;;  %5236 = vmatmul.mubr.bf16.gmra.mxu0 %v5051_v49  ;;  %v14884_v49 = vld [vmem:[#allocation124_spill] sm:$0xff] }
 0x5de   :  { %7400 = vrcp.f32 %v5721_v48  ;;  %v5853_v23 = vpack.c.bf16 %v5813_v16, %v5811_v62  ;;  %v5852_v43 = vpack.c.bf16 %v5812_v22, %v5810_v42  ;;  %v5014_v4 = vmul.f32 %v7387_v13, %v14872_v31  ;;  %v14886_v62 = vld [vmem:[#allocation118_spill] sm:$0xff]  ;;  %v14888_v42 = vld [vmem:[#allocation171_spill] sm:$0xff] }
 0x5df   :  { %v7389_v50 = vpop.eup %7388  ;;  %v4923_v11 = vpop.xlane.xlu0 %4922  ;;  %v5013_v44 = vmul.f32 %v7387_v13, %v14874_v36 }
 0x5e0   :  { %7402 = vrcp.f32 %v4923_v11  ;;  %6036 = vmatprep.mubr.bf16.mxu1 %v5853_v23  ;;  %v5016_v52 = vmul.f32 %v7389_v50, %v14873_v56  ;;  %v5015_v40 = vmul.f32 %v7389_v50, %v14875_v45  ;;  %v5147_v58 = vpop.f32.mrf.mxu0  ;;  %v14889_v50 = vld [vmem:[#allocation144_spill] sm:$0xff] }
 0x5e1   :  { %v7391_v8 = vpop.eup %7390  ;;  %v4926_v29 = vpop.xlane.xlu1 %4925  ;;  %5294 = vst [vmem:[#allocation2 + $0x40] sm:$0xff] %v5147_v58  ;;  %v14893_v58 = vld [vmem:[#allocation9_spill] sm:$0xff] }
 0x5e2   :  { %7404 = vrcp.f32 %v4926_v29  ;;  %v5054_v30 = vpack.c.bf16 %v5016_v52, %v5014_v4  ;;  %v5053_v17 = vpack.c.bf16 %v5015_v40, %v5013_v44  ;;  %v5149_v55 = vpop.f32.mrf.mxu0  ;;  %v5815_v6 = vmul.f32 %v7391_v8, %v14876_v27  ;;  %v14891_v4 = vld [vmem:[#allocation122_spill] sm:$0xff]  ;;  %v14892_v40 = vld [vmem:[#allocation43_spill] sm:$0xff] }
 0x5e3   :  { %v7393_v51 = vpop.eup %7392  ;;  %v5724_v28 = vpop.xlane.xlu0 %5723  ;;  %5295 = vst [vmem:[#allocation2 + $0x48] sm:$0xff] %v5149_v55  ;;  %6037 = vmatmul.mubr.bf16.gmra.mxu1 %v5852_v43  ;;  %v5814_v41 = vmul.f32 %v7391_v8, %v14879_v38  ;;  %v14890_v43 = vld [vmem:[#allocation116_spill] sm:$0xff]  ;;  %v14895_v55 = vld [vmem:[#allocation143_spill] sm:$0xff] }
 0x5e4   :  { %7406 = vrcp.f32 %v5724_v28  ;;  %5245 = vmatprep.mubr.bf16.mxu0 %v5054_v30  ;;  %v5817_v46 = vmul.f32 %v7393_v51, %v14877_v60  ;;  %v5816_v15 = vmul.f32 %v7393_v51, %v14878_v34  ;;  %v5151_v10 = vpop.f32.mrf.mxu0  ;;  %v14894_v30 = vld [vmem:[#allocation134_spill] sm:$0xff] }
 0x5e5   :  { %v7395_v19 = vpop.eup %7394  ;;  %v5727_v21 = vpop.xlane.xlu1 %5726  ;;  %5296 = vst [vmem:[#allocation2 + $0x50] sm:$0xff] %v5151_v10  ;;  %5246 = vmatmul.mubr.bf16.gmra.mxu0 %v5053_v17 }
 0x5e6   :  { %7408 = vrcp.f32 %v5727_v21  ;;  %v5855_v9 = vpack.c.bf16 %v5817_v46, %v5815_v6  ;;  %v5153_v54 = vpop.f32.mrf.mxu0  ;;  %v5854_v1 = vpack.c.bf16 %v5816_v15, %v5814_v41  ;;  %v5018_v39 = vmul.f32 %v7395_v19, %v14880_v20  ;;  %v14896_v20 = vld [vmem:[#allocation123_spill] sm:$0xff] }
 0x5e7   :  { %v7397_v47 = vpop.eup %7396  ;;  %5297 = vst [vmem:[#allocation2 + $0x58] sm:$0xff] %v5153_v54  ;;  %v5017_v0 = vmul.f32 %v7395_v19, %v14882_v12  ;;  %v14898_v12 = vld [vmem:[#allocation44_spill] sm:$0xff] }
 0x5e8   :  { %6046 = vmatprep.mubr.bf16.mxu1 %v5855_v9  ;;  %v5020_v5 = vmul.f32 %v7397_v47, %v14881_v53  ;;  %v5019_v7 = vmul.f32 %v7397_v47, %v14883_v26  ;;  %v14897_v53 = vld [vmem:[#allocation111_spill] sm:$0xff]  ;;  %v14899_v26 = vld [vmem:[#allocation38_spill] sm:$0xff] }
 0x5e9   :  { %v7399_v37 = vpop.eup %7398 }
 0x5ea   :  { %v5056_v57 = vpack.c.bf16 %v5020_v5, %v5018_v39  ;;  %v5055_v18 = vpack.c.bf16 %v5019_v7, %v5017_v0  ;;  %v5819_v59 = vmul.f32 %v7399_v37, %v14884_v49  ;;  %v5818_v22 = vmul.f32 %v7399_v37, %v14887_v2 }
 0x5eb   :  { %v7401_v25 = vpop.eup %7400  ;;  %6047 = vmatmul.mubr.bf16.gmra.mxu1 %v5854_v1 }
 0x5ec   :  { %5255 = vmatprep.mubr.bf16.mxu0 %v5056_v57  ;;  %v5821_v33 = vmul.f32 %v7401_v25, %v14885_v61  ;;  %v5820_v24 = vmul.f32 %v7401_v25, %v14886_v62 }
 0x5ed   :  { %v7403_v16 = vpop.eup %7402  ;;  %5256 = vmatmul.mubr.bf16.gmra.mxu0 %v5055_v18 }
 0x5ee   :  { %v5857_v13 = vpack.c.bf16 %v5821_v33, %v5819_v59  ;;  %v5856_v14 = vpack.c.bf16 %v5820_v24, %v5818_v22  ;;  %v5022_v23 = vmul.f32 %v7403_v16, %v14888_v42  ;;  %v5021_v31 = vmul.f32 %v7403_v16, %v14890_v43 }
 0x5ef   :  { %v7405_v48 = vpop.eup %7404 }
 0x5f0   :  { %6056 = vmatprep.mubr.bf16.mxu1 %v5857_v13  ;;  %v5024_v11 = vmul.f32 %v7405_v48, %v14889_v50  ;;  %v5023_v56 = vmul.f32 %v7405_v48, %v14891_v4 }
 0x5f1   :  { %v7407_v52 = vpop.eup %7406 }
 0x5f2   :  { %v5058_v36 = vpack.c.bf16 %v5024_v11, %v5022_v23  ;;  %v5057_v44 = vpack.c.bf16 %v5023_v56, %v5021_v31  ;;  %v5823_v8 = vmul.f32 %v7407_v52, %v14892_v40  ;;  %v5822_v28 = vmul.f32 %v7407_v52, %v14895_v55 }
 0x5f3   :  { %v7409_v45 = vpop.eup %7408  ;;  %6057 = vmatmul.mubr.bf16.gmra.mxu1 %v5856_v14 }
 0x5f4   :  { %5265 = vmatprep.mubr.bf16.mxu0 %v5058_v36  ;;  %v5825_v29 = vmul.f32 %v7409_v45, %v14893_v58  ;;  %v5824_v17 = vmul.f32 %v7409_v45, %v14894_v30 }
 0x5f5   :  { %5266 = vmatmul.mubr.bf16.gmra.mxu0 %v5057_v44 }
 0x5f6   :  { %v5859_v51 = vpack.c.bf16 %v5825_v29, %v5823_v8  ;;  %v5858_v27 = vpack.c.bf16 %v5824_v17, %v5822_v28 }
 0x5f8   :  { %6066 = vmatprep.mubr.bf16.mxu1 %v5859_v51 }
 0x5fb   :  { %6067 = vmatmul.mubr.bf16.gmra.mxu1 %v5858_v27 }
 0x61d   :  { %v4929_v6 = vpop.xlane.xlu0 %4928 }
 0x61e   :  { %7410 = vrcp.f32 %v4929_v6 }
 0x61f   :  { %v4932_v60 = vpop.xlane.xlu1 %4931 }
 0x620   :  { %7412 = vrcp.f32 %v4932_v60 }
 0x625   :  { %v5730_v46 = vpop.xlane.xlu0 %5729 }
 0x626   :  { %7414 = vrcp.f32 %v5730_v46 }
 0x627   :  { %v5733_v34 = vpop.xlane.xlu1 %5732 }
 0x628   :  { %7416 = vrcp.f32 %v5733_v34 }
 0x62b   :  { %v7411_v15 = vpop.eup %7410 }
 0x62c   :  { %v5026_v10 = vmul.f32 %v7411_v15, %v13058_v63  ;;  %v5025_v38 = vmul.f32 %v7411_v15, %v13056_v32 }
 0x62d   :  { %v7413_v19 = vpop.eup %7412 }
 0x62e   :  { %v5028_v21 = vmul.f32 %v7413_v19, %v13064_v3  ;;  %v5027_v41 = vmul.f32 %v7413_v19, %v13060_v35 }
 0x630   :  { %v5060_v9 = vpack.c.bf16 %v5028_v21, %v5026_v10  ;;  %v5059_v47 = vpack.c.bf16 %v5027_v41, %v5025_v38 }
 0x632   :  { %5275 = vmatprep.mubr.bf16.mxu0 %v5060_v9 }
 0x633   :  { %v7415_v54 = vpop.eup %7414  ;;  %5276 = vmatmul.mubr.bf16.gmra.mxu0 %v5059_v47 }
 0x634   :  { %v5827_v39 = vmul.f32 %v7415_v54, %v14896_v20  ;;  %v5826_v0 = vmul.f32 %v7415_v54, %v14898_v12 }
 0x635   :  { %v7417_v1 = vpop.eup %7416 }
 0x636   :  { %v5829_v5 = vmul.f32 %v7417_v1, %v14897_v53  ;;  %v5828_v63 = vmul.f32 %v7417_v1, %v14899_v26 }
 0x638   :  { %v5861_v7 = vpack.c.bf16 %v5829_v5, %v5827_v39  ;;  %v5860_v3 = vpack.c.bf16 %v5828_v63, %v5826_v0 }
 0x63a   :  { %6076 = vmatprep.mubr.bf16.mxu1 %v5861_v7 }
 0x63b   :  { %6077 = vmatmul.mubr.bf16.gmra.mxu1 %v5860_v3 }
 0x649   :  { %v5928_v32 = vpop.f32.mrf.mxu1 }
 0x64a   :  { %6087 = vst [vmem:[#allocation2 + $0x200] sm:$0xff] %v5928_v32 }
 0x64b   :  { %v5930_v35 = vpop.f32.mrf.mxu1 }
 0x64c   :  { %6088 = vst [vmem:[#allocation2 + $0x208] sm:$0xff] %v5930_v35 }
 0x64d   :  { %v5157_v37 = vpop.f32.mrf.mxu0  ;;  %v5932_v57 = vpop.f32.mrf.mxu1 }
 0x64e   :  { %5298 = vst [vmem:[#allocation2 + $0x60] sm:$0xff] %v5157_v37  ;;  %6089 = vst [vmem:[#allocation2 + $0x210] sm:$0xff] %v5932_v57 }
 0x64f   :  { %v5159_v18 = vpop.f32.mrf.mxu0  ;;  %v5934_v25 = vpop.f32.mrf.mxu1 }
 0x650   :  { %5299 = vst [vmem:[#allocation2 + $0x68] sm:$0xff] %v5159_v18  ;;  %6090 = vst [vmem:[#allocation2 + $0x218] sm:$0xff] %v5934_v25 }
 0x651   :  { %v5161_v49 = vpop.f32.mrf.mxu0  ;;  %v5938_v59 = vpop.f32.mrf.mxu1 }
 0x652   :  { %5300 = vst [vmem:[#allocation2 + $0x70] sm:$0xff] %v5161_v49  ;;  %6091 = vst [vmem:[#allocation2 + $0x220] sm:$0xff] %v5938_v59 }
 0x653   :  { %v5163_v61 = vpop.f32.mrf.mxu0  ;;  %v5940_v33 = vpop.f32.mrf.mxu1 }
 0x654   :  { %5301 = vst [vmem:[#allocation2 + $0x78] sm:$0xff] %v5163_v61  ;;  %6092 = vst [vmem:[#allocation2 + $0x228] sm:$0xff] %v5940_v33 }
 0x655   :  { %v5942_v62 = vpop.f32.mrf.mxu1 }
 0x656   :  { %6093 = vst [vmem:[#allocation2 + $0x230] sm:$0xff] %v5942_v62 }
 0x657   :  { %v5944_v24 = vpop.f32.mrf.mxu1 }
 0x658   :  { %6094 = vst [vmem:[#allocation2 + $0x238] sm:$0xff] %v5944_v24 }
 0x65b   :  { %v5948_v16 = vpop.f32.mrf.mxu1 }
 0x65c   :  { %6095 = vst [vmem:[#allocation2 + $0x240] sm:$0xff] %v5948_v16 }
 0x65d   :  { %v5950_v2 = vpop.f32.mrf.mxu1 }
 0x65e   :  { %6096 = vst [vmem:[#allocation2 + $0x248] sm:$0xff] %v5950_v2 }
 0x65f   :  { %v5952_v22 = vpop.f32.mrf.mxu1 }
 0x660   :  { %6097 = vst [vmem:[#allocation2 + $0x250] sm:$0xff] %v5952_v22 }
 0x661   :  { %v5954_v13 = vpop.f32.mrf.mxu1 }
 0x662   :  { %6098 = vst [vmem:[#allocation2 + $0x258] sm:$0xff] %v5954_v13 }
 0x663   :  { %v5958_v48 = vpop.f32.mrf.mxu1 }
 0x664   :  { %6099 = vst [vmem:[#allocation2 + $0x260] sm:$0xff] %v5958_v48 }
 0x665   :  { %v5960_v14 = vpop.f32.mrf.mxu1  ;;  %v5167_v42 = vpop.f32.mrf.mxu0 }
 0x666   :  { %6100 = vst [vmem:[#allocation2 + $0x268] sm:$0xff] %v5960_v14  ;;  %5302 = vst [vmem:[#allocation2 + $0x80] sm:$0xff] %v5167_v42 }
 0x667   :  { %v5962_v23 = vpop.f32.mrf.mxu1  ;;  %v5169_v50 = vpop.f32.mrf.mxu0 }
 0x668   :  { %6101 = vst [vmem:[#allocation2 + $0x270] sm:$0xff] %v5962_v23  ;;  %5303 = vst [vmem:[#allocation2 + $0x88] sm:$0xff] %v5169_v50 }
 0x669   :  { %v5964_v11 = vpop.f32.mrf.mxu1  ;;  %v5171_v43 = vpop.f32.mrf.mxu0 }
 0x66a   :  { %6102 = vst [vmem:[#allocation2 + $0x278] sm:$0xff] %v5964_v11  ;;  %5304 = vst [vmem:[#allocation2 + $0x90] sm:$0xff] %v5171_v43 }
 0x66b   :  { %v5173_v31 = vpop.f32.mrf.mxu0  ;;  %v5968_v4 = vpop.f32.mrf.mxu1 }
 0x66c   :  { %5305 = vst [vmem:[#allocation2 + $0x98] sm:$0xff] %v5173_v31  ;;  %6103 = vst [vmem:[#allocation2 + $0x280] sm:$0xff] %v5968_v4 }
 0x66d   :  { %v5970_v56 = vpop.f32.mrf.mxu1  ;;  %v5177_v52 = vpop.f32.mrf.mxu0 }
 0x66e   :  { %6104 = vst [vmem:[#allocation2 + $0x288] sm:$0xff] %v5970_v56  ;;  %5306 = vst [vmem:[#allocation2 + $0xa0] sm:$0xff] %v5177_v52 }
 0x66f   :  { %v5972_v36 = vpop.f32.mrf.mxu1  ;;  %v5179_v44 = vpop.f32.mrf.mxu0 }
 0x670   :  { %6105 = vst [vmem:[#allocation2 + $0x290] sm:$0xff] %v5972_v36  ;;  %5307 = vst [vmem:[#allocation2 + $0xa8] sm:$0xff] %v5179_v44 }
 0x671   :  { %v5974_v45 = vpop.f32.mrf.mxu1  ;;  %v5181_v40 = vpop.f32.mrf.mxu0 }
 0x672   :  { %6106 = vst [vmem:[#allocation2 + $0x298] sm:$0xff] %v5974_v45  ;;  %5308 = vst [vmem:[#allocation2 + $0xb0] sm:$0xff] %v5181_v40 }
 0x673   :  { %v5978_v8 = vpop.f32.mrf.mxu1  ;;  %v5183_v58 = vpop.f32.mrf.mxu0 }
 0x674   :  { %6107 = vst [vmem:[#allocation2 + $0x2a0] sm:$0xff] %v5978_v8  ;;  %5309 = vst [vmem:[#allocation2 + $0xb8] sm:$0xff] %v5183_v58 }
 0x675   :  { %v5980_v29 = vpop.f32.mrf.mxu1  ;;  %v5187_v30 = vpop.f32.mrf.mxu0 }
 0x676   :  { %6108 = vst [vmem:[#allocation2 + $0x2a8] sm:$0xff] %v5980_v29  ;;  %5310 = vst [vmem:[#allocation2 + $0xc0] sm:$0xff] %v5187_v30 }
 0x677   :  { %v5982_v17 = vpop.f32.mrf.mxu1  ;;  %v5189_v51 = vpop.f32.mrf.mxu0 }
 0x678   :  { %6109 = vst [vmem:[#allocation2 + $0x2b0] sm:$0xff] %v5982_v17  ;;  %5311 = vst [vmem:[#allocation2 + $0xc8] sm:$0xff] %v5189_v51 }
 0x679   :  { %v5984_v55 = vpop.f32.mrf.mxu1  ;;  %v5191_v28 = vpop.f32.mrf.mxu0 }
 0x67a   :  { %6110 = vst [vmem:[#allocation2 + $0x2b8] sm:$0xff] %v5984_v55  ;;  %5312 = vst [vmem:[#allocation2 + $0xd0] sm:$0xff] %v5191_v28 }
 0x67b   :  { %v5988_v27 = vpop.f32.mrf.mxu1  ;;  %v5193_v6 = vpop.f32.mrf.mxu0 }
 0x67c   :  { %6111 = vst [vmem:[#allocation2 + $0x2c0] sm:$0xff] %v5988_v27  ;;  %5313 = vst [vmem:[#allocation2 + $0xd8] sm:$0xff] %v5193_v6 }
 0x67d   :  { %v5990_v60 = vpop.f32.mrf.mxu1  ;;  %v5197_v46 = vpop.f32.mrf.mxu0 }
 0x67e   :  { %6112 = vst [vmem:[#allocation2 + $0x2c8] sm:$0xff] %v5990_v60  ;;  %5314 = vst [vmem:[#allocation2 + $0xe0] sm:$0xff] %v5197_v46 }
 0x67f   :  { %v5992_v34 = vpop.f32.mrf.mxu1  ;;  %v5199_v15 = vpop.f32.mrf.mxu0 }
 0x680   :  { %6113 = vst [vmem:[#allocation2 + $0x2d0] sm:$0xff] %v5992_v34  ;;  %5315 = vst [vmem:[#allocation2 + $0xe8] sm:$0xff] %v5199_v15 }
 0x681   :  { %v5994_v19 = vpop.f32.mrf.mxu1  ;;  %v5201_v10 = vpop.f32.mrf.mxu0 }
 0x682   :  { %6114 = vst [vmem:[#allocation2 + $0x2d8] sm:$0xff] %v5994_v19  ;;  %5316 = vst [vmem:[#allocation2 + $0xf0] sm:$0xff] %v5201_v10 }
 0x683   :  { %v5998_v21 = vpop.f32.mrf.mxu1  ;;  %v5203_v38 = vpop.f32.mrf.mxu0 }
 0x684   :  { %6115 = vst [vmem:[#allocation2 + $0x2e0] sm:$0xff] %v5998_v21  ;;  %5317 = vst [vmem:[#allocation2 + $0xf8] sm:$0xff] %v5203_v38 }
 0x685   :  { %v6000_v41 = vpop.f32.mrf.mxu1  ;;  %v5207_v9 = vpop.f32.mrf.mxu0 }
 0x686   :  { %6116 = vst [vmem:[#allocation2 + $0x2e8] sm:$0xff] %v6000_v41  ;;  %5318 = vst [vmem:[#allocation2 + $0x100] sm:$0xff] %v5207_v9 }
 0x687   :  { %v6002_v47 = vpop.f32.mrf.mxu1  ;;  %v5209_v54 = vpop.f32.mrf.mxu0 }
 0x688   :  { %6117 = vst [vmem:[#allocation2 + $0x2f0] sm:$0xff] %v6002_v47  ;;  %5319 = vst [vmem:[#allocation2 + $0x108] sm:$0xff] %v5209_v54 }
 0x689   :  { %v6004_v1 = vpop.f32.mrf.mxu1  ;;  %v5211_v20 = vpop.f32.mrf.mxu0 }
 0x68a   :  { %6118 = vst [vmem:[#allocation2 + $0x2f8] sm:$0xff] %v6004_v1  ;;  %5320 = vst [vmem:[#allocation2 + $0x110] sm:$0xff] %v5211_v20 }
 0x68b   :  { %v6008_v39 = vpop.f32.mrf.mxu1  ;;  %v5213_v53 = vpop.f32.mrf.mxu0 }
 0x68c   :  { %6119 = vst [vmem:[#allocation2 + $0x300] sm:$0xff] %v6008_v39  ;;  %5321 = vst [vmem:[#allocation2 + $0x118] sm:$0xff] %v5213_v53 }
 0x68d   :  { %v6010_v5 = vpop.f32.mrf.mxu1  ;;  %v5217_v12 = vpop.f32.mrf.mxu0 }
 0x68e   :  { %6120 = vst [vmem:[#allocation2 + $0x308] sm:$0xff] %v6010_v5  ;;  %5322 = vst [vmem:[#allocation2 + $0x120] sm:$0xff] %v5217_v12 }
 0x68f   :  { %v6012_v0 = vpop.f32.mrf.mxu1  ;;  %v5219_v26 = vpop.f32.mrf.mxu0 }
 0x690   :  { %6121 = vst [vmem:[#allocation2 + $0x310] sm:$0xff] %v6012_v0  ;;  %5323 = vst [vmem:[#allocation2 + $0x128] sm:$0xff] %v5219_v26 }
 0x691   :  { %v6014_v63 = vpop.f32.mrf.mxu1  ;;  %v5221_v7 = vpop.f32.mrf.mxu0 }
 0x692   :  { %6122 = vst [vmem:[#allocation2 + $0x318] sm:$0xff] %v6014_v63  ;;  %5324 = vst [vmem:[#allocation2 + $0x130] sm:$0xff] %v5221_v7 }
 0x693   :  { %v6018_v3 = vpop.f32.mrf.mxu1  ;;  %v5223_v32 = vpop.f32.mrf.mxu0 }
 0x694   :  { %6123 = vst [vmem:[#allocation2 + $0x320] sm:$0xff] %v6018_v3  ;;  %5325 = vst [vmem:[#allocation2 + $0x138] sm:$0xff] %v5223_v32 }
 0x695   :  { %v6020_v35 = vpop.f32.mrf.mxu1  ;;  %v5227_v37 = vpop.f32.mrf.mxu0 }
 0x696   :  { %6124 = vst [vmem:[#allocation2 + $0x328] sm:$0xff] %v6020_v35  ;;  %5326 = vst [vmem:[#allocation2 + $0x140] sm:$0xff] %v5227_v37 }
 0x697   :  { %v6022_v57 = vpop.f32.mrf.mxu1  ;;  %v5229_v18 = vpop.f32.mrf.mxu0 }
 0x698   :  { %6125 = vst [vmem:[#allocation2 + $0x330] sm:$0xff] %v6022_v57  ;;  %5327 = vst [vmem:[#allocation2 + $0x148] sm:$0xff] %v5229_v18 }
 0x699   :  { %v6024_v25 = vpop.f32.mrf.mxu1  ;;  %v5231_v49 = vpop.f32.mrf.mxu0 }
 0x69a   :  { %6126 = vst [vmem:[#allocation2 + $0x338] sm:$0xff] %v6024_v25  ;;  %5328 = vst [vmem:[#allocation2 + $0x150] sm:$0xff] %v5231_v49 }
 0x69b   :  { %v6028_v59 = vpop.f32.mrf.mxu1  ;;  %v5233_v61 = vpop.f32.mrf.mxu0 }
 0x69c   :  { %6127 = vst [vmem:[#allocation2 + $0x340] sm:$0xff] %v6028_v59  ;;  %5329 = vst [vmem:[#allocation2 + $0x158] sm:$0xff] %v5233_v61 }
 0x69d   :  { %v6030_v33 = vpop.f32.mrf.mxu1  ;;  %v5237_v62 = vpop.f32.mrf.mxu0 }
 0x69e   :  { %6128 = vst [vmem:[#allocation2 + $0x348] sm:$0xff] %v6030_v33  ;;  %5330 = vst [vmem:[#allocation2 + $0x160] sm:$0xff] %v5237_v62 }
 0x69f   :  { %v6032_v24 = vpop.f32.mrf.mxu1  ;;  %v5239_v16 = vpop.f32.mrf.mxu0 }
 0x6a0   :  { %6129 = vst [vmem:[#allocation2 + $0x350] sm:$0xff] %v6032_v24  ;;  %5331 = vst [vmem:[#allocation2 + $0x168] sm:$0xff] %v5239_v16 }
 0x6a1   :  { %v6034_v2 = vpop.f32.mrf.mxu1  ;;  %v5241_v22 = vpop.f32.mrf.mxu0 }
 0x6a2   :  { %6130 = vst [vmem:[#allocation2 + $0x358] sm:$0xff] %v6034_v2  ;;  %5332 = vst [vmem:[#allocation2 + $0x170] sm:$0xff] %v5241_v22 }
 0x6a3   :  { %v6038_v13 = vpop.f32.mrf.mxu1  ;;  %v5243_v48 = vpop.f32.mrf.mxu0 }
 0x6a4   :  { %6131 = vst [vmem:[#allocation2 + $0x360] sm:$0xff] %v6038_v13  ;;  %5333 = vst [vmem:[#allocation2 + $0x178] sm:$0xff] %v5243_v48 }
 0x6a5   :  { %v6040_v14 = vpop.f32.mrf.mxu1  ;;  %v5247_v42 = vpop.f32.mrf.mxu0 }
 0x6a6   :  { %6132 = vst [vmem:[#allocation2 + $0x368] sm:$0xff] %v6040_v14  ;;  %5334 = vst [vmem:[#allocation2 + $0x180] sm:$0xff] %v5247_v42 }
 0x6a7   :  { %v6042_v23 = vpop.f32.mrf.mxu1  ;;  %v5249_v50 = vpop.f32.mrf.mxu0 }
 0x6a8   :  { %6133 = vst [vmem:[#allocation2 + $0x370] sm:$0xff] %v6042_v23  ;;  %5335 = vst [vmem:[#allocation2 + $0x188] sm:$0xff] %v5249_v50 }
 0x6a9   :  { %v6044_v11 = vpop.f32.mrf.mxu1  ;;  %v5251_v43 = vpop.f32.mrf.mxu0 }
 0x6aa   :  { %6134 = vst [vmem:[#allocation2 + $0x378] sm:$0xff] %v6044_v11  ;;  %5336 = vst [vmem:[#allocation2 + $0x190] sm:$0xff] %v5251_v43 }
 0x6ab   :  { %v6048_v31 = vpop.f32.mrf.mxu1  ;;  %v5253_v4 = vpop.f32.mrf.mxu0 }
 0x6ac   :  { %6135 = vst [vmem:[#allocation2 + $0x380] sm:$0xff] %v6048_v31  ;;  %5337 = vst [vmem:[#allocation2 + $0x198] sm:$0xff] %v5253_v4 }
 0x6ad   :  { %v6050_v56 = vpop.f32.mrf.mxu1  ;;  %v5257_v52 = vpop.f32.mrf.mxu0 }
 0x6ae   :  { %6136 = vst [vmem:[#allocation2 + $0x388] sm:$0xff] %v6050_v56  ;;  %5338 = vst [vmem:[#allocation2 + $0x1a0] sm:$0xff] %v5257_v52 }
 0x6af   :  { %v6052_v36 = vpop.f32.mrf.mxu1  ;;  %v5259_v44 = vpop.f32.mrf.mxu0 }
 0x6b0   :  { %6137 = vst [vmem:[#allocation2 + $0x390] sm:$0xff] %v6052_v36  ;;  %5339 = vst [vmem:[#allocation2 + $0x1a8] sm:$0xff] %v5259_v44 }
 0x6b1   :  { %v6054_v45 = vpop.f32.mrf.mxu1  ;;  %v5261_v40 = vpop.f32.mrf.mxu0 }
 0x6b2   :  { %6138 = vst [vmem:[#allocation2 + $0x398] sm:$0xff] %v6054_v45  ;;  %5340 = vst [vmem:[#allocation2 + $0x1b0] sm:$0xff] %v5261_v40 }
 0x6b3   :  { %v6058_v8 = vpop.f32.mrf.mxu1  ;;  %v5263_v58 = vpop.f32.mrf.mxu0 }
 0x6b4   :  { %6139 = vst [vmem:[#allocation2 + $0x3a0] sm:$0xff] %v6058_v8  ;;  %5341 = vst [vmem:[#allocation2 + $0x1b8] sm:$0xff] %v5263_v58 }
 0x6b5   :  { %v6060_v29 = vpop.f32.mrf.mxu1  ;;  %v5267_v30 = vpop.f32.mrf.mxu0 }
 0x6b6   :  { %6140 = vst [vmem:[#allocation2 + $0x3a8] sm:$0xff] %v6060_v29  ;;  %5342 = vst [vmem:[#allocation2 + $0x1c0] sm:$0xff] %v5267_v30 }
 0x6b7   :  { %v6062_v17 = vpop.f32.mrf.mxu1  ;;  %v5269_v51 = vpop.f32.mrf.mxu0 }
 0x6b8   :  { %6141 = vst [vmem:[#allocation2 + $0x3b0] sm:$0xff] %v6062_v17  ;;  %5343 = vst [vmem:[#allocation2 + $0x1c8] sm:$0xff] %v5269_v51 }
 0x6b9   :  { %v6064_v55 = vpop.f32.mrf.mxu1  ;;  %v5271_v28 = vpop.f32.mrf.mxu0 }
 0x6ba   :  { %6142 = vst [vmem:[#allocation2 + $0x3b8] sm:$0xff] %v6064_v55  ;;  %5344 = vst [vmem:[#allocation2 + $0x1d0] sm:$0xff] %v5271_v28 }
 0x6bb   :  { %v6068_v27 = vpop.f32.mrf.mxu1  ;;  %v5273_v6 = vpop.f32.mrf.mxu0 }
 0x6bc   :  { %6143 = vst [vmem:[#allocation2 + $0x3c0] sm:$0xff] %v6068_v27  ;;  %5345 = vst [vmem:[#allocation2 + $0x1d8] sm:$0xff] %v5273_v6 }
 0x6bd   :  { %v6070_v60 = vpop.f32.mrf.mxu1 }
 0x6be   :  { %6144 = vst [vmem:[#allocation2 + $0x3c8] sm:$0xff] %v6070_v60 }
 0x6bf   :  { %v6072_v46 = vpop.f32.mrf.mxu1 }
 0x6c0   :  { %6145 = vst [vmem:[#allocation2 + $0x3d0] sm:$0xff] %v6072_v46 }
 0x6c1   :  { %v6074_v34 = vpop.f32.mrf.mxu1 }
 0x6c2   :  { %6146 = vst [vmem:[#allocation2 + $0x3d8] sm:$0xff] %v6074_v34 }
 0x6f3   :  { %v5277_v15 = vpop.f32.mrf.mxu0 }
 0x6f4   :  { %5346 = vst [vmem:[#allocation2 + $0x1e0] sm:$0xff] %v5277_v15 }
 0x6f5   :  { %v5279_v19 = vpop.f32.mrf.mxu0 }
 0x6f6   :  { %5347 = vst [vmem:[#allocation2 + $0x1e8] sm:$0xff] %v5279_v19 }
 0x6f7   :  { %v5281_v10 = vpop.f32.mrf.mxu0 }
 0x6f8   :  { %5348 = vst [vmem:[#allocation2 + $0x1f0] sm:$0xff] %v5281_v10 }
 0x6f9   :  { %v5283_v21 = vpop.f32.mrf.mxu0 }
 0x6fa   :  { %5349 = vst [vmem:[#allocation2 + $0x1f8] sm:$0xff] %v5283_v21 }
 0x6fb   :  { %v6078_v38 = vpop.f32.mrf.mxu1 }
 0x6fc   :  { %6147 = vst [vmem:[#allocation2 + $0x3e0] sm:$0xff] %v6078_v38 }
 0x6fd   :  { %v6080_v41 = vpop.f32.mrf.mxu1 }
 0x6fe   :  { %6148 = vst [vmem:[#allocation2 + $0x3e8] sm:$0xff] %v6080_v41 }
 0x6ff   :  { %v6082_v9 = vpop.f32.mrf.mxu1 }
 0x700   :  { %6149 = vst [vmem:[#allocation2 + $0x3f0] sm:$0xff] %v6082_v9 }
 0x701   :  { %v6084_v47 = vpop.f32.mrf.mxu1 }
 0x702   :  { %6150 = vst [vmem:[#allocation2 + $0x3f8] sm:$0xff] %v6084_v47 }
 0x703   :  { %7486 = shalt.err (!%p7483_p4)
}
 0x704   :  { %s7498_s9 = smov 256   ;;  %s7499_s10 = smov 16  }
 0x705   :  { %6162 = dma.vmem_to_hbm [thread:$0]  %s6157_s7, 16384, %s13192_s5, [#allocation3], %s7498_s9, %s7498_s9, %s7499_s10  }
 0x706   :  { %7495 = dma.done.wait [#allocation3], 16384  }
 0x707   :  { %7496 = vsyncadd [#allocation3], 4294950912 }
 0x708   :  { %6166 = vsyncpa [#allocation3], 1 }

</bundles_post_ra>
